<compile_context>
chip_gen: v5e
topology: v5e:2x2
jax: 0.10.0
libtpu: 0.0.40
codegen_flags: <defaults>
</compile_context>

<pallas_src>
import functools

import jax
import jax.numpy as jnp
import numpy as np
from jax.experimental import pallas as pl
from jax.experimental.pallas import tpu as pltpu


# --------------------------------------------------------------------------
# Pallas kernel
# --------------------------------------------------------------------------
def _update_kernel(eps,
                   s_ref, v_ref,
                   wV_ref, wU_ref,
                   w1s_ref, w1n_ref, b1_ref,
                   w2ss_ref, w2vv_ref, w2sv_ref,
                   b2ss_ref, b2vv_ref, b2sv_ref,
                   s_out_ref, v_out_ref):
    tn, F = s_ref.shape
    f32 = jnp.float32

    # Activation streams may be bf16 in HBM; compute in f32 (v5e has no bf16 VPU).
    s = s_ref[...].astype(f32)                               # (tn, F)
    v = v_ref[...].astype(f32)                               # (3, tn, F)

    # ---- linear_transformation (no bias), split weights ---------------------
    # (3, tn, F) -> (3*tn, F) is a free sublane-stacking view (tn % 8 == 0),
    # so each of these is ONE wide MXU matmul with no lane-slicing afterwards.
    v2d = v.reshape(3 * tn, F)
    v_V = jnp.dot(v2d, wV_ref[...],
                  preferred_element_type=f32).reshape(3, tn, F)
    v_U = jnp.dot(v2d, wU_ref[...],
                  preferred_element_type=f32).reshape(3, tn, F)

    # ---- L2 norm over the spatial (3-component) axis -------------------------
    norm = jnp.sqrt(jnp.sum(v_V * v_V, axis=0) + eps)        # (tn, F)

    # ---- intra_atomic_net layer 1: concat([s, norm]) @ W1 + b1, SiLU --------
    # The lane-concat is folded into two K=F dots (identical math).
    h = (jnp.dot(s, w1s_ref[...], preferred_element_type=f32)
         + jnp.dot(norm, w1n_ref[...], preferred_element_type=f32)
         + b1_ref[...])
    h = h * jax.nn.sigmoid(h)                                 # SiLU

    # ---- intra_atomic_net layer 2: three K=F dots (no output lane slices) ----
    a_ss = jnp.dot(h, w2ss_ref[...], preferred_element_type=f32) + b2ss_ref[...]
    a_vv = jnp.dot(h, w2vv_ref[...], preferred_element_type=f32) + b2vv_ref[...]
    a_sv = jnp.dot(h, w2sv_ref[...], preferred_element_type=f32) + b2sv_ref[...]

    # ---- gating / elementwise updates ----------------------------------------
    sv = jnp.sum(v_V * v_U, axis=0)                           # (tn, F)

    s_out_ref[...] = (s + a_ss + a_sv * sv).astype(s_out_ref.dtype)
    v_out_ref[...] = (v + a_vv[None, :, :] * v_U).astype(v_out_ref.dtype)


# --------------------------------------------------------------------------
# Tile selection
# --------------------------------------------------------------------------
def _pick_tile(N, max_tile):
    # Keep grid >= 2 when possible (v7x has 2 TensorCores), never below one
    # sublane group, and always an exact divisor of N.
    t = min(max_tile, max(8, N // 2))
    t -= t % 8
    t = max(t, 8)
    while t > 8 and N % t != 0:
        t -= 8
    assert t >= 8 and N % t == 0 and t % 8 == 0
    return t


# --------------------------------------------------------------------------
# Core wrapper: persistent planar layout, no transposes.
#   scalar_2d: (N, F),  vector_3d: (3, N, F)
# --------------------------------------------------------------------------
def painn_update_planar(scalar_2d, vector_3d, params, *, epsilon=1e-8,
                        tile_n=1024, stream_dtype=None):
    N, F = scalar_2d.shape
    assert vector_3d.shape == (3, N, F)
    # TODO(synk): pad ragged N to a multiple of 8 instead of asserting.
    assert N % 8 == 0
    tile_n = _pick_tile(N, tile_n)

    if stream_dtype is not None:
        scalar_2d = scalar_2d.astype(stream_dtype)
        vector_3d = vector_3d.astype(stream_dtype)
    out_dtype = scalar_2d.dtype
    itemsize = jnp.dtype(out_dtype).itemsize

    grid = (N // tile_n,)

    def wspec(shp):
        # Constant block index -> fetched once, not re-DMA'd per grid step.
        return pl.BlockSpec(shp, lambda i, _s=len(shp): (0,) * _s)

    kernel = functools.partial(_update_kernel, epsilon)

    cost = pl.CostEstimate(
        flops=22 * N * F * F,
        transcendentals=2 * N * F,
        bytes_accessed=2 * 4 * N * F * itemsize + 8 * F * F * 4,
    )

    s_out, v_out = pl.pallas_call(
        kernel,
        out_shape=(
            jax.ShapeDtypeStruct((N, F), out_dtype),
            jax.ShapeDtypeStruct((3, N, F), out_dtype),
        ),
        grid_spec=pltpu.PrefetchScalarGridSpec(
            num_scalar_prefetch=0,
            grid=grid,
            in_specs=[
                pl.BlockSpec((tile_n, F), lambda i: (i, 0)),        # scalar
                pl.BlockSpec((3, tile_n, F), lambda i: (0, i, 0)),  # vector
                wspec((F, F)),    # wV
                wspec((F, F)),    # wU
                wspec((F, F)),    # w1 (scalar half)
                wspec((F, F)),    # w1 (norm half)
                wspec((1, F)),    # b1
                wspec((F, F)),    # w2 ss
                wspec((F, F)),    # w2 vv
                wspec((F, F)),    # w2 sv
                wspec((1, F)),    # b2 ss
                wspec((1, F)),    # b2 vv
                wspec((1, F)),    # b2 sv
            ],
            out_specs=[
                pl.BlockSpec((tile_n, F), lambda i: (i, 0)),
                pl.BlockSpec((3, tile_n, F), lambda i: (0, i, 0)),
            ],
        ),
        compiler_params=pltpu.CompilerParams(
            dimension_semantics=("parallel",),
            vmem_limit_bytes=32 * 1024 * 1024,   # covers v5e's 16 MiB default
        ),
        cost_estimate=cost,
    )(scalar_2d, vector_3d,
      params["wV"], params["wU"],
      params["w1s"], params["w1n"], params["b1"],
      params["w2ss"], params["w2vv"], params["w2sv"],
      params["b2ss"], params["b2vv"], params["b2sv"])

    return s_out, v_out


# --------------------------------------------------------------------------
# PyTorch-layout compatibility shim:
#   scalar_message: (N, 1, F), vector_message: (N, 3, F)
# --------------------------------------------------------------------------
def painn_update(scalar_message, vector_message, params, *, epsilon=1e-8,
                 tile_n=1024, stream_dtype=None):
    N, _, F = scalar_message.shape
    s2d = scalar_message.reshape(N, F)
    # TODO(synk): keep (3, N, F) persistent across PaiNN blocks so these
    #             boundary transposes (full HBM round trips) go away entirely.
    v3d = jnp.transpose(vector_message, (1, 0, 2))            # (3, N, F)
    s_out, v_out = painn_update_planar(s2d, v3d, params, epsilon=epsilon,
                                       tile_n=tile_n, stream_dtype=stream_dtype)
    return s_out.reshape(N, 1, F), jnp.transpose(v_out, (1, 0, 2))


# --------------------------------------------------------------------------
# Pure-JAX reference (mirrors the PyTorch forward exactly)
# --------------------------------------------------------------------------
def painn_update_ref(scalar_message, vector_message, params, *, epsilon=1e-8):
    F = scalar_message.shape[-1]
    W_lin = jnp.concatenate([params["wV"], params["wU"]], axis=-1)        # (F, 2F)
    W1 = jnp.concatenate([params["w1s"], params["w1n"]], axis=0)          # (2F, F)
    b1 = params["b1"][0]
    W2 = jnp.concatenate([params["w2ss"], params["w2vv"], params["w2sv"]], axis=-1)
    b2 = jnp.concatenate([params["b2ss"], params["b2vv"], params["b2sv"]], axis=-1)[0]

    vt = vector_message @ W_lin                                           # (N, 3, 2F)
    v_V, v_U = vt[..., :F], vt[..., F:]
    L2 = jnp.sqrt(jnp.sum(v_V ** 2, axis=-2, keepdims=True) + epsilon)    # (N, 1, F)
    ctx = jnp.concatenate([scalar_message, L2], axis=-1)                  # (N, 1, 2F)
    h = ctx @ W1 + b1
    h = h * jax.nn.sigmoid(h)                                             # SiLU
    t = h @ W2 + b2                                                       # (N, 1, 3F)
    a_ss, a_vv, a_sv = t[..., :F], t[..., F:2 * F], t[..., 2 * F:]
    a_vv = a_vv * v_U
    a_sv = a_sv * jnp.sum(v_V * v_U, axis=1, keepdims=True)
    return scalar_message + a_ss + a_sv, vector_message + a_vv


# --------------------------------------------------------------------------
if __name__ == "__main__":
    N = 512          # number of atoms -> tile_n picks 256, grid of 2
    F = 32           # nr_atom_basis
    eps = 1e-8

    key = jax.random.PRNGKey(0)
    ks = jax.random.split(key, 16)

    def init(k, shape, scale):
        return (scale * jax.random.normal(k, shape)).astype(jnp.float32)

    # Deterministic synthetic parameters (Linear layers stored as (in, out)).
    params = {
        "wV":   init(ks[0], (F, F), 1.0 / np.sqrt(F)),
        "wU":   init(ks[1], (F, F), 1.0 / np.sqrt(F)),
        "w1s":  init(ks[2], (F, F), 1.0 / np.sqrt(2 * F)),
        "w1n":  init(ks[3], (F, F), 1.0 / np.sqrt(2 * F)),
        "b1":   init(ks[4], (1, F), 0.1),
        "w2ss": init(ks[5], (F, F), 1.0 / np.sqrt(F)),
        "w2vv": init(ks[6], (F, F), 1.0 / np.sqrt(F)),
        "w2sv": init(ks[7], (F, F), 1.0 / np.sqrt(F)),
        "b2ss": init(ks[8], (1, F), 0.1),
        "b2vv": init(ks[9], (1, F), 0.1),
        "b2sv": init(ks[10], (1, F), 0.1),
    }

    scalar_message = init(ks[11], (N, 1, F), 1.0)
    vector_message = init(ks[12], (N, 3, F), 1.0)

    s_out, v_out = painn_update(scalar_message, vector_message, params,
                                epsilon=eps)
    jax.block_until_ready((s_out, v_out))

    s_ref, v_ref = painn_update_ref(scalar_message, vector_message, params,
                                    epsilon=eps)

    np.testing.assert_allclose(np.asarray(s_out), np.asarray(s_ref),
                               rtol=2e-5, atol=2e-5)
    np.testing.assert_allclose(np.asarray(v_out), np.asarray(v_ref),
                               rtol=2e-5, atol=2e-5)

    print("KERNEL_OK")
</pallas_src>

<mosaic_0001>
module attributes {stable_mosaic.version = 11 : i64} {
  func.func @_update_kernel(%arg0: i32, %arg1: memref<256x32xf32, #tpu.memory_space<vmem>>, %arg2: memref<3x256x32xf32, #tpu.memory_space<vmem>>, %arg3: memref<32x32xf32, #tpu.memory_space<vmem>>, %arg4: memref<32x32xf32, #tpu.memory_space<vmem>>, %arg5: memref<32x32xf32, #tpu.memory_space<vmem>>, %arg6: memref<32x32xf32, #tpu.memory_space<vmem>>, %arg7: memref<1x32xf32, #tpu.memory_space<vmem>>, %arg8: memref<32x32xf32, #tpu.memory_space<vmem>>, %arg9: memref<32x32xf32, #tpu.memory_space<vmem>>, %arg10: memref<32x32xf32, #tpu.memory_space<vmem>>, %arg11: memref<1x32xf32, #tpu.memory_space<vmem>>, %arg12: memref<1x32xf32, #tpu.memory_space<vmem>>, %arg13: memref<1x32xf32, #tpu.memory_space<vmem>>, %arg14: memref<256x32xf32, #tpu.memory_space<vmem>>, %arg15: memref<3x256x32xf32, #tpu.memory_space<vmem>>) attributes {dimension_semantics = [#tpu.dimension_semantics<parallel>], iteration_bounds = array<i64: 2>, scalar_prefetch = 0 : i64, scratch_operands = 0 : i64, tpu.core_type = #tpu.core_type<tc>, window_params = [{transform_indices = @transform_0, window_bounds = array<i64: 256, 32>}, {transform_indices = @transform_1, window_bounds = array<i64: 3, 256, 32>}, {pipeline_mode = #tpu.pipeline_mode<synchronous>, transform_indices = @transform_2, window_bounds = array<i64: 32, 32>}, {pipeline_mode = #tpu.pipeline_mode<synchronous>, transform_indices = @transform_3, window_bounds = array<i64: 32, 32>}, {pipeline_mode = #tpu.pipeline_mode<synchronous>, transform_indices = @transform_4, window_bounds = array<i64: 32, 32>}, {pipeline_mode = #tpu.pipeline_mode<synchronous>, transform_indices = @transform_5, window_bounds = array<i64: 32, 32>}, {pipeline_mode = #tpu.pipeline_mode<synchronous>, transform_indices = @transform_6, window_bounds = array<i64: 1, 32>}, {pipeline_mode = #tpu.pipeline_mode<synchronous>, transform_indices = @transform_7, window_bounds = array<i64: 32, 32>}, {pipeline_mode = #tpu.pipeline_mode<synchronous>, transform_indices = @transform_8, window_bounds = array<i64: 32, 32>}, {pipeline_mode = #tpu.pipeline_mode<synchronous>, transform_indices = @transform_9, window_bounds = array<i64: 32, 32>}, {pipeline_mode = #tpu.pipeline_mode<synchronous>, transform_indices = @transform_10, window_bounds = array<i64: 1, 32>}, {pipeline_mode = #tpu.pipeline_mode<synchronous>, transform_indices = @transform_11, window_bounds = array<i64: 1, 32>}, {pipeline_mode = #tpu.pipeline_mode<synchronous>, transform_indices = @transform_12, window_bounds = array<i64: 1, 32>}, {transform_indices = @transform_13, window_bounds = array<i64: 256, 32>}, {transform_indices = @transform_14, window_bounds = array<i64: 3, 256, 32>}]} {
    %c0 = arith.constant 0 : index
    %c0_0 = arith.constant 0 : index
    %0 = vector.load %arg1[%c0, %c0_0] : memref<256x32xf32, #tpu.memory_space<vmem>>, vector<256x32xf32>
    %c0_1 = arith.constant 0 : index
    %c0_2 = arith.constant 0 : index
    %c0_3 = arith.constant 0 : index
    %1 = vector.load %arg2[%c0_1, %c0_2, %c0_3] : memref<3x256x32xf32, #tpu.memory_space<vmem>>, vector<3x256x32xf32>
    %2 = vector.shape_cast %1 : vector<3x256x32xf32> to vector<768x32xf32>
    %c0_4 = arith.constant 0 : index
    %c0_5 = arith.constant 0 : index
    %3 = vector.load %arg3[%c0_4, %c0_5] : memref<32x32xf32, #tpu.memory_space<vmem>>, vector<32x32xf32>
    %cst = arith.constant dense<0.000000e+00> : vector<768x32xf32>
    %4 = tpu.matmul %2, %3, %cst {dimension_numbers = #tpu.dot_dimension_numbers<[1], [0], [0], [1], [0, 0, 1, 1], [], []>} : vector<768x32xf32>, vector<32x32xf32>, vector<768x32xf32> -> vector<768x32xf32>
    %5 = vector.shape_cast %4 : vector<768x32xf32> to vector<3x256x32xf32>
    %c0_6 = arith.constant 0 : index
    %c0_7 = arith.constant 0 : index
    %6 = vector.load %arg4[%c0_6, %c0_7] : memref<32x32xf32, #tpu.memory_space<vmem>>, vector<32x32xf32>
    %cst_8 = arith.constant dense<0.000000e+00> : vector<768x32xf32>
    %7 = tpu.matmul %2, %6, %cst_8 {dimension_numbers = #tpu.dot_dimension_numbers<[1], [0], [0], [1], [0, 0, 1, 1], [], []>} : vector<768x32xf32>, vector<32x32xf32>, vector<768x32xf32> -> vector<768x32xf32>
    %8 = vector.shape_cast %7 : vector<768x32xf32> to vector<3x256x32xf32>
    %9 = arith.mulf %5, %5 : vector<3x256x32xf32>
    %cst_9 = arith.constant dense<0.000000e+00> : vector<256x32xf32>
    %10 = vector.multi_reduction <add>, %9, %cst_9 [0] : vector<3x256x32xf32> to vector<256x32xf32>
    %cst_10 = arith.constant 9.99999993E-9 : f32
    %11 = vector.broadcast %cst_10 : f32 to vector<256x32xf32>
    %12 = arith.addf %10, %11 : vector<256x32xf32>
    %13 = math.sqrt %12 : vector<256x32xf32>
    %c0_11 = arith.constant 0 : index
    %c0_12 = arith.constant 0 : index
    %14 = vector.load %arg5[%c0_11, %c0_12] : memref<32x32xf32, #tpu.memory_space<vmem>>, vector<32x32xf32>
    %cst_13 = arith.constant dense<0.000000e+00> : vector<256x32xf32>
    %15 = tpu.matmul %0, %14, %cst_13 {dimension_numbers = #tpu.dot_dimension_numbers<[1], [0], [0], [1], [0, 0, 1, 1], [], []>} : vector<256x32xf32>, vector<32x32xf32>, vector<256x32xf32> -> vector<256x32xf32>
    %c0_14 = arith.constant 0 : index
    %c0_15 = arith.constant 0 : index
    %16 = vector.load %arg6[%c0_14, %c0_15] : memref<32x32xf32, #tpu.memory_space<vmem>>, vector<32x32xf32>
    %cst_16 = arith.constant dense<0.000000e+00> : vector<256x32xf32>
    %17 = tpu.matmul %13, %16, %cst_16 {dimension_numbers = #tpu.dot_dimension_numbers<[1], [0], [0], [1], [0, 0, 1, 1], [], []>} : vector<256x32xf32>, vector<32x32xf32>, vector<256x32xf32> -> vector<256x32xf32>
    %18 = arith.addf %15, %17 : vector<256x32xf32>
    %c0_17 = arith.constant 0 : index
    %c0_18 = arith.constant 0 : index
    %19 = vector.load %arg7[%c0_17, %c0_18] : memref<1x32xf32, #tpu.memory_space<vmem>>, vector<1x32xf32>
    %20 = vector.broadcast %19 : vector<1x32xf32> to vector<256x32xf32>
    %21 = arith.addf %18, %20 : vector<256x32xf32>
    %22 = arith.negf %21 : vector<256x32xf32>
    %23 = math.exp %22 : vector<256x32xf32>
    %cst_19 = arith.constant 1.000000e+00 : f32
    %24 = vector.broadcast %cst_19 : f32 to vector<256x32xf32>
    %25 = arith.addf %24, %23 : vector<256x32xf32>
    %26 = arith.divf %24, %25 : vector<256x32xf32>
    %27 = arith.mulf %21, %26 : vector<256x32xf32>
    %c0_20 = arith.constant 0 : index
    %c0_21 = arith.constant 0 : index
    %28 = vector.load %arg8[%c0_20, %c0_21] : memref<32x32xf32, #tpu.memory_space<vmem>>, vector<32x32xf32>
    %cst_22 = arith.constant dense<0.000000e+00> : vector<256x32xf32>
    %29 = tpu.matmul %27, %28, %cst_22 {dimension_numbers = #tpu.dot_dimension_numbers<[1], [0], [0], [1], [0, 0, 1, 1], [], []>} : vector<256x32xf32>, vector<32x32xf32>, vector<256x32xf32> -> vector<256x32xf32>
    %c0_23 = arith.constant 0 : index
    %c0_24 = arith.constant 0 : index
    %30 = vector.load %arg11[%c0_23, %c0_24] : memref<1x32xf32, #tpu.memory_space<vmem>>, vector<1x32xf32>
    %31 = vector.broadcast %30 : vector<1x32xf32> to vector<256x32xf32>
    %32 = arith.addf %29, %31 : vector<256x32xf32>
    %c0_25 = arith.constant 0 : index
    %c0_26 = arith.constant 0 : index
    %33 = vector.load %arg9[%c0_25, %c0_26] : memref<32x32xf32, #tpu.memory_space<vmem>>, vector<32x32xf32>
    %cst_27 = arith.constant dense<0.000000e+00> : vector<256x32xf32>
    %34 = tpu.matmul %27, %33, %cst_27 {dimension_numbers = #tpu.dot_dimension_numbers<[1], [0], [0], [1], [0, 0, 1, 1], [], []>} : vector<256x32xf32>, vector<32x32xf32>, vector<256x32xf32> -> vector<256x32xf32>
    %c0_28 = arith.constant 0 : index
    %c0_29 = arith.constant 0 : index
    %35 = vector.load %arg12[%c0_28, %c0_29] : memref<1x32xf32, #tpu.memory_space<vmem>>, vector<1x32xf32>
    %36 = vector.broadcast %35 : vector<1x32xf32> to vector<256x32xf32>
    %37 = arith.addf %34, %36 : vector<256x32xf32>
    %c0_30 = arith.constant 0 : index
    %c0_31 = arith.constant 0 : index
    %38 = vector.load %arg10[%c0_30, %c0_31] : memref<32x32xf32, #tpu.memory_space<vmem>>, vector<32x32xf32>
    %cst_32 = arith.constant dense<0.000000e+00> : vector<256x32xf32>
    %39 = tpu.matmul %27, %38, %cst_32 {dimension_numbers = #tpu.dot_dimension_numbers<[1], [0], [0], [1], [0, 0, 1, 1], [], []>} : vector<256x32xf32>, vector<32x32xf32>, vector<256x32xf32> -> vector<256x32xf32>
    %c0_33 = arith.constant 0 : index
    %c0_34 = arith.constant 0 : index
    %40 = vector.load %arg13[%c0_33, %c0_34] : memref<1x32xf32, #tpu.memory_space<vmem>>, vector<1x32xf32>
    %41 = vector.broadcast %40 : vector<1x32xf32> to vector<256x32xf32>
    %42 = arith.addf %39, %41 : vector<256x32xf32>
    %43 = arith.mulf %5, %8 : vector<3x256x32xf32>
    %cst_35 = arith.constant dense<0.000000e+00> : vector<256x32xf32>
    %44 = vector.multi_reduction <add>, %43, %cst_35 [0] : vector<3x256x32xf32> to vector<256x32xf32>
    %45 = arith.addf %0, %32 : vector<256x32xf32>
    %46 = arith.mulf %42, %44 : vector<256x32xf32>
    %47 = arith.addf %45, %46 : vector<256x32xf32>
    %c0_36 = arith.constant 0 : index
    %c0_37 = arith.constant 0 : index
    %48 = vector.load %arg14[%c0_36, %c0_37] : memref<256x32xf32, #tpu.memory_space<vmem>>, vector<256x32xf32>
    tpu.vector_store %arg14[%c0_36, %c0_37], %47 {strides = array<i32>} : memref<256x32xf32, #tpu.memory_space<vmem>>, vector<256x32xf32>,
    %49 = vector.shape_cast %37 : vector<256x32xf32> to vector<1x256x32xf32>
    %50 = vector.broadcast %49 : vector<1x256x32xf32> to vector<3x256x32xf32>
    %51 = arith.mulf %50, %8 : vector<3x256x32xf32>
    %52 = arith.addf %1, %51 : vector<3x256x32xf32>
    %c0_38 = arith.constant 0 : index
    %c0_39 = arith.constant 0 : index
    %c0_40 = arith.constant 0 : index
    %53 = vector.load %arg15[%c0_38, %c0_39, %c0_40] : memref<3x256x32xf32, #tpu.memory_space<vmem>>, vector<3x256x32xf32>
    tpu.vector_store %arg15[%c0_38, %c0_39, %c0_40], %52 {strides = array<i32>} : memref<3x256x32xf32, #tpu.memory_space<vmem>>, vector<3x256x32xf32>,
    return
  }
  func.func @transform_0(%arg0: i32) -> (i32, i32) {
    %c0_i32 = arith.constant 0 : i32
    %c0_i32_0 = arith.constant 0 : i32
    return %arg0, %c0_i32 : i32, i32
  }
  func.func @transform_1(%arg0: i32) -> (i32, i32, i32) {
    %c0_i32 = arith.constant 0 : i32
    %c0_i32_0 = arith.constant 0 : i32
    %c0_i32_1 = arith.constant 0 : i32
    return %c0_i32, %arg0, %c0_i32_0 : i32, i32, i32
  }
  func.func @transform_2(%arg0: i32) -> (i32, i32) {
    %c0_i32 = arith.constant 0 : i32
    %c0_i32_0 = arith.constant 0 : i32
    %c0_i32_1 = arith.constant 0 : i32
    return %c0_i32, %c0_i32_0 : i32, i32
  }
  func.func @transform_3(%arg0: i32) -> (i32, i32) {
    %c0_i32 = arith.constant 0 : i32
    %c0_i32_0 = arith.constant 0 : i32
    %c0_i32_1 = arith.constant 0 : i32
    return %c0_i32, %c0_i32_0 : i32, i32
  }
  func.func @transform_4(%arg0: i32) -> (i32, i32) {
    %c0_i32 = arith.constant 0 : i32
    %c0_i32_0 = arith.constant 0 : i32
    %c0_i32_1 = arith.constant 0 : i32
    return %c0_i32, %c0_i32_0 : i32, i32
  }
  func.func @transform_5(%arg0: i32) -> (i32, i32) {
    %c0_i32 = arith.constant 0 : i32
    %c0_i32_0 = arith.constant 0 : i32
    %c0_i32_1 = arith.constant 0 : i32
    return %c0_i32, %c0_i32_0 : i32, i32
  }
  func.func @transform_6(%arg0: i32) -> (i32, i32) {
    %c0_i32 = arith.constant 0 : i32
    %c0_i32_0 = arith.constant 0 : i32
    %c0_i32_1 = arith.constant 0 : i32
    return %c0_i32, %c0_i32_0 : i32, i32
  }
  func.func @transform_7(%arg0: i32) -> (i32, i32) {
    %c0_i32 = arith.constant 0 : i32
    %c0_i32_0 = arith.constant 0 : i32
    %c0_i32_1 = arith.constant 0 : i32
    return %c0_i32, %c0_i32_0 : i32, i32
  }
  func.func @transform_8(%arg0: i32) -> (i32, i32) {
    %c0_i32 = arith.constant 0 : i32
    %c0_i32_0 = arith.constant 0 : i32
    %c0_i32_1 = arith.constant 0 : i32
    return %c0_i32, %c0_i32_0 : i32, i32
  }
  func.func @transform_9(%arg0: i32) -> (i32, i32) {
    %c0_i32 = arith.constant 0 : i32
    %c0_i32_0 = arith.constant 0 : i32
    %c0_i32_1 = arith.constant 0 : i32
    return %c0_i32, %c0_i32_0 : i32, i32
  }
  func.func @transform_10(%arg0: i32) -> (i32, i32) {
    %c0_i32 = arith.constant 0 : i32
    %c0_i32_0 = arith.constant 0 : i32
    %c0_i32_1 = arith.constant 0 : i32
    return %c0_i32, %c0_i32_0 : i32, i32
  }
  func.func @transform_11(%arg0: i32) -> (i32, i32) {
    %c0_i32 = arith.constant 0 : i32
    %c0_i32_0 = arith.constant 0 : i32
    %c0_i32_1 = arith.constant 0 : i32
    return %c0_i32, %c0_i32_0 : i32, i32
  }
  func.func @transform_12(%arg0: i32) -> (i32, i32) {
    %c0_i32 = arith.constant 0 : i32
    %c0_i32_0 = arith.constant 0 : i32
    %c0_i32_1 = arith.constant 0 : i32
    return %c0_i32, %c0_i32_0 : i32, i32
  }
  func.func @transform_13(%arg0: i32) -> (i32, i32) {
    %c0_i32 = arith.constant 0 : i32
    %c0_i32_0 = arith.constant 0 : i32
    return %arg0, %c0_i32 : i32, i32
  }
  func.func @transform_14(%arg0: i32) -> (i32, i32, i32) {
    %c0_i32 = arith.constant 0 : i32
    %c0_i32_0 = arith.constant 0 : i32
    %c0_i32_1 = arith.constant 0 : i32
    return %c0_i32, %arg0, %c0_i32_0 : i32, i32, i32
  }
}

</mosaic_0001>

<bundles_post_ra>
// kernel: tpu_custom_call.1
= control target key start
LH: loop header
LB: loop body
LE: loop exit
PB: predicated region body
PF: predicated region fallthrough
CT: control target
= control target key end

     0   :  { %s6247_s29 = smov 0   ;;  %s6249_s30 = smov 0   ;;  %s10097_s0 = inlined_call_operand.vmem [shape: f32[512,32], index: 0, kind: input, shape index: {}]   ;;  %s10098_s1 = inlined_call_operand.vmem [shape: f32[3,512,32], index: 1, kind: input, shape index: {}]   ;;  %s10099_s2 = inlined_call_operand.vmem [shape: f32[32,32], index: 2, kind: input, shape index: {}]   ;;  %s10100_s3 = inlined_call_operand.vmem [shape: f32[32,32], index: 3, kind: input, shape index: {}]   ;;  %s10101_s4 = inlined_call_operand.vmem [shape: f32[32,32], index: 4, kind: input, shape index: {}]   ;;  %s10102_s5 = inlined_call_operand.vmem [shape: f32[32,32], index: 5, kind: input, shape index: {}]   ;;  %s10103_s6 = inlined_call_operand.vmem [shape: f32[1,32], index: 6, kind: input, shape index: {}]   ;;  %s10104_s7 = inlined_call_operand.vmem [shape: f32[32,32], index: 7, kind: input, shape index: {}]   ;;  %s10105_s8 = inlined_call_operand.vmem [shape: f32[32,32], index: 8, kind: input, shape index: {}]   ;;  %s10106_s9 = inlined_call_operand.vmem [shape: f32[32,32], index: 9, kind: input, shape index: {}]   ;;  %s10107_s10 = inlined_call_operand.vmem [shape: f32[1,32], index: 10, kind: input, shape index: {}]   ;;  %s10108_s11 = inlined_call_operand.vmem [shape: f32[1,32], index: 11, kind: input, shape index: {}]   ;;  %s10109_s12 = inlined_call_operand.vmem [shape: f32[1,32], index: 12, kind: input, shape index: {}]   ;;  %s10110_s13 = inlined_call_operand.vmem [shape: f32[512,32], index: 13, kind: output, shape index: {0}]   ;;  %s10111_s14 = inlined_call_operand.vmem [shape: f32[3,512,32], index: 14, kind: output, shape index: {1}]  }
   0x1   :  { %s6251_s15 = smov 0  }
   0x2 LB: > { %s6263_s16 = sadd.s32 4294967295, %s6170_s15   ;;  %s6266_s17 = sadd.s32 1, %s6170_s15   ;;  %s6170_s15 = sphi %s6251_s15, %s10823_s15   ;;  %s6166_s30 = sphi %s6249_s30, %s10822_s30   ;;  %s6162_s29 = sphi %s6247_s29, %s10821_s29  }
   0x3   : > { %s55_s18 = ssub.s32 %s6170_s15, %s6266_s17  ;;  %s58_s19 = sadd.s32 1, %s6166_s30 }
   0x4   : > { %p56_p0 = scmp.eq.s32.totalorder %s55_s18, 0  ;;  %p65_p1 = scmp.ne.s32.totalorder %s6166_s30, %s6162_s29 }
   0x5   : > { %p66_p2 = scmp.eq.s32.totalorder %s6170_s15, 0  ;;  %p352_p3 = scmp.eq.s32.totalorder %s6263_s16, 1 }
   0x6   : > { %s6276_s20 = scalar_select %p56_p0, %s6166_s30, %s58_s19  }
   0x7   : > { %p67_p4 = por %p66_p2, %p65_p1  ;;  %p6278_p5 = por %p352_p3, %p65_p1 }
   0x8   : > { %p5384_p6 = scmp.ge.s32.totalorder %s6170_s15, 2 }
   0xa   : > { %407 = sbr.rel (%p5384_p6) target bundleno = 115 (0x73), region = 60 }
   0xf   : > { %419 = sbr.rel (!%p67_p4) target bundleno = 115 (0x73), region = 68  ;;  %s421_s22 = sand.u32 (%p67_p4), 1, %s6166_s30  }
  0x10   : > { %s5780_s23 = sshll.u32 (%p67_p4), %s6170_s15, 8  ;;  %s5794_s24 = smul.u32 (%p67_p4), 768, %s421_s22 }
  0x11   : > { %s6288_s27 = scalar_lea.vmem (%p67_p4), %s10098_s1, %s5780_s23 }
  0x12   : > { %v645_v0 = vld [vmem:[%s6288_s27] sm:$0xff] (%p67_p4)  ;;  %v647_v1 = vld [vmem:[%s6288_s27 + $0x8] sm:$0xff] (%p67_p4)  ;;  %v649_v2 = vld [vmem:[%s6288_s27 + $0x10] sm:$0xff] (%p67_p4)  ;;  %s6293_s28 = scalar_lea.vmem (%p67_p4), [#allocation2], %s5794_s24 }
  0x13   : > { %646 = vst [vmem:[%s6293_s28] sm:$0xff] (%p67_p4), %v645_v0  ;;  %v651_v3 = vld [vmem:[%s6288_s27 + $0x18] sm:$0xff] (%p67_p4)  ;;  %v653_v4 = vld [vmem:[%s6288_s27 + $0x20] sm:$0xff] (%p67_p4)  ;;  %v655_v5 = vld [vmem:[%s6288_s27 + $0x28] sm:$0xff] (%p67_p4) }
  0x14   : > { %648 = vst [vmem:[%s6293_s28 + $0x8] sm:$0xff] %v647_v1  ;;  %v657_v6 = vld [vmem:[%s6288_s27 + $0x30] sm:$0xff]  ;;  %v659_v7 = vld [vmem:[%s6288_s27 + $0x38] sm:$0xff]  ;;  %v661_v8 = vld [vmem:[%s6288_s27 + $0x40] sm:$0xff] }
  0x15   : > { %650 = vst [vmem:[%s6293_s28 + $0x10] sm:$0xff] %v649_v2  ;;  %v663_v9 = vld [vmem:[%s6288_s27 + $0x48] sm:$0xff]  ;;  %v665_v10 = vld [vmem:[%s6288_s27 + $0x50] sm:$0xff]  ;;  %v667_v11 = vld [vmem:[%s6288_s27 + $0x58] sm:$0xff] }
  0x16   : > { %652 = vst [vmem:[%s6293_s28 + $0x18] sm:$0xff] %v651_v3  ;;  %v669_v12 = vld [vmem:[%s6288_s27 + $0x60] sm:$0xff]  ;;  %v671_v13 = vld [vmem:[%s6288_s27 + $0x68] sm:$0xff]  ;;  %v673_v14 = vld [vmem:[%s6288_s27 + $0x70] sm:$0xff] }
  0x17   : > { %654 = vst [vmem:[%s6293_s28 + $0x20] sm:$0xff] %v653_v4  ;;  %v675_v15 = vld [vmem:[%s6288_s27 + $0x78] sm:$0xff]  ;;  %v677_v16 = vld [vmem:[%s6288_s27 + $0x80] sm:$0xff]  ;;  %v679_v17 = vld [vmem:[%s6288_s27 + $0x88] sm:$0xff] }
  0x18   : > { %656 = vst [vmem:[%s6293_s28 + $0x28] sm:$0xff] %v655_v5  ;;  %v681_v18 = vld [vmem:[%s6288_s27 + $0x90] sm:$0xff]  ;;  %v683_v19 = vld [vmem:[%s6288_s27 + $0x98] sm:$0xff]  ;;  %v685_v20 = vld [vmem:[%s6288_s27 + $0xa0] sm:$0xff] }
  0x19   : > { %658 = vst [vmem:[%s6293_s28 + $0x30] sm:$0xff] %v657_v6  ;;  %v687_v21 = vld [vmem:[%s6288_s27 + $0xa8] sm:$0xff]  ;;  %v689_v22 = vld [vmem:[%s6288_s27 + $0xb0] sm:$0xff]  ;;  %v691_v23 = vld [vmem:[%s6288_s27 + $0xb8] sm:$0xff] }
  0x1a   : > { %660 = vst [vmem:[%s6293_s28 + $0x38] sm:$0xff] %v659_v7  ;;  %v693_v24 = vld [vmem:[%s6288_s27 + $0xc0] sm:$0xff]  ;;  %v695_v25 = vld [vmem:[%s6288_s27 + $0xc8] sm:$0xff]  ;;  %v697_v26 = vld [vmem:[%s6288_s27 + $0xd0] sm:$0xff] }
  0x1b   : > { %662 = vst [vmem:[%s6293_s28 + $0x40] sm:$0xff] %v661_v8  ;;  %v699_v27 = vld [vmem:[%s6288_s27 + $0xd8] sm:$0xff]  ;;  %v701_v28 = vld [vmem:[%s6288_s27 + $0xe0] sm:$0xff]  ;;  %v703_v29 = vld [vmem:[%s6288_s27 + $0xe8] sm:$0xff] }
  0x1c   : > { %664 = vst [vmem:[%s6293_s28 + $0x48] sm:$0xff] %v663_v9  ;;  %v705_v30 = vld [vmem:[%s6288_s27 + $0xf0] sm:$0xff]  ;;  %v707_v31 = vld [vmem:[%s6288_s27 + $0xf8] sm:$0xff]  ;;  %v709_v32 = vld [vmem:[%s6288_s27 + $0x200] sm:$0xff] }
  0x1d   : > { %666 = vst [vmem:[%s6293_s28 + $0x50] sm:$0xff] %v665_v10  ;;  %v711_v33 = vld [vmem:[%s6288_s27 + $0x208] sm:$0xff]  ;;  %v713_v34 = vld [vmem:[%s6288_s27 + $0x210] sm:$0xff]  ;;  %v715_v35 = vld [vmem:[%s6288_s27 + $0x218] sm:$0xff] }
  0x1e   : > { %668 = vst [vmem:[%s6293_s28 + $0x58] sm:$0xff] %v667_v11  ;;  %v717_v36 = vld [vmem:[%s6288_s27 + $0x220] sm:$0xff]  ;;  %v719_v37 = vld [vmem:[%s6288_s27 + $0x228] sm:$0xff]  ;;  %v721_v38 = vld [vmem:[%s6288_s27 + $0x230] sm:$0xff] }
  0x1f   : > { %670 = vst [vmem:[%s6293_s28 + $0x60] sm:$0xff] %v669_v12  ;;  %v723_v39 = vld [vmem:[%s6288_s27 + $0x238] sm:$0xff]  ;;  %v725_v40 = vld [vmem:[%s6288_s27 + $0x240] sm:$0xff]  ;;  %v727_v41 = vld [vmem:[%s6288_s27 + $0x248] sm:$0xff] }
  0x20   : > { %672 = vst [vmem:[%s6293_s28 + $0x68] sm:$0xff] %v671_v13  ;;  %v729_v42 = vld [vmem:[%s6288_s27 + $0x250] sm:$0xff]  ;;  %v731_v43 = vld [vmem:[%s6288_s27 + $0x258] sm:$0xff]  ;;  %v733_v44 = vld [vmem:[%s6288_s27 + $0x260] sm:$0xff] }
  0x21   : > { %674 = vst [vmem:[%s6293_s28 + $0x70] sm:$0xff] %v673_v14  ;;  %v735_v45 = vld [vmem:[%s6288_s27 + $0x268] sm:$0xff]  ;;  %v737_v46 = vld [vmem:[%s6288_s27 + $0x270] sm:$0xff]  ;;  %v739_v47 = vld [vmem:[%s6288_s27 + $0x278] sm:$0xff] }
  0x22   : > { %676 = vst [vmem:[%s6293_s28 + $0x78] sm:$0xff] %v675_v15  ;;  %v741_v48 = vld [vmem:[%s6288_s27 + $0x280] sm:$0xff]  ;;  %v743_v49 = vld [vmem:[%s6288_s27 + $0x288] sm:$0xff]  ;;  %v745_v50 = vld [vmem:[%s6288_s27 + $0x290] sm:$0xff] }
  0x23   : > { %678 = vst [vmem:[%s6293_s28 + $0x80] sm:$0xff] %v677_v16  ;;  %v747_v51 = vld [vmem:[%s6288_s27 + $0x298] sm:$0xff]  ;;  %v749_v52 = vld [vmem:[%s6288_s27 + $0x2a0] sm:$0xff]  ;;  %v751_v53 = vld [vmem:[%s6288_s27 + $0x2a8] sm:$0xff] }
  0x24   : > { %680 = vst [vmem:[%s6293_s28 + $0x88] sm:$0xff] %v679_v17  ;;  %v753_v54 = vld [vmem:[%s6288_s27 + $0x2b0] sm:$0xff]  ;;  %v755_v55 = vld [vmem:[%s6288_s27 + $0x2b8] sm:$0xff]  ;;  %v757_v56 = vld [vmem:[%s6288_s27 + $0x2c0] sm:$0xff] }
  0x25   : > { %682 = vst [vmem:[%s6293_s28 + $0x90] sm:$0xff] %v681_v18  ;;  %v759_v57 = vld [vmem:[%s6288_s27 + $0x2c8] sm:$0xff]  ;;  %v761_v58 = vld [vmem:[%s6288_s27 + $0x2d0] sm:$0xff]  ;;  %v763_v59 = vld [vmem:[%s6288_s27 + $0x2d8] sm:$0xff] }
  0x26   : > { %684 = vst [vmem:[%s6293_s28 + $0x98] sm:$0xff] %v683_v19  ;;  %v765_v60 = vld [vmem:[%s6288_s27 + $0x2e0] sm:$0xff]  ;;  %v767_v61 = vld [vmem:[%s6288_s27 + $0x2e8] sm:$0xff]  ;;  %v769_v62 = vld [vmem:[%s6288_s27 + $0x2f0] sm:$0xff] }
  0x27   : > { %686 = vst [vmem:[%s6293_s28 + $0xa0] sm:$0xff] %v685_v20  ;;  %v771_v63 = vld [vmem:[%s6288_s27 + $0x2f8] sm:$0xff]  ;;  %v773_v0 = vld [vmem:[%s6288_s27 + $0x400] sm:$0xff]  ;;  %v775_v1 = vld [vmem:[%s6288_s27 + $0x408] sm:$0xff] }
  0x28   : > { %688 = vst [vmem:[%s6293_s28 + $0xa8] sm:$0xff] %v687_v21  ;;  %v777_v2 = vld [vmem:[%s6288_s27 + $0x410] sm:$0xff]  ;;  %v779_v3 = vld [vmem:[%s6288_s27 + $0x418] sm:$0xff]  ;;  %v781_v4 = vld [vmem:[%s6288_s27 + $0x420] sm:$0xff] }
  0x29   : > { %690 = vst [vmem:[%s6293_s28 + $0xb0] sm:$0xff] %v689_v22  ;;  %v783_v5 = vld [vmem:[%s6288_s27 + $0x428] sm:$0xff]  ;;  %v785_v6 = vld [vmem:[%s6288_s27 + $0x430] sm:$0xff]  ;;  %v787_v7 = vld [vmem:[%s6288_s27 + $0x438] sm:$0xff] }
  0x2a   : > { %692 = vst [vmem:[%s6293_s28 + $0xb8] sm:$0xff] %v691_v23  ;;  %v789_v8 = vld [vmem:[%s6288_s27 + $0x440] sm:$0xff]  ;;  %v791_v9 = vld [vmem:[%s6288_s27 + $0x448] sm:$0xff]  ;;  %v793_v10 = vld [vmem:[%s6288_s27 + $0x450] sm:$0xff] }
  0x2b   : > { %694 = vst [vmem:[%s6293_s28 + $0xc0] sm:$0xff] %v693_v24  ;;  %v795_v11 = vld [vmem:[%s6288_s27 + $0x458] sm:$0xff]  ;;  %v797_v12 = vld [vmem:[%s6288_s27 + $0x460] sm:$0xff]  ;;  %v799_v13 = vld [vmem:[%s6288_s27 + $0x468] sm:$0xff] }
  0x2c   : > { %696 = vst [vmem:[%s6293_s28 + $0xc8] sm:$0xff] %v695_v25  ;;  %v801_v14 = vld [vmem:[%s6288_s27 + $0x470] sm:$0xff]  ;;  %v803_v15 = vld [vmem:[%s6288_s27 + $0x478] sm:$0xff]  ;;  %v805_v16 = vld [vmem:[%s6288_s27 + $0x480] sm:$0xff] }
  0x2d   : > { %698 = vst [vmem:[%s6293_s28 + $0xd0] sm:$0xff] %v697_v26  ;;  %v807_v17 = vld [vmem:[%s6288_s27 + $0x488] sm:$0xff]  ;;  %v809_v18 = vld [vmem:[%s6288_s27 + $0x490] sm:$0xff]  ;;  %v811_v19 = vld [vmem:[%s6288_s27 + $0x498] sm:$0xff] }
  0x2e   : > { %700 = vst [vmem:[%s6293_s28 + $0xd8] sm:$0xff] %v699_v27  ;;  %v813_v20 = vld [vmem:[%s6288_s27 + $0x4a0] sm:$0xff]  ;;  %v815_v21 = vld [vmem:[%s6288_s27 + $0x4a8] sm:$0xff]  ;;  %v817_v22 = vld [vmem:[%s6288_s27 + $0x4b0] sm:$0xff] }
  0x2f   : > { %702 = vst [vmem:[%s6293_s28 + $0xe0] sm:$0xff] %v701_v28  ;;  %v819_v23 = vld [vmem:[%s6288_s27 + $0x4b8] sm:$0xff]  ;;  %v821_v24 = vld [vmem:[%s6288_s27 + $0x4c0] sm:$0xff]  ;;  %v823_v25 = vld [vmem:[%s6288_s27 + $0x4c8] sm:$0xff] }
  0x30   : > { %704 = vst [vmem:[%s6293_s28 + $0xe8] sm:$0xff] %v703_v29  ;;  %v825_v26 = vld [vmem:[%s6288_s27 + $0x4d0] sm:$0xff]  ;;  %v827_v27 = vld [vmem:[%s6288_s27 + $0x4d8] sm:$0xff]  ;;  %v829_v28 = vld [vmem:[%s6288_s27 + $0x4e0] sm:$0xff] }
  0x31   : > { %706 = vst [vmem:[%s6293_s28 + $0xf0] sm:$0xff] %v705_v30  ;;  %v831_v29 = vld [vmem:[%s6288_s27 + $0x4e8] sm:$0xff]  ;;  %v833_v30 = vld [vmem:[%s6288_s27 + $0x4f0] sm:$0xff] }
  0x32   : > { %708 = vst [vmem:[%s6293_s28 + $0xf8] sm:$0xff] %v707_v31  ;;  %v835_v31 = vld [vmem:[%s6288_s27 + $0x4f8] sm:$0xff] }
  0x33   : > { %710 = vst [vmem:[%s6293_s28 + $0x100] sm:$0xff] %v709_v32 }
  0x34   : > { %712 = vst [vmem:[%s6293_s28 + $0x108] sm:$0xff] %v711_v33 }
  0x35   : > { %714 = vst [vmem:[%s6293_s28 + $0x110] sm:$0xff] %v713_v34 }
  0x36   : > { %716 = vst [vmem:[%s6293_s28 + $0x118] sm:$0xff] %v715_v35 }
  0x37   : > { %718 = vst [vmem:[%s6293_s28 + $0x120] sm:$0xff] %v717_v36 }
  0x38   : > { %720 = vst [vmem:[%s6293_s28 + $0x128] sm:$0xff] %v719_v37 }
  0x39   : > { %722 = vst [vmem:[%s6293_s28 + $0x130] sm:$0xff] %v721_v38 }
  0x3a   : > { %724 = vst [vmem:[%s6293_s28 + $0x138] sm:$0xff] %v723_v39 }
  0x3b   : > { %726 = vst [vmem:[%s6293_s28 + $0x140] sm:$0xff] %v725_v40 }
  0x3c   : > { %728 = vst [vmem:[%s6293_s28 + $0x148] sm:$0xff] %v727_v41 }
  0x3d   : > { %730 = vst [vmem:[%s6293_s28 + $0x150] sm:$0xff] %v729_v42 }
  0x3e   : > { %732 = vst [vmem:[%s6293_s28 + $0x158] sm:$0xff] %v731_v43 }
  0x3f   : > { %734 = vst [vmem:[%s6293_s28 + $0x160] sm:$0xff] %v733_v44 }
  0x40   : > { %736 = vst [vmem:[%s6293_s28 + $0x168] sm:$0xff] %v735_v45 }
  0x41   : > { %738 = vst [vmem:[%s6293_s28 + $0x170] sm:$0xff] %v737_v46 }
  0x42   : > { %740 = vst [vmem:[%s6293_s28 + $0x178] sm:$0xff] %v739_v47 }
  0x43   : > { %742 = vst [vmem:[%s6293_s28 + $0x180] sm:$0xff] %v741_v48 }
  0x44   : > { %744 = vst [vmem:[%s6293_s28 + $0x188] sm:$0xff] %v743_v49 }
  0x45   : > { %746 = vst [vmem:[%s6293_s28 + $0x190] sm:$0xff] %v745_v50 }
  0x46   : > { %748 = vst [vmem:[%s6293_s28 + $0x198] sm:$0xff] %v747_v51 }
  0x47   : > { %750 = vst [vmem:[%s6293_s28 + $0x1a0] sm:$0xff] %v749_v52 }
  0x48   : > { %752 = vst [vmem:[%s6293_s28 + $0x1a8] sm:$0xff] %v751_v53 }
  0x49   : > { %754 = vst [vmem:[%s6293_s28 + $0x1b0] sm:$0xff] %v753_v54 }
  0x4a   : > { %756 = vst [vmem:[%s6293_s28 + $0x1b8] sm:$0xff] %v755_v55 }
  0x4b   : > { %758 = vst [vmem:[%s6293_s28 + $0x1c0] sm:$0xff] %v757_v56 }
  0x4c   : > { %760 = vst [vmem:[%s6293_s28 + $0x1c8] sm:$0xff] %v759_v57 }
  0x4d   : > { %762 = vst [vmem:[%s6293_s28 + $0x1d0] sm:$0xff] %v761_v58 }
  0x4e   : > { %764 = vst [vmem:[%s6293_s28 + $0x1d8] sm:$0xff] %v763_v59 }
  0x4f   : > { %766 = vst [vmem:[%s6293_s28 + $0x1e0] sm:$0xff] %v765_v60 }
  0x50   : > { %768 = vst [vmem:[%s6293_s28 + $0x1e8] sm:$0xff] %v767_v61 }
  0x51   : > { %770 = vst [vmem:[%s6293_s28 + $0x1f0] sm:$0xff] %v769_v62 }
  0x52   : > { %772 = vst [vmem:[%s6293_s28 + $0x1f8] sm:$0xff] %v771_v63 }
  0x53   : > { %774 = vst [vmem:[%s6293_s28 + $0x200] sm:$0xff] %v773_v0 }
  0x54   : > { %776 = vst [vmem:[%s6293_s28 + $0x208] sm:$0xff] %v775_v1 }
  0x55   : > { %778 = vst [vmem:[%s6293_s28 + $0x210] sm:$0xff] %v777_v2 }
  0x56   : > { %780 = vst [vmem:[%s6293_s28 + $0x218] sm:$0xff] %v779_v3 }
  0x57   : > { %782 = vst [vmem:[%s6293_s28 + $0x220] sm:$0xff] %v781_v4 }
  0x58   : > { %784 = vst [vmem:[%s6293_s28 + $0x228] sm:$0xff] %v783_v5 }
  0x59   : > { %786 = vst [vmem:[%s6293_s28 + $0x230] sm:$0xff] %v785_v6 }
  0x5a   : > { %788 = vst [vmem:[%s6293_s28 + $0x238] sm:$0xff] %v787_v7 }
  0x5b   : > { %790 = vst [vmem:[%s6293_s28 + $0x240] sm:$0xff] %v789_v8 }
  0x5c   : > { %792 = vst [vmem:[%s6293_s28 + $0x248] sm:$0xff] %v791_v9 }
  0x5d   : > { %794 = vst [vmem:[%s6293_s28 + $0x250] sm:$0xff] %v793_v10 }
  0x5e   : > { %796 = vst [vmem:[%s6293_s28 + $0x258] sm:$0xff] %v795_v11 }
  0x5f   : > { %798 = vst [vmem:[%s6293_s28 + $0x260] sm:$0xff] %v797_v12 }
  0x60   : > { %800 = vst [vmem:[%s6293_s28 + $0x268] sm:$0xff] %v799_v13 }
  0x61   : > { %802 = vst [vmem:[%s6293_s28 + $0x270] sm:$0xff] %v801_v14 }
  0x62   : > { %804 = vst [vmem:[%s6293_s28 + $0x278] sm:$0xff] %v803_v15 }
  0x63   : > { %806 = vst [vmem:[%s6293_s28 + $0x280] sm:$0xff] %v805_v16 }
  0x64   : > { %808 = vst [vmem:[%s6293_s28 + $0x288] sm:$0xff] %v807_v17 }
  0x65   : > { %810 = vst [vmem:[%s6293_s28 + $0x290] sm:$0xff] %v809_v18 }
  0x66   : > { %812 = vst [vmem:[%s6293_s28 + $0x298] sm:$0xff] %v811_v19 }
  0x67   : > { %814 = vst [vmem:[%s6293_s28 + $0x2a0] sm:$0xff] %v813_v20 }
  0x68   : > { %816 = vst [vmem:[%s6293_s28 + $0x2a8] sm:$0xff] %v815_v21 }
  0x69   : > { %818 = vst [vmem:[%s6293_s28 + $0x2b0] sm:$0xff] %v817_v22 }
  0x6a   : > { %820 = vst [vmem:[%s6293_s28 + $0x2b8] sm:$0xff] %v819_v23 }
  0x6b   : > { %822 = vst [vmem:[%s6293_s28 + $0x2c0] sm:$0xff] %v821_v24 }
  0x6c   : > { %824 = vst [vmem:[%s6293_s28 + $0x2c8] sm:$0xff] %v823_v25 }
  0x6d   : > { %826 = vst [vmem:[%s6293_s28 + $0x2d0] sm:$0xff] %v825_v26 }
  0x6e   : > { %828 = vst [vmem:[%s6293_s28 + $0x2d8] sm:$0xff] %v827_v27 }
  0x6f   : > { %830 = vst [vmem:[%s6293_s28 + $0x2e0] sm:$0xff] %v829_v28 }
  0x70   : > { %832 = vst [vmem:[%s6293_s28 + $0x2e8] sm:$0xff] %v831_v29 }
  0x71   : > { %834 = vst [vmem:[%s6293_s28 + $0x2f0] sm:$0xff] %v833_v30 }
  0x72   : > { %836 = vst [vmem:[%s6293_s28 + $0x2f8] sm:$0xff] %v835_v31 }
  0x73 PF: > { %p5387_p7 = scmp.ge.s32.totalorder %s6170_s15, 1  ;;  %p841_p8 = scmp.lt.s32.totalorder %s6170_s15, 3 }
  0x75   : > { %p842_p9 = pnand %p5387_p7, %p841_p8 }
  0x77   : > { %845 = sbr.rel (%p842_p9) target bundleno = 1736 (0x6c8), region = 106 }
  0x7c   : > { %v1047_v32 = vld [vmem:[%s10099_s2 + $0x18] sm:$0xff]  ;;  %v1046_v34 = vld [vmem:[%s10099_s2 + $0x10] sm:$0xff]  ;;  %s848_s26 = sand.u32 1, %s6162_s29   ;;  %v1045_v36 = vld [vmem:[%s10099_s2 + $0x8] sm:$0xff]  ;;  %vm1048_vm0 = vcmask 261120   ;;  %s5388_s15 = sshll.u32 %s6263_s16, 5 }
  0x7d   : > { %v1645_v33 = vld [vmem:[%s10100_s3 + $0x18] sm:$0xff]  ;;  %1349 = vmatpush.msra.mxu0 %v1047_v32  ;;  %v1644_v35 = vld [vmem:[%s10100_s3 + $0x10] sm:$0xff]  ;;  %s6499_s28 = smul.u32 768, %s848_s26  ;;  %v1643_v37 = vld [vmem:[%s10100_s3 + $0x8] sm:$0xff]  ;;  %5782 = vmatpush.msra.mxu3 %v1047_v32  ;;  %p903_p10 = scmp.lt.s32.totalorder %s5388_s15, 63 }
  0x7e   : > { %1658 = vmatpush.msra.mxu1 %v1645_v33  ;;  %v1044_v38 = vld [vmem:[%s10099_s2] sm:$0xff]  ;;  %s5781_s25 = sshll.u32 (%p6278_p5), %s6263_s16, 8 }
  0x7f   : > { %1350 = vmatpush.msra.mxu0 %v1046_v34  ;;  %v1642_v39 = vld [vmem:[%s10100_s3] sm:$0xff]  ;;  %5783 = vmatpush.msra.mxu3 %v1046_v34  ;;  %s6514_s26 = scalar_lea.vmem [#allocation2], %s6499_s28  ;;  %s10825_s15 = smov (!%p903_p10, %s5388_s15), 63 }
  0x80   : > { %1659 = vmatpush.msra.mxu1 %v1644_v35  ;;  %v948_v40 = vld [vmem:[%s6514_s26] sm:$0xff]  ;;  %v949_v41 = vld [vmem:[%s6514_s26 + $0x8] sm:$0xff]  ;;  %v950_v42 = vld [vmem:[%s6514_s26 + $0x10] sm:$0xff]  ;;  %s5389_s18 = sshll.u32 %s10825_s15, 3  ;;  %s8660_s19 = scalar_lea.vmem [#allocation3], %s6499_s28 }
  0x81   : > { %1351 = vmatpush.msra.mxu0 %v1045_v36  ;;  %5784 = vmatpush.msra.mxu3 %v1045_v36  ;;  %v951_v43 = vld [vmem:[%s6514_s26 + $0x18] sm:$0xff]  ;;  %v952_v44 = vld [vmem:[%s6514_s26 + $0x20] sm:$0xff]  ;;  %v953_v45 = vld [vmem:[%s6514_s26 + $0x28] sm:$0xff]  ;;  %s7299_s23 = scalar_lea.vmem %s10097_s0, %s5389_s18  ;;  %s9296_s28 = scalar_lea.vmem %s10110_s13, %s5389_s18 }
  0x82   : > { %1660 = vmatpush.msra.mxu1 %v1643_v37  ;;  %v954_v46 = vld [vmem:[%s6514_s26 + $0x30] sm:$0xff]  ;;  %v955_v47 = vld [vmem:[%s6514_s26 + $0x38] sm:$0xff]  ;;  %v956_v48 = vld [vmem:[%s6514_s26 + $0x40] sm:$0xff] }
  0x83   : > { %1352 = vmatpush.msra.mxu0 %v1044_v38  ;;  %5785 = vmatpush.msra.mxu3 %v1044_v38  ;;  %v957_v49 = vld [vmem:[%s6514_s26 + $0x48] sm:$0xff]  ;;  %v958_v50 = vld [vmem:[%s6514_s26 + $0x50] sm:$0xff]  ;;  %v959_v51 = vld [vmem:[%s6514_s26 + $0x58] sm:$0xff] }
  0x84   : > { %1661 = vmatpush.msra.mxu1 %v1642_v39  ;;  %5392 = vmatmul.msk.f32.vlgmr.msra.gmra.mxu0 %vm1048_vm0, %v948_v40  ;;  %v960_v52 = vld [vmem:[%s6514_s26 + $0x60] sm:$0xff]  ;;  %v961_v53 = vld [vmem:[%s6514_s26 + $0x68] sm:$0xff]  ;;  %v962_v54 = vld [vmem:[%s6514_s26 + $0x70] sm:$0xff] }
  0x85   : > { %5488 = vmatmul.msk.f32.vlgmr.msra.gmra.mxu1 %vm1048_vm0, %v948_v40  ;;  %5786 = vmatpush.msrb.mxu3 %v1645_v33  ;;  %v963_v55 = vld [vmem:[%s6514_s26 + $0x78] sm:$0xff]  ;;  %v964_v58 = vld [vmem:[%s6514_s26 + $0x80] sm:$0xff]  ;;  %v965_v61 = vld [vmem:[%s6514_s26 + $0x88] sm:$0xff] }
  0x86   : > { %v966_v0 = vld [vmem:[%s6514_s26 + $0x90] sm:$0xff]  ;;  %v967_v3 = vld [vmem:[%s6514_s26 + $0x98] sm:$0xff]  ;;  %v968_v6 = vld [vmem:[%s6514_s26 + $0xa0] sm:$0xff] }
  0x87   : > { %5787 = vmatpush.msrb.mxu3 %v1644_v35  ;;  %v969_v9 = vld [vmem:[%s6514_s26 + $0xa8] sm:$0xff]  ;;  %v970_v12 = vld [vmem:[%s6514_s26 + $0xb0] sm:$0xff]  ;;  %v971_v15 = vld [vmem:[%s6514_s26 + $0xb8] sm:$0xff] }
  0x88   : > { %v972_v18 = vld [vmem:[%s6514_s26 + $0xc0] sm:$0xff]  ;;  %v973_v21 = vld [vmem:[%s6514_s26 + $0xc8] sm:$0xff]  ;;  %v974_v24 = vld [vmem:[%s6514_s26 + $0xd0] sm:$0xff] }
  0x89   : > { %5788 = vmatpush.msrb.mxu3 %v1643_v37  ;;  %v975_v27 = vld [vmem:[%s6514_s26 + $0xd8] sm:$0xff]  ;;  %v976_v30 = vld [vmem:[%s6514_s26 + $0xe0] sm:$0xff]  ;;  %v977_v33 = vld [vmem:[%s6514_s26 + $0xe8] sm:$0xff] }
  0x8a   : > { %v978_v36 = vld [vmem:[%s6514_s26 + $0xf0] sm:$0xff] }
  0x8b   : > { %5789 = vmatpush.msrb.mxu3 %v1642_v39  ;;  %v979_v39 = vld [vmem:[%s6514_s26 + $0xf8] sm:$0xff] }
  0x8c   : > { %5393 = vmatmul.msk.f32.gmra.mxu0 %vm1048_vm0, %v949_v41 }
  0x8d   : > { %5489 = vmatmul.msk.f32.gmra.mxu1 %vm1048_vm0, %v949_v41 }
  0x94   : > { %5394 = vmatmul.msk.f32.gmra.mxu0 %vm1048_vm0, %v950_v42 }
  0x95   : > { %5490 = vmatmul.msk.f32.gmra.mxu1 %vm1048_vm0, %v950_v42  ;;  %v980_v42 = vld [vmem:[%s6514_s26 + $0x100] sm:$0xff] }
  0x9c   : > { %5395 = vmatmul.msk.f32.gmra.mxu0 %vm1048_vm0, %v951_v43 }
  0x9d   : > { %5491 = vmatmul.msk.f32.gmra.mxu1 %vm1048_vm0, %v951_v43 }
  0xa4   : > { %5396 = vmatmul.msk.f32.gmra.mxu0 %vm1048_vm0, %v952_v44 }
  0xa5   : > { %5492 = vmatmul.msk.f32.gmra.mxu1 %vm1048_vm0, %v952_v44 }
  0xac   : > { %5397 = vmatmul.msk.f32.gmra.mxu0 %vm1048_vm0, %v953_v45 }
  0xad   : > { %5493 = vmatmul.msk.f32.gmra.mxu1 %vm1048_vm0, %v953_v45  ;;  %v981_v45 = vld [vmem:[%s6514_s26 + $0x108] sm:$0xff] }
  0xb4   : > { %5398 = vmatmul.msk.f32.gmra.mxu0 %vm1048_vm0, %v954_v46 }
  0xb5   : > { %5494 = vmatmul.msk.f32.gmra.mxu1 %vm1048_vm0, %v954_v46 }
  0xbc   : > { %5399 = vmatmul.msk.f32.gmra.mxu0 %vm1048_vm0, %v955_v47 }
  0xbd   : > { %5495 = vmatmul.msk.f32.gmra.mxu1 %vm1048_vm0, %v955_v47 }
  0xc4   : > { %5400 = vmatmul.msk.f32.gmra.mxu0 %vm1048_vm0, %v956_v48 }
  0xc5   : > { %5496 = vmatmul.msk.f32.gmra.mxu1 %vm1048_vm0, %v956_v48  ;;  %v982_v48 = vld [vmem:[%s6514_s26 + $0x110] sm:$0xff] }
  0xcc   : > { %5401 = vmatmul.msk.f32.gmra.mxu0 %vm1048_vm0, %v957_v49 }
  0xcd   : > { %5497 = vmatmul.msk.f32.gmra.mxu1 %vm1048_vm0, %v957_v49 }
  0xd4   : > { %5402 = vmatmul.msk.f32.gmra.mxu0 %vm1048_vm0, %v958_v50 }
  0xd5   : > { %5498 = vmatmul.msk.f32.gmra.mxu1 %vm1048_vm0, %v958_v50 }
  0xdc   : > { %5403 = vmatmul.msk.f32.gmra.mxu0 %vm1048_vm0, %v959_v51 }
  0xdd   : > { %5499 = vmatmul.msk.f32.gmra.mxu1 %vm1048_vm0, %v959_v51  ;;  %v983_v51 = vld [vmem:[%s6514_s26 + $0x118] sm:$0xff] }
  0xe4   : > { %5404 = vmatmul.msk.f32.gmra.mxu0 %vm1048_vm0, %v960_v52 }
  0xe5   : > { %5500 = vmatmul.msk.f32.gmra.mxu1 %vm1048_vm0, %v960_v52 }
  0xec   : > { %5405 = vmatmul.msk.f32.gmra.mxu0 %vm1048_vm0, %v961_v53 }
  0xed   : > { %5501 = vmatmul.msk.f32.gmra.mxu1 %vm1048_vm0, %v961_v53 }
  0xf4   : > { %5406 = vmatmul.msk.f32.gmra.mxu0 %vm1048_vm0, %v962_v54 }
  0xf5   : > { %5502 = vmatmul.msk.f32.gmra.mxu1 %vm1048_vm0, %v962_v54  ;;  %v984_v54 = vld [vmem:[%s6514_s26 + $0x120] sm:$0xff] }
  0xfc   : > { %5407 = vmatmul.msk.f32.gmra.mxu0 %vm1048_vm0, %v963_v55 }
  0xfd   : > { %5503 = vmatmul.msk.f32.gmra.mxu1 %vm1048_vm0, %v963_v55 }
 0x101   : > { %v6564_v56 = vpop.f32.mrf.mxu0 }
 0x102   : > { %10309 = vst [vmem:[#allocation4_spill] sm:$0xff] %v6564_v56  ;;  %v6566_v57 = vpop.f32.mrf.mxu1 }
 0x103   : > { %10310 = vst [vmem:[#allocation5_spill] sm:$0xff] %v6566_v57 }
 0x104   : > { %5408 = vmatmul.msk.f32.gmra.mxu0 %vm1048_vm0, %v964_v58 }
 0x105   : > { %5504 = vmatmul.msk.f32.gmra.mxu1 %vm1048_vm0, %v964_v58 }
 0x109   : > { %v6571_v59 = vpop.f32.mrf.mxu0 }
 0x10a   : > { %10311 = vst [vmem:[#allocation6_spill] sm:$0xff] %v6571_v59  ;;  %v6573_v60 = vpop.f32.mrf.mxu1 }
 0x10b   : > { %10312 = vst [vmem:[#allocation7_spill] sm:$0xff] %v6573_v60  ;;  %v1019_v60 = vld [vmem:[%s6514_s26 + $0x238] sm:$0xff] }
 0x10c   : > { %5409 = vmatmul.msk.f32.gmra.mxu0 %vm1048_vm0, %v965_v61 }
 0x10d   : > { %5505 = vmatmul.msk.f32.gmra.mxu1 %vm1048_vm0, %v965_v61  ;;  %v985_v61 = vld [vmem:[%s6514_s26 + $0x128] sm:$0xff] }
 0x111   : > { %v6578_v62 = vpop.f32.mrf.mxu0 }
 0x112   : > { %10313 = vst [vmem:[#allocation8_spill] sm:$0xff] %v6578_v62  ;;  %v6580_v63 = vpop.f32.mrf.mxu1 }
 0x113   : > { %10314 = vst [vmem:[#allocation9_spill] sm:$0xff] %v6580_v63 }
 0x114   : > { %5410 = vmatmul.msk.f32.gmra.mxu0 %vm1048_vm0, %v966_v0 }
 0x115   : > { %5506 = vmatmul.msk.f32.gmra.mxu1 %vm1048_vm0, %v966_v0 }
 0x119   : > { %v6585_v1 = vpop.f32.mrf.mxu0 }
 0x11a   : > { %10315 = vst [vmem:[#allocation10_spill] sm:$0xff] %v6585_v1  ;;  %v6587_v2 = vpop.f32.mrf.mxu1 }
 0x11b   : > { %10316 = vst [vmem:[#allocation11_spill] sm:$0xff] %v6587_v2  ;;  %v1016_v2 = vld [vmem:[%s6514_s26 + $0x220] sm:$0xff] }
 0x11c   : > { %5411 = vmatmul.msk.f32.gmra.mxu0 %vm1048_vm0, %v967_v3 }
 0x11d   : > { %5507 = vmatmul.msk.f32.gmra.mxu1 %vm1048_vm0, %v967_v3 }
 0x121   : > { %v6592_v4 = vpop.f32.mrf.mxu0 }
 0x122   : > { %10317 = vst [vmem:[#allocation12_spill] sm:$0xff] %v6592_v4  ;;  %v6594_v5 = vpop.f32.mrf.mxu1 }
 0x123   : > { %10318 = vst [vmem:[#allocation13_spill] sm:$0xff] %v6594_v5 }
 0x124   : > { %5412 = vmatmul.msk.f32.gmra.mxu0 %vm1048_vm0, %v968_v6 }
 0x125   : > { %5508 = vmatmul.msk.f32.gmra.mxu1 %vm1048_vm0, %v968_v6  ;;  %v986_v6 = vld [vmem:[%s6514_s26 + $0x130] sm:$0xff] }
 0x129   : > { %v6599_v7 = vpop.f32.mrf.mxu0 }
 0x12a   : > { %10319 = vst [vmem:[#allocation14_spill] sm:$0xff] %v6599_v7  ;;  %v6601_v8 = vpop.f32.mrf.mxu1 }
 0x12b   : > { %10320 = vst [vmem:[#allocation15_spill] sm:$0xff] %v6601_v8  ;;  %v1012_v8 = vld [vmem:[%s6514_s26 + $0x200] sm:$0xff] }
 0x12c   : > { %5413 = vmatmul.msk.f32.gmra.mxu0 %vm1048_vm0, %v969_v9 }
 0x12d   : > { %5509 = vmatmul.msk.f32.gmra.mxu1 %vm1048_vm0, %v969_v9 }
 0x131   : > { %v6606_v10 = vpop.f32.mrf.mxu0 }
 0x132   : > { %10321 = vst [vmem:[#allocation16_spill] sm:$0xff] %v6606_v10  ;;  %v6608_v11 = vpop.f32.mrf.mxu1 }
 0x133   : > { %10322 = vst [vmem:[#allocation17_spill] sm:$0xff] %v6608_v11 }
 0x134   : > { %5414 = vmatmul.msk.f32.gmra.mxu0 %vm1048_vm0, %v970_v12 }
 0x135   : > { %5510 = vmatmul.msk.f32.gmra.mxu1 %vm1048_vm0, %v970_v12 }
 0x139   : > { %v6613_v13 = vpop.f32.mrf.mxu0 }
 0x13a   : > { %10323 = vst [vmem:[#allocation18_spill] sm:$0xff] %v6613_v13  ;;  %v6615_v14 = vpop.f32.mrf.mxu1 }
 0x13b   : > { %10324 = vst [vmem:[#allocation19_spill] sm:$0xff] %v6615_v14 }
 0x13c   : > { %5415 = vmatmul.msk.f32.gmra.mxu0 %vm1048_vm0, %v971_v15 }
 0x13d   : > { %5511 = vmatmul.msk.f32.gmra.mxu1 %vm1048_vm0, %v971_v15  ;;  %v987_v15 = vld [vmem:[%s6514_s26 + $0x138] sm:$0xff] }
 0x141   : > { %v6620_v16 = vpop.f32.mrf.mxu0 }
 0x142   : > { %10325 = vst [vmem:[#allocation20_spill] sm:$0xff] %v6620_v16  ;;  %v6622_v17 = vpop.f32.mrf.mxu1 }
 0x143   : > { %10326 = vst [vmem:[#allocation21_spill] sm:$0xff] %v6622_v17 }
 0x144   : > { %5416 = vmatmul.msk.f32.gmra.mxu0 %vm1048_vm0, %v972_v18 }
 0x145   : > { %5512 = vmatmul.msk.f32.gmra.mxu1 %vm1048_vm0, %v972_v18 }
 0x149   : > { %v6627_v19 = vpop.f32.mrf.mxu0 }
 0x14a   : > { %10327 = vst [vmem:[#allocation22_spill] sm:$0xff] %v6627_v19  ;;  %v6629_v20 = vpop.f32.mrf.mxu1 }
 0x14b   : > { %10328 = vst [vmem:[#allocation23_spill] sm:$0xff] %v6629_v20  ;;  %v1003_v20 = vld [vmem:[%s6514_s26 + $0x1b8] sm:$0xff] }
 0x14c   : > { %5417 = vmatmul.msk.f32.gmra.mxu0 %vm1048_vm0, %v973_v21 }
 0x14d   : > { %5513 = vmatmul.msk.f32.gmra.mxu1 %vm1048_vm0, %v973_v21 }
 0x151   : > { %v6634_v22 = vpop.f32.mrf.mxu0 }
 0x152   : > { %10329 = vst [vmem:[#allocation24_spill] sm:$0xff] %v6634_v22  ;;  %v6636_v23 = vpop.f32.mrf.mxu1 }
 0x153   : > { %10330 = vst [vmem:[#allocation25_spill] sm:$0xff] %v6636_v23  ;;  %v1002_v23 = vld [vmem:[%s6514_s26 + $0x1b0] sm:$0xff] }
 0x154   : > { %5418 = vmatmul.msk.f32.gmra.mxu0 %vm1048_vm0, %v974_v24 }
 0x155   : > { %5514 = vmatmul.msk.f32.gmra.mxu1 %vm1048_vm0, %v974_v24  ;;  %v988_v24 = vld [vmem:[%s6514_s26 + $0x140] sm:$0xff] }
 0x159   : > { %v6641_v25 = vpop.f32.mrf.mxu0 }
 0x15a   : > { %10331 = vst [vmem:[#allocation26_spill] sm:$0xff] %v6641_v25  ;;  %v6643_v26 = vpop.f32.mrf.mxu1 }
 0x15b   : > { %10332 = vst [vmem:[#allocation27_spill] sm:$0xff] %v6643_v26  ;;  %v1001_v26 = vld [vmem:[%s6514_s26 + $0x1a8] sm:$0xff] }
 0x15c   : > { %5419 = vmatmul.msk.f32.gmra.mxu0 %vm1048_vm0, %v975_v27 }
 0x15d   : > { %5515 = vmatmul.msk.f32.gmra.mxu1 %vm1048_vm0, %v975_v27 }
 0x161   : > { %v6648_v28 = vpop.f32.mrf.mxu0 }
 0x162   : > { %10333 = vst [vmem:[#allocation28_spill] sm:$0xff] %v6648_v28  ;;  %v6650_v29 = vpop.f32.mrf.mxu1 }
 0x163   : > { %10334 = vst [vmem:[#allocation29_spill] sm:$0xff] %v6650_v29 }
 0x164   : > { %5420 = vmatmul.msk.f32.gmra.mxu0 %vm1048_vm0, %v976_v30 }
 0x165   : > { %5516 = vmatmul.msk.f32.gmra.mxu1 %vm1048_vm0, %v976_v30 }
 0x169   : > { %v6655_v31 = vpop.f32.mrf.mxu0 }
 0x16a   : > { %10335 = vst [vmem:[#allocation30_spill] sm:$0xff] %v6655_v31  ;;  %v6657_v32 = vpop.f32.mrf.mxu1 }
 0x16b   : > { %10336 = vst [vmem:[#allocation31_spill] sm:$0xff] %v6657_v32  ;;  %v1000_v32 = vld [vmem:[%s6514_s26 + $0x1a0] sm:$0xff] }
 0x16c   : > { %5421 = vmatmul.msk.f32.gmra.mxu0 %vm1048_vm0, %v977_v33 }
 0x16d   : > { %5517 = vmatmul.msk.f32.gmra.mxu1 %vm1048_vm0, %v977_v33  ;;  %v989_v33 = vld [vmem:[%s6514_s26 + $0x148] sm:$0xff] }
 0x171   : > { %v6662_v34 = vpop.f32.mrf.mxu0 }
 0x172   : > { %10337 = vst [vmem:[#allocation32_spill] sm:$0xff] %v6662_v34  ;;  %v6664_v35 = vpop.f32.mrf.mxu1 }
 0x173   : > { %10338 = vst [vmem:[#allocation33_spill] sm:$0xff] %v6664_v35 }
 0x174   : > { %5422 = vmatmul.msk.f32.gmra.mxu0 %vm1048_vm0, %v978_v36 }
 0x175   : > { %5518 = vmatmul.msk.f32.gmra.mxu1 %vm1048_vm0, %v978_v36 }
 0x179   : > { %v6669_v37 = vpop.f32.mrf.mxu0 }
 0x17a   : > { %10339 = vst [vmem:[#allocation34_spill] sm:$0xff] %v6669_v37  ;;  %v6671_v38 = vpop.f32.mrf.mxu1 }
 0x17b   : > { %10340 = vst [vmem:[#allocation35_spill] sm:$0xff] %v6671_v38 }
 0x17c   : > { %5423 = vmatmul.msk.f32.gmra.mxu0 %vm1048_vm0, %v979_v39 }
 0x17d   : > { %5519 = vmatmul.msk.f32.gmra.mxu1 %vm1048_vm0, %v979_v39 }
 0x181   : > { %v6676_v40 = vpop.f32.mrf.mxu0 }
 0x182   : > { %10341 = vst [vmem:[#allocation36_spill] sm:$0xff] %v6676_v40  ;;  %v6678_v41 = vpop.f32.mrf.mxu1 }
 0x183   : > { %10342 = vst [vmem:[#allocation37_spill] sm:$0xff] %v6678_v41 }
 0x184   : > { %5424 = vmatmul.msk.f32.gmra.mxu0 %vm1048_vm0, %v980_v42 }
 0x185   : > { %5520 = vmatmul.msk.f32.gmra.mxu1 %vm1048_vm0, %v980_v42  ;;  %v990_v42 = vld [vmem:[%s6514_s26 + $0x150] sm:$0xff] }
 0x189   : > { %v6683_v43 = vpop.f32.mrf.mxu0 }
 0x18a   : > { %10343 = vst [vmem:[#allocation38_spill] sm:$0xff] %v6683_v43  ;;  %v6685_v44 = vpop.f32.mrf.mxu1 }
 0x18b   : > { %10344 = vst [vmem:[#allocation39_spill] sm:$0xff] %v6685_v44  ;;  %v1043_v44 = vld [vmem:[%s6514_s26 + $0x2f8] sm:$0xff] }
 0x18c   : > { %5425 = vmatmul.msk.f32.gmra.mxu0 %vm1048_vm0, %v981_v45 }
 0x18d   : > { %5521 = vmatmul.msk.f32.gmra.mxu1 %vm1048_vm0, %v981_v45 }
 0x191   : > { %v6690_v46 = vpop.f32.mrf.mxu0 }
 0x192   : > { %10345 = vst [vmem:[#allocation40_spill] sm:$0xff] %v6690_v46  ;;  %v6692_v47 = vpop.f32.mrf.mxu1 }
 0x193   : > { %10346 = vst [vmem:[#allocation41_spill] sm:$0xff] %v6692_v47  ;;  %v998_v47 = vld [vmem:[%s6514_s26 + $0x190] sm:$0xff] }
 0x194   : > { %5426 = vmatmul.msk.f32.gmra.mxu0 %vm1048_vm0, %v982_v48 }
 0x195   : > { %5522 = vmatmul.msk.f32.gmra.mxu1 %vm1048_vm0, %v982_v48 }
 0x199   : > { %v6697_v49 = vpop.f32.mrf.mxu0 }
 0x19a   : > { %10347 = vst [vmem:[#allocation42_spill] sm:$0xff] %v6697_v49  ;;  %v6699_v50 = vpop.f32.mrf.mxu1 }
 0x19b   : > { %10348 = vst [vmem:[#allocation43_spill] sm:$0xff] %v6699_v50 }
 0x19c   : > { %5427 = vmatmul.msk.f32.gmra.mxu0 %vm1048_vm0, %v983_v51 }
 0x19d   : > { %5523 = vmatmul.msk.f32.gmra.mxu1 %vm1048_vm0, %v983_v51  ;;  %v991_v51 = vld [vmem:[%s6514_s26 + $0x158] sm:$0xff] }
 0x1a1   : > { %v6704_v52 = vpop.f32.mrf.mxu0 }
 0x1a2   : > { %10349 = vst [vmem:[#allocation44_spill] sm:$0xff] %v6704_v52  ;;  %v6706_v53 = vpop.f32.mrf.mxu1 }
 0x1a3   : > { %10350 = vst [vmem:[#allocation45_spill] sm:$0xff] %v6706_v53  ;;  %v1042_v53 = vld [vmem:[%s6514_s26 + $0x2f0] sm:$0xff] }
 0x1a4   : > { %5428 = vmatmul.msk.f32.gmra.mxu0 %vm1048_vm0, %v984_v54 }
 0x1a5   : > { %5524 = vmatmul.msk.f32.gmra.mxu1 %vm1048_vm0, %v984_v54  ;;  %v1036_v54 = vld [vmem:[%s6514_s26 + $0x2c0] sm:$0xff] }
 0x1a6   : > { %5480 = vmatmul.msk.f32.vlgmr.msra.gmra.mxu3 %vm1048_vm0, %v1036_v54 }
 0x1a9   : > { %v6711_v55 = vpop.f32.mrf.mxu0 }
 0x1aa   : > { %10351 = vst [vmem:[#allocation46_spill] sm:$0xff] %v6711_v55  ;;  %v6713_v58 = vpop.f32.mrf.mxu1 }
 0x1ab   : > { %10352 = vst [vmem:[#allocation47_spill] sm:$0xff] %v6713_v58 }
 0x1ac   : > { %5429 = vmatmul.msk.f32.gmra.mxu0 %vm1048_vm0, %v985_v61 }
 0x1ad   : > { %5525 = vmatmul.msk.f32.gmra.mxu1 %vm1048_vm0, %v985_v61 }
 0x1b1   : > { %v6718_v0 = vpop.f32.mrf.mxu0 }
 0x1b2   : > { %10353 = vst [vmem:[#allocation48_spill] sm:$0xff] %v6718_v0  ;;  %v6720_v3 = vpop.f32.mrf.mxu1 }
 0x1b3   : > { %10354 = vst [vmem:[#allocation49_spill] sm:$0xff] %v6720_v3  ;;  %v1041_v3 = vld [vmem:[%s6514_s26 + $0x2e8] sm:$0xff] }
 0x1b4   : > { %5430 = vmatmul.msk.f32.gmra.mxu0 %vm1048_vm0, %v986_v6 }
 0x1b5   : > { %5526 = vmatmul.msk.f32.gmra.mxu1 %vm1048_vm0, %v986_v6 }
 0x1b9   : > { %v6725_v9 = vpop.f32.mrf.mxu0 }
 0x1ba   : > { %10355 = vst [vmem:[#allocation50_spill] sm:$0xff] %v6725_v9  ;;  %v6727_v12 = vpop.f32.mrf.mxu1 }
 0x1bb   : > { %10356 = vst [vmem:[#allocation51_spill] sm:$0xff] %v6727_v12 }
 0x1bc   : > { %5431 = vmatmul.msk.f32.gmra.mxu0 %vm1048_vm0, %v987_v15 }
 0x1bd   : > { %5527 = vmatmul.msk.f32.gmra.mxu1 %vm1048_vm0, %v987_v15  ;;  %v992_v15 = vld [vmem:[%s6514_s26 + $0x160] sm:$0xff] }
 0x1c1   : > { %v6732_v18 = vpop.f32.mrf.mxu0 }
 0x1c2   : > { %10357 = vst [vmem:[#allocation52_spill] sm:$0xff] %v6732_v18  ;;  %v6734_v21 = vpop.f32.mrf.mxu1 }
 0x1c3   : > { %10358 = vst [vmem:[#allocation53_spill] sm:$0xff] %v6734_v21 }
 0x1c4   : > { %5432 = vmatmul.msk.f32.gmra.mxu0 %vm1048_vm0, %v988_v24 }
 0x1c5   : > { %5528 = vmatmul.msk.f32.gmra.mxu1 %vm1048_vm0, %v988_v24  ;;  %v1037_v24 = vld [vmem:[%s6514_s26 + $0x2c8] sm:$0xff] }
 0x1c6   : > { %5481 = vmatmul.msk.f32.gmra.mxu3 %vm1048_vm0, %v1037_v24 }
 0x1c9   : > { %v6739_v27 = vpop.f32.mrf.mxu0 }
 0x1ca   : > { %10359 = vst [vmem:[#allocation54_spill] sm:$0xff] %v6739_v27  ;;  %v6741_v30 = vpop.f32.mrf.mxu1  ;;  %v1976_v55 = vmul.f32 %v6739_v27, %v6739_v27 }
 0x1cb   : > { %10360 = vst [vmem:[#allocation55_spill] sm:$0xff] %v6741_v30 }
 0x1cc   : > { %5433 = vmatmul.msk.f32.gmra.mxu0 %vm1048_vm0, %v989_v33 }
 0x1cd   : > { %5529 = vmatmul.msk.f32.gmra.mxu1 %vm1048_vm0, %v989_v33 }
 0x1d1   : > { %v6746_v36 = vpop.f32.mrf.mxu0 }
 0x1d2   : > { %10361 = vst [vmem:[#allocation56_spill] sm:$0xff] %v6746_v36  ;;  %v6748_v39 = vpop.f32.mrf.mxu1  ;;  %v1977_v27 = vmul.f32 %v6746_v36, %v6746_v36 }
 0x1d3   : > { %10362 = vst [vmem:[#allocation57_spill] sm:$0xff] %v6748_v39 }
 0x1d4   : > { %5434 = vmatmul.msk.f32.gmra.mxu0 %vm1048_vm0, %v990_v42 }
 0x1d5   : > { %5530 = vmatmul.msk.f32.gmra.mxu1 %vm1048_vm0, %v990_v42 }
 0x1d9   : > { %v6753_v45 = vpop.f32.mrf.mxu0 }
 0x1da   : > { %10363 = vst [vmem:[#allocation58_spill] sm:$0xff] %v6753_v45  ;;  %v6755_v48 = vpop.f32.mrf.mxu1 }
 0x1db   : > { %10364 = vst [vmem:[#allocation59_spill] sm:$0xff] %v6755_v48 }
 0x1dc   : > { %5435 = vmatmul.msk.f32.gmra.mxu0 %vm1048_vm0, %v991_v51 }
 0x1dd   : > { %5531 = vmatmul.msk.f32.gmra.mxu1 %vm1048_vm0, %v991_v51  ;;  %v993_v51 = vld [vmem:[%s6514_s26 + $0x168] sm:$0xff] }
 0x1e1   : > { %v6762_v61 = vpop.f32.mrf.mxu0 }
 0x1e2   : > { %10365 = vst [vmem:[#allocation60_spill] sm:$0xff] %v6762_v61  ;;  %v6764_v6 = vpop.f32.mrf.mxu1 }
 0x1e3   : > { %10366 = vst [vmem:[#allocation61_spill] sm:$0xff] %v6764_v6  ;;  %v1038_v6 = vld [vmem:[%s6514_s26 + $0x2d0] sm:$0xff] }
 0x1e4   : > { %5436 = vmatmul.msk.f32.gmra.mxu0 %vm1048_vm0, %v992_v15  ;;  %5482 = vmatmul.msk.f32.gmra.mxu3 %vm1048_vm0, %v1038_v6 }
 0x1e5   : > { %5532 = vmatmul.msk.f32.gmra.mxu1 %vm1048_vm0, %v992_v15  ;;  %v994_v15 = vld [vmem:[%s6514_s26 + $0x170] sm:$0xff] }
 0x1e9   : > { %v6771_v33 = vpop.f32.mrf.mxu0 }
 0x1ea   : > { %10367 = vst [vmem:[#allocation62_spill] sm:$0xff] %v6771_v33  ;;  %v6773_v42 = vpop.f32.mrf.mxu1 }
 0x1eb   : > { %10368 = vst [vmem:[#allocation63_spill] sm:$0xff] %v6773_v42  ;;  %v1039_v42 = vld [vmem:[%s6514_s26 + $0x2d8] sm:$0xff] }
 0x1ec   : > { %5437 = vmatmul.msk.f32.gmra.mxu0 %vm1048_vm0, %v993_v51  ;;  %5483 = vmatmul.msk.f32.gmra.mxu3 %vm1048_vm0, %v1039_v42 }
 0x1ed   : > { %5533 = vmatmul.msk.f32.gmra.mxu1 %vm1048_vm0, %v993_v51  ;;  %v995_v51 = vld [vmem:[%s6514_s26 + $0x178] sm:$0xff] }
 0x1f1   : > { %v6780_v48 = vpop.f32.mrf.mxu0 }
 0x1f2   : > { %10369 = vst [vmem:[#allocation64_spill] sm:$0xff] %v6780_v48  ;;  %v6783_v39 = vpop.f32.mrf.mxu1 }
 0x1f3   : > { %10370 = vst [vmem:[#allocation65_spill] sm:$0xff] %v6783_v39  ;;  %v1040_v39 = vld [vmem:[%s6514_s26 + $0x2e0] sm:$0xff] }
 0x1f4   : > { %5438 = vmatmul.msk.f32.gmra.mxu0 %vm1048_vm0, %v994_v15  ;;  %5484 = vmatmul.msk.f32.gmra.mxu3 %vm1048_vm0, %v1040_v39 }
 0x1f5   : > { %5534 = vmatmul.msk.f32.gmra.mxu1 %vm1048_vm0, %v994_v15  ;;  %v996_v15 = vld [vmem:[%s6514_s26 + $0x180] sm:$0xff] }
 0x1f9   : > { %v6789_v30 = vpop.f32.mrf.mxu0 }
 0x1fa   : > { %10371 = vst [vmem:[#allocation66_spill] sm:$0xff] %v6789_v30  ;;  %v6792_v21 = vpop.f32.mrf.mxu1 }
 0x1fb   : > { %10372 = vst [vmem:[#allocation67_spill] sm:$0xff] %v6792_v21 }
 0x1fc   : > { %5439 = vmatmul.msk.f32.gmra.mxu0 %vm1048_vm0, %v995_v51  ;;  %5485 = vmatmul.msk.f32.gmra.mxu3 %vm1048_vm0, %v1041_v3 }
 0x1fd   : > { %5535 = vmatmul.msk.f32.gmra.mxu1 %vm1048_vm0, %v995_v51  ;;  %v997_v51 = vld [vmem:[%s6514_s26 + $0x188] sm:$0xff] }
 0x201   : > { %v6798_v12 = vpop.f32.mrf.mxu0 }
 0x202   : > { %10373 = vst [vmem:[#allocation68_spill] sm:$0xff] %v6798_v12  ;;  %v6804_v58 = vpop.f32.mrf.mxu1 }
 0x203   : > { %10374 = vst [vmem:[#allocation69_spill] sm:$0xff] %v6804_v58  ;;  %v1975_v58 = vmul.f32 %v6732_v18, %v6732_v18 }
 0x204   : > { %5440 = vmatmul.msk.f32.gmra.mxu0 %vm1048_vm0, %v996_v15  ;;  %5486 = vmatmul.msk.f32.gmra.mxu3 %vm1048_vm0, %v1042_v53 }
 0x205   : > { %5536 = vmatmul.msk.f32.gmra.mxu1 %vm1048_vm0, %v996_v15 }
 0x209   : > { %v6807_v21 = vpop.f32.mrf.mxu0 }
 0x20a   : > { %10375 = vst [vmem:[#allocation70_spill] sm:$0xff] %v6807_v21  ;;  %v6814_v50 = vpop.f32.mrf.mxu1 }
 0x20b   : > { %10376 = vst [vmem:[#allocation71_spill] sm:$0xff] %v6814_v50 }
 0x20c   : > { %5441 = vmatmul.msk.f32.gmra.mxu0 %vm1048_vm0, %v997_v51  ;;  %5487 = vmatmul.msk.f32.gmra.mxu3 %vm1048_vm0, %v1043_v44 }
 0x20d   : > { %5537 = vmatmul.msk.f32.gmra.mxu1 %vm1048_vm0, %v997_v51  ;;  %v999_v51 = vld [vmem:[%s6514_s26 + $0x198] sm:$0xff] }
 0x211   : > { %v6816_v15 = vpop.f32.mrf.mxu0 }
 0x212   : > { %10377 = vst [vmem:[#allocation72_spill] sm:$0xff] %v6816_v15  ;;  %v6826_v38 = vpop.f32.mrf.mxu1 }
 0x213   : > { %10379 = vst [vmem:[#allocation74_spill] sm:$0xff] %v6826_v38  ;;  %v1017_v38 = vld [vmem:[%s6514_s26 + $0x228] sm:$0xff] }
 0x214   : > { %5442 = vmatmul.msk.f32.gmra.mxu0 %vm1048_vm0, %v998_v47  ;;  %5576 = vmatmul.msk.f32.vlgmr.msrb.gmra.mxu3 %vm1048_vm0, %v1036_v54 }
 0x215   : > { %5538 = vmatmul.msk.f32.gmra.mxu1 %vm1048_vm0, %v998_v47 }
 0x219   : > { %v6823_v41 = vpop.f32.mrf.mxu0 }
 0x21a   : > { %10378 = vst [vmem:[#allocation73_spill] sm:$0xff] %v6823_v41  ;;  %v6834_v47 = vpop.f32.mrf.mxu1 }
 0x21b   : > { %10381 = vst [vmem:[#allocation76_spill] sm:$0xff] %v6834_v47  ;;  %v1015_v47 = vld [vmem:[%s6514_s26 + $0x218] sm:$0xff] }
 0x21c   : > { %5443 = vmatmul.msk.f32.gmra.mxu0 %vm1048_vm0, %v999_v51  ;;  %5577 = vmatmul.msk.f32.gmra.mxu3 %vm1048_vm0, %v1037_v24 }
 0x21d   : > { %5539 = vmatmul.msk.f32.gmra.mxu1 %vm1048_vm0, %v999_v51 }
 0x221   : > { %v6831_v35 = vpop.f32.mrf.mxu0 }
 0x222   : > { %10380 = vst [vmem:[#allocation75_spill] sm:$0xff] %v6831_v35  ;;  %v6844_v54 = vpop.f32.mrf.mxu1 }
 0x223   : > { %10383 = vst [vmem:[#allocation78_spill] sm:$0xff] %v6844_v54  ;;  %v1013_v54 = vld [vmem:[%s6514_s26 + $0x208] sm:$0xff] }
 0x224   : > { %5444 = vmatmul.msk.f32.gmra.mxu0 %vm1048_vm0, %v1000_v32  ;;  %5578 = vmatmul.msk.f32.gmra.mxu3 %vm1048_vm0, %v1038_v6  ;;  %v1004_v6 = vld [vmem:[%s6514_s26 + $0x1c0] sm:$0xff] }
 0x225   : > { %5540 = vmatmul.msk.f32.gmra.mxu1 %vm1048_vm0, %v1000_v32 }
 0x229   : > { %v6839_v29 = vpop.f32.mrf.mxu0  ;;  %v6964_v63 = vpop.f32.mrf.mxu3 }
 0x22a   : > { %10382 = vst [vmem:[#allocation77_spill] sm:$0xff] %v6839_v29  ;;  %v6853_v32 = vpop.f32.mrf.mxu1 }
 0x22b   : > { %10385 = vst [vmem:[#allocation80_spill] sm:$0xff] %v6853_v32  ;;  %v1011_v32 = vld [vmem:[%s6514_s26 + $0x1f8] sm:$0xff] }
 0x22c   : > { %5445 = vmatmul.msk.f32.gmra.mxu0 %vm1048_vm0, %v1001_v26  ;;  %5579 = vmatmul.msk.f32.gmra.mxu3 %vm1048_vm0, %v1039_v42  ;;  %v1005_v42 = vld [vmem:[%s6514_s26 + $0x1c8] sm:$0xff]  ;;  %10413 = vst [vmem:[#allocation108_spill] sm:$0xff] %v6964_v63 }
 0x22d   : > { %5541 = vmatmul.msk.f32.gmra.mxu1 %vm1048_vm0, %v1001_v26 }
 0x231   : > { %v6847_v51 = vpop.f32.mrf.mxu0 }
 0x232   : > { %10384 = vst [vmem:[#allocation79_spill] sm:$0xff] %v6847_v51  ;;  %v6864_v17 = vpop.f32.mrf.mxu1 }
 0x233   : > { %10388 = vst [vmem:[#allocation83_spill] sm:$0xff] %v6864_v17  ;;  %v1008_v17 = vld [vmem:[%s6514_s26 + $0x1e0] sm:$0xff] }
 0x234   : > { %5446 = vmatmul.msk.f32.gmra.mxu0 %vm1048_vm0, %v1002_v23  ;;  %5580 = vmatmul.msk.f32.gmra.mxu3 %vm1048_vm0, %v1040_v39  ;;  %v1006_v39 = vld [vmem:[%s6514_s26 + $0x1d0] sm:$0xff] }
 0x235   : > { %5542 = vmatmul.msk.f32.gmra.mxu1 %vm1048_vm0, %v1002_v23 }
 0x239   : > { %v6855_v24 = vpop.f32.mrf.mxu0 }
 0x23a   : > { %10386 = vst [vmem:[#allocation81_spill] sm:$0xff] %v6855_v24  ;;  %v6872_v14 = vpop.f32.mrf.mxu1 }
 0x23b   : > { %10390 = vst [vmem:[#allocation85_spill] sm:$0xff] %v6872_v14  ;;  %v1007_v14 = vld [vmem:[%s6514_s26 + $0x1d8] sm:$0xff] }
 0x23c   : > { %5447 = vmatmul.msk.f32.gmra.mxu0 %vm1048_vm0, %v1003_v20  ;;  %5581 = vmatmul.msk.f32.gmra.mxu3 %vm1048_vm0, %v1041_v3 }
 0x23d   : > { %5543 = vmatmul.msk.f32.gmra.mxu1 %vm1048_vm0, %v1003_v20 }
 0x241   : > { %v6861_v26 = vpop.f32.mrf.mxu0 }
 0x242   : > { %10387 = vst [vmem:[#allocation82_spill] sm:$0xff] %v6861_v26  ;;  %v6882_v3 = vpop.f32.mrf.mxu1 }
 0x243   : > { %10392 = vst [vmem:[#allocation87_spill] sm:$0xff] %v6882_v3 }
 0x244   : > { %5448 = vmatmul.msk.f32.gmra.mxu0 %vm1048_vm0, %v1004_v6  ;;  %5582 = vmatmul.msk.f32.gmra.mxu3 %vm1048_vm0, %v1042_v53 }
 0x245   : > { %5544 = vmatmul.msk.f32.gmra.mxu1 %vm1048_vm0, %v1004_v6 }
 0x249   : > { %v6869_v23 = vpop.f32.mrf.mxu0 }
 0x24a   : > { %10389 = vst [vmem:[#allocation84_spill] sm:$0xff] %v6869_v23  ;;  %v6890_v53 = vpop.f32.mrf.mxu1 }
 0x24b   : > { %10394 = vst [vmem:[#allocation89_spill] sm:$0xff] %v6890_v53  ;;  %v1010_v53 = vld [vmem:[%s6514_s26 + $0x1f0] sm:$0xff] }
 0x24c   : > { %5449 = vmatmul.msk.f32.gmra.mxu0 %vm1048_vm0, %v1005_v42  ;;  %5583 = vmatmul.msk.f32.gmra.mxu3 %vm1048_vm0, %v1043_v44  ;;  %v1009_v44 = vld [vmem:[%s6514_s26 + $0x1e8] sm:$0xff] }
 0x24d   : > { %5545 = vmatmul.msk.f32.gmra.mxu1 %vm1048_vm0, %v1005_v42 }
 0x251   : > { %v6877_v20 = vpop.f32.mrf.mxu0 }
 0x252   : > { %10391 = vst [vmem:[#allocation86_spill] sm:$0xff] %v6877_v20  ;;  %v6900_v3 = vpop.f32.mrf.mxu1 }
 0x253   : > { %10397 = vst [vmem:[#allocation92_spill] sm:$0xff] %v6900_v3 }
 0x254   : > { %5450 = vmatmul.msk.f32.gmra.mxu0 %vm1048_vm0, %v1006_v39 }
 0x255   : > { %5546 = vmatmul.msk.f32.gmra.mxu1 %vm1048_vm0, %v1006_v39 }
 0x259   : > { %v6885_v6 = vpop.f32.mrf.mxu0 }
 0x25a   : > { %10393 = vst [vmem:[#allocation88_spill] sm:$0xff] %v6885_v6  ;;  %v6907_v11 = vpop.f32.mrf.mxu1 }
 0x25b   : > { %10399 = vst [vmem:[#allocation94_spill] sm:$0xff] %v6907_v11 }
 0x25c   : > { %5451 = vmatmul.msk.f32.gmra.mxu0 %vm1048_vm0, %v1007_v14 }
 0x25d   : > { %5547 = vmatmul.msk.f32.gmra.mxu1 %vm1048_vm0, %v1007_v14 }
 0x261   : > { %v6892_v42 = vpop.f32.mrf.mxu0 }
 0x262   : > { %10395 = vst [vmem:[#allocation90_spill] sm:$0xff] %v6892_v42  ;;  %v6916_v3 = vpop.f32.mrf.mxu1 }
 0x263   : > { %10401 = vst [vmem:[#allocation96_spill] sm:$0xff] %v6916_v3  ;;  %v1014_v3 = vld [vmem:[%s6514_s26 + $0x210] sm:$0xff] }
 0x264   : > { %5452 = vmatmul.msk.f32.gmra.mxu0 %vm1048_vm0, %v1008_v17 }
 0x265   : > { %5548 = vmatmul.msk.f32.gmra.mxu1 %vm1048_vm0, %v1008_v17 }
 0x269   : > { %v6897_v39 = vpop.f32.mrf.mxu0 }
 0x26a   : > { %10396 = vst [vmem:[#allocation91_spill] sm:$0xff] %v6897_v39  ;;  %v6923_v11 = vpop.f32.mrf.mxu1 }
 0x26b   : > { %10403 = vst [vmem:[#allocation98_spill] sm:$0xff] %v6923_v11 }
 0x26c   : > { %5453 = vmatmul.msk.f32.gmra.mxu0 %vm1048_vm0, %v1009_v44 }
 0x26d   : > { %5549 = vmatmul.msk.f32.gmra.mxu1 %vm1048_vm0, %v1009_v44 }
 0x271   : > { %v6904_v14 = vpop.f32.mrf.mxu0 }
 0x272   : > { %10398 = vst [vmem:[#allocation93_spill] sm:$0xff] %v6904_v14  ;;  %v6933_v5 = vpop.f32.mrf.mxu1 }
 0x273   : > { %10406 = vst [vmem:[#allocation101_spill] sm:$0xff] %v6933_v5 }
 0x274   : > { %5454 = vmatmul.msk.f32.gmra.mxu0 %vm1048_vm0, %v1010_v53 }
 0x275   : > { %5550 = vmatmul.msk.f32.gmra.mxu1 %vm1048_vm0, %v1010_v53 }
 0x279   : > { %v6911_v17 = vpop.f32.mrf.mxu0 }
 0x27a   : > { %10400 = vst [vmem:[#allocation95_spill] sm:$0xff] %v6911_v17 }
 0x27c   : > { %5455 = vmatmul.msk.f32.gmra.mxu0 %vm1048_vm0, %v1011_v32 }
 0x27d   : > { %5551 = vmatmul.msk.f32.gmra.mxu1 %vm1048_vm0, %v1011_v32 }
 0x281   : > { %v6918_v44 = vpop.f32.mrf.mxu0 }
 0x282   : > { %10402 = vst [vmem:[#allocation97_spill] sm:$0xff] %v6918_v44 }
 0x284   : > { %5456 = vmatmul.msk.f32.gmra.mxu0 %vm1048_vm0, %v1012_v8 }
 0x285   : > { %5552 = vmatmul.msk.f32.gmra.mxu1 %vm1048_vm0, %v1012_v8  ;;  %v2630_v8 = vld [vmem:[%s10102_s5 + $0x18] sm:$0xff] }
 0x286   : > { %5790 = vmatpush.msra.mxu3 %v2630_v8  ;;  %2739 = vmatpush.msra.mxu2 %v2630_v8 }
 0x289   : > { %v6925_v53 = vpop.f32.mrf.mxu0 }
 0x28a   : > { %10404 = vst [vmem:[#allocation99_spill] sm:$0xff] %v6925_v53 }
 0x28c   : > { %5457 = vmatmul.msk.f32.gmra.mxu0 %vm1048_vm0, %v1013_v54 }
 0x28d   : > { %5553 = vmatmul.msk.f32.gmra.mxu1 %vm1048_vm0, %v1013_v54  ;;  %v6943_v54 = vpop.f32.mrf.mxu1 }
 0x28e   : > { %10408 = vst [vmem:[#allocation103_spill] sm:$0xff] %v6943_v54  ;;  %v2629_v54 = vld [vmem:[%s10102_s5 + $0x10] sm:$0xff] }
 0x28f   : > { %5791 = vmatpush.msra.mxu3 %v2629_v54  ;;  %2740 = vmatpush.msra.mxu2 %v2629_v54  ;;  %v2628_v54 = vld [vmem:[%s10102_s5 + $0x8] sm:$0xff] }
 0x291   : > { %v6930_v32 = vpop.f32.mrf.mxu0  ;;  %5792 = vmatpush.msra.mxu3 %v2628_v54  ;;  %2741 = vmatpush.msra.mxu2 %v2628_v54  ;;  %v1020_v54 = vld [vmem:[%s6514_s26 + $0x240] sm:$0xff] }
 0x292   : > { %10405 = vst [vmem:[#allocation100_spill] sm:$0xff] %v6930_v32 }
 0x294   : > { %5458 = vmatmul.msk.f32.gmra.mxu0 %vm1048_vm0, %v1014_v3 }
 0x295   : > { %5554 = vmatmul.msk.f32.gmra.mxu1 %vm1048_vm0, %v1014_v3  ;;  %v6952_v3 = vpop.f32.mrf.mxu1 }
 0x296   : > { %10410 = vst [vmem:[#allocation105_spill] sm:$0xff] %v6952_v3  ;;  %v1018_v3 = vld [vmem:[%s6514_s26 + $0x230] sm:$0xff] }
 0x299   : > { %v6940_v11 = vpop.f32.mrf.mxu0 }
 0x29a   : > { %10407 = vst [vmem:[#allocation102_spill] sm:$0xff] %v6940_v11 }
 0x29c   : > { %5459 = vmatmul.msk.f32.gmra.mxu0 %vm1048_vm0, %v1015_v47 }
 0x29d   : > { %5555 = vmatmul.msk.f32.gmra.mxu1 %vm1048_vm0, %v1015_v47  ;;  %v6962_v47 = vpop.f32.mrf.mxu1 }
 0x29e   : > { %10412 = vst [vmem:[#allocation107_spill] sm:$0xff] %v6962_v47  ;;  %v6979_v47 = vpop.f32.mrf.mxu3 }
 0x29f   : > { %10417 = vst [vmem:[#allocation112_spill] sm:$0xff] %v6979_v47 }
 0x2a1   : > { %v6947_v5 = vpop.f32.mrf.mxu0 }
 0x2a2   : > { %10409 = vst [vmem:[#allocation104_spill] sm:$0xff] %v6947_v5 }
 0x2a4   : > { %5460 = vmatmul.msk.f32.gmra.mxu0 %vm1048_vm0, %v1016_v2 }
 0x2a5   : > { %5556 = vmatmul.msk.f32.gmra.mxu1 %vm1048_vm0, %v1016_v2 }
 0x2a9   : > { %v6954_v8 = vpop.f32.mrf.mxu0 }
 0x2aa   : > { %10411 = vst [vmem:[#allocation106_spill] sm:$0xff] %v6954_v8  ;;  %v1022_v8 = vld [vmem:[%s6514_s26 + $0x250] sm:$0xff] }
 0x2ac   : > { %5461 = vmatmul.msk.f32.gmra.mxu0 %vm1048_vm0, %v1017_v38 }
 0x2ad   : > { %5557 = vmatmul.msk.f32.gmra.mxu1 %vm1048_vm0, %v1017_v38  ;;  %v6977_v38 = vpop.f32.mrf.mxu1 }
 0x2ae   : > { %10416 = vst [vmem:[#allocation111_spill] sm:$0xff] %v6977_v38  ;;  %v2039_v38 = vmul.f32 %v6964_v63, %v6964_v63  ;;  %v7002_v63 = vpop.f32.mrf.mxu3 }
 0x2af   : > { %10420 = vst [vmem:[#allocation115_spill] sm:$0xff] %v7002_v63 }
 0x2b1   : > { %v6966_v2 = vpop.f32.mrf.mxu0 }
 0x2b2   : > { %10414 = vst [vmem:[#allocation109_spill] sm:$0xff] %v6966_v2 }
 0x2b4   : > { %5462 = vmatmul.msk.f32.gmra.mxu0 %vm1048_vm0, %v1018_v3 }
 0x2b5   : > { %5558 = vmatmul.msk.f32.gmra.mxu1 %vm1048_vm0, %v1018_v3  ;;  %v2627_v3 = vld [vmem:[%s10102_s5] sm:$0xff]  ;;  %v6997_v0 = vpop.f32.mrf.mxu1 }
 0x2b6   : > { %5793 = vmatpush.msra.mxu3 %v2627_v3  ;;  %2742 = vmatpush.msra.mxu2 %v2627_v3  ;;  %10419 = vst [vmem:[#allocation114_spill] sm:$0xff] %v6997_v0  ;;  %v1021_v0 = vld [vmem:[%s6514_s26 + $0x248] sm:$0xff] }
 0x2b9   : > { %v6971_v50 = vpop.f32.mrf.mxu0 }
 0x2ba   : > { %10415 = vst [vmem:[#allocation110_spill] sm:$0xff] %v6971_v50  ;;  %v2170_v50 = vsel %vm1048_vm0, %v2039_v38, 0.0 }
 0x2bc   : > { %5463 = vmatmul.msk.f32.gmra.mxu0 %vm1048_vm0, %v1019_v60 }
 0x2bd   : > { %5559 = vmatmul.msk.f32.gmra.mxu1 %vm1048_vm0, %v1019_v60  ;;  %v2167_v60 = vsel %vm1048_vm0, %v1975_v58, 0.0  ;;  %v2040_v58 = vmul.f32 %v6979_v47, %v6979_v47 }
 0x2c1   : > { %v6990_v57 = vpop.f32.mrf.mxu0 }
 0x2c2   : > { %10418 = vst [vmem:[#allocation113_spill] sm:$0xff] %v6990_v57  ;;  %v2007_v9 = vmul.f32 %v6990_v57, %v6990_v57 }
 0x2c4   : > { %v2168_v3 = vsel %vm1048_vm0, %v2007_v9, 0.0  ;;  %5464 = vmatmul.msk.f32.gmra.mxu0 %vm1048_vm0, %v1020_v54 }
 0x2c5   : > { %5560 = vmatmul.msk.f32.gmra.mxu1 %vm1048_vm0, %v1020_v54  ;;  %v2169_v18 = vadd.f32 %v2168_v3, %v2167_v60  ;;  %v2172_v54 = vsel %vm1048_vm0, %v1976_v55, 0.0  ;;  %v7021_v60 = vpop.f32.mrf.mxu1  ;;  %v7023_v3 = vpop.f32.mrf.mxu3  ;;  %v2041_v55 = vmul.f32 %v7002_v63, %v7002_v63 }
 0x2c6   : > { %10422 = vst [vmem:[#allocation117_spill] sm:$0xff] %v7021_v60  ;;  %v2042_v52 = vmul.f32 %v7023_v3, %v7023_v3 }
 0x2c7   : > { %v2171_v2 = vadd.f32 %v2170_v50, %v2169_v18  ;;  %v2175_v50 = vsel %vm1048_vm0, %v2040_v58, 0.0  ;;  %10423 = vst [vmem:[#allocation118_spill] sm:$0xff] %v7023_v3 }
 0x2c9   : > { %v7008_v57 = vadd.f32 1e-08, %v2171_v2  ;;  %v7010_v38 = vpop.f32.mrf.mxu0 }
 0x2ca   : > { %10421 = vst [vmem:[#allocation116_spill] sm:$0xff] %v7010_v38  ;;  %v2008_v9 = vmul.f32 %v7010_v38, %v7010_v38 }
 0x2cb   : > { %5824 = vrsqrt.f32 %v7008_v57  ;;  %vm2534_vm1 = vcmp.eq.f32.partialorder %v7008_v57, inf  ;;  %vm2536_vm2 = vcmp.eq.f32.partialorder %v7008_v57, 0.0 }
 0x2cc   : > { %v2173_v18 = vsel %vm1048_vm0, %v2008_v9, 0.0  ;;  %5465 = vmatmul.msk.f32.gmra.mxu0 %vm1048_vm0, %v1021_v0 }
 0x2cd   : > { %5561 = vmatmul.msk.f32.gmra.mxu1 %vm1048_vm0, %v1021_v0  ;;  %v2174_v2 = vadd.f32 %v2173_v18, %v2172_v54  ;;  %v2180_v18 = vsel %vm1048_vm0, %v2041_v55, 0.0  ;;  %v7049_v49 = vpop.f32.mrf.mxu3 }
 0x2ce   : > { %10426 = vst [vmem:[#allocation121_spill] sm:$0xff] %v7049_v49 }
 0x2cf   : > { %v2176_v47 = vadd.f32 %v2175_v50, %v2174_v2  ;;  %v2177_v50 = vsel %vm1048_vm0, %v1977_v27, 0.0  ;;  %v7047_v27 = vpop.f32.mrf.mxu1 }
 0x2d0   : > { %10425 = vst [vmem:[#allocation120_spill] sm:$0xff] %v7047_v27 }
 0x2d1   : > { %v5825_v38 = vpop.eup %5824  ;;  %v7029_v58 = vadd.f32 1e-08, %v2176_v47  ;;  %v7031_v9 = vpop.f32.mrf.mxu0 }
 0x2d2   : > { %10424 = vst [vmem:[#allocation119_spill] sm:$0xff] %v7031_v9  ;;  %v2009_v0 = vmul.f32 %v7031_v9, %v7031_v9  ;;  %v2528_v54 = vmul.f32 %v5825_v38, %v7008_v57  ;;  %v1978_v9 = vmul.f32 %v6753_v45, %v6753_v45 }
 0x2d3   : > { %5826 = vrsqrt.f32 %v7029_v58  ;;  %vm2546_vm3 = vcmp.eq.f32.partialorder %v7029_v58, inf  ;;  %vm2548_vm4 = vcmp.eq.f32.partialorder %v7029_v58, 0.0 }
 0x2d4   : > { %v2178_v2 = vsel %vm1048_vm0, %v2009_v0, 0.0  ;;  %5466 = vmatmul.msk.f32.gmra.mxu0 %vm1048_vm0, %v1022_v8  ;;  %v2529_v47 = vmul.f32 %v5825_v38, %v2528_v54  ;;  %v2626_v54 = vld [vmem:[%s10101_s4 + $0x18] sm:$0xff] }
 0x2d5   : > { %5562 = vmatmul.msk.f32.gmra.mxu1 %vm1048_vm0, %v1022_v8  ;;  %v2179_v63 = vadd.f32 %v2178_v2, %v2177_v50  ;;  %v1023_v8 = vld [vmem:[%s6514_s26 + $0x258] sm:$0xff]  ;;  %2948 = vmatpush.msrb.mxu3 %v2626_v54  ;;  %v1979_v54 = vmul.f32 %v6762_v61, %v6762_v61 }
 0x2d6   : > { %v2530_v36 = vmul.f32 0.5, %v2529_v47 }
 0x2d7   : > { %v2181_v60 = vadd.f32 %v2180_v18, %v2179_v63 }
 0x2d8   : > { %v2531_v55 = vsub.f32 1.5, %v2530_v36  ;;  %v2182_v36 = vsel %vm1048_vm0, %v1978_v9, 0.0 }
 0x2d9   : > { %v5827_v5 = vpop.eup %5826  ;;  %v7051_v0 = vadd.f32 1e-08, %v2181_v60  ;;  %v7053_v11 = vpop.f32.mrf.mxu0  ;;  %v2185_v60 = vsel %vm1048_vm0, %v2042_v52, 0.0 }
 0x2da   : > { %10427 = vst [vmem:[#allocation122_spill] sm:$0xff] %v7053_v11  ;;  %v2010_v63 = vmul.f32 %v7053_v11, %v7053_v11  ;;  %v2532_v50 = vmul.f32 %v5825_v38, %v2531_v55  ;;  %v2540_v18 = vmul.f32 %v5827_v5, %v7029_v58  ;;  %v2537_v55 = vand.u32 2147483648, %v7008_v57  ;;  %v7083_v11 = vpop.f32.mrf.mxu1 }
 0x2db   : > { %5828 = vrsqrt.f32 %v7051_v0  ;;  %10429 = vst [vmem:[#allocation124_spill] sm:$0xff] %v7083_v11  ;;  %vm2558_vm5 = vcmp.eq.f32.partialorder %v7051_v0, inf  ;;  %vm2560_vm6 = vcmp.eq.f32.partialorder %v7051_v0, 0.0 }
 0x2dc   : > { %v2183_v2 = vsel %vm1048_vm0, %v2010_v63, 0.0  ;;  %5467 = vmatmul.msk.f32.gmra.mxu0 %vm1048_vm0, %v1023_v8  ;;  %v2533_v47 = vmul.f32 %v2532_v50, %v7008_v57  ;;  %v2541_v3 = vmul.f32 %v5827_v5, %v2540_v18 }
 0x2dd   : > { %5563 = vmatmul.msk.f32.gmra.mxu1 %vm1048_vm0, %v1023_v8  ;;  %v2184_v38 = vadd.f32 %v2183_v2, %v2182_v36  ;;  %v2043_v8 = vmul.f32 %v7049_v49, %v7049_v49 }
 0x2de   : > { %v2535_v9 = vsel %vm2534_vm1, %v7008_v57, %v2533_v47  ;;  %v2542_v52 = vmul.f32 0.5, %v2541_v3  ;;  %v1024_v47 = vld [vmem:[%s6514_s26 + $0x260] sm:$0xff] }
 0x2df   : > { %v2186_v63 = vadd.f32 %v2185_v60, %v2184_v38  ;;  %v2538_v45 = vsel %vm2536_vm2, %v2537_v55, %v2535_v9  ;;  %v2187_v38 = vsel %vm1048_vm0, %v1979_v54, 0.0  ;;  %v7089_v55 = vpop.f32.mrf.mxu3  ;;  %v2549_v54 = vand.u32 2147483648, %v7029_v58 }
 0x2e0   : > { %5608 = vmatmul.msk.f32.vlgmr.msra.gmra.mxu3 %vm1048_vm0, %v2538_v45  ;;  %v2543_v50 = vsub.f32 1.5, %v2542_v52  ;;  %10430 = vst [vmem:[#allocation125_spill] sm:$0xff] %v7089_v55  ;;  %v2190_v45 = vsel %vm1048_vm0, %v2043_v8, 0.0 }
 0x2e1   : > { %v5829_v18 = vpop.eup %5828  ;;  %v7078_v36 = vadd.f32 1e-08, %v2186_v63  ;;  %v7080_v2 = vpop.f32.mrf.mxu0 }
 0x2e2   : > { %10428 = vst [vmem:[#allocation123_spill] sm:$0xff] %v7080_v2  ;;  %v2011_v57 = vmul.f32 %v7080_v2, %v7080_v2  ;;  %v2544_v3 = vmul.f32 %v5827_v5, %v2543_v50  ;;  %v2552_v60 = vmul.f32 %v5829_v18, %v7051_v0 }
 0x2e3   : > { %5830 = vrsqrt.f32 %v7078_v36  ;;  %vm2570_vm7 = vcmp.eq.f32.partialorder %v7078_v36, inf  ;;  %vm2572_vm8 = vcmp.eq.f32.partialorder %v7078_v36, 0.0 }
 0x2e4   : > { %v2188_v9 = vsel %vm1048_vm0, %v2011_v57, 0.0  ;;  %5468 = vmatmul.msk.f32.gmra.mxu0 %vm1048_vm0, %v1024_v47  ;;  %v2545_v52 = vmul.f32 %v2544_v3, %v7029_v58  ;;  %v2553_v63 = vmul.f32 %v5829_v18, %v2552_v60  ;;  %v1980_v57 = vmul.f32 %v6771_v33, %v6771_v33  ;;  %v2625_v60 = vld [vmem:[%s10101_s4 + $0x10] sm:$0xff] }
 0x2e5   : > { %5564 = vmatmul.msk.f32.gmra.mxu1 %vm1048_vm0, %v1024_v47  ;;  %v2189_v5 = vadd.f32 %v2188_v9, %v2187_v38  ;;  %v2044_v47 = vmul.f32 %v7089_v55, %v7089_v55  ;;  %2949 = vmatpush.msrb.mxu3 %v2625_v60  ;;  %v1981_v55 = vmul.f32 %v6780_v48, %v6780_v48 }
 0x2e6   : > { %v2547_v50 = vsel %vm2546_vm3, %v7029_v58, %v2545_v52  ;;  %v2554_v8 = vmul.f32 0.5, %v2553_v63  ;;  %v1025_v52 = vld [vmem:[%s6514_s26 + $0x268] sm:$0xff] }
 0x2e7   : > { %v2191_v49 = vadd.f32 %v2190_v45, %v2189_v5  ;;  %v2550_v61 = vsel %vm2548_vm4, %v2549_v54, %v2547_v50  ;;  %v2195_v54 = vsel %vm1048_vm0, %v2044_v47, 0.0  ;;  %v7120_v50 = vpop.f32.mrf.mxu1 }
 0x2e8   : > { %5609 = vmatmul.msk.f32.gmra.mxu3 %vm1048_vm0, %v2550_v61  ;;  %v2555_v3 = vsub.f32 1.5, %v2554_v8  ;;  %v2192_v61 = vsel %vm1048_vm0, %v1980_v57, 0.0  ;;  %10432 = vst [vmem:[#allocation127_spill] sm:$0xff] %v7120_v50  ;;  %v2561_v57 = vand.u32 2147483648, %v7051_v0  ;;  %v6019_v50 = vld [vmem:[%s6514_s26 + $0x200] sm:$0xff] }
 0x2e9   : > { %v5831_v38 = vpop.eup %5830  ;;  %v7109_v9 = vadd.f32 1e-08, %v2191_v49  ;;  %v7111_v58 = vpop.f32.mrf.mxu0 }
 0x2ea   : > { %10431 = vst [vmem:[#allocation126_spill] sm:$0xff] %v7111_v58  ;;  %v2012_v45 = vmul.f32 %v7111_v58, %v7111_v58  ;;  %v2556_v63 = vmul.f32 %v5829_v18, %v2555_v3  ;;  %v2564_v5 = vmul.f32 %v5831_v38, %v7078_v36  ;;  %v7126_v18 = vpop.f32.mrf.mxu3 }
 0x2eb   : > { %5832 = vrsqrt.f32 %v7109_v9  ;;  %10433 = vst [vmem:[#allocation128_spill] sm:$0xff] %v7126_v18  ;;  %vm2582_vm9 = vcmp.eq.f32.partialorder %v7109_v9, inf  ;;  %vm2584_vm10 = vcmp.eq.f32.partialorder %v7109_v9, 0.0 }
 0x2ec   : > { %v2193_v49 = vsel %vm1048_vm0, %v2012_v45, 0.0  ;;  %5469 = vmatmul.msk.f32.gmra.mxu0 %vm1048_vm0, %v1025_v52  ;;  %v2557_v8 = vmul.f32 %v2556_v63, %v7051_v0  ;;  %v2565_v60 = vmul.f32 %v5831_v38, %v2564_v5  ;;  %v2045_v63 = vmul.f32 %v7126_v18, %v7126_v18 }
 0x2ed   : > { %5565 = vmatmul.msk.f32.gmra.mxu1 %vm1048_vm0, %v1025_v52  ;;  %v2194_v3 = vadd.f32 %v2193_v49, %v2192_v61 }
 0x2ee   : > { %v2559_v47 = vsel %vm2558_vm5, %v7051_v0, %v2557_v8  ;;  %v2566_v45 = vmul.f32 0.5, %v2565_v60  ;;  %v1026_v8 = vld [vmem:[%s6514_s26 + $0x270] sm:$0xff] }
 0x2ef   : > { %v2196_v52 = vadd.f32 %v2195_v54, %v2194_v3  ;;  %v2562_v33 = vsel %vm2560_vm6, %v2561_v57, %v2559_v47  ;;  %v2197_v54 = vsel %vm1048_vm0, %v1981_v55, 0.0  ;;  %v2200_v3 = vsel %vm1048_vm0, %v2045_v63, 0.0  ;;  %v7154_v55 = vpop.f32.mrf.mxu1 }
 0x2f0   : > { %5610 = vmatmul.msk.f32.gmra.mxu3 %vm1048_vm0, %v2562_v33  ;;  %v2567_v5 = vsub.f32 1.5, %v2566_v45  ;;  %10435 = vst [vmem:[#allocation130_spill] sm:$0xff] %v7154_v55 }
 0x2f1   : > { %v5833_v61 = vpop.eup %5832  ;;  %v7137_v49 = vadd.f32 1e-08, %v2196_v52  ;;  %v7139_v58 = vpop.f32.mrf.mxu0 }
 0x2f2   : > { %10434 = vst [vmem:[#allocation129_spill] sm:$0xff] %v7139_v58  ;;  %v2013_v0 = vmul.f32 %v7139_v58, %v7139_v58  ;;  %v2568_v60 = vmul.f32 %v5831_v38, %v2567_v5  ;;  %v2576_v48 = vmul.f32 %v5833_v61, %v7109_v9  ;;  %v2573_v38 = vand.u32 2147483648, %v7078_v36  ;;  %v1029_v58 = vld [vmem:[%s6514_s26 + $0x288] sm:$0xff] }
 0x2f3   : > { %5834 = vrsqrt.f32 %v7137_v49  ;;  %v1982_v5 = vmul.f32 %v6789_v30, %v6789_v30  ;;  %v1027_v30 = vld [vmem:[%s6514_s26 + $0x278] sm:$0xff]  ;;  %vm2594_vm11 = vcmp.eq.f32.partialorder %v7137_v49, inf  ;;  %vm2596_vm12 = vcmp.eq.f32.partialorder %v7137_v49, 0.0 }
 0x2f4   : > { %v2198_v33 = vsel %vm1048_vm0, %v2013_v0, 0.0  ;;  %5470 = vmatmul.msk.f32.gmra.mxu0 %vm1048_vm0, %v1026_v8  ;;  %v2569_v57 = vmul.f32 %v2568_v60, %v7078_v36  ;;  %v2577_v47 = vmul.f32 %v5833_v61, %v2576_v48 }
 0x2f5   : > { %5566 = vmatmul.msk.f32.gmra.mxu1 %vm1048_vm0, %v1026_v8  ;;  %v2199_v45 = vadd.f32 %v2198_v33, %v2197_v54  ;;  %v7160_v8 = vpop.f32.mrf.mxu3  ;;  %v2624_v33 = vld [vmem:[%s10101_s4 + $0x8] sm:$0xff] }
 0x2f6   : > { %v2571_v52 = vsel %vm2570_vm7, %v7078_v36, %v2569_v57  ;;  %v2578_v63 = vmul.f32 0.5, %v2577_v47  ;;  %10436 = vst [vmem:[#allocation131_spill] sm:$0xff] %v7160_v8  ;;  %v2046_v60 = vmul.f32 %v7160_v8, %v7160_v8  ;;  %2950 = vmatpush.msrb.mxu3 %v2624_v33  ;;  %v1951_v8 = vmul.f32 %v6564_v56, %v6564_v56  ;;  %v6017_v56 = vld [vmem:[%s6514_s26] sm:$0xff] }
 0x2f7   : > { %v2201_v0 = vadd.f32 %v2200_v3, %v2199_v45  ;;  %v2574_v48 = vsel %vm2572_vm8, %v2573_v38, %v2571_v52  ;;  %v2202_v52 = vsel %vm1048_vm0, %v1982_v5, 0.0  ;;  %v2585_v5 = vand.u32 2147483648, %v7109_v9 }
 0x2f8   : > { %5611 = vmatmul.msk.f32.gmra.mxu3 %vm1048_vm0, %v2574_v48  ;;  %v2579_v54 = vsub.f32 1.5, %v2578_v63  ;;  %v1983_v63 = vmul.f32 %v6798_v12, %v6798_v12 }
 0x2f9   : > { %v5835_v57 = vpop.eup %5834  ;;  %v7168_v36 = vadd.f32 1e-08, %v2201_v0  ;;  %v7170_v47 = vpop.f32.mrf.mxu0  ;;  %v2205_v0 = vsel %vm1048_vm0, %v2046_v60, 0.0 }
 0x2fa   : > { %10437 = vst [vmem:[#allocation132_spill] sm:$0xff] %v7170_v47  ;;  %v2014_v3 = vmul.f32 %v7170_v47, %v7170_v47  ;;  %v2580_v45 = vmul.f32 %v5833_v61, %v2579_v54  ;;  %v2588_v38 = vmul.f32 %v5835_v57, %v7137_v49 }
 0x2fb   : > { %5836 = vrsqrt.f32 %v7168_v36  ;;  %vm2606_vm13 = vcmp.eq.f32.partialorder %v7168_v36, inf  ;;  %vm2608_vm14 = vcmp.eq.f32.partialorder %v7168_v36, 0.0 }
 0x2fc   : > { %v2203_v48 = vsel %vm1048_vm0, %v2014_v3, 0.0  ;;  %5471 = vmatmul.msk.f32.gmra.mxu0 %vm1048_vm0, %v1027_v30  ;;  %v2581_v33 = vmul.f32 %v2580_v45, %v7109_v9  ;;  %v2589_v61 = vmul.f32 %v5835_v57, %v2588_v38  ;;  %v3728_v38 = vld [vmem:[%s10104_s7 + $0x18] sm:$0xff] }
 0x2fd   : > { %5567 = vmatmul.msk.f32.gmra.mxu1 %vm1048_vm0, %v1027_v30  ;;  %v2204_v54 = vadd.f32 %v2203_v48, %v2202_v52  ;;  %v2623_v30 = vld [vmem:[%s10101_s4] sm:$0xff]  ;;  %v2048_v52 = vsel %vm1048_vm0, %v1983_v63, 0.0  ;;  %v7198_v48 = vpop.f32.mrf.mxu1  ;;  %3841 = vmatpush.msrb.mxu2 %v3728_v38 }
 0x2fe   : > { %v2583_v47 = vsel %vm2582_vm9, %v7109_v9, %v2581_v33  ;;  %v2590_v60 = vmul.f32 0.5, %v2589_v61  ;;  %2951 = vmatpush.msrb.mxu3 %v2623_v30  ;;  %10438 = vst [vmem:[#allocation133_spill] sm:$0xff] %v7198_v48 }
 0x2ff   : > { %v2206_v3 = vadd.f32 %v2205_v0, %v2204_v54  ;;  %v2586_v45 = vsel %vm2584_vm10, %v2585_v5, %v2583_v47  ;;  %v1028_v0 = vld [vmem:[%s6514_s26 + $0x280] sm:$0xff]  ;;  %v2047_v47 = vsel %vm1048_vm0, %v1951_v8, 0.0 }
 0x300   : > { %5612 = vmatmul.msk.f32.gmra.mxu3 %vm1048_vm0, %v2586_v45  ;;  %v2591_v33 = vsub.f32 1.5, %v2590_v60  ;;  %v2049_v30 = vadd.f32 %v2048_v52, %v2047_v47  ;;  %v1984_v60 = vmul.f32 %v6807_v21, %v6807_v21  ;;  %v1952_v52 = vmul.f32 %v6571_v59, %v6571_v59 }
 0x301   : > { %v5837_v9 = vpop.eup %5836  ;;  %v7201_v61 = vadd.f32 1e-08, %v2206_v3  ;;  %v7203_v18 = vpop.f32.mrf.mxu0 }
 0x302   : > { %10439 = vst [vmem:[#allocation134_spill] sm:$0xff] %v7203_v18  ;;  %v2015_v54 = vmul.f32 %v7203_v18, %v7203_v18  ;;  %v2592_v5 = vmul.f32 %v5835_v57, %v2591_v33  ;;  %v2600_v63 = vmul.f32 %v5837_v9, %v7168_v36  ;;  %v2597_v57 = vand.u32 2147483648, %v7137_v49 }
 0x303   : > { %5838 = vrsqrt.f32 %v7201_v61  ;;  %vm2618_vm15 = vcmp.eq.f32.partialorder %v7201_v61, inf  ;;  %vm2620_vm1 = vcmp.eq.f32.partialorder %v7201_v61, 0.0 }
 0x304   : > { %v2050_v3 = vsel %vm1048_vm0, %v2015_v54, 0.0  ;;  %5472 = vmatmul.msk.f32.gmra.mxu0 %vm1048_vm0, %v1028_v0  ;;  %v2593_v8 = vmul.f32 %v2592_v5, %v7137_v49  ;;  %v2601_v45 = vmul.f32 %v5837_v9, %v2600_v63  ;;  %v2053_v5 = vsel %vm1048_vm0, %v1984_v60, 0.0 }
 0x305   : > { %5568 = vmatmul.msk.f32.gmra.mxu1 %vm1048_vm0, %v1028_v0  ;;  %v2051_v38 = vadd.f32 %v2050_v3, %v2049_v30  ;;  %v7232_v2 = vpop.f32.mrf.mxu1 }
 0x306   : > { %v2595_v33 = vsel %vm2594_vm11, %v7137_v49, %v2593_v8  ;;  %v2602_v47 = vmul.f32 0.5, %v2601_v45  ;;  %v2052_v8 = vsel %vm1048_vm0, %v1952_v52, 0.0  ;;  %10441 = vst [vmem:[#allocation136_spill] sm:$0xff] %v7232_v2 }
 0x307   : > { %v7223_v54 = vadd.f32 1e-08, %v2051_v38  ;;  %v2598_v0 = vsel %vm2596_vm12, %v2597_v57, %v2595_v33  ;;  %v2054_v38 = vadd.f32 %v2053_v5, %v2052_v8  ;;  %v1985_v57 = vmul.f32 %v6816_v15, %v6816_v15 }
 0x308   : > { %5613 = vmatmul.msk.f32.gmra.mxu3 %vm1048_vm0, %v2598_v0  ;;  %v2603_v63 = vsub.f32 1.5, %v2602_v47  ;;  %v1953_v5 = vmul.f32 %v6578_v62, %v6578_v62  ;;  %v1030_v62 = vld [vmem:[%s6514_s26 + $0x290] sm:$0xff] }
 0x309   : > { %v5839_v30 = vpop.eup %5838  ;;  %v7227_v3 = vpop.f32.mrf.mxu0  ;;  %5840 = vrsqrt.f32 %v7223_v54  ;;  %vm2246_vm2 = vcmp.eq.f32.partialorder %v7223_v54, inf  ;;  %vm2248_vm3 = vcmp.eq.f32.partialorder %v7223_v54, 0.0 }
 0x30a   : > { %10440 = vst [vmem:[#allocation135_spill] sm:$0xff] %v7227_v3  ;;  %v2016_v49 = vmul.f32 %v7227_v3, %v7227_v3  ;;  %v2604_v45 = vmul.f32 %v5837_v9, %v2603_v63  ;;  %v2612_v60 = vmul.f32 %v5839_v30, %v7201_v61  ;;  %v2609_v9 = vand.u32 2147483648, %v7168_v36 }
 0x30c   : > { %v2055_v33 = vsel %vm1048_vm0, %v2016_v49, 0.0  ;;  %5473 = vmatmul.msk.f32.gmra.mxu0 %vm1048_vm0, %v1029_v58  ;;  %v2605_v52 = vmul.f32 %v2604_v45, %v7168_v36  ;;  %v2613_v47 = vmul.f32 %v5839_v30, %v2612_v60  ;;  %v2058_v60 = vsel %vm1048_vm0, %v1985_v57, 0.0 }
 0x30d   : > { %5569 = vmatmul.msk.f32.gmra.mxu1 %vm1048_vm0, %v1029_v58  ;;  %v2056_v0 = vadd.f32 %v2055_v33, %v2054_v38  ;;  %v1986_v57 = vmul.f32 %v6823_v41, %v6823_v41 }
 0x30e   : > { %v2607_v63 = vsel %vm2606_vm13, %v7168_v36, %v2605_v52  ;;  %v2614_v8 = vmul.f32 0.5, %v2613_v47  ;;  %v2057_v36 = vsel %vm1048_vm0, %v1953_v5, 0.0 }
 0x30f   : > { %v5841_v49 = vpop.eup %5840  ;;  %v7250_v58 = vadd.f32 1e-08, %v2056_v0  ;;  %v2610_v45 = vsel %vm2608_vm14, %v2609_v9, %v2607_v63  ;;  %v2059_v9 = vadd.f32 %v2058_v60, %v2057_v36  ;;  %v7266_v63 = vpop.f32.mrf.mxu1 }
 0x310   : > { %5614 = vmatmul.msk.f32.gmra.mxu3 %vm1048_vm0, %v2610_v45  ;;  %v2615_v38 = vsub.f32 1.5, %v2614_v8  ;;  %v2240_v33 = vmul.f32 %v5841_v49, %v7223_v54  ;;  %10443 = vst [vmem:[#allocation138_spill] sm:$0xff] %v7266_v63 }
 0x311   : > { %v7255_v2 = vpop.f32.mrf.mxu0  ;;  %5842 = vrsqrt.f32 %v7250_v58  ;;  %vm2258_vm4 = vcmp.eq.f32.partialorder %v7250_v58, inf  ;;  %vm2260_vm5 = vcmp.eq.f32.partialorder %v7250_v58, 0.0 }
 0x312   : > { %10442 = vst [vmem:[#allocation137_spill] sm:$0xff] %v7255_v2  ;;  %v2017_v52 = vmul.f32 %v7255_v2, %v7255_v2  ;;  %v2616_v47 = vmul.f32 %v5839_v30, %v2615_v38  ;;  %v2241_v0 = vmul.f32 %v5841_v49, %v2240_v33  ;;  %v7272_v30 = vpop.f32.mrf.mxu3  ;;  %v2621_v38 = vand.u32 2147483648, %v7201_v61 }
 0x313   : > { %10444 = vst [vmem:[#allocation139_spill] sm:$0xff] %v7272_v30  ;;  %v1954_v33 = vmul.f32 %v6585_v1, %v6585_v1  ;;  %v1031_v1 = vld [vmem:[%s6514_s26 + $0x298] sm:$0xff] }
 0x314   : > { %v2060_v8 = vsel %vm1048_vm0, %v2017_v52, 0.0  ;;  %5474 = vmatmul.msk.f32.gmra.mxu0 %vm1048_vm0, %v1030_v62  ;;  %v2617_v5 = vmul.f32 %v2616_v47, %v7201_v61  ;;  %v2242_v45 = vmul.f32 0.5, %v2241_v0 }
 0x315   : > { %5570 = vmatmul.msk.f32.gmra.mxu1 %vm1048_vm0, %v1030_v62  ;;  %v2061_v60 = vadd.f32 %v2060_v8, %v2059_v9  ;;  %v2063_v9 = vsel %vm1048_vm0, %v1986_v57, 0.0 }
 0x316   : > { %v2619_v36 = vsel %vm2618_vm15, %v7201_v61, %v2617_v5  ;;  %v2243_v62 = vsub.f32 1.5, %v2242_v45  ;;  %v2062_v61 = vsel %vm1048_vm0, %v1954_v33, 0.0 }
 0x317   : > { %v5843_v52 = vpop.eup %5842  ;;  %v7280_v47 = vadd.f32 1e-08, %v2061_v60  ;;  %v2622_v0 = vsel %vm2620_vm1, %v2621_v38, %v2619_v36  ;;  %v2064_v57 = vadd.f32 %v2063_v9, %v2062_v61  ;;  %v1987_v60 = vmul.f32 %v6831_v35, %v6831_v35  ;;  %v916_v9 = vld [vmem:[%s7299_s23] sm:$0xff]  ;;  %v7313_v61 = vpop.f32.mrf.mxu1 }
 0x318   : > { %5615 = vmatmul.msk.f32.gmra.mxu3 %vm1048_vm0, %v2622_v0  ;;  %v2244_v8 = vmul.f32 %v5841_v49, %v2243_v62  ;;  %v2252_v63 = vmul.f32 %v5843_v52, %v7250_v58  ;;  %v2249_v38 = vand.u32 2147483648, %v7223_v54  ;;  %10446 = vst [vmem:[#allocation141_spill] sm:$0xff] %v7313_v61 }
 0x319   : > { %v7286_v41 = vpop.f32.mrf.mxu0  ;;  %5844 = vrsqrt.f32 %v7280_v47  ;;  %vm2270_vm6 = vcmp.eq.f32.partialorder %v7280_v47, inf  ;;  %vm2272_vm7 = vcmp.eq.f32.partialorder %v7280_v47, 0.0 }
 0x31a   : > { %10445 = vst [vmem:[#allocation140_spill] sm:$0xff] %v7286_v41  ;;  %v2018_v5 = vmul.f32 %v7286_v41, %v7286_v41  ;;  %v2245_v45 = vmul.f32 %v2244_v8, %v7223_v54  ;;  %v2253_v49 = vmul.f32 %v5843_v52, %v2252_v63  ;;  %v1955_v8 = vmul.f32 %v6592_v4, %v6592_v4  ;;  %v7316_v41 = vpop.f32.mrf.mxu3 }
 0x31b   : > { %10447 = vst [vmem:[#allocation142_spill] sm:$0xff] %v7316_v41 }
 0x31c   : > { %v2065_v33 = vsel %vm1048_vm0, %v2018_v5, 0.0  ;;  %5475 = vmatmul.msk.f32.gmra.mxu0 %vm1048_vm0, %v1031_v1  ;;  %v2247_v36 = vsel %vm2246_vm2, %v7223_v54, %v2245_v45  ;;  %v2254_v62 = vmul.f32 0.5, %v2253_v49  ;;  %v2068_v54 = vsel %vm1048_vm0, %v1987_v60, 0.0 }
 0x31d   : > { %5571 = vmatmul.msk.f32.gmra.mxu1 %vm1048_vm0, %v1031_v1  ;;  %v2066_v63 = vadd.f32 %v2065_v33, %v2064_v57  ;;  %v2250_v0 = vsel %vm2248_vm3, %v2249_v38, %v2247_v36  ;;  %v1032_v38 = vld [vmem:[%s6514_s26 + $0x2a0] sm:$0xff]  ;;  %v2067_v33 = vsel %vm1048_vm0, %v1955_v8, 0.0 }
 0x31e   : > { %5584 = vmatmul.msk.f32.vlgmr.msra.gmra.mxu2 %vm1048_vm0, %v2250_v0  ;;  %v2255_v5 = vsub.f32 1.5, %v2254_v62  ;;  %v2069_v60 = vadd.f32 %v2068_v54, %v2067_v33  ;;  %v2261_v0 = vand.u32 2147483648, %v7250_v58  ;;  %v1956_v33 = vmul.f32 %v6599_v7, %v6599_v7 }
 0x31f   : > { %v5845_v35 = vpop.eup %5844  ;;  %v7318_v1 = vadd.f32 1e-08, %v2066_v63 }
 0x320   : > { %5616 = vmatmul.msk.f32.vlgmr.msrb.gmra.mxu3 %vm1048_vm0, %v916_v9  ;;  %v2256_v45 = vmul.f32 %v5843_v52, %v2255_v5  ;;  %v2264_v49 = vmul.f32 %v5845_v35, %v7280_v47  ;;  %v1988_v52 = vmul.f32 %v6839_v29, %v6839_v29 }
 0x321   : > { %v7323_v57 = vpop.f32.mrf.mxu0  ;;  %5846 = vrsqrt.f32 %v7318_v1  ;;  %vm2282_vm8 = vcmp.eq.f32.partialorder %v7318_v1, inf  ;;  %vm2284_vm9 = vcmp.eq.f32.partialorder %v7318_v1, 0.0 }
 0x322   : > { %10448 = vst [vmem:[#allocation143_spill] sm:$0xff] %v7323_v57  ;;  %v2019_v36 = vmul.f32 %v7323_v57, %v7323_v57  ;;  %v2257_v62 = vmul.f32 %v2256_v45, %v7250_v58  ;;  %v2265_v63 = vmul.f32 %v5845_v35, %v2264_v49  ;;  %v917_v49 = vld [vmem:[%s7299_s23 + $0x8] sm:$0xff]  ;;  %v7347_v57 = vpop.f32.mrf.mxu1 }
 0x323   : > { %10449 = vst [vmem:[#allocation144_spill] sm:$0xff] %v7347_v57 }
 0x324   : > { %v2070_v9 = vsel %vm1048_vm0, %v2019_v36, 0.0  ;;  %5476 = vmatmul.msk.f32.gmra.mxu0 %vm1048_vm0, %v1032_v38  ;;  %v2259_v8 = vsel %vm2258_vm4, %v7250_v58, %v2257_v62  ;;  %v2266_v5 = vmul.f32 0.5, %v2265_v63  ;;  %v7351_v63 = vpop.f32.mrf.mxu3 }
 0x325   : > { %5572 = vmatmul.msk.f32.gmra.mxu1 %vm1048_vm0, %v1032_v38  ;;  %v2071_v54 = vadd.f32 %v2070_v9, %v2069_v60  ;;  %v2262_v45 = vsel %vm2260_vm5, %v2261_v0, %v2259_v8  ;;  %v2073_v38 = vsel %vm1048_vm0, %v1988_v52, 0.0  ;;  %10450 = vst [vmem:[#allocation145_spill] sm:$0xff] %v7351_v63  ;;  %v1033_v0 = vld [vmem:[%s6514_s26 + $0x2a8] sm:$0xff]  ;;  %v2072_v9 = vsel %vm1048_vm0, %v1956_v33, 0.0 }
 0x326   : > { %5585 = vmatmul.msk.f32.gmra.mxu2 %vm1048_vm0, %v2262_v45  ;;  %v2267_v29 = vsub.f32 1.5, %v2266_v5 }
 0x327   : > { %v5847_v36 = vpop.eup %5846  ;;  %v7344_v61 = vadd.f32 1e-08, %v2071_v54  ;;  %v2074_v54 = vadd.f32 %v2073_v38, %v2072_v9  ;;  %v1957_v9 = vmul.f32 %v6606_v10, %v6606_v10 }
 0x328   : > { %5617 = vmatmul.msk.f32.gmra.mxu3 %vm1048_vm0, %v917_v49  ;;  %v2268_v58 = vmul.f32 %v5845_v35, %v2267_v29  ;;  %v2276_v62 = vmul.f32 %v5847_v36, %v7318_v1  ;;  %v1989_v29 = vmul.f32 %v6847_v51, %v6847_v51  ;;  %v2273_v35 = vand.u32 2147483648, %v7280_v47 }
 0x329   : > { %v7353_v60 = vpop.f32.mrf.mxu0  ;;  %5848 = vrsqrt.f32 %v7344_v61  ;;  %vm2294_vm10 = vcmp.eq.f32.partialorder %v7344_v61, inf  ;;  %vm2296_vm11 = vcmp.eq.f32.partialorder %v7344_v61, 0.0 }
 0x32a   : > { %10451 = vst [vmem:[#allocation146_spill] sm:$0xff] %v7353_v60  ;;  %v2020_v52 = vmul.f32 %v7353_v60, %v7353_v60  ;;  %v2269_v8 = vmul.f32 %v2268_v58, %v7280_v47  ;;  %v2277_v5 = vmul.f32 %v5847_v36, %v2276_v62  ;;  %v918_v62 = vld [vmem:[%s7299_s23 + $0x10] sm:$0xff] }
 0x32c   : > { %v2075_v45 = vsel %vm1048_vm0, %v2020_v52, 0.0  ;;  %5477 = vmatmul.msk.f32.gmra.mxu0 %vm1048_vm0, %v1033_v0  ;;  %v2271_v49 = vsel %vm2270_vm6, %v7280_v47, %v2269_v8  ;;  %v2278_v33 = vmul.f32 0.5, %v2277_v5  ;;  %v2078_v47 = vsel %vm1048_vm0, %v1989_v29, 0.0 }
 0x32d   : > { %5573 = vmatmul.msk.f32.gmra.mxu1 %vm1048_vm0, %v1033_v0  ;;  %v2076_v38 = vadd.f32 %v2075_v45, %v2074_v54  ;;  %v2274_v58 = vsel %vm2272_vm7, %v2273_v35, %v2271_v49  ;;  %v3727_v0 = vld [vmem:[%s10104_s7 + $0x10] sm:$0xff]  ;;  %v2077_v45 = vsel %vm1048_vm0, %v1957_v9, 0.0  ;;  %v7387_v49 = vpop.f32.mrf.mxu1 }
 0x32e   : > { %5586 = vmatmul.msk.f32.gmra.mxu2 %vm1048_vm0, %v2274_v58  ;;  %v2279_v51 = vsub.f32 1.5, %v2278_v33  ;;  %v1034_v35 = vld [vmem:[%s6514_s26 + $0x2b0] sm:$0xff]  ;;  %10453 = vst [vmem:[#allocation148_spill] sm:$0xff] %v7387_v49  ;;  %v7394_v58 = vpop.f32.mrf.mxu3 }
 0x32f   : > { %v5849_v52 = vpop.eup %5848  ;;  %v7374_v57 = vadd.f32 1e-08, %v2076_v38  ;;  %3842 = vmatpush.msrb.mxu2 %v3727_v0  ;;  %10454 = vst [vmem:[#allocation149_spill] sm:$0xff] %v7394_v58 }
 0x330   : > { %5618 = vmatmul.msk.f32.gmra.mxu3 %vm1048_vm0, %v918_v62  ;;  %v2280_v8 = vmul.f32 %v5847_v36, %v2279_v51  ;;  %v2288_v5 = vmul.f32 %v5849_v52, %v7344_v61  ;;  %v2079_v51 = vadd.f32 %v2078_v47, %v2077_v45  ;;  %v1990_v36 = vmul.f32 %v6855_v24, %v6855_v24  ;;  %v919_v45 = vld [vmem:[%s7299_s23 + $0x18] sm:$0xff] }
 0x331   : > { %v7382_v54 = vpop.f32.mrf.mxu0  ;;  %5850 = vrsqrt.f32 %v7374_v57  ;;  %v2285_v62 = vand.u32 2147483648, %v7318_v1  ;;  %v1958_v24 = vmul.f32 %v6613_v13, %v6613_v13  ;;  %vm2306_vm12 = vcmp.eq.f32.partialorder %v7374_v57, inf }
 0x332   : > { %10452 = vst [vmem:[#allocation147_spill] sm:$0xff] %v7382_v54  ;;  %v2021_v33 = vmul.f32 %v7382_v54, %v7382_v54  ;;  %v2281_v29 = vmul.f32 %v2280_v8, %v7318_v1  ;;  %v2289_v38 = vmul.f32 %v5849_v52, %v2288_v5  ;;  %vm2308_vm13 = vcmp.eq.f32.partialorder %v7374_v57, 0.0 }
 0x334   : > { %v2080_v9 = vsel %vm1048_vm0, %v2021_v33, 0.0  ;;  %5478 = vmatmul.msk.f32.gmra.mxu0 %vm1048_vm0, %v1034_v35  ;;  %v2283_v0 = vsel %vm2282_vm8, %v7318_v1, %v2281_v29  ;;  %v2290_v47 = vmul.f32 0.5, %v2289_v38 }
 0x335   : > { %5574 = vmatmul.msk.f32.gmra.mxu1 %vm1048_vm0, %v1034_v35  ;;  %v2081_v8 = vadd.f32 %v2080_v9, %v2079_v51  ;;  %v2286_v5 = vsel %vm2284_vm9, %v2285_v62, %v2283_v0  ;;  %v2083_v35 = vsel %vm1048_vm0, %v1990_v36, 0.0  ;;  %v1035_v51 = vld [vmem:[%s6514_s26 + $0x2b8] sm:$0xff]  ;;  %v2082_v62 = vsel %vm1048_vm0, %v1958_v24, 0.0 }
 0x336   : > { %5587 = vmatmul.msk.f32.gmra.mxu2 %vm1048_vm0, %v2286_v5  ;;  %v2291_v49 = vsub.f32 1.5, %v2290_v47  ;;  %v2084_v36 = vadd.f32 %v2083_v35, %v2082_v62  ;;  %v7431_v35 = vpop.f32.mrf.mxu3  ;;  %v920_v62 = vld [vmem:[%s7299_s23 + $0x20] sm:$0xff] }
 0x337   : > { %v5851_v33 = vpop.eup %5850  ;;  %v7407_v54 = vadd.f32 1e-08, %v2081_v8  ;;  %v7424_v8 = vpop.f32.mrf.mxu1  ;;  %10457 = vst [vmem:[#allocation152_spill] sm:$0xff] %v7431_v35 }
 0x338   : > { %5619 = vmatmul.msk.f32.gmra.mxu3 %vm1048_vm0, %v919_v45  ;;  %v2292_v29 = vmul.f32 %v5849_v52, %v2291_v49  ;;  %v2300_v1 = vmul.f32 %v5851_v33, %v7374_v57  ;;  %v1991_v52 = vmul.f32 %v6861_v26, %v6861_v26  ;;  %v2297_v49 = vand.u32 2147483648, %v7344_v61  ;;  %10456 = vst [vmem:[#allocation151_spill] sm:$0xff] %v7424_v8 }
 0x339   : > { %v7412_v38 = vpop.f32.mrf.mxu0  ;;  %5852 = vrsqrt.f32 %v7407_v54  ;;  %v1959_v26 = vmul.f32 %v6620_v16, %v6620_v16  ;;  %vm2318_vm14 = vcmp.eq.f32.partialorder %v7407_v54, inf  ;;  %vm2320_vm15 = vcmp.eq.f32.partialorder %v7407_v54, 0.0 }
 0x33a   : > { %10455 = vst [vmem:[#allocation150_spill] sm:$0xff] %v7412_v38  ;;  %v2022_v9 = vmul.f32 %v7412_v38, %v7412_v38  ;;  %v2293_v0 = vmul.f32 %v2292_v29, %v7344_v61  ;;  %v2301_v47 = vmul.f32 %v5851_v33, %v2300_v1 }
 0x33c   : > { %v2085_v5 = vsel %vm1048_vm0, %v2022_v9, 0.0  ;;  %5479 = vmatmul.msk.f32.gmra.mxu0 %vm1048_vm0, %v1035_v51  ;;  %v2295_v24 = vsel %vm2294_vm10, %v7344_v61, %v2293_v0  ;;  %v2302_v45 = vmul.f32 0.5, %v2301_v47 }
 0x33d   : > { %5575 = vmatmul.msk.f32.gmra.mxu1 %vm1048_vm0, %v1035_v51  ;;  %v2086_v29 = vadd.f32 %v2085_v5, %v2084_v36  ;;  %v2298_v1 = vsel %vm2296_vm11, %v2297_v49, %v2295_v24  ;;  %v2088_v51 = vsel %vm1048_vm0, %v1991_v52, 0.0  ;;  %v2087_v36 = vsel %vm1048_vm0, %v1959_v26, 0.0 }
 0x33e   : > { %5588 = vmatmul.msk.f32.gmra.mxu2 %vm1048_vm0, %v2298_v1  ;;  %v2303_v9 = vsub.f32 1.5, %v2302_v45  ;;  %v2089_v45 = vadd.f32 %v2088_v51, %v2087_v36  ;;  %v1992_v52 = vmul.f32 %v6869_v23, %v6869_v23  ;;  %v1960_v51 = vmul.f32 %v6627_v19, %v6627_v19  ;;  %v7460_v36 = vpop.f32.mrf.mxu3 }
 0x33f   : > { %v5853_v8 = vpop.eup %5852  ;;  %v7437_v38 = vadd.f32 1e-08, %v2086_v29  ;;  %10459 = vst [vmem:[#allocation154_spill] sm:$0xff] %v7460_v36 }
 0x340   : > { %5620 = vmatmul.msk.f32.gmra.mxu3 %vm1048_vm0, %v920_v62  ;;  %v2304_v61 = vmul.f32 %v5851_v33, %v2303_v9  ;;  %v2312_v0 = vmul.f32 %v5853_v8, %v7407_v54  ;;  %v2309_v33 = vand.u32 2147483648, %v7374_v57 }
 0x341   : > { %v7442_v47 = vpop.f32.mrf.mxu0  ;;  %5854 = vrsqrt.f32 %v7437_v38  ;;  %vm2330_vm1 = vcmp.eq.f32.partialorder %v7437_v38, inf  ;;  %vm2332_vm2 = vcmp.eq.f32.partialorder %v7437_v38, 0.0 }
 0x342   : > { %10458 = vst [vmem:[#allocation153_spill] sm:$0xff] %v7442_v47  ;;  %v2023_v49 = vmul.f32 %v7442_v47, %v7442_v47  ;;  %v2305_v5 = vmul.f32 %v2304_v61, %v7374_v57  ;;  %v2313_v24 = vmul.f32 %v5853_v8, %v2312_v0  ;;  %v921_v47 = vld [vmem:[%s7299_s23 + $0x28] sm:$0xff] }
 0x344   : > { %v2090_v29 = vsel %vm1048_vm0, %v2023_v49, 0.0  ;;  %v2307_v1 = vsel %vm2306_vm12, %v7374_v57, %v2305_v5  ;;  %v2314_v26 = vmul.f32 0.5, %v2313_v24  ;;  %v2093_v49 = vsel %vm1048_vm0, %v1992_v52, 0.0 }
 0x345   : > { %v2091_v62 = vadd.f32 %v2090_v29, %v2089_v45  ;;  %v2310_v9 = vsel %vm2308_vm13, %v2309_v33, %v2307_v1  ;;  %v2092_v45 = vsel %vm1048_vm0, %v1960_v51, 0.0 }
 0x346   : > { %5589 = vmatmul.msk.f32.gmra.mxu2 %vm1048_vm0, %v2310_v9  ;;  %v2315_v61 = vsub.f32 1.5, %v2314_v26  ;;  %v2094_v26 = vadd.f32 %v2093_v49, %v2092_v45  ;;  %v1961_v49 = vmul.f32 %v6634_v22, %v6634_v22 }
 0x347   : > { %v5855_v0 = vpop.eup %5854  ;;  %v7462_v23 = vadd.f32 1e-08, %v2091_v62 }
 0x348   : > { %5621 = vmatmul.msk.f32.gmra.mxu3 %vm1048_vm0, %v921_v47  ;;  %v2316_v57 = vmul.f32 %v5853_v8, %v2315_v61  ;;  %v2324_v5 = vmul.f32 %v5855_v0, %v7437_v38  ;;  %v1993_v47 = vmul.f32 %v6877_v20, %v6877_v20  ;;  %v2321_v8 = vand.u32 2147483648, %v7407_v54 }
 0x349   : > { %v7467_v24 = vpop.f32.mrf.mxu0  ;;  %5856 = vrsqrt.f32 %v7462_v23  ;;  %vm2342_vm3 = vcmp.eq.f32.partialorder %v7462_v23, inf  ;;  %vm2344_vm4 = vcmp.eq.f32.partialorder %v7462_v23, 0.0 }
 0x34a   : > { %10460 = vst [vmem:[#allocation155_spill] sm:$0xff] %v7467_v24  ;;  %v2024_v33 = vmul.f32 %v7467_v24, %v7467_v24  ;;  %v2317_v29 = vmul.f32 %v2316_v57, %v7407_v54  ;;  %v2325_v1 = vmul.f32 %v5855_v0, %v2324_v5  ;;  %v922_v24 = vld [vmem:[%s7299_s23 + $0x30] sm:$0xff]  ;;  %v2098_v20 = vsel %vm1048_vm0, %v1993_v47, 0.0 }
 0x34c   : > { %v2095_v52 = vsel %vm1048_vm0, %v2024_v33, 0.0  ;;  %v2319_v62 = vsel %vm2318_vm14, %v7407_v54, %v2317_v29  ;;  %v2326_v9 = vmul.f32 0.5, %v2325_v1  ;;  %v7490_v29 = vpop.f32.mrf.mxu3 }
 0x34d   : > { %v2096_v51 = vadd.f32 %v2095_v52, %v2094_v26  ;;  %v2322_v61 = vsel %vm2320_vm15, %v2321_v8, %v2319_v62  ;;  %10461 = vst [vmem:[#allocation156_spill] sm:$0xff] %v7490_v29  ;;  %v2097_v26 = vsel %vm1048_vm0, %v1961_v49, 0.0 }
 0x34e   : > { %5590 = vmatmul.msk.f32.gmra.mxu2 %vm1048_vm0, %v2322_v61  ;;  %v2327_v57 = vsub.f32 1.5, %v2326_v9  ;;  %v2099_v62 = vadd.f32 %v2098_v20, %v2097_v26  ;;  %v1962_v20 = vmul.f32 %v6641_v25, %v6641_v25 }
 0x34f   : > { %v5857_v5 = vpop.eup %5856  ;;  %v7485_v45 = vadd.f32 1e-08, %v2096_v51 }
 0x350   : > { %5622 = vmatmul.msk.f32.gmra.mxu3 %vm1048_vm0, %v922_v24  ;;  %v2328_v33 = vmul.f32 %v5855_v0, %v2327_v57  ;;  %v2336_v54 = vmul.f32 %v5857_v5, %v7462_v23  ;;  %v1994_v0 = vmul.f32 %v6885_v6, %v6885_v6  ;;  %v2333_v24 = vand.u32 2147483648, %v7437_v38 }
 0x351   : > { %v7492_v1 = vpop.f32.mrf.mxu0  ;;  %5858 = vrsqrt.f32 %v7485_v45  ;;  %vm2354_vm5 = vcmp.eq.f32.partialorder %v7485_v45, inf  ;;  %vm2356_vm6 = vcmp.eq.f32.partialorder %v7485_v45, 0.0 }
 0x352   : > { %10462 = vst [vmem:[#allocation157_spill] sm:$0xff] %v7492_v1  ;;  %v2025_v8 = vmul.f32 %v7492_v1, %v7492_v1  ;;  %v2329_v52 = vmul.f32 %v2328_v33, %v7437_v38  ;;  %v2337_v47 = vmul.f32 %v5857_v5, %v2336_v54  ;;  %v923_v1 = vld [vmem:[%s7299_s23 + $0x38] sm:$0xff]  ;;  %v2103_v6 = vsel %vm1048_vm0, %v1994_v0, 0.0 }
 0x353   : > { %v2345_v0 = vand.u32 2147483648, %v7462_v23 }
 0x354   : > { %v2100_v9 = vsel %vm1048_vm0, %v2025_v8, 0.0  ;;  %v2331_v51 = vsel %vm2330_vm1, %v7437_v38, %v2329_v52  ;;  %v2338_v61 = vmul.f32 0.5, %v2337_v47  ;;  %v2102_v47 = vsel %vm1048_vm0, %v1962_v20, 0.0 }
 0x355   : > { %v2101_v49 = vadd.f32 %v2100_v9, %v2099_v62  ;;  %v2334_v57 = vsel %vm2332_vm2, %v2333_v24, %v2331_v51  ;;  %v2104_v51 = vadd.f32 %v2103_v6, %v2102_v47  ;;  %v1963_v6 = vmul.f32 %v6648_v28, %v6648_v28 }
 0x356   : > { %5591 = vmatmul.msk.f32.gmra.mxu2 %vm1048_vm0, %v2334_v57  ;;  %v2339_v33 = vsub.f32 1.5, %v2338_v61 }
 0x357   : > { %v5859_v54 = vpop.eup %5858  ;;  %v7510_v26 = vadd.f32 1e-08, %v2101_v49 }
 0x358   : > { %5623 = vmatmul.msk.f32.gmra.mxu3 %vm1048_vm0, %v923_v1  ;;  %v2340_v8 = vmul.f32 %v5857_v5, %v2339_v33  ;;  %v2348_v38 = vmul.f32 %v5859_v54, %v7485_v45  ;;  %v1995_v1 = vmul.f32 %v6892_v42, %v6892_v42  ;;  %v7524_v5 = vpop.f32.mrf.mxu3 }
 0x359   : > { %v7515_v52 = vpop.f32.mrf.mxu0  ;;  %5860 = vrsqrt.f32 %v7510_v26  ;;  %10464 = vst [vmem:[#allocation159_spill] sm:$0xff] %v7524_v5  ;;  %vm2366_vm7 = vcmp.eq.f32.partialorder %v7510_v26, inf  ;;  %vm2368_vm8 = vcmp.eq.f32.partialorder %v7510_v26, 0.0 }
 0x35a   : > { %10463 = vst [vmem:[#allocation158_spill] sm:$0xff] %v7515_v52  ;;  %v2026_v62 = vmul.f32 %v7515_v52, %v7515_v52  ;;  %v2341_v24 = vmul.f32 %v2340_v8, %v7462_v23  ;;  %v2349_v9 = vmul.f32 %v5859_v54, %v2348_v38  ;;  %v924_v8 = vld [vmem:[%s7299_s23 + $0x40] sm:$0xff] }
 0x35c   : > { %v2105_v61 = vsel %vm1048_vm0, %v2026_v62, 0.0  ;;  %v2343_v49 = vsel %vm2342_vm3, %v7462_v23, %v2341_v24  ;;  %v2350_v57 = vmul.f32 0.5, %v2349_v9  ;;  %v3726_v62 = vld [vmem:[%s10104_s7 + $0x8] sm:$0xff]  ;;  %v2108_v24 = vsel %vm1048_vm0, %v1995_v1, 0.0 }
 0x35d   : > { %v2106_v20 = vadd.f32 %v2105_v61, %v2104_v51  ;;  %v2346_v33 = vsel %vm2344_vm4, %v2345_v0, %v2343_v49  ;;  %3843 = vmatpush.msrb.mxu2 %v3726_v62  ;;  %v2107_v0 = vsel %vm1048_vm0, %v1963_v6, 0.0 }
 0x35e   : > { %5592 = vmatmul.msk.f32.gmra.mxu2 %vm1048_vm0, %v2346_v33  ;;  %v2351_v38 = vsub.f32 1.5, %v2350_v57  ;;  %v2109_v1 = vadd.f32 %v2108_v24, %v2107_v0  ;;  %v2357_v33 = vand.u32 2147483648, %v7485_v45  ;;  %v1964_v24 = vmul.f32 %v6655_v31, %v6655_v31 }
 0x35f   : > { %v5861_v47 = vpop.eup %5860  ;;  %v7535_v42 = vadd.f32 1e-08, %v2106_v20 }
 0x360   : > { %5624 = vmatmul.msk.f32.gmra.mxu3 %vm1048_vm0, %v924_v8  ;;  %v2352_v23 = vmul.f32 %v5859_v54, %v2351_v38  ;;  %v2360_v9 = vmul.f32 %v5861_v47, %v7510_v26  ;;  %v1996_v54 = vmul.f32 %v6897_v39, %v6897_v39 }
 0x361   : > { %v7543_v51 = vpop.f32.mrf.mxu0  ;;  %5862 = vrsqrt.f32 %v7535_v42  ;;  %vm2378_vm9 = vcmp.eq.f32.partialorder %v7535_v42, inf  ;;  %vm2380_vm10 = vcmp.eq.f32.partialorder %v7535_v42, 0.0 }
 0x362   : > { %10465 = vst [vmem:[#allocation160_spill] sm:$0xff] %v7543_v51  ;;  %v2027_v61 = vmul.f32 %v7543_v51, %v7543_v51  ;;  %v2353_v49 = vmul.f32 %v2352_v23, %v7485_v45  ;;  %v2361_v57 = vmul.f32 %v5861_v47, %v2360_v9  ;;  %v925_v9 = vld [vmem:[%s7299_s23 + $0x48] sm:$0xff]  ;;  %v2113_v28 = vsel %vm1048_vm0, %v1996_v54, 0.0 }
 0x363   : > { %v7552_v20 = vpop.f32.mrf.mxu3  ;;  %v1997_v54 = vmul.f32 %v6904_v14, %v6904_v14 }
 0x364   : > { %v2110_v8 = vsel %vm1048_vm0, %v2027_v61, 0.0  ;;  %v2355_v6 = vsel %vm2354_vm5, %v7485_v45, %v2353_v49  ;;  %v2362_v38 = vmul.f32 0.5, %v2361_v57  ;;  %v2112_v57 = vsel %vm1048_vm0, %v1964_v24, 0.0 }
 0x365   : > { %v2111_v62 = vadd.f32 %v2110_v8, %v2109_v1  ;;  %v2358_v23 = vsel %vm2356_vm6, %v2357_v33, %v2355_v6  ;;  %v2114_v6 = vadd.f32 %v2113_v28, %v2112_v57  ;;  %v1965_v28 = vmul.f32 %v6662_v34, %v6662_v34 }
 0x366   : > { %5593 = vmatmul.msk.f32.gmra.mxu2 %vm1048_vm0, %v2358_v23  ;;  %v2363_v0 = vsub.f32 1.5, %v2362_v38  ;;  %v2369_v38 = vand.u32 2147483648, %v7510_v26 }
 0x367   : > { %v5863_v39 = vpop.eup %5862  ;;  %v7563_v51 = vadd.f32 1e-08, %v2111_v62 }
 0x368   : > { %5625 = vmatmul.msk.f32.gmra.mxu3 %vm1048_vm0, %v925_v9  ;;  %v2364_v61 = vmul.f32 %v5861_v47, %v2363_v0  ;;  %v2372_v45 = vmul.f32 %v5863_v39, %v7535_v42 }
 0x369   : > { %v7568_v49 = vpop.f32.mrf.mxu0  ;;  %5864 = vrsqrt.f32 %v7563_v51  ;;  %vm2390_vm11 = vcmp.eq.f32.partialorder %v7563_v51, inf  ;;  %vm2392_vm12 = vcmp.eq.f32.partialorder %v7563_v51, 0.0 }
 0x36a   : > { %10466 = vst [vmem:[#allocation161_spill] sm:$0xff] %v7568_v49  ;;  %v2028_v1 = vmul.f32 %v7568_v49, %v7568_v49  ;;  %v2365_v33 = vmul.f32 %v2364_v61, %v7510_v26  ;;  %v2373_v8 = vmul.f32 %v5863_v39, %v2372_v45  ;;  %v926_v61 = vld [vmem:[%s7299_s23 + $0x50] sm:$0xff]  ;;  %v2118_v49 = vsel %vm1048_vm0, %v1997_v54, 0.0 }
 0x36b   : > { %v7577_v47 = vpop.f32.mrf.mxu3  ;;  %v1998_v54 = vmul.f32 %v6911_v17, %v6911_v17 }
 0x36c   : > { %v2115_v62 = vsel %vm1048_vm0, %v2028_v1, 0.0  ;;  %v2367_v23 = vsel %vm2366_vm7, %v7510_v26, %v2365_v33  ;;  %v2374_v9 = vmul.f32 0.5, %v2373_v8  ;;  %v2117_v8 = vsel %vm1048_vm0, %v1965_v28, 0.0 }
 0x36d   : > { %v2116_v24 = vadd.f32 %v2115_v62, %v2114_v6  ;;  %v2370_v0 = vsel %vm2368_vm8, %v2369_v38, %v2367_v23  ;;  %v2119_v23 = vadd.f32 %v2118_v49, %v2117_v8  ;;  %v1966_v49 = vmul.f32 %v6669_v37, %v6669_v37 }
 0x36e   : > { %5594 = vmatmul.msk.f32.gmra.mxu2 %vm1048_vm0, %v2370_v0  ;;  %v2375_v45 = vsub.f32 1.5, %v2374_v9  ;;  %v2381_v9 = vand.u32 2147483648, %v7535_v42 }
 0x36f   : > { %v5865_v57 = vpop.eup %5864  ;;  %v7588_v14 = vadd.f32 1e-08, %v2116_v24 }
 0x370   : > { %5626 = vmatmul.msk.f32.gmra.mxu3 %vm1048_vm0, %v926_v61  ;;  %v2376_v1 = vmul.f32 %v5863_v39, %v2375_v45  ;;  %v2384_v26 = vmul.f32 %v5865_v57, %v7563_v51 }
 0x371   : > { %v7593_v33 = vpop.f32.mrf.mxu0  ;;  %5866 = vrsqrt.f32 %v7588_v14  ;;  %vm2402_vm13 = vcmp.eq.f32.partialorder %v7588_v14, inf  ;;  %vm2404_vm14 = vcmp.eq.f32.partialorder %v7588_v14, 0.0 }
 0x372   : > { %10467 = vst [vmem:[#allocation162_spill] sm:$0xff] %v7593_v33  ;;  %v2029_v6 = vmul.f32 %v7593_v33, %v7593_v33  ;;  %v2377_v38 = vmul.f32 %v2376_v1, %v7535_v42  ;;  %v2385_v62 = vmul.f32 %v5865_v57, %v2384_v26  ;;  %v927_v1 = vld [vmem:[%s7299_s23 + $0x58] sm:$0xff]  ;;  %v2123_v33 = vsel %vm1048_vm0, %v1998_v54, 0.0 }
 0x373   : > { %v7602_v39 = vpop.f32.mrf.mxu3  ;;  %v1999_v54 = vmul.f32 %v6918_v44, %v6918_v44 }
 0x374   : > { %v2120_v24 = vsel %vm1048_vm0, %v2029_v6, 0.0  ;;  %v2379_v0 = vsel %vm2378_vm9, %v7535_v42, %v2377_v38  ;;  %v2386_v61 = vmul.f32 0.5, %v2385_v62  ;;  %v2122_v62 = vsel %vm1048_vm0, %v1966_v49, 0.0 }
 0x375   : > { %v2121_v28 = vadd.f32 %v2120_v24, %v2119_v23  ;;  %v2382_v45 = vsel %vm2380_vm10, %v2381_v9, %v2379_v0  ;;  %v2124_v0 = vadd.f32 %v2123_v33, %v2122_v62  ;;  %v1967_v33 = vmul.f32 %v6676_v40, %v6676_v40 }
 0x376   : > { %5595 = vmatmul.msk.f32.gmra.mxu2 %vm1048_vm0, %v2382_v45  ;;  %v2387_v26 = vsub.f32 1.5, %v2386_v61  ;;  %v2393_v61 = vand.u32 2147483648, %v7563_v51 }
 0x377   : > { %v5867_v8 = vpop.eup %5866  ;;  %v7613_v17 = vadd.f32 1e-08, %v2121_v28 }
 0x378   : > { %5627 = vmatmul.msk.f32.gmra.mxu3 %vm1048_vm0, %v927_v1  ;;  %v2388_v6 = vmul.f32 %v5865_v57, %v2387_v26  ;;  %v2396_v42 = vmul.f32 %v5867_v8, %v7588_v14 }
 0x379   : > { %v7618_v38 = vpop.f32.mrf.mxu0  ;;  %5868 = vrsqrt.f32 %v7613_v17  ;;  %vm2414_vm15 = vcmp.eq.f32.partialorder %v7613_v17, inf  ;;  %vm2416_vm1 = vcmp.eq.f32.partialorder %v7613_v17, 0.0 }
 0x37a   : > { %10468 = vst [vmem:[#allocation163_spill] sm:$0xff] %v7618_v38  ;;  %v2030_v23 = vmul.f32 %v7618_v38, %v7618_v38  ;;  %v2389_v9 = vmul.f32 %v2388_v6, %v7563_v51  ;;  %v2397_v24 = vmul.f32 %v5867_v8, %v2396_v42  ;;  %v928_v6 = vld [vmem:[%s7299_s23 + $0x60] sm:$0xff]  ;;  %v2128_v38 = vsel %vm1048_vm0, %v1999_v54, 0.0 }
 0x37b   : > { %v7627_v57 = vpop.f32.mrf.mxu3  ;;  %v2000_v54 = vmul.f32 %v6925_v53, %v6925_v53 }
 0x37c   : > { %v2125_v28 = vsel %vm1048_vm0, %v2030_v23, 0.0  ;;  %v2391_v45 = vsel %vm2390_vm11, %v7563_v51, %v2389_v9  ;;  %v2398_v1 = vmul.f32 0.5, %v2397_v24  ;;  %v2127_v24 = vsel %vm1048_vm0, %v1967_v33, 0.0 }
 0x37d   : > { %v2126_v49 = vadd.f32 %v2125_v28, %v2124_v0  ;;  %v2394_v26 = vsel %vm2392_vm12, %v2393_v61, %v2391_v45  ;;  %v2129_v45 = vadd.f32 %v2128_v38, %v2127_v24  ;;  %v1968_v38 = vmul.f32 %v6683_v43, %v6683_v43 }
 0x37e   : > { %5596 = vmatmul.msk.f32.gmra.mxu2 %vm1048_vm0, %v2394_v26  ;;  %v2399_v42 = vsub.f32 1.5, %v2398_v1  ;;  %v2405_v1 = vand.u32 2147483648, %v7588_v14 }
 0x37f   : > { %v5869_v62 = vpop.eup %5868  ;;  %v7638_v44 = vadd.f32 1e-08, %v2126_v49 }
 0x380   : > { %5628 = vmatmul.msk.f32.gmra.mxu3 %vm1048_vm0, %v928_v6  ;;  %v2400_v23 = vmul.f32 %v5867_v8, %v2399_v42  ;;  %v2408_v51 = vmul.f32 %v5869_v62, %v7613_v17 }
 0x381   : > { %v7643_v9 = vpop.f32.mrf.mxu0  ;;  %5870 = vrsqrt.f32 %v7638_v44  ;;  %vm2426_vm2 = vcmp.eq.f32.partialorder %v7638_v44, inf  ;;  %vm2428_vm3 = vcmp.eq.f32.partialorder %v7638_v44, 0.0 }
 0x382   : > { %10469 = vst [vmem:[#allocation164_spill] sm:$0xff] %v7643_v9  ;;  %v2031_v0 = vmul.f32 %v7643_v9, %v7643_v9  ;;  %v2401_v61 = vmul.f32 %v2400_v23, %v7588_v14  ;;  %v2409_v28 = vmul.f32 %v5869_v62, %v2408_v51  ;;  %v929_v23 = vld [vmem:[%s7299_s23 + $0x68] sm:$0xff]  ;;  %v2133_v9 = vsel %vm1048_vm0, %v2000_v54, 0.0 }
 0x383   : > { %v7652_v8 = vpop.f32.mrf.mxu3  ;;  %v2001_v54 = vmul.f32 %v6930_v32, %v6930_v32 }
 0x384   : > { %v2130_v49 = vsel %vm1048_vm0, %v2031_v0, 0.0  ;;  %v2403_v26 = vsel %vm2402_vm13, %v7588_v14, %v2401_v61  ;;  %v2410_v6 = vmul.f32 0.5, %v2409_v28  ;;  %v2132_v28 = vsel %vm1048_vm0, %v1968_v38, 0.0 }
 0x385   : > { %v2131_v33 = vadd.f32 %v2130_v49, %v2129_v45  ;;  %v2406_v42 = vsel %vm2404_vm14, %v2405_v1, %v2403_v26  ;;  %v2134_v26 = vadd.f32 %v2133_v9, %v2132_v28  ;;  %v1969_v9 = vmul.f32 %v6690_v46, %v6690_v46 }
 0x386   : > { %5597 = vmatmul.msk.f32.gmra.mxu2 %vm1048_vm0, %v2406_v42  ;;  %v2411_v51 = vsub.f32 1.5, %v2410_v6  ;;  %v2417_v6 = vand.u32 2147483648, %v7613_v17 }
 0x387   : > { %v5871_v24 = vpop.eup %5870  ;;  %v7663_v53 = vadd.f32 1e-08, %v2131_v33 }
 0x388   : > { %5629 = vmatmul.msk.f32.gmra.mxu3 %vm1048_vm0, %v929_v23  ;;  %v2412_v0 = vmul.f32 %v5869_v62, %v2411_v51  ;;  %v2420_v14 = vmul.f32 %v5871_v24, %v7638_v44 }
 0x389   : > { %v7668_v61 = vpop.f32.mrf.mxu0  ;;  %5872 = vrsqrt.f32 %v7663_v53  ;;  %vm2438_vm4 = vcmp.eq.f32.partialorder %v7663_v53, inf  ;;  %vm2440_vm5 = vcmp.eq.f32.partialorder %v7663_v53, 0.0 }
 0x38a   : > { %10470 = vst [vmem:[#allocation165_spill] sm:$0xff] %v7668_v61  ;;  %v2032_v45 = vmul.f32 %v7668_v61, %v7668_v61  ;;  %v2413_v1 = vmul.f32 %v2412_v0, %v7613_v17  ;;  %v2421_v49 = vmul.f32 %v5871_v24, %v2420_v14  ;;  %v930_v0 = vld [vmem:[%s7299_s23 + $0x70] sm:$0xff]  ;;  %v2138_v61 = vsel %vm1048_vm0, %v2001_v54, 0.0 }
 0x38b   : > { %v7677_v62 = vpop.f32.mrf.mxu3  ;;  %v10472_v54 = vld [vmem:[#allocation102_spill] sm:$0xff] }
 0x38c   : > { %v2135_v33 = vsel %vm1048_vm0, %v2032_v45, 0.0  ;;  %v2415_v42 = vsel %vm2414_vm15, %v7613_v17, %v2413_v1  ;;  %v2422_v23 = vmul.f32 0.5, %v2421_v49  ;;  %v2137_v49 = vsel %vm1048_vm0, %v1969_v9, 0.0 }
 0x38d   : > { %v2136_v38 = vadd.f32 %v2135_v33, %v2134_v26  ;;  %v2418_v51 = vsel %vm2416_vm1, %v2417_v6, %v2415_v42  ;;  %v2139_v42 = vadd.f32 %v2138_v61, %v2137_v49  ;;  %v10473_v61 = vld [vmem:[#allocation42_spill] sm:$0xff] }
 0x38e   : > { %5598 = vmatmul.msk.f32.gmra.mxu2 %vm1048_vm0, %v2418_v51  ;;  %v2423_v14 = vsub.f32 1.5, %v2422_v23  ;;  %v2002_v23 = vmul.f32 %v10472_v54, %v10472_v54  ;;  %v1970_v49 = vmul.f32 %v10473_v61, %v10473_v61 }
 0x38f   : > { %v5873_v28 = vpop.eup %5872  ;;  %v7688_v32 = vadd.f32 1e-08, %v2136_v38  ;;  %v2429_v38 = vand.u32 2147483648, %v7638_v44 }
 0x390   : > { %5630 = vmatmul.msk.f32.gmra.mxu3 %vm1048_vm0, %v930_v0  ;;  %v2424_v45 = vmul.f32 %v5871_v24, %v2423_v14  ;;  %v2432_v17 = vmul.f32 %v5873_v28, %v7663_v53  ;;  %v2143_v43 = vsel %vm1048_vm0, %v2002_v23, 0.0  ;;  %v10475_v23 = vld [vmem:[#allocation104_spill] sm:$0xff] }
 0x391   : > { %v7693_v1 = vpop.f32.mrf.mxu0  ;;  %5874 = vrsqrt.f32 %v7688_v32  ;;  %vm2450_vm6 = vcmp.eq.f32.partialorder %v7688_v32, inf  ;;  %vm2452_vm7 = vcmp.eq.f32.partialorder %v7688_v32, 0.0 }
 0x392   : > { %10471 = vst [vmem:[#allocation166_spill] sm:$0xff] %v7693_v1  ;;  %v2033_v26 = vmul.f32 %v7693_v1, %v7693_v1  ;;  %v2425_v6 = vmul.f32 %v2424_v45, %v7638_v44  ;;  %v2433_v33 = vmul.f32 %v5873_v28, %v2432_v17  ;;  %v931_v17 = vld [vmem:[%s7299_s23 + $0x78] sm:$0xff] }
 0x393   : > { %v7702_v24 = vpop.f32.mrf.mxu3 }
 0x394   : > { %v2140_v51 = vsel %vm1048_vm0, %v2033_v26, 0.0  ;;  %v2427_v0 = vsel %vm2426_vm2, %v7638_v44, %v2425_v6  ;;  %v2434_v9 = vmul.f32 0.5, %v2433_v33  ;;  %v2142_v33 = vsel %vm1048_vm0, %v1970_v49, 0.0 }
 0x395   : > { %v2141_v14 = vadd.f32 %v2140_v51, %v2139_v42  ;;  %v2430_v45 = vsel %vm2428_vm3, %v2429_v38, %v2427_v0  ;;  %v2144_v0 = vadd.f32 %v2143_v43, %v2142_v33  ;;  %v10476_v43 = vld [vmem:[#allocation44_spill] sm:$0xff] }
 0x396   : > { %5599 = vmatmul.msk.f32.gmra.mxu2 %vm1048_vm0, %v2430_v45  ;;  %v2435_v54 = vsub.f32 1.5, %v2434_v9  ;;  %v2003_v9 = vmul.f32 %v10475_v23, %v10475_v23  ;;  %v1971_v33 = vmul.f32 %v10476_v43, %v10476_v43  ;;  %v933_v43 = vld [vmem:[%s7299_s23 + $0x88] sm:$0xff] }
 0x397   : > { %v5875_v1 = vpop.eup %5874  ;;  %v7713_v46 = vadd.f32 1e-08, %v2141_v14 }
 0x398   : > { %5631 = vmatmul.msk.f32.gmra.mxu3 %vm1048_vm0, %v931_v17  ;;  %v2436_v26 = vmul.f32 %v5873_v28, %v2435_v54  ;;  %v2444_v44 = vmul.f32 %v5875_v1, %v7688_v32  ;;  %v2441_v54 = vand.u32 2147483648, %v7663_v53  ;;  %v2148_v40 = vsel %vm1048_vm0, %v2003_v9, 0.0 }
 0x399   : > { %v7718_v6 = vpop.f32.mrf.mxu0  ;;  %5876 = vrsqrt.f32 %v7713_v46  ;;  %vm2462_vm8 = vcmp.eq.f32.partialorder %v7713_v46, inf  ;;  %vm2464_vm9 = vcmp.eq.f32.partialorder %v7713_v46, 0.0 }
 0x39a   : > { %10474 = vst [vmem:[#allocation167_spill] sm:$0xff] %v7718_v6  ;;  %v2034_v42 = vmul.f32 %v7718_v6, %v7718_v6  ;;  %v2437_v38 = vmul.f32 %v2436_v26, %v7663_v53  ;;  %v2445_v51 = vmul.f32 %v5875_v1, %v2444_v44  ;;  %v932_v44 = vld [vmem:[%s7299_s23 + $0x80] sm:$0xff] }
 0x39b   : > { %v7727_v28 = vpop.f32.mrf.mxu3 }
 0x39c   : > { %v2145_v14 = vsel %vm1048_vm0, %v2034_v42, 0.0  ;;  %v2439_v45 = vsel %vm2438_vm4, %v7663_v53, %v2437_v38  ;;  %v2446_v17 = vmul.f32 0.5, %v2445_v51  ;;  %v2147_v51 = vsel %vm1048_vm0, %v1971_v33, 0.0 }
 0x39d   : > { %v2146_v49 = vadd.f32 %v2145_v14, %v2144_v0  ;;  %v2442_v26 = vsel %vm2440_vm5, %v2441_v54, %v2439_v45  ;;  %v2149_v9 = vadd.f32 %v2148_v40, %v2147_v51 }
 0x39e   : > { %5600 = vmatmul.msk.f32.gmra.mxu2 %vm1048_vm0, %v2442_v26  ;;  %v2447_v23 = vsub.f32 1.5, %v2446_v17 }
 0x39f   : > { %v5877_v6 = vpop.eup %5876  ;;  %v7738_v61 = vadd.f32 1e-08, %v2146_v49 }
 0x3a0   : > { %5632 = vmatmul.msk.f32.gmra.mxu3 %vm1048_vm0, %v932_v44  ;;  %v2448_v42 = vmul.f32 %v5875_v1, %v2447_v23  ;;  %v2456_v53 = vmul.f32 %v5877_v6, %v7713_v46  ;;  %v2453_v1 = vand.u32 2147483648, %v7688_v32  ;;  %v10478_v23 = vld [vmem:[#allocation106_spill] sm:$0xff] }
 0x3a1   : > { %v7743_v38 = vpop.f32.mrf.mxu0  ;;  %5878 = vrsqrt.f32 %v7738_v61  ;;  %v2744_v54 = vpop.f32.mrf.mxu2  ;;  %v2004_v49 = vmul.f32 %v10478_v23, %v10478_v23  ;;  %vm2474_vm10 = vcmp.eq.f32.partialorder %v7738_v61, inf  ;;  %vm2476_vm11 = vcmp.eq.f32.partialorder %v7738_v61, 0.0 }
 0x3a2   : > { %10477 = vst [vmem:[#allocation168_spill] sm:$0xff] %v7743_v38  ;;  %v2035_v0 = vmul.f32 %v7743_v38, %v7743_v38  ;;  %v2449_v14 = vmul.f32 %v2448_v42, %v7688_v32  ;;  %v2457_v45 = vmul.f32 %v5877_v6, %v2456_v53  ;;  %v10479_v53 = vld [vmem:[#allocation46_spill] sm:$0xff] }
 0x3a3   : > { %v2953_v17 = vpop.f32.mrf.mxu3  ;;  %v1972_v40 = vmul.f32 %v10479_v53, %v10479_v53  ;;  %v2153_v23 = vsel %vm1048_vm0, %v2004_v49, 0.0 }
 0x3a4   : > { %v2150_v26 = vsel %vm1048_vm0, %v2035_v0, 0.0  ;;  %v2451_v44 = vsel %vm2450_vm6, %v7688_v32, %v2449_v14  ;;  %v2458_v42 = vmul.f32 0.5, %v2457_v45 }
 0x3a5   : > { %v2151_v33 = vadd.f32 %v2150_v26, %v2149_v9  ;;  %v2454_v38 = vsel %vm2452_vm7, %v2453_v1, %v2451_v44  ;;  %v2152_v45 = vsel %vm1048_vm0, %v1972_v40, 0.0  ;;  %v10481_v44 = vld [vmem:[#allocation109_spill] sm:$0xff]  ;;  %v2465_v40 = vand.u32 2147483648, %v7713_v46 }
 0x3a6   : > { %5601 = vmatmul.msk.f32.gmra.mxu2 %vm1048_vm0, %v2454_v38  ;;  %v2459_v34 = vsub.f32 1.5, %v2458_v42  ;;  %v2154_v26 = vadd.f32 %v2153_v23, %v2152_v45  ;;  %v2005_v49 = vmul.f32 %v10481_v44, %v10481_v44  ;;  %v3725_v23 = vld [vmem:[%s10104_s7] sm:$0xff] }
 0x3a7   : > { %v5879_v51 = vpop.eup %5878  ;;  %v7761_v37 = vadd.f32 1e-08, %v2151_v33  ;;  %v10482_v45 = vld [vmem:[#allocation48_spill] sm:$0xff]  ;;  %3844 = vmatpush.msrb.mxu2 %v3725_v23 }
 0x3a8   : > { %5633 = vmatmul.msk.f32.gmra.mxu3 %vm1048_vm0, %v933_v43  ;;  %v2468_v0 = vmul.f32 %v5879_v51, %v7738_v61  ;;  %v2460_v14 = vmul.f32 %v5877_v6, %v2459_v34  ;;  %v2954_v34 = vadd.f32 %v2953_v17, %v2744_v54  ;;  %v7779_v6 = vld [vmem:[%s10103_s6] ss:$0 sm:$0xff]  ;;  %v934_v17 = vld [vmem:[%s7299_s23 + $0x90] sm:$0xff]  ;;  %v2158_v31 = vsel %vm1048_vm0, %v2005_v49, 0.0 }
 0x3a9   : > { %v7766_v32 = vpop.f32.mrf.mxu0  ;;  %5880 = vrsqrt.f32 %v7761_v37  ;;  %v2747_v9 = vpop.f32.mrf.mxu2  ;;  %vm2486_vm12 = vcmp.eq.f32.partialorder %v7761_v37, inf  ;;  %vm2488_vm13 = vcmp.eq.f32.partialorder %v7761_v37, 0.0 }
 0x3aa   : > { %10480 = vst [vmem:[#allocation169_spill] sm:$0xff] %v7766_v32  ;;  %v2036_v38 = vmul.f32 %v7766_v32, %v7766_v32  ;;  %v2469_v1 = vmul.f32 %v5879_v51, %v2468_v0  ;;  %v2461_v33 = vmul.f32 %v2460_v14, %v7713_v46  ;;  %v1973_v14 = vmul.f32 %v10482_v45, %v10482_v45 }
 0x3ab   : > { %v2956_v43 = vpop.f32.mrf.mxu3 }
 0x3ac   : > { %v2155_v42 = vsel %vm1048_vm0, %v2036_v38, 0.0  ;;  %v2470_v0 = vmul.f32 0.5, %v2469_v1  ;;  %v2463_v54 = vsel %vm2462_vm8, %v7713_v46, %v2461_v33  ;;  %v7796_v1 = vadd.f32 %v7779_v6, %v2954_v34 }
 0x3ad   : > { %v2156_v44 = vadd.f32 %v2155_v42, %v2154_v26  ;;  %v2466_v32 = vsel %vm2464_vm9, %v2465_v40, %v2463_v54  ;;  %v2157_v33 = vsel %vm1048_vm0, %v1973_v14, 0.0  ;;  %v10484_v40 = vld [vmem:[#allocation110_spill] sm:$0xff] }
 0x3ae   : > { %v2471_v53 = vsub.f32 1.5, %v2470_v0  ;;  %5602 = vmatmul.msk.f32.gmra.mxu2 %vm1048_vm0, %v2466_v32  ;;  %v2159_v42 = vadd.f32 %v2158_v31, %v2157_v33  ;;  %v2006_v23 = vmul.f32 %v10484_v40, %v10484_v40  ;;  %v5648_v31 = vmul.f32 -1.442695, %v7796_v1  ;;  %v935_v33 = vld [vmem:[%s7299_s23 + $0x98] sm:$0xff] }
 0x3af   : > { %v5881_v38 = vpop.eup %5880  ;;  %v7792_v52 = vadd.f32 1e-08, %v2156_v44  ;;  %v2957_v0 = vadd.f32 %v2956_v43, %v2747_v9 }
 0x3b0   : > { %5634 = vmatmul.msk.f32.gmra.mxu3 %vm1048_vm0, %v934_v17  ;;  %v2472_v26 = vmul.f32 %v5879_v51, %v2471_v53  ;;  %v2480_v34 = vmul.f32 %v5881_v38, %v7761_v37  ;;  %v2477_v51 = vand.u32 2147483648, %v7738_v61  ;;  %v2163_v19 = vsel %vm1048_vm0, %v2006_v23, 0.0 }
 0x3b1   : > { %v7800_v46 = vpop.f32.mrf.mxu0  ;;  %5882 = vrsqrt.f32 %v7792_v52  ;;  %v2750_v49 = vpop.f32.mrf.mxu2  ;;  %v7823_v9 = vadd.f32 %v7779_v6, %v2957_v0  ;;  %vm2498_vm14 = vcmp.eq.f32.partialorder %v7792_v52, inf  ;;  %vm2500_vm15 = vcmp.eq.f32.partialorder %v7792_v52, 0.0 }
 0x3b2   : > { %10483 = vst [vmem:[#allocation170_spill] sm:$0xff] %v7800_v46  ;;  %v2037_v44 = vmul.f32 %v7800_v46, %v7800_v46  ;;  %v2473_v32 = vmul.f32 %v2472_v26, %v7738_v61  ;;  %v10485_v46 = vld [vmem:[#allocation50_spill] sm:$0xff]  ;;  %v2481_v45 = vmul.f32 %v5881_v38, %v2480_v34  ;;  %5884 = vpow2.f32 %v5648_v31 }
 0x3b3   : > { %v2959_v53 = vpop.f32.mrf.mxu3  ;;  %v1974_v40 = vmul.f32 %v10485_v46, %v10485_v46  ;;  %v5649_v31 = vmul.f32 -1.442695, %v7823_v9 }
 0x3b4   : > { %v2160_v14 = vsel %vm1048_vm0, %v2037_v44, 0.0  ;;  %v2475_v54 = vsel %vm2474_vm10, %v7738_v61, %v2473_v32  ;;  %v2482_v43 = vmul.f32 0.5, %v2481_v45  ;;  %v936_v45 = vld [vmem:[%s7299_s23 + $0xa0] sm:$0xff] }
 0x3b5   : > { %v2161_v17 = vadd.f32 %v2160_v14, %v2159_v42  ;;  %v2478_v26 = vsel %vm2476_vm11, %v2477_v51, %v2475_v54  ;;  %v2162_v42 = vsel %vm1048_vm0, %v1974_v40, 0.0  ;;  %v2960_v14 = vadd.f32 %v2959_v53, %v2750_v49 }
 0x3b6   : > { %5603 = vmatmul.msk.f32.gmra.mxu2 %vm1048_vm0, %v2478_v26  ;;  %v2164_v23 = vadd.f32 %v2163_v19, %v2162_v42 }
 0x3b7   : > { %v5883_v25 = vpop.eup %5882  ;;  %v7818_v22 = vadd.f32 1e-08, %v2161_v17  ;;  %v2483_v17 = vsub.f32 1.5, %v2482_v43  ;;  %v7840_v19 = vadd.f32 %v7779_v6, %v2960_v14 }
 0x3b8   : > { %5635 = vmatmul.msk.f32.gmra.mxu3 %vm1048_vm0, %v935_v33  ;;  %v2492_v34 = vmul.f32 %v5883_v25, %v7792_v52  ;;  %v5885_v26 = vpop.eup %5884 }
 0x3b9   : > { %v7826_v61 = vpop.f32.mrf.mxu0  ;;  %5886 = vrsqrt.f32 %v7818_v22  ;;  %v2753_v32 = vpop.f32.mrf.mxu2  ;;  %v2484_v16 = vmul.f32 %v5881_v38, %v2483_v17  ;;  %v7844_v49 = vadd.f32 1.0, %v5885_v26  ;;  %v2489_v38 = vand.u32 2147483648, %v7761_v37 }
 0x3ba   : > { %10486 = vst [vmem:[#allocation171_spill] sm:$0xff] %v7826_v61  ;;  %v2038_v44 = vmul.f32 %v7826_v61, %v7826_v61  ;;  %v2493_v33 = vmul.f32 %v5883_v25, %v2492_v34  ;;  %5888 = vpow2.f32 %v5649_v31  ;;  %v5650_v31 = vmul.f32 -1.442695, %v7840_v19 }
 0x3bb   : > { %v2962_v51 = vpop.f32.mrf.mxu3  ;;  %v2485_v42 = vmul.f32 %v2484_v16, %v7761_v37  ;;  %vm2510_vm1 = vcmp.eq.f32.partialorder %v7818_v22, inf  ;;  %vm2512_vm2 = vcmp.eq.f32.partialorder %v7818_v22, 0.0  ;;  %vm3218_vm6 = vweird.f32 %v7844_v49 }
 0x3bc   : > { %v2165_v0 = vsel %vm1048_vm0, %v2038_v44, 0.0  ;;  %v2494_v44 = vmul.f32 0.5, %v2493_v33  ;;  %v2963_v16 = vadd.f32 %v2962_v51, %v2753_v32 }
 0x3bd   : > { %v2166_v54 = vadd.f32 %v2165_v0, %v2164_v23  ;;  %v2487_v23 = vsel %vm2486_vm12, %v7761_v37, %v2485_v42 }
 0x3be   : > { %v2490_v0 = vsel %vm2488_vm13, %v2489_v38, %v2487_v23  ;;  %v2495_v14 = vsub.f32 1.5, %v2494_v44  ;;  %v7857_v37 = vadd.f32 %v7779_v6, %v2963_v16 }
 0x3bf   : > { %v5887_v46 = vpop.eup %5886  ;;  %v7836_v40 = vadd.f32 1e-08, %v2166_v54  ;;  %v937_v54 = vld [vmem:[%s7299_s23 + $0xa8] sm:$0xff]  ;;  %5604 = vmatmul.msk.f32.gmra.mxu2 %vm1048_vm0, %v2490_v0 }
 0x3c0   : > { %5636 = vmatmul.msk.f32.gmra.mxu3 %vm1048_vm0, %v936_v45  ;;  %v2504_v43 = vmul.f32 %v5887_v46, %v7818_v22  ;;  %v5889_v17 = vpop.eup %5888  ;;  %v2496_v33 = vmul.f32 %v5883_v25, %v2495_v14  ;;  %v2501_v25 = vand.u32 2147483648, %v7792_v52 }
 0x3c1   : > { %5890 = vrsqrt.f32 %v7836_v40  ;;  %v2756_v53 = vpop.f32.mrf.mxu2  ;;  %v7860_v51 = vadd.f32 1.0, %v5889_v17  ;;  %vm2522_vm3 = vcmp.eq.f32.partialorder %v7836_v40, inf  ;;  %vm2524_vm5 = vcmp.eq.f32.partialorder %v7836_v40, 0.0 }
 0x3c2   : > { %5892 = vrcp.f32 %v7844_v49  ;;  %v2505_v45 = vmul.f32 %v5887_v46, %v2504_v43  ;;  %v2497_v32 = vmul.f32 %v2496_v33, %v7792_v52 }
 0x3c3   : > { %v2965_v34 = vpop.f32.mrf.mxu3  ;;  %5894 = vpow2.f32 %v5650_v31  ;;  %v5651_v31 = vmul.f32 -1.442695, %v7857_v37  ;;  %vm3233_vm10 = vweird.f32 %v7860_v51 }
 0x3c4   : > { %v2506_v61 = vmul.f32 0.5, %v2505_v45  ;;  %v2966_v16 = vadd.f32 %v2965_v34, %v2756_v53  ;;  %v2499_v0 = vsel %vm2498_vm14, %v7792_v52, %v2497_v32  ;;  %5896 = vrcp.f32 %v7860_v51 }
 0x3c5   : > { %5898 = vpow2.f32 %v5651_v31  ;;  %v2513_v32 = vand.u32 2147483648, %v7818_v22 }
 0x3c6   : > { %v2507_v44 = vsub.f32 1.5, %v2506_v61  ;;  %v2502_v61 = vsel %vm2500_vm15, %v2501_v25, %v2499_v0 }
 0x3c7   : > { %v5891_v26 = vpop.eup %5890  ;;  %5605 = vmatmul.msk.f32.gmra.mxu2 %vm1048_vm0, %v2502_v61 }
 0x3c8   : > { %5637 = vmatmul.msk.f32.gmra.mxu3 %vm1048_vm0, %v937_v54  ;;  %v2516_v38 = vmul.f32 %v5891_v26, %v7836_v40  ;;  %v7863_v43 = vpop.eup %5892  ;;  %v2508_v14 = vmul.f32 %v5887_v46, %v2507_v44  ;;  %v938_v54 = vld [vmem:[%s7299_s23 + $0xb0] sm:$0xff]  ;;  %v7879_v46 = vadd.f32 %v7779_v6, %v2966_v16  ;;  %v939_v16 = vld [vmem:[%s7299_s23 + $0xb8] sm:$0xff] }
 0x3c9   : > { %v2759_v42 = vpop.f32.mrf.mxu2  ;;  %v5895_v45 = vpop.eup %5894  ;;  %v3214_v33 = vmul.f32 %v7863_v43, %v7844_v49  ;;  %vm3219_vm4 = vweird.f32 %v7863_v43 }
 0x3ca   : > { %v2517_v17 = vmul.f32 %v5891_v26, %v2516_v38  ;;  %v2509_v5 = vmul.f32 %v2508_v14, %v7818_v22  ;;  %v7882_v34 = vadd.f32 1.0, %v5895_v45  ;;  %v7886_v14 = vpop.eup %5896  ;;  %v5652_v31 = vmul.f32 -1.442695, %v7879_v46  ;;  %vm7915_vm7 = vmor %vm3218_vm6, %vm3219_vm4 }
 0x3cb   : > { %v2968_v23 = vpop.f32.mrf.mxu3  ;;  %v3215_v38 = vsub.f32 1.0, %v3214_v33  ;;  %v3229_v33 = vmul.f32 %v7886_v14, %v7860_v51  ;;  %vm3234_vm9 = vweird.f32 %v7886_v14 }
 0x3cc   : > { %v2518_v52 = vmul.f32 0.5, %v2517_v17  ;;  %v2511_v53 = vsel %vm2510_vm1, %v7818_v22, %v2509_v5  ;;  %v2969_v61 = vadd.f32 %v2968_v23, %v2759_v42  ;;  %5900 = vrcp.f32 %v7882_v34  ;;  %v5899_v17 = vpop.eup %5898  ;;  %vm3235_vm11 = vmor %vm3233_vm10, %vm3234_vm9 }
 0x3cd   : > { %v3216_v45 = vmul.f32 %v7863_v43, %v3215_v38  ;;  %5902 = vpow2.f32 %v5652_v31  ;;  %v7901_v42 = vadd.f32 1.0, %v5899_v17  ;;  %v2525_v23 = vand.u32 2147483648, %v7836_v40 }
 0x3ce   : > { %v2519_v0 = vsub.f32 1.5, %v2518_v52  ;;  %v7898_v52 = vadd.f32 %v7779_v6, %v2969_v61  ;;  %v3230_v38 = vsub.f32 1.0, %v3229_v33  ;;  %v3224_v31 = vand.u32 2147483648, %v7844_v49  ;;  %v4066_v33 = vld [vmem:[%s10106_s9 + $0x18] sm:$0xff] }
 0x3cf   : > { %5904 = vrcp.f32 %v7901_v42  ;;  %4083 = vmatpush.msra.mxu2 %v4066_v33  ;;  %vm3248_vm14 = vweird.f32 %v7882_v34 }
 0x3d0   : > { %5638 = vmatmul.msk.f32.gmra.mxu3 %vm1048_vm0, %v938_v54  ;;  %v2514_v54 = vsel %vm2512_vm2, %v2513_v32, %v2511_v53  ;;  %v2520_v5 = vmul.f32 %v5891_v26, %v2519_v0  ;;  %v3217_v32 = vadd.f32 %v7863_v43, %v3216_v45 }
 0x3d1   : > { %v2762_v44 = vpop.f32.mrf.mxu2  ;;  %5606 = vmatmul.msk.f32.gmra.mxu2 %vm1048_vm0, %v2514_v54 }
 0x3d2   : > { %v2521_v22 = vmul.f32 %v2520_v5, %v7836_v40  ;;  %v7908_v54 = vpop.eup %5900  ;;  %v5653_v5 = vmul.f32 -1.442695, %v7898_v52 }
 0x3d3   : > { %v2971_v25 = vpop.f32.mrf.mxu3  ;;  %vm3249_vm13 = vweird.f32 %v7908_v54 }
 0x3d4   : > { %v2523_v26 = vsel %vm2522_vm3, %v7836_v40, %v2521_v22  ;;  %v2972_v17 = vadd.f32 %v2971_v25, %v2762_v44  ;;  %v940_v22 = vld [vmem:[%s7299_s23 + $0xc0] sm:$0xff]  ;;  %v3945_v40 = vld [vmem:[%s10105_s8 + $0x18] sm:$0xff]  ;;  %v3231_v44 = vmul.f32 %v7886_v14, %v3230_v38  ;;  %v3244_v25 = vmul.f32 %v7908_v54, %v7882_v34  ;;  %vm3250_vm15 = vmor %vm3248_vm14, %vm3249_vm13 }
 0x3d5   : > { %v2526_v61 = vsel %vm2524_vm5, %v2525_v23, %v2523_v26  ;;  %v5903_v26 = vpop.eup %5902  ;;  %3962 = vmatpush.msra.mxu3 %v3945_v40  ;;  %v3225_v23 = vor.u32 1.1754944e-38, %v3224_v31  ;;  %5906 = vpow2.f32 %v5653_v5  ;;  %vm3263_vm3 = vweird.f32 %v7901_v42 }
 0x3d6   : > { %v7935_v13 = vadd.f32 %v7779_v6, %v2972_v17  ;;  %v3232_v38 = vadd.f32 %v7886_v14, %v3231_v44  ;;  %v7941_v31 = vpop.eup %5904  ;;  %v3237_v17 = vand.u32 2147483647, %v7860_v51 }
 0x3d7   : > { %vm3264_vm2 = vweird.f32 %v7941_v31 }
 0x3d8   : > { %5639 = vmatmul.msk.f32.gmra.mxu3 %vm1048_vm0, %v939_v16  ;;  %v3222_v16 = vand.u32 2147483647, %v7844_v49  ;;  %v3221_v49 = vsel %vm7915_vm7, %v7863_v43, %v3217_v32  ;;  %v7937_v43 = vadd.f32 1.0, %v5903_v26  ;;  %v941_v26 = vld [vmem:[%s7299_s23 + $0xc8] sm:$0xff]  ;;  %v3236_v44 = vsel %vm3235_vm11, %v7886_v14, %v3232_v38  ;;  %vm3265_vm4 = vmor %vm3263_vm3, %vm3264_vm2 }
 0x3d9   : > { %v2765_v53 = vpop.f32.mrf.mxu2  ;;  %5607 = vmatmul.msk.f32.gmra.mxu2 %vm1048_vm0, %v2526_v61  ;;  %v3245_v61 = vsub.f32 1.0, %v3244_v25  ;;  %vm3238_vm12 = vcmp.eq.f32.partialorder %v3237_v17, 8.507059e+37 }
 0x3da   : > { %vm3223_vm8 = vcmp.eq.f32.partialorder %v3222_v16, 8.507059e+37  ;;  %v3239_v16 = vand.u32 2147483648, %v7860_v51  ;;  %5908 = vrcp.f32 %v7937_v43  ;;  %vm3278_vm7 = vweird.f32 %v7937_v43 }
 0x3db   : > { %v2974_v0 = vpop.f32.mrf.mxu3  ;;  %v3226_v45 = vsel %vm3223_vm8, %v3225_v23, %v3221_v49  ;;  %v5907_v49 = vpop.eup %5906  ;;  %v3246_v25 = vmul.f32 %v7908_v54, %v3245_v61  ;;  %v3259_v23 = vmul.f32 %v7941_v31, %v7901_v42 }
 0x3dc   : > { %v7946_v5 = vmul.f32 %v3226_v45, %v7796_v1  ;;  %v2975_v33 = vadd.f32 %v2974_v0, %v2765_v53  ;;  %v3240_v1 = vor.u32 1.1754944e-38, %v3239_v16  ;;  %v7962_v0 = vadd.f32 1.0, %v5907_v49  ;;  %v942_v49 = vld [vmem:[%s7299_s23 + $0xd0] sm:$0xff] }
 0x3dd   : > { %v3247_v45 = vadd.f32 %v7908_v54, %v3246_v25  ;;  %v3260_v38 = vsub.f32 1.0, %v3259_v23  ;;  %v3254_v16 = vand.u32 2147483648, %v7882_v34 }
 0x3de   : > { %v7960_v51 = vadd.f32 %v7779_v6, %v2975_v33  ;;  %v3241_v53 = vsel %vm3238_vm12, %v3240_v1, %v3236_v44  ;;  %vm3293_vm11 = vweird.f32 %v7962_v0 }
 0x3df   : > { %v7971_v17 = vmul.f32 %v3241_v53, %v7823_v9  ;;  %v3251_v25 = vsel %vm3250_vm15, %v7908_v54, %v3247_v45  ;;  %v3261_v23 = vmul.f32 %v7941_v31, %v3260_v38  ;;  %v3255_v9 = vor.u32 1.1754944e-38, %v3254_v16 }
 0x3e0   : > { %5640 = vmatmul.msk.f32.gmra.mxu3 %vm1048_vm0, %v940_v22  ;;  %v5654_v22 = vmul.f32 -1.442695, %v7935_v13  ;;  %v7966_v29 = vpop.eup %5908  ;;  %v5655_v33 = vmul.f32 -1.442695, %v7960_v51  ;;  %v3269_v16 = vand.u32 2147483648, %v7901_v42 }
 0x3e1   : > { %v2768_v32 = vpop.f32.mrf.mxu2  ;;  %5680 = vmatmul.msk.f32.vlgmr.msrb.gmra.mxu2 %vm1048_vm0, %v7946_v5  ;;  %v3274_v1 = vmul.f32 %v7966_v29, %v7937_v43  ;;  %v3262_v53 = vadd.f32 %v7941_v31, %v3261_v23  ;;  %vm3279_vm6 = vweird.f32 %v7966_v29 }
 0x3e2   : > { %5910 = vpow2.f32 %v5654_v22  ;;  %v3252_v22 = vand.u32 2147483647, %v7882_v34  ;;  %vm3280_vm8 = vmor %vm3278_vm7, %vm3279_vm6 }
 0x3e3   : > { %v2977_v40 = vpop.f32.mrf.mxu3  ;;  %5912 = vrcp.f32 %v7962_v0  ;;  %v3275_v45 = vsub.f32 1.0, %v3274_v1  ;;  %v3266_v23 = vsel %vm3265_vm4, %v7941_v31, %v3262_v53 }
 0x3e4   : > { %vm3253_vm1 = vcmp.eq.f32.partialorder %v3252_v22, 8.507059e+37  ;;  %5914 = vpow2.f32 %v5655_v33  ;;  %v3267_v33 = vand.u32 2147483647, %v7901_v42 }
 0x3e5   : > { %v3276_v1 = vmul.f32 %v7966_v29, %v3275_v45 }
 0x3e6   : > { %vm3268_vm5 = vcmp.eq.f32.partialorder %v3267_v33, 8.507059e+37 }
 0x3e8   : > { %5641 = vmatmul.msk.f32.gmra.mxu3 %vm1048_vm0, %v941_v26  ;;  %v2978_v26 = vadd.f32 %v2977_v40, %v2768_v32  ;;  %v5911_v44 = vpop.eup %5910  ;;  %v3256_v32 = vsel %vm3253_vm1, %v3255_v9, %v3251_v25 }
 0x3e9   : > { %v2771_v14 = vpop.f32.mrf.mxu2  ;;  %5681 = vmatmul.msk.f32.gmra.mxu2 %vm1048_vm0, %v7971_v17  ;;  %v7987_v40 = vadd.f32 1.0, %v5911_v44  ;;  %v7991_v10 = vpop.eup %5912  ;;  %v7996_v22 = vmul.f32 %v3256_v32, %v7840_v19  ;;  %v943_v44 = vld [vmem:[%s7299_s23 + $0xd8] sm:$0xff]  ;;  %v3270_v19 = vor.u32 1.1754944e-38, %v3269_v16  ;;  %v3277_v32 = vadd.f32 %v7966_v29, %v3276_v1 }
 0x3ea   : > { %v7985_v34 = vadd.f32 %v7779_v6, %v2978_v26  ;;  %v5915_v25 = vpop.eup %5914  ;;  %v3289_v9 = vmul.f32 %v7991_v10, %v7962_v0  ;;  %v3284_v16 = vand.u32 2147483648, %v7937_v43  ;;  %vm3294_vm10 = vweird.f32 %v7991_v10 }
 0x3eb   : > { %v2980_v61 = vpop.f32.mrf.mxu3  ;;  %5916 = vrcp.f32 %v7987_v40  ;;  %v3281_v1 = vsel %vm3280_vm8, %v7966_v29, %v3277_v32  ;;  %vm8057_vm12 = vmor %vm3293_vm11, %vm3294_vm10  ;;  %vm3308_vm15 = vweird.f32 %v7987_v40 }
 0x3ec   : > { %v5656_v26 = vmul.f32 -1.442695, %v7985_v34  ;;  %v3290_v53 = vsub.f32 1.0, %v3289_v9 }
 0x3ee   : > { %5918 = vpow2.f32 %v5656_v26  ;;  %v3282_v26 = vand.u32 2147483647, %v7937_v43  ;;  %v3291_v9 = vmul.f32 %v7991_v10, %v3290_v53 }
 0x3f0   : > { %5642 = vmatmul.msk.f32.gmra.mxu3 %vm1048_vm0, %v942_v49  ;;  %v2981_v49 = vadd.f32 %v2980_v61, %v2771_v14  ;;  %v3271_v14 = vsel %vm3268_vm5, %v3270_v19, %v3266_v23  ;;  %v8012_v61 = vadd.f32 1.0, %v5915_v25  ;;  %v944_v25 = vld [vmem:[%s7299_s23 + $0xe0] sm:$0xff]  ;;  %vm3283_vm9 = vcmp.eq.f32.partialorder %v3282_v26, 8.507059e+37 }
 0x3f1   : > { %v2774_v54 = vpop.f32.mrf.mxu2  ;;  %5682 = vmatmul.msk.f32.gmra.mxu2 %vm1048_vm0, %v7996_v22  ;;  %v8016_v36 = vpop.eup %5916  ;;  %v8021_v33 = vmul.f32 %v3271_v14, %v7857_v37  ;;  %v3285_v37 = vor.u32 1.1754944e-38, %v3284_v16  ;;  %v3292_v14 = vadd.f32 %v7991_v10, %v3291_v9  ;;  %v3944_v16 = vld [vmem:[%s10105_s8 + $0x10] sm:$0xff]  ;;  %v945_v9 = vld [vmem:[%s7299_s23 + $0xe8] sm:$0xff] }
 0x3f2   : > { %v8010_v42 = vadd.f32 %v7779_v6, %v2981_v49  ;;  %5920 = vrcp.f32 %v8012_v61  ;;  %v3304_v19 = vmul.f32 %v8016_v36, %v7987_v40  ;;  %3963 = vmatpush.msra.mxu3 %v3944_v16  ;;  %vm3309_vm14 = vweird.f32 %v8016_v36 }
 0x3f3   : > { %v2983_v38 = vpop.f32.mrf.mxu3  ;;  %vm3310_vm1 = vmor %vm3308_vm15, %vm3309_vm14  ;;  %vm3323_vm4 = vweird.f32 %v8012_v61 }
 0x3f4   : > { %v5657_v49 = vmul.f32 -1.442695, %v8010_v42  ;;  %v5919_v23 = vpop.eup %5918  ;;  %v3305_v32 = vsub.f32 1.0, %v3304_v19  ;;  %v3943_v19 = vld [vmem:[%s10105_s8 + $0x8] sm:$0xff] }
 0x3f5   : > { %3964 = vmatpush.msra.mxu3 %v3943_v19 }
 0x3f6   : > { %5922 = vpow2.f32 %v5657_v49  ;;  %v3299_v49 = vand.u32 2147483648, %v7962_v0 }
 0x3f8   : > { %5643 = vmatmul.msk.f32.gmra.mxu3 %vm1048_vm0, %v943_v44  ;;  %v2984_v44 = vadd.f32 %v2983_v38, %v2774_v54  ;;  %v3286_v54 = vsel %vm3283_vm9, %v3285_v37, %v3281_v1  ;;  %v8037_v38 = vadd.f32 1.0, %v5919_v23  ;;  %v8044_v26 = vpop.eup %5920 }
 0x3f9   : > { %v2777_v31 = vpop.f32.mrf.mxu2  ;;  %5683 = vmatmul.msk.f32.gmra.mxu2 %vm1048_vm0, %v8021_v33  ;;  %vm3324_vm3 = vweird.f32 %v8044_v26 }
 0x3fa   : > { %v8035_v43 = vadd.f32 %v7779_v6, %v2984_v44  ;;  %v8049_v44 = vmul.f32 %v3286_v54, %v7879_v46  ;;  %5924 = vrcp.f32 %v8037_v38  ;;  %v3296_v46 = vsel %vm8057_vm12, %v7991_v10, %v3292_v14  ;;  %vm3325_vm5 = vmor %vm3323_vm4, %vm3324_vm3 }
 0x3fb   : > { %v2986_v45 = vpop.f32.mrf.mxu3  ;;  %v3300_v54 = vor.u32 1.1754944e-38, %v3299_v49  ;;  %vm3338_vm8 = vweird.f32 %v8037_v38 }
 0x3fc   : > { %v5658_v23 = vmul.f32 -1.442695, %v8035_v43  ;;  %v2987_v1 = vadd.f32 %v2986_v45, %v2777_v31  ;;  %v5923_v16 = vpop.eup %5922  ;;  %v3319_v31 = vmul.f32 %v8044_v26, %v8012_v61  ;;  %v3942_v45 = vld [vmem:[%s10105_s8] sm:$0xff] }
 0x3fd   : > { %3965 = vmatpush.msra.mxu3 %v3942_v45  ;;  %v8077_v14 = vadd.f32 1.0, %v5923_v16 }
 0x3fe   : > { %5926 = vpow2.f32 %v5658_v23  ;;  %v8075_v19 = vadd.f32 %v7779_v6, %v2987_v1  ;;  %v3320_v60 = vsub.f32 1.0, %v3319_v31  ;;  %v3312_v1 = vand.u32 2147483647, %v7987_v40 }
 0x3ff   : > { %5928 = vrcp.f32 %v8077_v14  ;;  %vm3353_vm12 = vweird.f32 %v8077_v14 }
 0x400   : > { %5644 = vmatmul.msk.f32.gmra.mxu3 %vm1048_vm0, %v944_v25  ;;  %v3297_v25 = vand.u32 2147483647, %v7962_v0  ;;  %v3306_v0 = vmul.f32 %v8016_v36, %v3305_v32  ;;  %v8081_v49 = vpop.eup %5924  ;;  %v3321_v45 = vmul.f32 %v8044_v26, %v3320_v60  ;;  %vm3313_vm2 = vcmp.eq.f32.partialorder %v3312_v1, 8.507059e+37 }
 0x401   : > { %v2780_v29 = vpop.f32.mrf.mxu2  ;;  %5684 = vmatmul.msk.f32.gmra.mxu2 %vm1048_vm0, %v8049_v44  ;;  %vm3339_vm7 = vweird.f32 %v8081_v49 }
 0x402   : > { %vm3298_vm13 = vcmp.eq.f32.partialorder %v3297_v25, 8.507059e+37  ;;  %v3307_v37 = vadd.f32 %v8016_v36, %v3306_v0  ;;  %v3314_v25 = vand.u32 2147483648, %v7987_v40  ;;  %v3322_v60 = vadd.f32 %v8044_v26, %v3321_v45  ;;  %vm3340_vm9 = vmor %vm3338_vm8, %vm3339_vm7 }
 0x403   : > { %v2989_v53 = vpop.f32.mrf.mxu3  ;;  %v3301_v10 = vsel %vm3298_vm13, %v3300_v54, %v3296_v46  ;;  %v946_v46 = vld [vmem:[%s7299_s23 + $0xf0] sm:$0xff]  ;;  %v3334_v54 = vmul.f32 %v8081_v49, %v8037_v38 }
 0x404   : > { %v8086_v23 = vmul.f32 %v3301_v10, %v7898_v52  ;;  %v2990_v16 = vadd.f32 %v2989_v53, %v2780_v29  ;;  %v5927_v0 = vpop.eup %5926  ;;  %v3311_v31 = vsel %vm3310_vm1, %v8016_v36, %v3307_v37  ;;  %v3315_v52 = vor.u32 1.1754944e-38, %v3314_v25 }
 0x405   : > { %v8102_v53 = vadd.f32 1.0, %v5927_v0  ;;  %v3335_v10 = vsub.f32 1.0, %v3334_v54  ;;  %v8106_v35 = vpop.eup %5928  ;;  %v3329_v25 = vand.u32 2147483648, %v8012_v61  ;;  %v947_v0 = vld [vmem:[%s7299_s23 + $0xf8] sm:$0xff]  ;;  %v3326_v45 = vsel %vm3325_vm5, %v8044_v26, %v3322_v60 }
 0x406   : > { %v8100_v40 = vadd.f32 %v7779_v6, %v2990_v16  ;;  %v3316_v29 = vsel %vm3313_vm2, %v3315_v52, %v3311_v31  ;;  %v3349_v52 = vmul.f32 %v8106_v35, %v8077_v14  ;;  %vm3354_vm11 = vweird.f32 %v8106_v35 }
 0x407   : > { %v8111_v1 = vmul.f32 %v3316_v29, %v7935_v13  ;;  %v3336_v54 = vmul.f32 %v8081_v49, %v3335_v10  ;;  %v3330_v13 = vor.u32 1.1754944e-38, %v3329_v25  ;;  %v3344_v25 = vand.u32 2147483648, %v8037_v38  ;;  %vm3355_vm13 = vmor %vm3353_vm12, %vm3354_vm11 }
 0x408   : > { %5645 = vmatmul.msk.f32.gmra.mxu3 %vm1048_vm0, %v945_v9  ;;  %v5659_v9 = vmul.f32 -1.442695, %v8075_v19  ;;  %v5660_v16 = vmul.f32 -1.442695, %v8100_v40  ;;  %v3350_v60 = vsub.f32 1.0, %v3349_v52  ;;  %vm3368_vm1 = vweird.f32 %v8102_v53 }
 0x409   : > { %v2783_v32 = vpop.f32.mrf.mxu2  ;;  %5685 = vmatmul.msk.f32.gmra.mxu2 %vm1048_vm0, %v8086_v23  ;;  %v3337_v29 = vadd.f32 %v8081_v49, %v3336_v54 }
 0x40a   : > { %5930 = vpow2.f32 %v5659_v9  ;;  %v3327_v9 = vand.u32 2147483647, %v8012_v61  ;;  %v3351_v52 = vmul.f32 %v8106_v35, %v3350_v60 }
 0x40b   : > { %v2992_v7 = vpop.f32.mrf.mxu3  ;;  %5932 = vrcp.f32 %v8102_v53  ;;  %v3341_v54 = vsel %vm3340_vm9, %v8081_v49, %v3337_v29 }
 0x40c   : > { %vm3328_vm6 = vcmp.eq.f32.partialorder %v3327_v9, 8.507059e+37  ;;  %5934 = vpow2.f32 %v5660_v16  ;;  %v4065_v9 = vld [vmem:[%s10106_s9 + $0x10] sm:$0xff] }
 0x40d   : > { %v3331_v61 = vsel %vm3328_vm6, %v3330_v13, %v3326_v45  ;;  %4084 = vmatpush.msra.mxu2 %v4065_v9 }
 0x40e   : > { %v8139_v16 = vmul.f32 %v3331_v61, %v7960_v51  ;;  %v3345_v51 = vor.u32 1.1754944e-38, %v3344_v25  ;;  %v3352_v61 = vadd.f32 %v8106_v35, %v3351_v52  ;;  %v3359_v25 = vand.u32 2147483648, %v8077_v14 }
 0x410   : > { %5646 = vmatmul.msk.f32.gmra.mxu3 %vm1048_vm0, %v946_v46  ;;  %v2993_v46 = vadd.f32 %v2992_v7, %v2783_v32  ;;  %v5931_v31 = vpop.eup %5930  ;;  %v3356_v52 = vsel %vm3355_vm13, %v8106_v35, %v3352_v61 }
 0x411   : > { %v2786_v36 = vpop.f32.mrf.mxu2  ;;  %5686 = vmatmul.msk.f32.gmra.mxu2 %vm1048_vm0, %v8111_v1  ;;  %v8127_v32 = vadd.f32 1.0, %v5931_v31  ;;  %v8131_v4 = vpop.eup %5932 }
 0x412   : > { %v8125_v7 = vadd.f32 %v7779_v6, %v2993_v46  ;;  %v3342_v46 = vand.u32 2147483647, %v8037_v38  ;;  %v5935_v45 = vpop.eup %5934  ;;  %v3364_v13 = vmul.f32 %v8131_v4, %v8102_v53  ;;  %vm3369_vm15 = vweird.f32 %v8131_v4 }
 0x413   : > { %v2995_v37 = vpop.f32.mrf.mxu3  ;;  %5936 = vrcp.f32 %v8127_v32  ;;  %vm3370_vm2 = vmor %vm3368_vm1, %vm3369_vm15  ;;  %vm3383_vm5 = vweird.f32 %v8127_v32 }
 0x414   : > { %v2996_v31 = vadd.f32 %v2995_v37, %v2786_v36  ;;  %vm3343_vm10 = vcmp.eq.f32.partialorder %v3342_v46, 8.507059e+37  ;;  %v8155_v37 = vadd.f32 1.0, %v5935_v45  ;;  %v3365_v29 = vsub.f32 1.0, %v3364_v13 }
 0x415   : > { %v3346_v36 = vsel %vm3343_vm10, %v3345_v51, %v3341_v54 }
 0x416   : > { %v8153_v38 = vadd.f32 %v7779_v6, %v2996_v31  ;;  %v8164_v46 = vmul.f32 %v3346_v36, %v7985_v34  ;;  %v3366_v13 = vmul.f32 %v8131_v4, %v3365_v29  ;;  %v3360_v34 = vor.u32 1.1754944e-38, %v3359_v25 }
 0x417   : > { %v3374_v25 = vand.u32 2147483648, %v8102_v53  ;;  %vm3398_vm9 = vweird.f32 %v8155_v37 }
 0x418   : > { %5647 = vmatmul.msk.f32.gmra.mxu3 %vm1048_vm0, %v947_v0  ;;  %v5661_v0 = vmul.f32 -1.442695, %v8125_v7  ;;  %v5662_v31 = vmul.f32 -1.442695, %v8153_v38  ;;  %v3367_v35 = vadd.f32 %v8131_v4, %v3366_v13 }
 0x419   : > { %v2789_v26 = vpop.f32.mrf.mxu2  ;;  %5687 = vmatmul.msk.f32.gmra.mxu2 %vm1048_vm0, %v8139_v16  ;;  %v8159_v9 = vpop.eup %5936 }
 0x41a   : > { %5938 = vpow2.f32 %v5661_v0  ;;  %v3357_v0 = vand.u32 2147483647, %v8077_v14  ;;  %v3379_v51 = vmul.f32 %v8159_v9, %v8127_v32  ;;  %v3371_v13 = vsel %vm3370_vm2, %v8131_v4, %v3367_v35 }
 0x41b   : > { %v2998_v10 = vpop.f32.mrf.mxu3  ;;  %5940 = vrcp.f32 %v8155_v37  ;;  %vm3384_vm4 = vweird.f32 %v8159_v9 }
 0x41c   : > { %v2999_v45 = vadd.f32 %v2998_v10, %v2789_v26  ;;  %vm3358_vm14 = vcmp.eq.f32.partialorder %v3357_v0, 8.507059e+37  ;;  %5942 = vpow2.f32 %v5662_v31  ;;  %v3380_v36 = vsub.f32 1.0, %v3379_v51  ;;  %vm3385_vm6 = vmor %vm3383_vm5, %vm3384_vm4 }
 0x41d   : > { %v3361_v26 = vsel %vm3358_vm14, %v3360_v34, %v3356_v52  ;;  %v3372_v31 = vand.u32 2147483647, %v8102_v53 }
 0x41e   : > { %v8178_v14 = vadd.f32 %v7779_v6, %v2999_v45  ;;  %v8189_v0 = vmul.f32 %v3361_v26, %v8010_v42  ;;  %v3381_v51 = vmul.f32 %v8159_v9, %v3380_v36  ;;  %v3375_v42 = vor.u32 1.1754944e-38, %v3374_v25 }
 0x41f   : > { %vm3373_vm3 = vcmp.eq.f32.partialorder %v3372_v31, 8.507059e+37  ;;  %v3389_v25 = vand.u32 2147483648, %v8127_v32 }
 0x420   : > { %5712 = vmatmul.msk.f32.vlgmr.msra.gmra.mxu3 %vm1048_vm0, %v7946_v5  ;;  %v5939_v54 = vpop.eup %5938  ;;  %v5663_v45 = vmul.f32 -1.442695, %v8178_v14  ;;  %v3382_v4 = vadd.f32 %v8159_v9, %v3381_v51 }
 0x421   : > { %v2792_v49 = vpop.f32.mrf.mxu2  ;;  %5688 = vmatmul.msk.f32.gmra.mxu2 %vm1048_vm0, %v8164_v46  ;;  %v8180_v10 = vadd.f32 1.0, %v5939_v54  ;;  %v8184_v58 = vpop.eup %5940 }
 0x422   : > { %v5943_v52 = vpop.eup %5942  ;;  %v3394_v34 = vmul.f32 %v8184_v58, %v8155_v37  ;;  %vm3399_vm8 = vweird.f32 %v8184_v58 }
 0x423   : > { %v3001_v60 = vpop.f32.mrf.mxu3  ;;  %5944 = vrcp.f32 %v8180_v10  ;;  %vm3400_vm10 = vmor %vm3398_vm9, %vm3399_vm8  ;;  %vm3413_vm13 = vweird.f32 %v8180_v10 }
 0x424   : > { %v3002_v54 = vadd.f32 %v3001_v60, %v2792_v49  ;;  %5946 = vpow2.f32 %v5663_v45  ;;  %v3376_v49 = vsel %vm3373_vm3, %v3375_v42, %v3371_v13  ;;  %v8205_v60 = vadd.f32 1.0, %v5943_v52 }
 0x425   : > { %v3395_v26 = vsub.f32 1.0, %v3394_v34  ;;  %v8214_v31 = vmul.f32 %v3376_v49, %v8035_v43  ;;  %v3387_v45 = vand.u32 2147483647, %v8127_v32  ;;  %v3386_v34 = vsel %vm3385_vm6, %v8159_v9, %v3382_v4 }
 0x426   : > { %v8203_v53 = vadd.f32 %v7779_v6, %v3002_v54  ;;  %5948 = vrcp.f32 %v8205_v60  ;;  %v3390_v43 = vor.u32 1.1754944e-38, %v3389_v25  ;;  %v3404_v25 = vand.u32 2147483648, %v8155_v37 }
 0x427   : > { %v3396_v42 = vmul.f32 %v8184_v58, %v3395_v26  ;;  %vm3388_vm7 = vcmp.eq.f32.partialorder %v3387_v45, 8.507059e+37  ;;  %vm3428_vm2 = vweird.f32 %v8205_v60 }
 0x428   : > { %5713 = vmatmul.msk.f32.gmra.mxu3 %vm1048_vm0, %v7971_v17  ;;  %v5664_v54 = vmul.f32 -1.442695, %v8203_v53 }
 0x429   : > { %v2795_v61 = vpop.f32.mrf.mxu2  ;;  %5689 = vmatmul.msk.f32.gmra.mxu2 %vm1048_vm0, %v8189_v0  ;;  %v8209_v36 = vpop.eup %5944  ;;  %v3397_v9 = vadd.f32 %v8184_v58, %v3396_v42 }
 0x42a   : > { %v5947_v51 = vpop.eup %5946  ;;  %v3409_v63 = vmul.f32 %v8209_v36, %v8180_v10  ;;  %5950 = vpow2.f32 %v5664_v54  ;;  %v3402_v54 = vand.u32 2147483647, %v8155_v37  ;;  %vm3414_vm12 = vweird.f32 %v8209_v36 }
 0x42b   : > { %v3004_v29 = vpop.f32.mrf.mxu3  ;;  %vm3415_vm14 = vmor %vm3413_vm13, %vm3414_vm12 }
 0x42c   : > { %v3005_v52 = vadd.f32 %v3004_v29, %v2795_v61  ;;  %v3391_v61 = vsel %vm3388_vm7, %v3390_v43, %v3386_v34  ;;  %v8230_v29 = vadd.f32 1.0, %v5947_v51  ;;  %v3410_v49 = vsub.f32 1.0, %v3409_v63  ;;  %v8234_v26 = vpop.eup %5948 }
 0x42d   : > { %v8239_v45 = vmul.f32 %v3391_v61, %v8075_v19  ;;  %v3401_v63 = vsel %vm3400_vm10, %v8184_v58, %v3397_v9  ;;  %v3424_v43 = vmul.f32 %v8234_v26, %v8205_v60  ;;  %v3405_v61 = vor.u32 1.1754944e-38, %v3404_v25 }
 0x42e   : > { %v8228_v32 = vadd.f32 %v7779_v6, %v3005_v52  ;;  %5952 = vrcp.f32 %v8230_v29  ;;  %v3411_v42 = vmul.f32 %v8209_v36, %v3410_v49  ;;  %vm3403_vm11 = vcmp.eq.f32.partialorder %v3402_v54, 8.507059e+37 }
 0x42f   : > { %v3425_v9 = vsub.f32 1.0, %v3424_v43  ;;  %v3419_v25 = vand.u32 2147483648, %v8180_v10  ;;  %vm3429_vm1 = vweird.f32 %v8234_v26  ;;  %vm3443_vm6 = vweird.f32 %v8230_v29 }
 0x430   : > { %5714 = vmatmul.msk.f32.gmra.mxu3 %vm1048_vm0, %v7996_v22  ;;  %v5665_v52 = vmul.f32 -1.442695, %v8228_v32  ;;  %v5951_v34 = vpop.eup %5950  ;;  %vm3430_vm3 = vmor %vm3428_vm2, %vm3429_vm1 }
 0x431   : > { %v2798_v13 = vpop.f32.mrf.mxu2  ;;  %5690 = vmatmul.msk.f32.gmra.mxu2 %vm1048_vm0, %v8214_v31  ;;  %v8255_v58 = vadd.f32 1.0, %v5951_v34 }
 0x432   : > { %5954 = vpow2.f32 %v5665_v52 }
 0x433   : > { %v3007_v35 = vpop.f32.mrf.mxu3  ;;  %5956 = vrcp.f32 %v8255_v58  ;;  %vm3458_vm10 = vweird.f32 %v8255_v58 }
 0x434   : > { %v3008_v51 = vadd.f32 %v3007_v35, %v2798_v13  ;;  %v3406_v35 = vsel %vm3403_vm11, %v3405_v61, %v3401_v63  ;;  %v3412_v13 = vadd.f32 %v8209_v36, %v3411_v42  ;;  %v8259_v2 = vpop.eup %5952  ;;  %v3426_v42 = vmul.f32 %v8234_v26, %v3425_v9 }
 0x435   : > { %v8264_v54 = vmul.f32 %v3406_v35, %v8100_v40  ;;  %v3439_v43 = vmul.f32 %v8259_v2, %v8230_v29  ;;  %v3420_v40 = vor.u32 1.1754944e-38, %v3419_v25  ;;  %vm3444_vm5 = vweird.f32 %v8259_v2 }
 0x436   : > { %v8253_v37 = vadd.f32 %v7779_v6, %v3008_v51  ;;  %v3417_v6 = vand.u32 2147483647, %v8180_v10  ;;  %v3416_v63 = vsel %vm3415_vm14, %v8209_v36, %v3412_v13  ;;  %v8280_v10 = vld [vmem:[%s10103_s6] ss:$0 sm:$0xff]  ;;  %v3427_v35 = vadd.f32 %v8234_v26, %v3426_v42  ;;  %vm3445_vm7 = vmor %vm3443_vm6, %vm3444_vm5 }
 0x437   : > { %v3440_v13 = vsub.f32 1.0, %v3439_v43 }
 0x438   : > { %5715 = vmatmul.msk.f32.gmra.mxu3 %vm1048_vm0, %v8021_v33  ;;  %v5666_v52 = vmul.f32 -1.442695, %v8253_v37  ;;  %v5955_v34 = vpop.eup %5954  ;;  %vm3418_vm15 = vcmp.eq.f32.partialorder %v3417_v6, 8.507059e+37  ;;  %v3434_v6 = vand.u32 2147483648, %v8205_v60  ;;  %v3431_v43 = vsel %vm3430_vm3, %v8234_v26, %v3427_v35 }
 0x439   : > { %5691 = vmatmul.msk.f32.gmra.mxu2 %vm1048_vm0, %v8239_v45  ;;  %v2801_v19 = vpop.f32.mrf.mxu2  ;;  %v8285_v61 = vadd.f32 1.0, %v5955_v34  ;;  %v8289_v25 = vpop.eup %5956 }
 0x43a   : > { %5958 = vpow2.f32 %v5666_v52  ;;  %v3454_v15 = vmul.f32 %v8289_v25, %v8255_v58  ;;  %vm3459_vm9 = vweird.f32 %v8289_v25 }
 0x43b   : > { %v3010_v4 = vpop.f32.mrf.mxu3  ;;  %5960 = vrcp.f32 %v8285_v61  ;;  %vm3460_vm11 = vmor %vm3458_vm10, %vm3459_vm9  ;;  %vm3473_vm14 = vweird.f32 %v8285_v61 }
 0x43c   : > { %v3011_v51 = vadd.f32 %v3010_v4, %v2801_v19  ;;  %v3421_v19 = vsel %vm3418_vm15, %v3420_v40, %v3416_v63  ;;  %v3441_v40 = vmul.f32 %v8259_v2, %v3440_v13  ;;  %v3455_v35 = vsub.f32 1.0, %v3454_v15 }
 0x43d   : > { %v8294_v52 = vmul.f32 %v3421_v19, %v8125_v7  ;;  %v3435_v7 = vor.u32 1.1754944e-38, %v3434_v6  ;;  %v3449_v6 = vand.u32 2147483648, %v8230_v29 }
 0x43e   : > { %v8283_v36 = vadd.f32 %v8280_v10, %v3011_v51  ;;  %v3432_v51 = vand.u32 2147483647, %v8205_v60  ;;  %v3442_v19 = vadd.f32 %v8259_v2, %v3441_v40  ;;  %v3456_v40 = vmul.f32 %v8289_v25, %v3455_v35 }
 0x440   : > { %5716 = vmatmul.msk.f32.gmra.mxu3 %vm1048_vm0, %v8049_v44  ;;  %v5667_v34 = vmul.f32 -1.442695, %v8283_v36  ;;  %v5959_v42 = vpop.eup %5958  ;;  %vm3433_vm4 = vcmp.eq.f32.partialorder %v3432_v51, 8.507059e+37  ;;  %v3446_v15 = vsel %vm3445_vm7, %v8259_v2, %v3442_v19 }
 0x441   : > { %5692 = vmatmul.msk.f32.gmra.mxu2 %vm1048_vm0, %v8264_v54  ;;  %v8314_v41 = vpop.eup %5960 }
 0x442   : > { %v2804_v4 = vpop.f32.mrf.mxu2  ;;  %5962 = vpow2.f32 %v5667_v34  ;;  %v3447_v34 = vand.u32 2147483647, %v8230_v29  ;;  %vm3474_vm13 = vweird.f32 %v8314_v41 }
 0x443   : > { %v3013_v49 = vpop.f32.mrf.mxu3  ;;  %vm3475_vm15 = vmor %vm3473_vm14, %vm3474_vm13 }
 0x444   : > { %v3014_v63 = vadd.f32 %v3013_v49, %v2804_v4  ;;  %v3436_v49 = vsel %vm3433_vm4, %v3435_v7, %v3431_v43  ;;  %v8310_v4 = vadd.f32 1.0, %v5959_v42  ;;  %v3469_v7 = vmul.f32 %v8314_v41, %v8285_v61 }
 0x445   : > { %v8319_v51 = vmul.f32 %v3436_v49, %v8153_v38  ;;  %v3450_v38 = vor.u32 1.1754944e-38, %v3449_v6  ;;  %vm3448_vm8 = vcmp.eq.f32.partialorder %v3447_v34, 8.507059e+37  ;;  %v3464_v6 = vand.u32 2147483648, %v8255_v58 }
 0x446   : > { %v8308_v60 = vadd.f32 %v8280_v10, %v3014_v63  ;;  %5964 = vrcp.f32 %v8310_v4  ;;  %v3470_v19 = vsub.f32 1.0, %v3469_v7  ;;  %vm3488_vm3 = vweird.f32 %v8310_v4 }
 0x447   : > { %10491 = vst [vmem:[#allocation172_spill] sm:$0xff] %v8319_v51 }
 0x448   : > { %5717 = vmatmul.msk.f32.gmra.mxu3 %vm1048_vm0, %v8086_v23  ;;  %v5668_v63 = vmul.f32 -1.442695, %v8308_v60  ;;  %v5963_v43 = vpop.eup %5962  ;;  %v3471_v7 = vmul.f32 %v8314_v41, %v3470_v19 }
 0x449   : > { %5693 = vmatmul.msk.f32.gmra.mxu2 %vm1048_vm0, %v8294_v52  ;;  %v8335_v49 = vadd.f32 1.0, %v5963_v43 }
 0x44a   : > { %v2807_v26 = vpop.f32.mrf.mxu2  ;;  %5966 = vpow2.f32 %v5668_v63  ;;  %v3462_v63 = vand.u32 2147483647, %v8255_v58 }
 0x44b   : > { %v3016_v9 = vpop.f32.mrf.mxu3  ;;  %5968 = vrcp.f32 %v8335_v49  ;;  %v3509_v21 = vand.u32 2147483648, %v8335_v49  ;;  %vm3503_vm7 = vweird.f32 %v8335_v49 }
 0x44c   : > { %v3017_v42 = vadd.f32 %v3016_v9, %v2807_v26  ;;  %v3451_v9 = vsel %vm3448_vm8, %v3450_v38, %v3446_v15  ;;  %v3457_v26 = vadd.f32 %v8289_v25, %v3456_v40  ;;  %v8339_v48 = vpop.eup %5964  ;;  %vm3463_vm12 = vcmp.eq.f32.partialorder %v3462_v63, 8.507059e+37 }
 0x44d   : > { %v8344_v34 = vmul.f32 %v3451_v9, %v8178_v14  ;;  %v3484_v38 = vmul.f32 %v8339_v48, %v8310_v4  ;;  %v3465_v14 = vor.u32 1.1754944e-38, %v3464_v6  ;;  %v3479_v6 = vand.u32 2147483648, %v8285_v61 }
 0x44e   : > { %v8333_v29 = vadd.f32 %v8280_v10, %v3017_v42  ;;  %v3461_v40 = vsel %vm3460_vm11, %v8289_v25, %v3457_v26  ;;  %vm3489_vm2 = vweird.f32 %v8339_v48 }
 0x44f   : > { %10492 = vst [vmem:[#allocation173_spill] sm:$0xff] %v8344_v34  ;;  %v3485_v26 = vsub.f32 1.0, %v3484_v38  ;;  %vm3490_vm4 = vmor %vm3488_vm3, %vm3489_vm2 }
 0x450   : > { %5718 = vmatmul.msk.f32.gmra.mxu3 %vm1048_vm0, %v8111_v1  ;;  %v5669_v42 = vmul.f32 -1.442695, %v8333_v29  ;;  %v5967_v15 = vpop.eup %5966 }
 0x451   : > { %5694 = vmatmul.msk.f32.gmra.mxu2 %vm1048_vm0, %v8319_v51  ;;  %v8360_v9 = vadd.f32 1.0, %v5967_v15  ;;  %v8364_v3 = vpop.eup %5968 }
 0x452   : > { %5970 = vpow2.f32 %v5669_v42  ;;  %v3477_v42 = vand.u32 2147483647, %v8285_v61  ;;  %v3480_v61 = vor.u32 1.1754944e-38, %v3479_v6  ;;  %vm3504_vm6 = vweird.f32 %v8364_v3 }
 0x453   : > { %v3019_v13 = vpop.f32.mrf.mxu3  ;;  %5972 = vrcp.f32 %v8360_v9  ;;  %vm3505_vm8 = vmor %vm3503_vm7, %vm3504_vm6  ;;  %vm3518_vm11 = vweird.f32 %v8360_v9 }
 0x454   : > { %v2810_v2 = vpop.f32.mrf.mxu2  ;;  %vm3478_vm1 = vcmp.eq.f32.partialorder %v3477_v42, 8.507059e+37  ;;  %v3494_v42 = vand.u32 2147483648, %v8310_v4 }
 0x455   : > { %v3020_v43 = vadd.f32 %v3019_v13, %v2810_v2  ;;  %v3466_v13 = vsel %vm3463_vm12, %v3465_v14, %v3461_v40  ;;  %v3472_v2 = vadd.f32 %v8314_v41, %v3471_v7  ;;  %v4064_v40 = vld [vmem:[%s10106_s9 + $0x8] sm:$0xff]  ;;  %v3486_v14 = vmul.f32 %v8339_v48, %v3485_v26 }
 0x456   : > { %v8369_v63 = vmul.f32 %v3466_v13, %v8203_v53  ;;  %4085 = vmatpush.msra.mxu2 %v4064_v40  ;;  %v3499_v53 = vmul.f32 %v8364_v3, %v8335_v49 }
 0x457   : > { %v8358_v58 = vadd.f32 %v8280_v10, %v3020_v43  ;;  %v3476_v38 = vsel %vm3475_vm15, %v8314_v41, %v3472_v2  ;;  %v3487_v2 = vadd.f32 %v8339_v48, %v3486_v14 }
 0x458   : > { %5719 = vmatmul.msk.f32.gmra.mxu3 %vm1048_vm0, %v8139_v16  ;;  %10493 = vst [vmem:[#allocation174_spill] sm:$0xff] %v8369_v63  ;;  %v5971_v7 = vpop.eup %5970  ;;  %v3481_v13 = vsel %vm3478_vm1, %v3480_v61, %v3476_v38  ;;  %v3500_v26 = vsub.f32 1.0, %v3499_v53 }
 0x459   : > { %5695 = vmatmul.msk.f32.gmra.mxu2 %vm1048_vm0, %v8344_v34  ;;  %v5670_v43 = vmul.f32 -1.442695, %v8358_v58  ;;  %v8394_v6 = vpop.eup %5972  ;;  %v3491_v53 = vsel %vm3490_vm4, %v8339_v48, %v3487_v2 }
 0x45a   : > { %v3501_v61 = vmul.f32 %v8364_v3, %v3500_v26  ;;  %v3514_v59 = vmul.f32 %v8394_v6, %v8360_v9  ;;  %vm3519_vm10 = vweird.f32 %v8394_v6 }
 0x45b   : > { %v3022_v35 = vpop.f32.mrf.mxu3  ;;  %5974 = vpow2.f32 %v5670_v43  ;;  %v8399_v43 = vmul.f32 %v3481_v13, %v8228_v32  ;;  %v3495_v32 = vor.u32 1.1754944e-38, %v3494_v42  ;;  %vm3520_vm12 = vmor %vm3518_vm11, %vm3519_vm10 }
 0x45c   : > { %v2813_v25 = vpop.f32.mrf.mxu2  ;;  %v3502_v13 = vadd.f32 %v8364_v3, %v3501_v61  ;;  %v3515_v2 = vsub.f32 1.0, %v3514_v59 }
 0x45d   : > { %v3023_v15 = vadd.f32 %v3022_v35, %v2813_v25  ;;  %v8388_v25 = vadd.f32 1.0, %v5971_v7  ;;  %10495 = vst [vmem:[#allocation176_spill] sm:$0xff] %v8399_v43 }
 0x45e   : > { %v3506_v61 = vsel %vm3505_vm8, %v8364_v3, %v3502_v13 }
 0x45f   : > { %v8386_v35 = vadd.f32 %v8280_v10, %v3023_v15  ;;  %v3492_v15 = vand.u32 2147483647, %v8310_v4  ;;  %5976 = vrcp.f32 %v8388_v25  ;;  %vm3533_vm15 = vweird.f32 %v8388_v25 }
 0x460   : > { %5720 = vmatmul.msk.f32.gmra.mxu3 %vm1048_vm0, %v8164_v46 }
 0x461   : > { %5696 = vmatmul.msk.f32.gmra.mxu2 %vm1048_vm0, %v8369_v63  ;;  %v5671_v7 = vmul.f32 -1.442695, %v8386_v35  ;;  %v5975_v14 = vpop.eup %5974  ;;  %vm3493_vm5 = vcmp.eq.f32.partialorder %v3492_v15, 8.507059e+37 }
 0x462   : > { %v3496_v4 = vsel %vm3493_vm5, %v3495_v32, %v3491_v53  ;;  %v8433_v53 = vpop.f32.mrf.mxu1  ;;  %v3516_v32 = vmul.f32 %v8394_v6, %v3515_v2 }
 0x463   : > { %v3025_v19 = vpop.f32.mrf.mxu3  ;;  %5978 = vpow2.f32 %v5671_v7  ;;  %v8427_v7 = vmul.f32 %v3496_v4, %v8253_v37  ;;  %v3510_v37 = vor.u32 1.1754944e-38, %v3509_v21 }
 0x464   : > { %v8390_v41 = vpop.f32.mrf.mxu2  ;;  %v3026_v38 = vadd.f32 %v3025_v19, %v7552_v20  ;;  %v8416_v19 = vadd.f32 1.0, %v5975_v14  ;;  %v3517_v13 = vadd.f32 %v8394_v6, %v3516_v32 }
 0x465   : > { %10494 = vst [vmem:[#allocation175_spill] sm:$0xff] %v8390_v41  ;;  %v8422_v42 = vpop.eup %5976 }
 0x466   : > { %v8414_v20 = vadd.f32 %v8280_v10, %v3026_v38  ;;  %10497 = vst [vmem:[#allocation178_spill] sm:$0xff] %v8427_v7  ;;  %v3507_v38 = vand.u32 2147483647, %v8335_v49  ;;  %5980 = vrcp.f32 %v8416_v19  ;;  %v3521_v32 = vsel %vm3520_vm12, %v8394_v6, %v3517_v13 }
 0x467   : > { %vm3534_vm14 = vweird.f32 %v8422_v42  ;;  %vm3548_vm4 = vweird.f32 %v8416_v19 }
 0x468   : > { %5721 = vmatmul.msk.f32.gmra.mxu3 %vm1048_vm0, %v8189_v0  ;;  %v5672_v14 = vmul.f32 -1.442695, %v8414_v20  ;;  %vm3508_vm9 = vcmp.eq.f32.partialorder %v3507_v38, 8.507059e+37  ;;  %vm3535_vm1 = vmor %vm3533_vm15, %vm3534_vm14 }
 0x469   : > { %5697 = vmatmul.msk.f32.gmra.mxu2 %vm1048_vm0, %v8399_v43  ;;  %v5979_v59 = vpop.eup %5978 }
 0x46a   : > { %5982 = vpow2.f32 %v5672_v14  ;;  %v8446_v4 = vadd.f32 1.0, %v5979_v59  ;;  %v3522_v59 = vand.u32 2147483647, %v8360_v9 }
 0x46b   : > { %v3028_v40 = vpop.f32.mrf.mxu3 }
 0x46c   : > { %v8418_v48 = vpop.f32.mrf.mxu2  ;;  %v3029_v15 = vadd.f32 %v3028_v40, %v7577_v47  ;;  %v3529_v47 = vmul.f32 %v8422_v42, %v8388_v25  ;;  %v3511_v40 = vsel %vm3508_vm9, %v3510_v37, %v3506_v61  ;;  %v8452_v21 = vpop.eup %5980  ;;  %5984 = vrcp.f32 %v8446_v4 }
 0x46d   : > { %10496 = vst [vmem:[#allocation177_spill] sm:$0xff] %v8418_v48  ;;  %v8458_v14 = vmul.f32 %v3511_v40, %v8283_v36  ;;  %v3544_v37 = vmul.f32 %v8452_v21, %v8416_v19  ;;  %vm3523_vm13 = vcmp.eq.f32.partialorder %v3522_v59, 8.507059e+37  ;;  %v3537_v59 = vand.u32 2147483647, %v8388_v25 }
 0x46e   : > { %v8442_v49 = vadd.f32 %v8280_v10, %v3029_v15  ;;  %v3530_v2 = vsub.f32 1.0, %v3529_v47  ;;  %v3524_v15 = vand.u32 2147483648, %v8360_v9  ;;  %v8474_v9 = vpop.f32.mrf.mxu1  ;;  %vm3549_vm3 = vweird.f32 %v8452_v21 }
 0x46f   : > { %10499 = vst [vmem:[#allocation180_spill] sm:$0xff] %v8458_v14  ;;  %vm3538_vm2 = vcmp.eq.f32.partialorder %v3537_v59, 8.507059e+37  ;;  %v3552_v59 = vand.u32 2147483647, %v8416_v19  ;;  %vm3550_vm5 = vmor %vm3548_vm4, %vm3549_vm3  ;;  %vm3563_vm8 = vweird.f32 %v8446_v4 }
 0x470   : > { %5722 = vmatmul.msk.f32.gmra.mxu3 %vm1048_vm0, %v8214_v31  ;;  %v5673_v41 = vmul.f32 -1.442695, %v8442_v49  ;;  %v5983_v61 = vpop.eup %5982  ;;  %v3531_v47 = vmul.f32 %v8422_v42, %v3530_v2  ;;  %v3545_v2 = vsub.f32 1.0, %v3544_v37 }
 0x471   : > { %5698 = vmatmul.msk.f32.gmra.mxu2 %vm1048_vm0, %v8427_v7  ;;  %vm3553_vm6 = vcmp.eq.f32.partialorder %v3552_v59, 8.507059e+37  ;;  %v3567_v59 = vand.u32 2147483647, %v8446_v4 }
 0x472   : > { %5986 = vpow2.f32 %v5673_v41  ;;  %v3532_v13 = vadd.f32 %v8422_v42, %v3531_v47  ;;  %v3546_v37 = vmul.f32 %v8452_v21, %v3545_v2 }
 0x473   : > { %v3031_v26 = vpop.f32.mrf.mxu3  ;;  %vm3568_vm10 = vcmp.eq.f32.partialorder %v3567_v59, 8.507059e+37 }
 0x474   : > { %v8448_v3 = vpop.f32.mrf.mxu2  ;;  %v3032_v38 = vadd.f32 %v3031_v26, %v7602_v39  ;;  %v3525_v39 = vor.u32 1.1754944e-38, %v3524_v15  ;;  %v8476_v26 = vadd.f32 1.0, %v5983_v61  ;;  %v8482_v15 = vpop.eup %5984  ;;  %v3536_v47 = vsel %vm3535_vm1, %v8422_v42, %v3532_v13 }
 0x475   : > { %10498 = vst [vmem:[#allocation179_spill] sm:$0xff] %v8448_v3  ;;  %v3547_v13 = vadd.f32 %v8452_v21, %v3546_v37  ;;  %vm3564_vm7 = vweird.f32 %v8482_v15 }
 0x476   : > { %v8470_v36 = vadd.f32 %v8280_v10, %v3032_v38  ;;  %v3526_v6 = vsel %vm3523_vm13, %v3525_v39, %v3521_v32  ;;  %v3539_v38 = vand.u32 2147483648, %v8388_v25  ;;  %5988 = vrcp.f32 %v8476_v26  ;;  %vm3565_vm9 = vmor %vm3563_vm8, %vm3564_vm7 }
 0x477   : > { %v8487_v30 = vmul.f32 %v3526_v6, %v8308_v60  ;;  %v3559_v39 = vmul.f32 %v8482_v15, %v8446_v4  ;;  %v8508_v6 = vpop.f32.mrf.mxu1  ;;  %vm3578_vm12 = vweird.f32 %v8476_v26 }
 0x478   : > { %5723 = vmatmul.msk.f32.gmra.mxu3 %vm1048_vm0, %v8239_v45  ;;  %v5674_v3 = vmul.f32 -1.442695, %v8470_v36  ;;  %v5987_v32 = vpop.eup %5986  ;;  %v3540_v60 = vor.u32 1.1754944e-38, %v3539_v38  ;;  %10503 = vst [vmem:[#allocation184_spill] sm:$0xff] %v8508_v6 }
 0x479   : > { %5699 = vmatmul.msk.f32.gmra.mxu2 %vm1048_vm0, %v8458_v14  ;;  %10501 = vst [vmem:[#allocation182_spill] sm:$0xff] %v8487_v30  ;;  %v3560_v2 = vsub.f32 1.0, %v3559_v39  ;;  %v3551_v39 = vsel %vm3550_vm5, %v8452_v21, %v3547_v13 }
 0x47a   : > { %5990 = vpow2.f32 %v5674_v3 }
 0x47b   : > { %v3034_v48 = vpop.f32.mrf.mxu3 }
 0x47c   : > { %v8478_v40 = vpop.f32.mrf.mxu2  ;;  %v3035_v61 = vadd.f32 %v3034_v48, %v7627_v57  ;;  %v8501_v57 = vadd.f32 1.0, %v5987_v32  ;;  %v3541_v48 = vsel %vm3538_vm2, %v3540_v60, %v3536_v47  ;;  %v8512_v38 = vpop.eup %5988 }
 0x47d   : > { %10500 = vst [vmem:[#allocation181_spill] sm:$0xff] %v8478_v40  ;;  %v8518_v32 = vmul.f32 %v3541_v48, %v8333_v29  ;;  %v3574_v40 = vmul.f32 %v8512_v38, %v8476_v26  ;;  %vm3579_vm11 = vweird.f32 %v8512_v38 }
 0x47e   : > { %v8504_v25 = vadd.f32 %v8280_v10, %v3035_v61  ;;  %v3554_v61 = vand.u32 2147483648, %v8416_v19  ;;  %5992 = vrcp.f32 %v8501_v57  ;;  %vm8580_vm13 = vmor %vm3578_vm12, %vm3579_vm11  ;;  %vm3593_vm1 = vweird.f32 %v8501_v57 }
 0x480   : > { %5724 = vmatmul.msk.f32.gmra.mxu3 %vm1048_vm0, %v8264_v54  ;;  %v5675_v47 = vmul.f32 -1.442695, %v8504_v25  ;;  %v5991_v60 = vpop.eup %5990  ;;  %v3555_v29 = vor.u32 1.1754944e-38, %v3554_v61 }
 0x481   : > { %5700 = vmatmul.msk.f32.gmra.mxu2 %vm1048_vm0, %v8487_v30  ;;  %v8531_v19 = vadd.f32 1.0, %v5991_v60  ;;  %v8545_v60 = vpop.f32.mrf.mxu1 }
 0x482   : > { %5994 = vpow2.f32 %v5675_v47  ;;  %v3556_v21 = vsel %vm3553_vm6, %v3555_v29, %v3551_v39  ;;  %v3569_v47 = vand.u32 2147483648, %v8446_v4  ;;  %10505 = vst [vmem:[#allocation186_spill] sm:$0xff] %v8545_v60 }
 0x483   : > { %v3037_v41 = vpop.f32.mrf.mxu3  ;;  %5996 = vrcp.f32 %v8531_v19  ;;  %vm3608_vm5 = vweird.f32 %v8531_v19 }
 0x484   : > { %v8506_v42 = vpop.f32.mrf.mxu2  ;;  %v3038_v37 = vadd.f32 %v3037_v41, %v7652_v8  ;;  %v8538_v48 = vpop.eup %5992 }
 0x485   : > { %10502 = vst [vmem:[#allocation183_spill] sm:$0xff] %v8506_v42  ;;  %v3561_v42 = vmul.f32 %v8482_v15, %v3560_v2  ;;  %v3575_v2 = vsub.f32 1.0, %v3574_v40  ;;  %v3589_v40 = vmul.f32 %v8538_v48, %v8501_v57  ;;  %vm3594_vm15 = vweird.f32 %v8538_v48 }
 0x486   : > { %v8534_v8 = vadd.f32 %v8280_v10, %v3038_v37  ;;  %v8548_v37 = vmul.f32 %v3556_v21, %v8358_v58  ;;  %v3570_v58 = vor.u32 1.1754944e-38, %v3569_v47  ;;  %v3584_v47 = vand.u32 2147483648, %v8476_v26  ;;  %vm8625_vm2 = vmor %vm3593_vm1, %vm3594_vm15 }
 0x487   : > { %v3562_v13 = vadd.f32 %v8482_v15, %v3561_v42  ;;  %v3576_v4 = vmul.f32 %v8512_v38, %v3575_v2  ;;  %v3590_v21 = vsub.f32 1.0, %v3589_v40 }
 0x488   : > { %5725 = vmatmul.msk.f32.gmra.mxu3 %vm1048_vm0, %v8294_v52  ;;  %v5676_v39 = vmul.f32 -1.442695, %v8534_v8  ;;  %v5995_v29 = vpop.eup %5994 }
 0x489   : > { %5701 = vmatmul.msk.f32.gmra.mxu2 %vm1048_vm0, %v8518_v32  ;;  %v8564_v55 = vadd.f32 1.0, %v5995_v29  ;;  %v3591_v29 = vmul.f32 %v8538_v48, %v3590_v21  ;;  %v8607_v21 = vld [vmem:[%s10108_s11] ss:$0 sm:$0xff] }
 0x48a   : > { %5998 = vpow2.f32 %v5676_v39 }
 0x48b   : > { %v3040_v3 = vpop.f32.mrf.mxu3  ;;  %6000 = vrcp.f32 %v8564_v55 }
 0x48c   : > { %v8536_v41 = vpop.f32.mrf.mxu2  ;;  %v3041_v42 = vadd.f32 %v3040_v3, %v7677_v62 }
 0x48d   : > { %10504 = vst [vmem:[#allocation185_spill] sm:$0xff] %v8536_v41  ;;  %v3566_v41 = vsel %vm3565_vm9, %v8482_v15, %v3562_v13  ;;  %v8568_v15 = vpop.eup %5996  ;;  %v3577_v13 = vadd.f32 %v8512_v38, %v3576_v4  ;;  %vm3623_vm9 = vweird.f32 %v8564_v55 }
 0x48e   : > { %v8562_v62 = vadd.f32 %v8280_v10, %v3041_v42  ;;  %v3571_v3 = vsel %vm3568_vm10, %v3570_v58, %v3566_v41  ;;  %v3582_v41 = vand.u32 2147483647, %v8476_v26  ;;  %v3604_v4 = vmul.f32 %v8568_v15, %v8531_v19 }
 0x48f   : > { %v8575_v39 = vmul.f32 %v3571_v3, %v8386_v35  ;;  %v3581_v26 = vsel %vm8580_vm13, %v8512_v38, %v3577_v13  ;;  %v3585_v58 = vor.u32 1.1754944e-38, %v3584_v47  ;;  %v3592_v13 = vadd.f32 %v8538_v48, %v3591_v29 }
 0x490   : > { %5726 = vmatmul.msk.f32.gmra.mxu3 %vm1048_vm0, %v8319_v51  ;;  %v5677_v42 = vmul.f32 -1.442695, %v8562_v62  ;;  %v5999_v35 = vpop.eup %5998  ;;  %vm3583_vm14 = vcmp.eq.f32.partialorder %v3582_v41, 8.507059e+37  ;;  %v3605_v47 = vsub.f32 1.0, %v3604_v4  ;;  %v3597_v41 = vand.u32 2147483647, %v8501_v57 }
 0x491   : > { %5702 = vmatmul.msk.f32.gmra.mxu2 %vm1048_vm0, %v8548_v37  ;;  %v3586_v38 = vsel %vm3583_vm14, %v3585_v58, %v3581_v26  ;;  %v8610_v40 = vadd.f32 1.0, %v5999_v35  ;;  %vm3609_vm4 = vweird.f32 %v8568_v15 }
 0x492   : > { %6002 = vpow2.f32 %v5677_v42  ;;  %v3599_v42 = vand.u32 2147483648, %v8501_v57  ;;  %v8621_v26 = vmul.f32 %v3586_v38, %v8414_v20  ;;  %v3596_v57 = vsel %vm8625_vm2, %v8538_v48, %v3592_v13  ;;  %vm8680_vm6 = vmor %vm3608_vm5, %vm3609_vm4 }
 0x493   : > { %v3043_v61 = vpop.f32.mrf.mxu3  ;;  %v3606_v58 = vmul.f32 %v8568_v15, %v3605_v47  ;;  %6004 = vrcp.f32 %v8610_v40  ;;  %vm3598_vm3 = vcmp.eq.f32.partialorder %v3597_v41, 8.507059e+37  ;;  %vm3638_vm13 = vweird.f32 %v8610_v40 }
 0x494   : > { %v8566_v18 = vpop.f32.mrf.mxu2  ;;  %v3044_v59 = vadd.f32 %v3043_v61, %v7702_v24  ;;  %v4063_v24 = vld [vmem:[%s10106_s9] sm:$0xff]  ;;  %v8591_v61 = vpop.f32.mrf.mxu1  ;;  %v3600_v48 = vor.u32 1.1754944e-38, %v3599_v42 }
 0x495   : > { %10506 = vst [vmem:[#allocation187_spill] sm:$0xff] %v8566_v18  ;;  %4086 = vmatpush.msra.mxu2 %v4063_v24  ;;  %v8614_v18 = vpop.eup %6000 }
 0x496   : > { %10509 = vst [vmem:[#allocation188_spill] sm:$0xff] %v8591_v61  ;;  %v8599_v3 = vadd.f32 %v8280_v10, %v3044_v59  ;;  %v3619_v38 = vmul.f32 %v8614_v18, %v8564_v55  ;;  %v3601_v51 = vsel %vm3598_vm3, %v3600_v48, %v3596_v57  ;;  %v6020_v48 = vld [vmem:[%s6514_s26 + $0x8] sm:$0xff]  ;;  %vm3624_vm8 = vweird.f32 %v8614_v18 }
 0x497   : > { %vm8724_vm10 = vmor %vm3623_vm9, %vm3624_vm8 }
 0x498   : > { %5727 = vmatmul.msk.f32.gmra.mxu3 %vm1048_vm0, %v8344_v34  ;;  %v6003_v20 = vpop.eup %6002  ;;  %v6018_v34 = vld [vmem:[%s6514_s26 + $0x100] sm:$0xff]  ;;  %v3620_v42 = vsub.f32 1.0, %v3619_v38 }
 0x499   : > { %5703 = vmatmul.msk.f32.gmra.mxu2 %vm1048_vm0, %v8575_v39 }
 0x49b   : > { %v3046_v2 = vpop.f32.mrf.mxu3 }
 0x49c   : > { %v8612_v59 = vpop.f32.mrf.mxu2  ;;  %v3047_v4 = vadd.f32 %v3046_v2, %v7727_v28  ;;  %v10513_v28 = vld [vmem:[#allocation5_spill] sm:$0xff]  ;;  %v8645_v13 = vpop.f32.mrf.mxu1 }
 0x49d   : > { %10510 = vst [vmem:[#allocation189_spill] sm:$0xff] %v8612_v59 }
 0x49e   : > { %v8648_v47 = vadd.f32 %v8280_v10, %v3047_v4  ;;  %v8664_v10 = vpop.eup %6004  ;;  %v3612_v4 = vand.u32 2147483647, %v8531_v19 }
 0x49f   : > { %vm3639_vm12 = vweird.f32 %v8664_v10 }
 0x4a0   : > { %5728 = vmatmul.msk.f32.gmra.mxu3 %vm1048_vm0, %v8369_v63  ;;  %v5678_v63 = vmul.f32 -1.442695, %v8599_v3  ;;  %vm3613_vm7 = vcmp.eq.f32.partialorder %v3612_v4, 8.507059e+37  ;;  %vm8768_vm14 = vmor %vm3638_vm13, %vm3639_vm12 }
 0x4a1   : > { %5704 = vmatmul.msk.f32.gmra.mxu2 %vm1048_vm0, %v8621_v26 }
 0x4a2   : > { %6006 = vpow2.f32 %v5678_v63  ;;  %v3607_v63 = vadd.f32 %v8568_v15, %v3606_v58 }
 0x4a3   : > { %v3967_v24 = vpop.f32.mrf.mxu3 }
 0x4a4   : > { %v3968_v35 = vadd.f32 %v8607_v21, %v3967_v24  ;;  %v10514_v24 = vld [vmem:[#allocation69_spill] sm:$0xff]  ;;  %v8655_v41 = vpop.f32.mrf.mxu2 }
 0x4a5   : > { %10515 = vst [vmem:[#allocation190_spill] sm:$0xff] %v8655_v41  ;;  %v6021_v41 = vld [vmem:[%s6514_s26 + $0x108] sm:$0xff] }
 0x4a6   : > { %v4568_v2 = vmul.f32 %v3968_v35, %v10513_v28  ;;  %v4600_v59 = vmul.f32 %v3968_v35, %v10514_v24  ;;  %v4632_v29 = vmul.f32 %v3968_v35, %v8433_v53  ;;  %v8653_v35 = vadd.f32 1.0, %v6003_v20  ;;  %v10520_v20 = vld [vmem:[#allocation71_spill] sm:$0xff] }
 0x4a8   : > { %5729 = vmatmul.msk.f32.gmra.mxu3 %vm1048_vm0, %v8399_v43  ;;  %v4664_v12 = vadd.f32 %v6017_v56, %v4568_v2  ;;  %v4696_v28 = vadd.f32 %v6018_v34, %v4600_v59  ;;  %v4728_v24 = vadd.f32 %v6019_v50, %v4632_v29  ;;  %v3614_v50 = vand.u32 2147483648, %v8531_v19  ;;  %v6007_v57 = vpop.eup %6006 }
 0x4a9   : > { %v8671_v59 = vmul.f32 %v3601_v51, %v8442_v49  ;;  %6008 = vrcp.f32 %v8653_v35  ;;  %v10519_v51 = vld [vmem:[#allocation7_spill] sm:$0xff]  ;;  %v3611_v19 = vsel %vm8680_vm6, %v8568_v15, %v3607_v63  ;;  %v3634_v2 = vmul.f32 %v8664_v10, %v8610_v40  ;;  %v6022_v15 = vld [vmem:[%s6514_s26 + $0x208] sm:$0xff] }
 0x4aa   : > { %4760 = vst.msk [vmem:[%s8660_s19] sm:$0xff] %vm1048_vm0, %v4664_v12  ;;  %v5679_v12 = vmul.f32 -1.442695, %v8648_v47  ;;  %v3615_v29 = vor.u32 1.1754944e-38, %v3614_v50  ;;  %v8701_v58 = vadd.f32 1.0, %v6007_v57  ;;  %v8707_v50 = vpop.f32.mrf.mxu1  ;;  %vm3653_vm2 = vweird.f32 %v8653_v35 }
 0x4ab   : > { %v3970_v56 = vpop.f32.mrf.mxu3  ;;  %4792 = vst.msk [vmem:[%s8660_s19 + $0x100] sm:$0xff] %vm1048_vm0, %v4696_v28  ;;  %v3621_v28 = vmul.f32 %v8614_v18, %v3620_v42  ;;  %5705 = vmatmul.msk.f32.gmra.mxu2 %vm1048_vm0, %v8671_v59 }
 0x4ac   : > { %v3971_v34 = vadd.f32 %v8607_v21, %v3970_v56  ;;  %10516 = vst [vmem:[#allocation191_spill] sm:$0xff] %v8671_v59  ;;  %6010 = vpow2.f32 %v5679_v12  ;;  %v3616_v42 = vsel %vm3613_vm7, %v3615_v29, %v3611_v19  ;;  %v3627_v19 = vand.u32 2147483647, %v8564_v55 }
 0x4ad   : > { %4824 = vst.msk [vmem:[%s8660_s19 + $0x200] sm:$0xff] %vm1048_vm0, %v4728_v24  ;;  %6012 = vrcp.f32 %v8701_v58  ;;  %vm3668_vm6 = vweird.f32 %v8701_v58 }
 0x4ae   : > { %v4569_v49 = vmul.f32 %v3971_v34, %v10519_v51  ;;  %v4601_v38 = vmul.f32 %v3971_v34, %v10520_v20  ;;  %v4633_v24 = vmul.f32 %v3971_v34, %v8474_v9  ;;  %v8703_v51 = vpop.f32.mrf.mxu2  ;;  %v3622_v34 = vadd.f32 %v8614_v18, %v3621_v28  ;;  %v10525_v28 = vld [vmem:[#allocation9_spill] sm:$0xff] }
 0x4af   : > { %10521 = vst [vmem:[#allocation71_spill] sm:$0xff] %v8703_v51  ;;  %v8713_v12 = vpop.eup %6008  ;;  %v6024_v51 = vld [vmem:[%s6514_s26 + $0x110] sm:$0xff]  ;;  %vm3628_vm11 = vcmp.eq.f32.partialorder %v3627_v19, 8.507059e+37 }
 0x4b0   : > { %v4665_v56 = vadd.f32 %v6020_v48, %v4569_v49  ;;  %v4697_v43 = vadd.f32 %v6021_v41, %v4601_v38  ;;  %5730 = vmatmul.msk.f32.gmra.mxu3 %vm1048_vm0, %v8427_v7  ;;  %v4729_v63 = vadd.f32 %v6022_v15, %v4633_v24  ;;  %v3635_v41 = vsub.f32 1.0, %v3634_v2  ;;  %v10526_v24 = vld [vmem:[#allocation74_spill] sm:$0xff] }
 0x4b1   : > { %v3629_v49 = vand.u32 2147483648, %v8564_v55  ;;  %v8720_v38 = vmul.f32 %v3616_v42, %v8470_v36  ;;  %v3649_v15 = vmul.f32 %v8713_v12, %v8653_v35  ;;  %v6023_v42 = vld [vmem:[%s6514_s26 + $0x10] sm:$0xff]  ;;  %vm3654_vm1 = vweird.f32 %v8713_v12 }
 0x4b2   : > { %4761 = vst.msk [vmem:[%s8660_s19 + $0x8] sm:$0xff] %vm1048_vm0, %v4665_v56  ;;  %v6011_v36 = vpop.eup %6010  ;;  %v3626_v56 = vsel %vm8724_vm10, %v8614_v18, %v3622_v34  ;;  %v3636_v55 = vmul.f32 %v8664_v10, %v3635_v41  ;;  %v6025_v7 = vld [vmem:[%s6514_s26 + $0x210] sm:$0xff]  ;;  %vm8808_vm3 = vmor %vm3653_vm2, %vm3654_vm1 }
 0x4b3   : > { %4793 = vst.msk [vmem:[%s8660_s19 + $0x108] sm:$0xff] %vm1048_vm0, %v4697_v43  ;;  %v3973_v4 = vpop.f32.mrf.mxu3  ;;  %5706 = vmatmul.msk.f32.gmra.mxu2 %vm1048_vm0, %v8720_v38  ;;  %v8745_v34 = vadd.f32 1.0, %v6011_v36  ;;  %v3650_v43 = vsub.f32 1.0, %v3649_v15  ;;  %v3642_v36 = vand.u32 2147483647, %v8610_v40  ;;  %v10532_v15 = vld [vmem:[#allocation76_spill] sm:$0xff] }
 0x4b4   : > { %4825 = vst.msk [vmem:[%s8660_s19 + $0x208] sm:$0xff] %vm1048_vm0, %v4729_v63  ;;  %v3974_v57 = vadd.f32 %v8607_v21, %v3973_v4  ;;  %v3630_v63 = vor.u32 1.1754944e-38, %v3629_v49  ;;  %v3637_v49 = vadd.f32 %v8664_v10, %v3636_v55 }
 0x4b5   : > { %10522 = vst [vmem:[#allocation192_spill] sm:$0xff] %v8720_v38  ;;  %6014 = vrcp.f32 %v8745_v34  ;;  %vm3643_vm15 = vcmp.eq.f32.partialorder %v3642_v36, 8.507059e+37  ;;  %vm3683_vm10 = vweird.f32 %v8745_v34 }
 0x4b6   : > { %v4570_v2 = vmul.f32 %v3974_v57, %v10525_v28  ;;  %v4602_v29 = vmul.f32 %v3974_v57, %v10526_v24  ;;  %v4634_v48 = vmul.f32 %v3974_v57, %v8508_v6  ;;  %v3631_v18 = vsel %vm3628_vm11, %v3630_v63, %v3626_v56  ;;  %v8747_v41 = vpop.f32.mrf.mxu2 }
 0x4b7   : > { %10527 = vst [vmem:[#allocation9_spill] sm:$0xff] %v8747_v41  ;;  %v6027_v41 = vld [vmem:[%s6514_s26 + $0x118] sm:$0xff] }
 0x4b8   : > { %v4666_v4 = vadd.f32 %v6023_v42, %v4570_v2  ;;  %v4698_v57 = vadd.f32 %v6024_v51, %v4602_v29  ;;  %v4730_v6 = vadd.f32 %v6025_v7, %v4634_v48  ;;  %5731 = vmatmul.msk.f32.gmra.mxu3 %vm1048_vm0, %v8458_v14  ;;  %v8755_v7 = vpop.eup %6012  ;;  %v3644_v2 = vand.u32 2147483648, %v8610_v40  ;;  %v8761_v29 = vpop.f32.mrf.mxu1  ;;  %v6028_v14 = vld [vmem:[%s6514_s26 + $0x218] sm:$0xff] }
 0x4b9   : > { %v8764_v48 = vmul.f32 %v3631_v18, %v8504_v25  ;;  %v3641_v25 = vsel %vm8768_vm14, %v8664_v10, %v3637_v49  ;;  %v3664_v40 = vmul.f32 %v8755_v7, %v8701_v58  ;;  %v6026_v18 = vld [vmem:[%s6514_s26 + $0x18] sm:$0xff]  ;;  %vm3669_vm5 = vweird.f32 %v8755_v7 }
 0x4ba   : > { %4762 = vst.msk [vmem:[%s8660_s19 + $0x10] sm:$0xff] %vm1048_vm0, %v4666_v4  ;;  %v3651_v4 = vmul.f32 %v8713_v12, %v3650_v43  ;;  %vm8847_vm7 = vmor %vm3668_vm6, %vm3669_vm5 }
 0x4bb   : > { %4794 = vst.msk [vmem:[%s8660_s19 + $0x110] sm:$0xff] %vm1048_vm0, %v4698_v57  ;;  %v3976_v51 = vpop.f32.mrf.mxu3  ;;  %5707 = vmatmul.msk.f32.gmra.mxu2 %vm1048_vm0, %v8764_v48  ;;  %v3645_v57 = vor.u32 1.1754944e-38, %v3644_v2  ;;  %v3665_v2 = vsub.f32 1.0, %v3664_v40  ;;  %v10538_v40 = vld [vmem:[#allocation78_spill] sm:$0xff] }
 0x4bc   : > { %4826 = vst.msk [vmem:[%s8660_s19 + $0x210] sm:$0xff] %vm1048_vm0, %v4730_v6  ;;  %v3977_v19 = vadd.f32 %v8607_v21, %v3976_v51  ;;  %v10531_v6 = vld [vmem:[#allocation11_spill] sm:$0xff]  ;;  %v3652_v43 = vadd.f32 %v8713_v12, %v3651_v4 }
 0x4bd   : > { %10528 = vst [vmem:[#allocation74_spill] sm:$0xff] %v8764_v48  ;;  %v3646_v10 = vsel %vm3643_vm15, %v3645_v57, %v3641_v25  ;;  %v10537_v25 = vld [vmem:[#allocation13_spill] sm:$0xff] }
 0x4be   : > { %v4571_v55 = vmul.f32 %v3977_v19, %v10531_v6  ;;  %v4603_v63 = vmul.f32 %v3977_v19, %v10532_v15  ;;  %v4635_v42 = vmul.f32 %v3977_v19, %v8545_v60  ;;  %v8789_v49 = vpop.f32.mrf.mxu2 }
 0x4bf   : > { %10533 = vst [vmem:[#allocation11_spill] sm:$0xff] %v8789_v49 }
 0x4c0   : > { %v4667_v51 = vadd.f32 %v6026_v18, %v4571_v55  ;;  %v4699_v19 = vadd.f32 %v6027_v41, %v4603_v63  ;;  %v4731_v60 = vadd.f32 %v6028_v14, %v4635_v42  ;;  %5732 = vmatmul.msk.f32.gmra.mxu3 %vm1048_vm0, %v8487_v30  ;;  %v8797_v41 = vpop.eup %6014  ;;  %v3659_v14 = vand.u32 2147483648, %v8653_v35  ;;  %v8815_v18 = vpop.f32.mrf.mxu1  ;;  %v6031_v30 = vld [vmem:[%s6514_s26 + $0x220] sm:$0xff] }
 0x4c1   : > { %v8804_v55 = vmul.f32 %v3646_v10, %v8534_v8  ;;  %v3657_v63 = vand.u32 2147483647, %v8653_v35  ;;  %v3656_v8 = vsel %vm8808_vm3, %v8713_v12, %v3652_v43  ;;  %v3679_v35 = vmul.f32 %v8797_v41, %v8745_v34  ;;  %v6029_v10 = vld [vmem:[%s6514_s26 + $0x20] sm:$0xff] }
 0x4c2   : > { %4763 = vst.msk [vmem:[%s8660_s19 + $0x18] sm:$0xff] %vm1048_vm0, %v4667_v51  ;;  %v3666_v51 = vmul.f32 %v8755_v7, %v3665_v2  ;;  %vm3684_vm9 = vweird.f32 %v8797_v41 }
 0x4c3   : > { %4795 = vst.msk [vmem:[%s8660_s19 + $0x118] sm:$0xff] %vm1048_vm0, %v4699_v19  ;;  %v3979_v56 = vpop.f32.mrf.mxu3  ;;  %5708 = vmatmul.msk.f32.gmra.mxu2 %vm1048_vm0, %v8804_v55  ;;  %v3660_v19 = vor.u32 1.1754944e-38, %v3659_v14  ;;  %vm3658_vm4 = vcmp.eq.f32.partialorder %v3657_v63, 8.507059e+37  ;;  %v3680_v14 = vsub.f32 1.0, %v3679_v35  ;;  %vm8884_vm11 = vmor %vm3683_vm10, %vm3684_vm9 }
 0x4c4   : > { %4827 = vst.msk [vmem:[%s8660_s19 + $0x218] sm:$0xff] %vm1048_vm0, %v4731_v60  ;;  %v3980_v36 = vadd.f32 %v8607_v21, %v3979_v56  ;;  %v3667_v2 = vadd.f32 %v8755_v7, %v3666_v51  ;;  %v10544_v51 = vld [vmem:[#allocation80_spill] sm:$0xff] }
 0x4c5   : > { %10534 = vst [vmem:[#allocation76_spill] sm:$0xff] %v8804_v55  ;;  %v3661_v12 = vsel %vm3658_vm4, %v3660_v19, %v3656_v8  ;;  %v3681_v19 = vmul.f32 %v8797_v41, %v3680_v14 }
 0x4c6   : > { %v4572_v4 = vmul.f32 %v3980_v36, %v10537_v25  ;;  %v4604_v57 = vmul.f32 %v3980_v36, %v10538_v40  ;;  %v4636_v60 = vmul.f32 %v3980_v36, %v8591_v61  ;;  %v6030_v36 = vld [vmem:[%s6514_s26 + $0x120] sm:$0xff]  ;;  %v8830_v43 = vpop.f32.mrf.mxu2 }
 0x4c7   : > { %10539 = vst [vmem:[#allocation13_spill] sm:$0xff] %v8830_v43  ;;  %v3682_v14 = vadd.f32 %v8797_v41, %v3681_v19 }
 0x4c8   : > { %v4668_v56 = vadd.f32 %v6029_v10, %v4572_v4  ;;  %v4700_v49 = vadd.f32 %v6030_v36, %v4604_v57  ;;  %v4732_v61 = vadd.f32 %v6031_v30, %v4636_v60  ;;  %5733 = vmatmul.msk.f32.gmra.mxu3 %vm1048_vm0, %v8518_v32  ;;  %v3674_v30 = vand.u32 2147483648, %v8701_v58  ;;  %v6032_v10 = vld [vmem:[%s6514_s26 + $0x28] sm:$0xff] }
 0x4c9   : > { %v8843_v4 = vmul.f32 %v3661_v12, %v8562_v62  ;;  %v3672_v57 = vand.u32 2147483647, %v8701_v58  ;;  %v3671_v62 = vsel %vm8847_vm7, %v8755_v7, %v3667_v2  ;;  %v6033_v36 = vld [vmem:[%s6514_s26 + $0x128] sm:$0xff]  ;;  %v3689_v60 = vand.u32 2147483648, %v8745_v34 }
 0x4ca   : > { %4764 = vst.msk [vmem:[%s8660_s19 + $0x20] sm:$0xff] %vm1048_vm0, %v4668_v56  ;;  %v3675_v58 = vor.u32 1.1754944e-38, %v3674_v30 }
 0x4cb   : > { %4796 = vst.msk [vmem:[%s8660_s19 + $0x120] sm:$0xff] %vm1048_vm0, %v4700_v49  ;;  %v3982_v42 = vpop.f32.mrf.mxu3  ;;  %v10543_v49 = vld [vmem:[#allocation15_spill] sm:$0xff]  ;;  %5709 = vmatmul.msk.f32.gmra.mxu2 %vm1048_vm0, %v8843_v4  ;;  %vm3673_vm8 = vcmp.eq.f32.partialorder %v3672_v57, 8.507059e+37 }
 0x4cc   : > { %4828 = vst.msk [vmem:[%s8660_s19 + $0x220] sm:$0xff] %vm1048_vm0, %v4732_v61  ;;  %v3983_v63 = vadd.f32 %v8607_v21, %v3982_v42  ;;  %v6034_v42 = vld [vmem:[%s6514_s26 + $0x228] sm:$0xff]  ;;  %v3676_v7 = vsel %vm3673_vm8, %v3675_v58, %v3671_v62  ;;  %v10550_v58 = vld [vmem:[#allocation83_spill] sm:$0xff] }
 0x4cd   : > { %10540 = vst [vmem:[#allocation78_spill] sm:$0xff] %v8843_v4  ;;  %v10549_v62 = vld [vmem:[#allocation17_spill] sm:$0xff] }
 0x4ce   : > { %v4573_v8 = vmul.f32 %v3983_v63, %v10543_v49  ;;  %v4605_v35 = vmul.f32 %v3983_v63, %v10544_v51  ;;  %v4637_v61 = vmul.f32 %v3983_v63, %v8645_v13  ;;  %v8865_v63 = vpop.f32.mrf.mxu1  ;;  %v8867_v2 = vpop.f32.mrf.mxu2 }
 0x4cf   : > { %10545 = vst [vmem:[#allocation15_spill] sm:$0xff] %v8867_v2  ;;  %v6046_v2 = vld [vmem:[%s6514_s26 + $0x248] sm:$0xff] }
 0x4d0   : > { %v4669_v56 = vadd.f32 %v6032_v10, %v4573_v8  ;;  %v4701_v12 = vadd.f32 %v6033_v36, %v4605_v35  ;;  %v4733_v43 = vadd.f32 %v6034_v42, %v4637_v61  ;;  %5734 = vmatmul.msk.f32.gmra.mxu3 %vm1048_vm0, %v8548_v37  ;;  %v8880_v8 = vmul.f32 %v3676_v7, %v8599_v3  ;;  %v6037_v7 = vld [vmem:[%s6514_s26 + $0x230] sm:$0xff] }
 0x4d1   : > { %v3687_v35 = vand.u32 2147483647, %v8745_v34  ;;  %v3686_v3 = vsel %vm8884_vm11, %v8797_v41, %v3682_v14  ;;  %v3690_v34 = vor.u32 1.1754944e-38, %v3689_v60 }
 0x4d2   : > { %4765 = vst.msk [vmem:[%s8660_s19 + $0x28] sm:$0xff] %vm1048_vm0, %v4669_v56  ;;  %v6035_v56 = vld [vmem:[%s6514_s26 + $0x30] sm:$0xff] }
 0x4d3   : > { %4797 = vst.msk [vmem:[%s8660_s19 + $0x128] sm:$0xff] %vm1048_vm0, %v4701_v12  ;;  %v3985_v30 = vpop.f32.mrf.mxu3  ;;  %5710 = vmatmul.msk.f32.gmra.mxu2 %vm1048_vm0, %v8880_v8  ;;  %v6036_v12 = vld [vmem:[%s6514_s26 + $0x130] sm:$0xff]  ;;  %vm3688_vm12 = vcmp.eq.f32.partialorder %v3687_v35, 8.507059e+37 }
 0x4d4   : > { %4829 = vst.msk [vmem:[%s8660_s19 + $0x228] sm:$0xff] %vm1048_vm0, %v4733_v43  ;;  %v3986_v57 = vadd.f32 %v8607_v21, %v3985_v30 }
 0x4d5   : > { %10546 = vst [vmem:[#allocation80_spill] sm:$0xff] %v8880_v8 }
 0x4d6   : > { %v4574_v19 = vmul.f32 %v3986_v57, %v10549_v62  ;;  %v4606_v10 = vmul.f32 %v3986_v57, %v10550_v58  ;;  %v4638_v43 = vmul.f32 %v3986_v57, %v8707_v50  ;;  %v3691_v57 = vsel %vm3688_vm12, %v3690_v34, %v3686_v3  ;;  %v8901_v61 = vpop.f32.mrf.mxu2  ;;  %v8905_v41 = vpop.f32.mrf.mxu1 }
 0x4d7   : > { %10551 = vst [vmem:[#allocation17_spill] sm:$0xff] %v8901_v61  ;;  %v8913_v35 = vmul.f32 %v3691_v57, %v8648_v47 }
 0x4d8   : > { %v4670_v36 = vadd.f32 %v6035_v56, %v4574_v19  ;;  %v4702_v42 = vadd.f32 %v6036_v12, %v4606_v10  ;;  %v4734_v30 = vadd.f32 %v6037_v7, %v4638_v43  ;;  %5735 = vmatmul.msk.f32.gmra.mxu3 %vm1048_vm0, %v8575_v39  ;;  %v10553_v19 = vld [vmem:[#allocation19_spill] sm:$0xff]  ;;  %v10554_v43 = vld [vmem:[#allocation85_spill] sm:$0xff] }
 0x4d9   : > { %10552 = vst [vmem:[#allocation83_spill] sm:$0xff] %v8913_v35  ;;  %v6038_v56 = vld [vmem:[%s6514_s26 + $0x38] sm:$0xff] }
 0x4da   : > { %4766 = vst.msk [vmem:[%s8660_s19 + $0x30] sm:$0xff] %vm1048_vm0, %v4670_v36  ;;  %v6039_v12 = vld [vmem:[%s6514_s26 + $0x138] sm:$0xff] }
 0x4db   : > { %4798 = vst.msk [vmem:[%s8660_s19 + $0x130] sm:$0xff] %vm1048_vm0, %v4702_v42  ;;  %v3988_v14 = vpop.f32.mrf.mxu3  ;;  %5711 = vmatmul.msk.f32.gmra.mxu2 %vm1048_vm0, %v8913_v35  ;;  %v6040_v7 = vld [vmem:[%s6514_s26 + $0x238] sm:$0xff] }
 0x4dc   : > { %4830 = vst.msk [vmem:[%s8660_s19 + $0x230] sm:$0xff] %vm1048_vm0, %v4734_v30  ;;  %v3989_v60 = vadd.f32 %v8607_v21, %v3988_v14 }
 0x4de   : > { %v4575_v10 = vmul.f32 %v3989_v60, %v10553_v19  ;;  %v4607_v3 = vmul.f32 %v3989_v60, %v10554_v43  ;;  %v4639_v34 = vmul.f32 %v3989_v60, %v8761_v29  ;;  %v8925_v47 = vpop.f32.mrf.mxu2  ;;  %v8934_v60 = vpop.f32.mrf.mxu1 }
 0x4df   : > { %10555 = vst [vmem:[#allocation19_spill] sm:$0xff] %v8925_v47  ;;  %v6043_v47 = vld [vmem:[%s6514_s26 + $0x240] sm:$0xff] }
 0x4e0   : > { %v4671_v36 = vadd.f32 %v6038_v56, %v4575_v10  ;;  %v4703_v42 = vadd.f32 %v6039_v12, %v4607_v3  ;;  %v4735_v30 = vadd.f32 %v6040_v7, %v4639_v34  ;;  %5736 = vmatmul.msk.f32.gmra.mxu3 %vm1048_vm0, %v8621_v26  ;;  %10556 = vst [vmem:[#allocation85_spill] sm:$0xff] %v8934_v60  ;;  %v10557_v10 = vld [vmem:[#allocation21_spill] sm:$0xff]  ;;  %v10558_v34 = vld [vmem:[#allocation87_spill] sm:$0xff]  ;;  %v6042_v7 = vld [vmem:[%s6514_s26 + $0x140] sm:$0xff] }
 0x4e2   : > { %4767 = vst.msk [vmem:[%s8660_s19 + $0x38] sm:$0xff] %vm1048_vm0, %v4671_v36  ;;  %v6041_v36 = vld [vmem:[%s6514_s26 + $0x40] sm:$0xff] }
 0x4e3   : > { %4799 = vst.msk [vmem:[%s8660_s19 + $0x138] sm:$0xff] %vm1048_vm0, %v4703_v42  ;;  %v3991_v57 = vpop.f32.mrf.mxu3  ;;  %5744 = vmatmul.msk.f32.vlgmr.msra.gmra.mxu2 %vm1048_vm0, %v7946_v5 }
 0x4e4   : > { %4831 = vst.msk [vmem:[%s8660_s19 + $0x238] sm:$0xff] %vm1048_vm0, %v4735_v30  ;;  %v3992_v14 = vadd.f32 %v8607_v21, %v3991_v57 }
 0x4e6   : > { %v4576_v3 = vmul.f32 %v3992_v14, %v10557_v10  ;;  %v4608_v56 = vmul.f32 %v3992_v14, %v10558_v34  ;;  %v4640_v12 = vmul.f32 %v3992_v14, %v8815_v18  ;;  %v8946_v61 = vpop.f32.mrf.mxu2 }
 0x4e7   : > { %10559 = vst [vmem:[#allocation21_spill] sm:$0xff] %v8946_v61  ;;  %v6045_v61 = vld [vmem:[%s6514_s26 + $0x148] sm:$0xff] }
 0x4e8   : > { %v4672_v42 = vadd.f32 %v6041_v36, %v4576_v3  ;;  %v4704_v30 = vadd.f32 %v6042_v7, %v4608_v56  ;;  %v4736_v57 = vadd.f32 %v6043_v47, %v4640_v12  ;;  %5737 = vmatmul.msk.f32.gmra.mxu3 %vm1048_vm0, %v8671_v59  ;;  %v10560_v3 = vld [vmem:[#allocation23_spill] sm:$0xff]  ;;  %v10561_v47 = vld [vmem:[#allocation89_spill] sm:$0xff]  ;;  %v8958_v7 = vpop.f32.mrf.mxu1 }
 0x4ea   : > { %4768 = vst.msk [vmem:[%s8660_s19 + $0x40] sm:$0xff] %vm1048_vm0, %v4672_v42  ;;  %v6044_v42 = vld [vmem:[%s6514_s26 + $0x48] sm:$0xff] }
 0x4eb   : > { %4800 = vst.msk [vmem:[%s8660_s19 + $0x140] sm:$0xff] %vm1048_vm0, %v4704_v30  ;;  %v3994_v14 = vpop.f32.mrf.mxu3  ;;  %5745 = vmatmul.msk.f32.gmra.mxu2 %vm1048_vm0, %v7971_v17 }
 0x4ec   : > { %4832 = vst.msk [vmem:[%s8660_s19 + $0x240] sm:$0xff] %vm1048_vm0, %v4736_v57  ;;  %v3995_v5 = vadd.f32 %v8607_v21, %v3994_v14 }
 0x4ee   : > { %v4577_v56 = vmul.f32 %v3995_v5, %v10560_v3  ;;  %v4609_v12 = vmul.f32 %v3995_v5, %v10561_v47  ;;  %v4641_v36 = vmul.f32 %v3995_v5, %v8865_v63  ;;  %v8967_v59 = vpop.f32.mrf.mxu2 }
 0x4ef   : > { %10562 = vst [vmem:[#allocation87_spill] sm:$0xff] %v8967_v59 }
 0x4f0   : > { %v4673_v30 = vadd.f32 %v6044_v42, %v4577_v56  ;;  %v4705_v57 = vadd.f32 %v6045_v61, %v4609_v12  ;;  %v4737_v14 = vadd.f32 %v6046_v2, %v4641_v36  ;;  %5738 = vmatmul.msk.f32.gmra.mxu3 %vm1048_vm0, %v8720_v38  ;;  %v10563_v61 = vld [vmem:[#allocation25_spill] sm:$0xff]  ;;  %v10564_v2 = vld [vmem:[#allocation92_spill] sm:$0xff]  ;;  %v6047_v42 = vld [vmem:[%s6514_s26 + $0x50] sm:$0xff] }
 0x4f1   : > { %v6049_v38 = vld [vmem:[%s6514_s26 + $0x250] sm:$0xff] }
 0x4f2   : > { %4769 = vst.msk [vmem:[%s8660_s19 + $0x48] sm:$0xff] %vm1048_vm0, %v4673_v30 }
 0x4f3   : > { %4801 = vst.msk [vmem:[%s8660_s19 + $0x148] sm:$0xff] %vm1048_vm0, %v4705_v57  ;;  %v3997_v5 = vpop.f32.mrf.mxu3  ;;  %5746 = vmatmul.msk.f32.gmra.mxu2 %vm1048_vm0, %v7996_v22  ;;  %v6048_v57 = vld [vmem:[%s6514_s26 + $0x150] sm:$0xff] }
 0x4f4   : > { %4833 = vst.msk [vmem:[%s8660_s19 + $0x248] sm:$0xff] %vm1048_vm0, %v4737_v14  ;;  %v3998_v17 = vadd.f32 %v8607_v21, %v3997_v5  ;;  %v8986_v5 = vpop.f32.mrf.mxu1 }
 0x4f6   : > { %v4578_v56 = vmul.f32 %v3998_v17, %v10563_v61  ;;  %v4610_v12 = vmul.f32 %v3998_v17, %v10564_v2  ;;  %v4642_v36 = vmul.f32 %v3998_v17, %v8905_v41  ;;  %v8988_v61 = vpop.f32.mrf.mxu2 }
 0x4f7   : > { %10565 = vst [vmem:[#allocation23_spill] sm:$0xff] %v8988_v61 }
 0x4f8   : > { %v4674_v30 = vadd.f32 %v6047_v42, %v4578_v56  ;;  %v4706_v59 = vadd.f32 %v6048_v57, %v4610_v12  ;;  %v4738_v14 = vadd.f32 %v6049_v38, %v4642_v36  ;;  %5739 = vmatmul.msk.f32.gmra.mxu3 %vm1048_vm0, %v8764_v48  ;;  %v10566_v38 = vld [vmem:[#allocation27_spill] sm:$0xff]  ;;  %v10567_v12 = vld [vmem:[#allocation94_spill] sm:$0xff] }
 0x4f9   : > { %v6052_v48 = vld [vmem:[%s6514_s26 + $0x258] sm:$0xff] }
 0x4fa   : > { %4770 = vst.msk [vmem:[%s8660_s19 + $0x50] sm:$0xff] %vm1048_vm0, %v4674_v30  ;;  %v6050_v30 = vld [vmem:[%s6514_s26 + $0x58] sm:$0xff] }
 0x4fb   : > { %4802 = vst.msk [vmem:[%s8660_s19 + $0x150] sm:$0xff] %vm1048_vm0, %v4706_v59  ;;  %v4000_v22 = vpop.f32.mrf.mxu3  ;;  %5747 = vmatmul.msk.f32.gmra.mxu2 %vm1048_vm0, %v8021_v33  ;;  %v6051_v59 = vld [vmem:[%s6514_s26 + $0x158] sm:$0xff] }
 0x4fc   : > { %4834 = vst.msk [vmem:[%s8660_s19 + $0x250] sm:$0xff] %vm1048_vm0, %v4738_v14  ;;  %v4001_v17 = vadd.f32 %v8607_v21, %v4000_v22 }
 0x4fe   : > { %v4579_v56 = vmul.f32 %v4001_v17, %v10566_v38  ;;  %v4611_v36 = vmul.f32 %v4001_v17, %v10567_v12  ;;  %v4643_v42 = vmul.f32 %v4001_v17, %v8934_v60  ;;  %v9007_v22 = vpop.f32.mrf.mxu2  ;;  %v9011_v17 = vpop.f32.mrf.mxu1  ;;  %v6055_v60 = vld [vmem:[%s6514_s26 + $0x260] sm:$0xff] }
 0x4ff   : > { %10568 = vst [vmem:[#allocation89_spill] sm:$0xff] %v9007_v22 }
 0x500   : > { %v4675_v57 = vadd.f32 %v6050_v30, %v4579_v56  ;;  %v4707_v61 = vadd.f32 %v6051_v59, %v4611_v36  ;;  %v4739_v14 = vadd.f32 %v6052_v48, %v4643_v42  ;;  %5740 = vmatmul.msk.f32.gmra.mxu3 %vm1048_vm0, %v8804_v55  ;;  %10569 = vst [vmem:[#allocation92_spill] sm:$0xff] %v9011_v17  ;;  %v10570_v48 = vld [vmem:[#allocation29_spill] sm:$0xff]  ;;  %v10571_v42 = vld [vmem:[#allocation96_spill] sm:$0xff] }
 0x502   : > { %4771 = vst.msk [vmem:[%s8660_s19 + $0x58] sm:$0xff] %vm1048_vm0, %v4675_v57  ;;  %v6053_v57 = vld [vmem:[%s6514_s26 + $0x60] sm:$0xff] }
 0x503   : > { %4803 = vst.msk [vmem:[%s8660_s19 + $0x158] sm:$0xff] %vm1048_vm0, %v4707_v61  ;;  %v4003_v33 = vpop.f32.mrf.mxu3  ;;  %5748 = vmatmul.msk.f32.gmra.mxu2 %vm1048_vm0, %v8049_v44  ;;  %v6054_v61 = vld [vmem:[%s6514_s26 + $0x160] sm:$0xff] }
 0x504   : > { %4835 = vst.msk [vmem:[%s8660_s19 + $0x258] sm:$0xff] %vm1048_vm0, %v4739_v14  ;;  %v4004_v56 = vadd.f32 %v8607_v21, %v4003_v33 }
 0x506   : > { %v4580_v36 = vmul.f32 %v4004_v56, %v10570_v48  ;;  %v4612_v30 = vmul.f32 %v4004_v56, %v10571_v42  ;;  %v4644_v59 = vmul.f32 %v4004_v56, %v8958_v7  ;;  %v9028_v33 = vpop.f32.mrf.mxu2 }
 0x507   : > { %10572 = vst [vmem:[#allocation27_spill] sm:$0xff] %v9028_v33  ;;  %v6057_v33 = vld [vmem:[%s6514_s26 + $0x168] sm:$0xff] }
 0x508   : > { %v4676_v22 = vadd.f32 %v6053_v57, %v4580_v36  ;;  %v4708_v55 = vadd.f32 %v6054_v61, %v4612_v30  ;;  %v4740_v14 = vadd.f32 %v6055_v60, %v4644_v59  ;;  %5741 = vmatmul.msk.f32.gmra.mxu3 %vm1048_vm0, %v8843_v4  ;;  %v9037_v36 = vpop.f32.mrf.mxu1  ;;  %v10574_v60 = vld [vmem:[#allocation31_spill] sm:$0xff]  ;;  %v10575_v59 = vld [vmem:[#allocation98_spill] sm:$0xff]  ;;  %v6058_v4 = vld [vmem:[%s6514_s26 + $0x268] sm:$0xff] }
 0x509   : > { %10573 = vst [vmem:[#allocation94_spill] sm:$0xff] %v9037_v36 }
 0x50a   : > { %4772 = vst.msk [vmem:[%s8660_s19 + $0x60] sm:$0xff] %vm1048_vm0, %v4676_v22 }
 0x50b   : > { %4804 = vst.msk [vmem:[%s8660_s19 + $0x160] sm:$0xff] %vm1048_vm0, %v4708_v55  ;;  %v4006_v56 = vpop.f32.mrf.mxu3  ;;  %5749 = vmatmul.msk.f32.gmra.mxu2 %vm1048_vm0, %v8086_v23  ;;  %v6056_v55 = vld [vmem:[%s6514_s26 + $0x68] sm:$0xff] }
 0x50c   : > { %4836 = vst.msk [vmem:[%s8660_s19 + $0x260] sm:$0xff] %vm1048_vm0, %v4740_v14  ;;  %v4007_v44 = vadd.f32 %v8607_v21, %v4006_v56 }
 0x50e   : > { %v4581_v30 = vmul.f32 %v4007_v44, %v10574_v60  ;;  %v4613_v57 = vmul.f32 %v4007_v44, %v10575_v59  ;;  %v4645_v61 = vmul.f32 %v4007_v44, %v8986_v5  ;;  %v9049_v60 = vpop.f32.mrf.mxu2 }
 0x50f   : > { %10576 = vst [vmem:[#allocation29_spill] sm:$0xff] %v9049_v60  ;;  %v6060_v60 = vld [vmem:[%s6514_s26 + $0x170] sm:$0xff] }
 0x510   : > { %v4677_v22 = vadd.f32 %v6056_v55, %v4581_v30  ;;  %v4709_v14 = vadd.f32 %v6057_v33, %v4613_v57  ;;  %v4741_v56 = vadd.f32 %v6058_v4, %v4645_v61  ;;  %5742 = vmatmul.msk.f32.gmra.mxu3 %vm1048_vm0, %v8880_v8  ;;  %v10577_v33 = vld [vmem:[#allocation33_spill] sm:$0xff]  ;;  %v9061_v55 = vpop.f32.mrf.mxu1  ;;  %v6061_v8 = vld [vmem:[%s6514_s26 + $0x270] sm:$0xff] }
 0x511   : > { %v10578_v4 = vld [vmem:[#allocation101_spill] sm:$0xff]  ;;  %10579 = vst [vmem:[#allocation96_spill] sm:$0xff] %v9061_v55 }
 0x512   : > { %4773 = vst.msk [vmem:[%s8660_s19 + $0x68] sm:$0xff] %vm1048_vm0, %v4677_v22  ;;  %v6059_v22 = vld [vmem:[%s6514_s26 + $0x70] sm:$0xff] }
 0x513   : > { %4805 = vst.msk [vmem:[%s8660_s19 + $0x168] sm:$0xff] %vm1048_vm0, %v4709_v14  ;;  %v4009_v44 = vpop.f32.mrf.mxu3  ;;  %5750 = vmatmul.msk.f32.gmra.mxu2 %vm1048_vm0, %v8111_v1 }
 0x514   : > { %4837 = vst.msk [vmem:[%s8660_s19 + $0x268] sm:$0xff] %vm1048_vm0, %v4741_v56  ;;  %v4010_v23 = vadd.f32 %v8607_v21, %v4009_v44 }
 0x516   : > { %v4582_v30 = vmul.f32 %v4010_v23, %v10577_v33  ;;  %v4614_v57 = vmul.f32 %v4010_v23, %v10578_v4  ;;  %v4646_v61 = vmul.f32 %v4010_v23, %v9011_v17  ;;  %v9070_v33 = vpop.f32.mrf.mxu2  ;;  %v10581_v23 = vld [vmem:[#allocation35_spill] sm:$0xff] }
 0x517   : > { %10580 = vst [vmem:[#allocation98_spill] sm:$0xff] %v9070_v33 }
 0x518   : > { %v4678_v14 = vadd.f32 %v6059_v22, %v4582_v30  ;;  %v4710_v56 = vadd.f32 %v6060_v60, %v4614_v57  ;;  %v4742_v44 = vadd.f32 %v6061_v8, %v4646_v61  ;;  %5743 = vmatmul.msk.f32.gmra.mxu3 %vm1048_vm0, %v8913_v35  ;;  %v10582_v30 = vld [vmem:[#allocation103_spill] sm:$0xff] }
 0x519   : > { %v6062_v22 = vld [vmem:[%s6514_s26 + $0x78] sm:$0xff] }
 0x51a   : > { %4774 = vst.msk [vmem:[%s8660_s19 + $0x70] sm:$0xff] %vm1048_vm0, %v4678_v14  ;;  %v6064_v35 = vld [vmem:[%s6514_s26 + $0x278] sm:$0xff] }
 0x51b   : > { %4806 = vst.msk [vmem:[%s8660_s19 + $0x170] sm:$0xff] %vm1048_vm0, %v4710_v56  ;;  %v4012_v1 = vpop.f32.mrf.mxu3  ;;  %5751 = vmatmul.msk.f32.gmra.mxu2 %vm1048_vm0, %v8139_v16  ;;  %v6063_v56 = vld [vmem:[%s6514_s26 + $0x178] sm:$0xff] }
 0x51c   : > { %4838 = vst.msk [vmem:[%s8660_s19 + $0x270] sm:$0xff] %vm1048_vm0, %v4742_v44  ;;  %v4013_v60 = vadd.f32 %v8607_v21, %v4012_v1  ;;  %v9087_v1 = vpop.f32.mrf.mxu1 }
 0x51d   : > { %10583 = vst [vmem:[#allocation101_spill] sm:$0xff] %v9087_v1 }
 0x51e   : > { %v4583_v8 = vmul.f32 %v4013_v60, %v10581_v23  ;;  %v4615_v57 = vmul.f32 %v4013_v60, %v10582_v30  ;;  %v4647_v61 = vmul.f32 %v4013_v60, %v9037_v36  ;;  %v9089_v17 = vpop.f32.mrf.mxu2  ;;  %v6067_v36 = vld [vmem:[%s6514_s26 + $0x280] sm:$0xff] }
 0x51f   : > { %10584 = vst [vmem:[#allocation35_spill] sm:$0xff] %v9089_v17 }
 0x520   : > { %v4679_v14 = vadd.f32 %v6062_v22, %v4583_v8  ;;  %v4711_v33 = vadd.f32 %v6063_v56, %v4615_v57  ;;  %v4743_v44 = vadd.f32 %v6064_v35, %v4647_v61  ;;  %v10585_v8 = vld [vmem:[#allocation37_spill] sm:$0xff] }
 0x521   : > { %v10586_v35 = vld [vmem:[#allocation105_spill] sm:$0xff] }
 0x522   : > { %4775 = vst.msk [vmem:[%s8660_s19 + $0x78] sm:$0xff] %vm1048_vm0, %v4679_v14  ;;  %v6065_v14 = vld [vmem:[%s6514_s26 + $0x80] sm:$0xff] }
 0x523   : > { %4807 = vst.msk [vmem:[%s8660_s19 + $0x178] sm:$0xff] %vm1048_vm0, %v4711_v33  ;;  %v4015_v60 = vpop.f32.mrf.mxu3  ;;  %5752 = vmatmul.msk.f32.gmra.mxu2 %vm1048_vm0, %v8164_v46  ;;  %v6066_v33 = vld [vmem:[%s6514_s26 + $0x180] sm:$0xff] }
 0x524   : > { %4839 = vst.msk [vmem:[%s8660_s19 + $0x278] sm:$0xff] %vm1048_vm0, %v4743_v44  ;;  %v4016_v16 = vadd.f32 %v8607_v21, %v4015_v60 }
 0x526   : > { %v4584_v57 = vmul.f32 %v4016_v16, %v10585_v8  ;;  %v4616_v61 = vmul.f32 %v4016_v16, %v10586_v35  ;;  %v4648_v22 = vmul.f32 %v4016_v16, %v9061_v55  ;;  %v9106_v60 = vpop.f32.mrf.mxu2  ;;  %v9110_v8 = vpop.f32.mrf.mxu1  ;;  %v6070_v55 = vld [vmem:[%s6514_s26 + $0x288] sm:$0xff] }
 0x527   : > { %10587 = vst [vmem:[#allocation103_spill] sm:$0xff] %v9106_v60 }
 0x528   : > { %v4680_v56 = vadd.f32 %v6065_v14, %v4584_v57  ;;  %v4712_v17 = vadd.f32 %v6066_v33, %v4616_v61  ;;  %v4744_v44 = vadd.f32 %v6067_v36, %v4648_v22  ;;  %10588 = vst [vmem:[#allocation193_spill] sm:$0xff] %v9110_v8  ;;  %v10589_v57 = vld [vmem:[#allocation39_spill] sm:$0xff] }
 0x529   : > { %v10590_v36 = vld [vmem:[#allocation107_spill] sm:$0xff] }
 0x52a   : > { %4776 = vst.msk [vmem:[%s8660_s19 + $0x80] sm:$0xff] %vm1048_vm0, %v4680_v56  ;;  %v6068_v56 = vld [vmem:[%s6514_s26 + $0x88] sm:$0xff] }
 0x52b   : > { %4808 = vst.msk [vmem:[%s8660_s19 + $0x180] sm:$0xff] %vm1048_vm0, %v4712_v17  ;;  %v4018_v46 = vpop.f32.mrf.mxu3  ;;  %5753 = vmatmul.msk.f32.gmra.mxu2 %vm1048_vm0, %v8189_v0  ;;  %v6069_v17 = vld [vmem:[%s6514_s26 + $0x188] sm:$0xff] }
 0x52c   : > { %4840 = vst.msk [vmem:[%s8660_s19 + $0x280] sm:$0xff] %vm1048_vm0, %v4744_v44  ;;  %v4019_v16 = vadd.f32 %v8607_v21, %v4018_v46 }
 0x52e   : > { %v4585_v61 = vmul.f32 %v4019_v16, %v10589_v57  ;;  %v4617_v22 = vmul.f32 %v4019_v16, %v10590_v36  ;;  %v4649_v14 = vmul.f32 %v4019_v16, %v9087_v1  ;;  %v9125_v35 = vpop.f32.mrf.mxu2  ;;  %v9134_v16 = vpop.f32.mrf.mxu1 }
 0x52f   : > { %10591 = vst [vmem:[#allocation39_spill] sm:$0xff] %v9125_v35 }
 0x530   : > { %v4681_v33 = vadd.f32 %v6068_v56, %v4585_v61  ;;  %v4713_v60 = vadd.f32 %v6069_v17, %v4617_v22  ;;  %v4745_v44 = vadd.f32 %v6070_v55, %v4649_v14  ;;  %10592 = vst [vmem:[#allocation107_spill] sm:$0xff] %v9134_v16  ;;  %v10593_v61 = vld [vmem:[#allocation41_spill] sm:$0xff]  ;;  %v10594_v55 = vld [vmem:[#allocation111_spill] sm:$0xff]  ;;  %v6072_v17 = vld [vmem:[%s6514_s26 + $0x190] sm:$0xff] }
 0x532   : > { %4777 = vst.msk [vmem:[%s8660_s19 + $0x88] sm:$0xff] %vm1048_vm0, %v4681_v33 }
 0x533   : > { %4809 = vst.msk [vmem:[%s8660_s19 + $0x188] sm:$0xff] %vm1048_vm0, %v4713_v60  ;;  %v4021_v46 = vpop.f32.mrf.mxu3  ;;  %5754 = vmatmul.msk.f32.gmra.mxu2 %vm1048_vm0, %v8214_v31  ;;  %v6071_v60 = vld [vmem:[%s6514_s26 + $0x90] sm:$0xff] }
 0x534   : > { %4841 = vst.msk [vmem:[%s8660_s19 + $0x288] sm:$0xff] %vm1048_vm0, %v4745_v44  ;;  %v4022_v0 = vadd.f32 %v8607_v21, %v4021_v46  ;;  %v6073_v44 = vld [vmem:[%s6514_s26 + $0x290] sm:$0xff] }
 0x536   : > { %v4586_v22 = vmul.f32 %v4022_v0, %v10593_v61  ;;  %v4618_v14 = vmul.f32 %v4022_v0, %v10594_v55  ;;  %v4650_v56 = vmul.f32 %v4022_v0, %v9110_v8  ;;  %v9144_v1 = vpop.f32.mrf.mxu2  ;;  %v6076_v8 = vld [vmem:[%s6514_s26 + $0x298] sm:$0xff] }
 0x537   : > { %10595 = vst [vmem:[#allocation194_spill] sm:$0xff] %v9144_v1  ;;  %v6075_v1 = vld [vmem:[%s6514_s26 + $0x198] sm:$0xff] }
 0x538   : > { %v4682_v33 = vadd.f32 %v6071_v60, %v4586_v22  ;;  %v4714_v35 = vadd.f32 %v6072_v17, %v4618_v14  ;;  %v4746_v46 = vadd.f32 %v6073_v44, %v4650_v56  ;;  %v10596_v22 = vld [vmem:[#allocation43_spill] sm:$0xff]  ;;  %v10597_v60 = vld [vmem:[#allocation114_spill] sm:$0xff]  ;;  %v9156_v44 = vpop.f32.mrf.mxu1 }
 0x539   : > { %10598 = vst [vmem:[#allocation195_spill] sm:$0xff] %v9156_v44  ;;  %v10627_v55 = vld [vmem:[#allocation7_spill] sm:$0xff] }
 0x53a   : > { %4778 = vst.msk [vmem:[%s8660_s19 + $0x90] sm:$0xff] %vm1048_vm0, %v4682_v33 }
 0x53b   : > { %4810 = vst.msk [vmem:[%s8660_s19 + $0x190] sm:$0xff] %vm1048_vm0, %v4714_v35  ;;  %v4024_v0 = vpop.f32.mrf.mxu3  ;;  %5755 = vmatmul.msk.f32.gmra.mxu2 %vm1048_vm0, %v8239_v45  ;;  %v6074_v35 = vld [vmem:[%s6514_s26 + $0x98] sm:$0xff] }
 0x53c   : > { %4842 = vst.msk [vmem:[%s8660_s19 + $0x290] sm:$0xff] %vm1048_vm0, %v4746_v46  ;;  %v4025_v31 = vadd.f32 %v8607_v21, %v4024_v0 }
 0x53e   : > { %v4587_v14 = vmul.f32 %v4025_v31, %v10596_v22  ;;  %v4619_v17 = vmul.f32 %v4025_v31, %v10597_v60  ;;  %v4651_v56 = vmul.f32 %v4025_v31, %v9134_v16  ;;  %v9163_v61 = vpop.f32.mrf.mxu2  ;;  %v6079_v16 = vld [vmem:[%s6514_s26 + $0x2a0] sm:$0xff] }
 0x53f   : > { %10599 = vst [vmem:[#allocation196_spill] sm:$0xff] %v9163_v61 }
 0x540   : > { %v4683_v33 = vadd.f32 %v6074_v35, %v4587_v14  ;;  %v4715_v46 = vadd.f32 %v6075_v1, %v4619_v17  ;;  %v4747_v0 = vadd.f32 %v6076_v8, %v4651_v56  ;;  %v10600_v14 = vld [vmem:[#allocation45_spill] sm:$0xff]  ;;  %v6077_v56 = vld [vmem:[%s6514_s26 + $0xa0] sm:$0xff] }
 0x541   : > { %v10601_v1 = vld [vmem:[#allocation117_spill] sm:$0xff] }
 0x542   : > { %4779 = vst.msk [vmem:[%s8660_s19 + $0x98] sm:$0xff] %vm1048_vm0, %v4683_v33 }
 0x543   : > { %4811 = vst.msk [vmem:[%s8660_s19 + $0x198] sm:$0xff] %vm1048_vm0, %v4715_v46  ;;  %v4027_v31 = vpop.f32.mrf.mxu3  ;;  %5756 = vmatmul.msk.f32.gmra.mxu2 %vm1048_vm0, %v8264_v54  ;;  %v6078_v46 = vld [vmem:[%s6514_s26 + $0x1a0] sm:$0xff] }
 0x544   : > { %4843 = vst.msk [vmem:[%s8660_s19 + $0x298] sm:$0xff] %vm1048_vm0, %v4747_v0  ;;  %v4028_v45 = vadd.f32 %v8607_v21, %v4027_v31  ;;  %v9180_v31 = vpop.f32.mrf.mxu1 }
 0x545   : > { %10602 = vst [vmem:[#allocation197_spill] sm:$0xff] %v9180_v31 }
 0x546   : > { %v4588_v35 = vmul.f32 %v4028_v45, %v10600_v14  ;;  %v4620_v17 = vmul.f32 %v4028_v45, %v10601_v1  ;;  %v4652_v8 = vmul.f32 %v4028_v45, %v9156_v44  ;;  %v9182_v22 = vpop.f32.mrf.mxu2 }
 0x547   : > { %10603 = vst [vmem:[#allocation198_spill] sm:$0xff] %v9182_v22  ;;  %v6082_v22 = vld [vmem:[%s6514_s26 + $0x2a8] sm:$0xff] }
 0x548   : > { %v4684_v33 = vadd.f32 %v6077_v56, %v4588_v35  ;;  %v4716_v61 = vadd.f32 %v6078_v46, %v4620_v17  ;;  %v4748_v0 = vadd.f32 %v6079_v16, %v4652_v8  ;;  %v10604_v35 = vld [vmem:[#allocation47_spill] sm:$0xff]  ;;  %v6080_v56 = vld [vmem:[%s6514_s26 + $0xa8] sm:$0xff] }
 0x54a   : > { %4780 = vst.msk [vmem:[%s8660_s19 + $0xa0] sm:$0xff] %vm1048_vm0, %v4684_v33 }
 0x54b   : > { %4812 = vst.msk [vmem:[%s8660_s19 + $0x1a0] sm:$0xff] %vm1048_vm0, %v4716_v61  ;;  %v4030_v45 = vpop.f32.mrf.mxu3  ;;  %5757 = vmatmul.msk.f32.gmra.mxu2 %vm1048_vm0, %v8294_v52  ;;  %v6081_v61 = vld [vmem:[%s6514_s26 + $0x1a8] sm:$0xff] }
 0x54c   : > { %4844 = vst.msk [vmem:[%s8660_s19 + $0x2a0] sm:$0xff] %vm1048_vm0, %v4748_v0  ;;  %v4031_v54 = vadd.f32 %v8607_v21, %v4030_v45 }
 0x54e   : > { %v4589_v17 = vmul.f32 %v4031_v54, %v10604_v35  ;;  %v4621_v16 = vmul.f32 %v4031_v54, %v7047_v27  ;;  %v4653_v8 = vmul.f32 %v4031_v54, %v9180_v31  ;;  %v9199_v45 = vpop.f32.mrf.mxu2  ;;  %v9203_v35 = vpop.f32.mrf.mxu1  ;;  %v6085_v31 = vld [vmem:[%s6514_s26 + $0x2b0] sm:$0xff] }
 0x54f   : > { %10605 = vst [vmem:[#allocation199_spill] sm:$0xff] %v9199_v45 }
 0x550   : > { %v4685_v33 = vadd.f32 %v6080_v56, %v4589_v17  ;;  %v4717_v46 = vadd.f32 %v6081_v61, %v4621_v16  ;;  %v4749_v0 = vadd.f32 %v6082_v22, %v4653_v8  ;;  %10606 = vst [vmem:[#allocation200_spill] sm:$0xff] %v9203_v35  ;;  %v10607_v17 = vld [vmem:[#allocation49_spill] sm:$0xff]  ;;  %v10608_v56 = vld [vmem:[#allocation172_spill] sm:$0xff] }
 0x552   : > { %4781 = vst.msk [vmem:[%s8660_s19 + $0xa8] sm:$0xff] %vm1048_vm0, %v4685_v33  ;;  %v6083_v33 = vld [vmem:[%s6514_s26 + $0xb0] sm:$0xff] }
 0x553   : > { %4813 = vst.msk [vmem:[%s8660_s19 + $0x1a8] sm:$0xff] %vm1048_vm0, %v4717_v46  ;;  %v4033_v52 = vpop.f32.mrf.mxu3  ;;  %5758 = vmatmul.msk.f32.gmra.mxu2 %vm1048_vm0, %v10608_v56  ;;  %v6084_v46 = vld [vmem:[%s6514_s26 + $0x1b0] sm:$0xff] }
 0x554   : > { %4845 = vst.msk [vmem:[%s8660_s19 + $0x2a8] sm:$0xff] %vm1048_vm0, %v4749_v0  ;;  %v4034_v54 = vadd.f32 %v8607_v21, %v4033_v52 }
 0x556   : > { %v4590_v16 = vmul.f32 %v4034_v54, %v10607_v17  ;;  %v4622_v22 = vmul.f32 %v4034_v54, %v7083_v11  ;;  %v4654_v8 = vmul.f32 %v4034_v54, %v9203_v35  ;;  %v9218_v27 = vpop.f32.mrf.mxu2  ;;  %v10615_v11 = vld [vmem:[#allocation69_spill] sm:$0xff] }
 0x557   : > { %10609 = vst [vmem:[#allocation172_spill] sm:$0xff] %v9218_v27  ;;  %v6087_v27 = vld [vmem:[%s6514_s26 + $0x1b8] sm:$0xff] }
 0x558   : > { %v4686_v61 = vadd.f32 %v6083_v33, %v4590_v16  ;;  %v4718_v45 = vadd.f32 %v6084_v46, %v4622_v22  ;;  %v4750_v0 = vadd.f32 %v6085_v31, %v4654_v8  ;;  %v9227_v16 = vpop.f32.mrf.mxu1  ;;  %v10611_v22 = vld [vmem:[#allocation51_spill] sm:$0xff]  ;;  %v10613_v46 = vld [vmem:[#allocation173_spill] sm:$0xff] }
 0x559   : > { %10610 = vst [vmem:[#allocation201_spill] sm:$0xff] %v9227_v16  ;;  %v10612_v33 = vld [vmem:[#allocation127_spill] sm:$0xff] }
 0x55a   : > { %4782 = vst.msk [vmem:[%s8660_s19 + $0xb0] sm:$0xff] %vm1048_vm0, %v4686_v61 }
 0x55b   : > { %4814 = vst.msk [vmem:[%s8660_s19 + $0x1b0] sm:$0xff] %vm1048_vm0, %v4718_v45  ;;  %v4036_v52 = vpop.f32.mrf.mxu3  ;;  %5759 = vmatmul.msk.f32.gmra.mxu2 %vm1048_vm0, %v10613_v46  ;;  %v6086_v45 = vld [vmem:[%s6514_s26 + $0xb8] sm:$0xff] }
 0x55c   : > { %4846 = vst.msk [vmem:[%s8660_s19 + $0x2b0] sm:$0xff] %vm1048_vm0, %v4750_v0  ;;  %v4037_v54 = vadd.f32 %v8607_v21, %v4036_v52  ;;  %v6088_v0 = vld [vmem:[%s6514_s26 + $0x2b8] sm:$0xff]  ;;  %v10614_v52 = vld [vmem:[#allocation68_spill] sm:$0xff] }
 0x55d   : > { %v4216_v44 = vmul.f32 %v10615_v11, %v10614_v52  ;;  %v10623_v52 = vld [vmem:[#allocation174_spill] sm:$0xff] }
 0x55e   : > { %v4591_v56 = vmul.f32 %v4037_v54, %v10611_v22  ;;  %v4623_v31 = vmul.f32 %v4037_v54, %v10612_v33  ;;  %v4655_v8 = vmul.f32 %v4037_v54, %v9227_v16  ;;  %v9239_v14 = vpop.f32.mrf.mxu2  ;;  %v10617_v22 = vld [vmem:[#allocation4_spill] sm:$0xff]  ;;  %v10618_v33 = vld [vmem:[#allocation5_spill] sm:$0xff]  ;;  %v10625_v16 = vld [vmem:[#allocation70_spill] sm:$0xff] }
 0x55f   : > { %10616 = vst [vmem:[#allocation173_spill] sm:$0xff] %v9239_v14  ;;  %v4184_v54 = vmul.f32 %v10618_v33, %v10617_v22  ;;  %v10620_v22 = vld [vmem:[#allocation53_spill] sm:$0xff]  ;;  %v6090_v14 = vld [vmem:[%s6514_s26 + $0x1c0] sm:$0xff]  ;;  %v4217_v1 = vmul.f32 %v10520_v20, %v10625_v16 }
 0x560   : > { %v4687_v61 = vadd.f32 %v6086_v45, %v4591_v56  ;;  %v4719_v35 = vadd.f32 %v6087_v27, %v4623_v31  ;;  %v4751_v17 = vadd.f32 %v6088_v0, %v4655_v8  ;;  %v10619_v56 = vld [vmem:[#allocation134_spill] sm:$0xff]  ;;  %v9255_v31 = vld [vmem:[%s10107_s10] ss:$0 sm:$0xff]  ;;  %v4281_v8 = vsel %vm1048_vm0, %v4216_v44, 0.0 }
 0x561   : > { %v4248_v27 = vmul.f32 %v8433_v53, %v10619_v56  ;;  %v4280_v53 = vsel %vm1048_vm0, %v4184_v54, 0.0  ;;  %v6092_v16 = vld [vmem:[%s7299_s23] sm:$0xff] }
 0x562   : > { %4783 = vst.msk [vmem:[%s8660_s19 + $0xb8] sm:$0xff] %vm1048_vm0, %v4687_v61  ;;  %v10622_v61 = vld [vmem:[#allocation139_spill] sm:$0xff]  ;;  %v4282_v54 = vadd.f32 %v4281_v8, %v4280_v53 }
 0x563   : > { %4815 = vst.msk [vmem:[%s8660_s19 + $0x1b8] sm:$0xff] %vm1048_vm0, %v4719_v35  ;;  %v4039_v46 = vpop.f32.mrf.mxu3  ;;  %v10621_v35 = vld [vmem:[#allocation130_spill] sm:$0xff]  ;;  %5760 = vmatmul.msk.f32.gmra.mxu2 %vm1048_vm0, %v10623_v52  ;;  %v4283_v44 = vsel %vm1048_vm0, %v4248_v27, 0.0  ;;  %v10628_v8 = vld [vmem:[#allocation135_spill] sm:$0xff] }
 0x564   : > { %4847 = vst.msk [vmem:[%s8660_s19 + $0x2b8] sm:$0xff] %vm1048_vm0, %v4751_v17  ;;  %v4040_v11 = vadd.f32 %v8607_v21, %v4039_v46  ;;  %v9267_v17 = vld [vmem:[%s10109_s12] ss:$0 sm:$0xff]  ;;  %v10626_v27 = vld [vmem:[#allocation6_spill] sm:$0xff] }
 0x565   : > { %v6089_v46 = vld [vmem:[%s6514_s26 + $0xc0] sm:$0xff] }
 0x566   : > { %v4592_v33 = vmul.f32 %v4040_v11, %v10620_v22  ;;  %v4624_v45 = vmul.f32 %v4040_v11, %v10621_v35  ;;  %v4656_v0 = vmul.f32 %v4040_v11, %v10622_v61  ;;  %v6091_v11 = vld [vmem:[%s6514_s26 + $0x2c0] sm:$0xff]  ;;  %v10624_v35 = vld [vmem:[#allocation175_spill] sm:$0xff]  ;;  %v4088_v60 = vpop.f32.mrf.mxu2 }
 0x567   : > { %v3847_v52 = vadd.f32 %v9255_v31, %v10624_v35  ;;  %v4249_v35 = vmul.f32 %v8474_v9, %v10628_v8 }
 0x568   : > { %v4688_v56 = vadd.f32 %v6089_v46, %v4592_v33  ;;  %v4720_v22 = vadd.f32 %v6090_v14, %v4624_v45  ;;  %v4752_v61 = vadd.f32 %v6091_v11, %v4656_v0  ;;  %v4185_v33 = vmul.f32 %v10627_v55, %v10626_v27 }
 0x569   : > { %v4284_v46 = vadd.f32 %v4283_v44, %v4282_v54  ;;  %v4089_v14 = vadd.f32 %v9267_v17, %v4088_v60  ;;  %v4440_v0 = vadd.f32 %v6092_v16, %v3847_v52  ;;  %v4286_v55 = vsel %vm1048_vm0, %v4217_v1, 0.0  ;;  %v10629_v60 = vld [vmem:[#allocation55_spill] sm:$0xff]  ;;  %v10631_v44 = vld [vmem:[#allocation142_spill] sm:$0xff]  ;;  %v10632_v54 = vld [vmem:[#allocation176_spill] sm:$0xff] }
 0x56a   : > { %4784 = vst.msk [vmem:[%s8660_s19 + $0xc0] sm:$0xff] %vm1048_vm0, %v4688_v56  ;;  %v4288_v1 = vsel %vm1048_vm0, %v4249_v35, 0.0  ;;  %v6093_v52 = vld [vmem:[%s6514_s26 + $0xc8] sm:$0xff]  ;;  %v10635_v35 = vld [vmem:[#allocation8_spill] sm:$0xff] }
 0x56b   : > { %4816 = vst.msk [vmem:[%s8660_s19 + $0x1c0] sm:$0xff] %vm1048_vm0, %v4720_v22  ;;  %v4042_v45 = vpop.f32.mrf.mxu3  ;;  %v4472_v53 = vmul.f32 %v4284_v46, %v4089_v14  ;;  %v10630_v22 = vld [vmem:[#allocation133_spill] sm:$0xff]  ;;  %5761 = vmatmul.msk.f32.gmra.mxu2 %vm1048_vm0, %v10632_v54 }
 0x56c   : > { %4848 = vst.msk [vmem:[%s8660_s19 + $0x2c0] sm:$0xff] %vm1048_vm0, %v4752_v61  ;;  %v4043_v20 = vadd.f32 %v8607_v21, %v4042_v45  ;;  %v4285_v21 = vsel %vm1048_vm0, %v4185_v33, 0.0  ;;  %v6094_v46 = vld [vmem:[%s6514_s26 + $0x1c8] sm:$0xff]  ;;  %v10634_v33 = vld [vmem:[#allocation72_spill] sm:$0xff] }
 0x56d   : > { %v4504_v11 = vadd.f32 %v4472_v53, %v4440_v0  ;;  %v6095_v45 = vld [vmem:[%s6514_s26 + $0x2c8] sm:$0xff]  ;;  %v4287_v16 = vadd.f32 %v4286_v55, %v4285_v21  ;;  %v4218_v0 = vmul.f32 %v10526_v24, %v10634_v33  ;;  %v10637_v21 = vld [vmem:[#allocation184_spill] sm:$0xff] }
 0x56e   : > { %v4593_v9 = vmul.f32 %v4043_v20, %v10629_v60  ;;  %v4625_v61 = vmul.f32 %v4043_v20, %v10630_v22  ;;  %v4657_v56 = vmul.f32 %v4043_v20, %v10631_v44  ;;  %v10633_v20 = vld [vmem:[#allocation177_spill] sm:$0xff]  ;;  %v4091_v53 = vpop.f32.mrf.mxu2  ;;  %v9328_v24 = vld [vmem:[%s10108_s11] ss:$0 sm:$0xff] }
 0x56f   : > { %v3850_v44 = vadd.f32 %v9255_v31, %v10633_v20  ;;  %4536 = vst.msk [vmem:[%s9296_s28] sm:$0xff] %vm1048_vm0, %v4504_v11  ;;  %v4289_v54 = vadd.f32 %v4288_v1, %v4287_v16  ;;  %v6097_v11 = vld [vmem:[%s7299_s23 + $0x8] sm:$0xff]  ;;  %v10639_v16 = vld [vmem:[#allocation136_spill] sm:$0xff] }
 0x570   : > { %v4689_v27 = vadd.f32 %v6093_v52, %v4593_v9  ;;  %v4721_v14 = vadd.f32 %v6094_v46, %v4625_v61  ;;  %v4753_v8 = vadd.f32 %v6095_v45, %v4657_v56  ;;  %v4186_v9 = vmul.f32 %v10525_v28, %v10635_v35  ;;  %v10636_v56 = vld [vmem:[#allocation137_spill] sm:$0xff] }
 0x571   : > { %v4092_v61 = vadd.f32 %v9267_v17, %v4091_v53  ;;  %v4250_v52 = vmul.f32 %v10637_v21, %v10636_v56  ;;  %v4441_v1 = vadd.f32 %v6097_v11, %v3850_v44  ;;  %v4291_v46 = vsel %vm1048_vm0, %v4218_v0, 0.0  ;;  %v10641_v56 = vld [vmem:[#allocation178_spill] sm:$0xff] }
 0x572   : > { %4785 = vst.msk [vmem:[%s8660_s19 + $0xc8] sm:$0xff] %vm1048_vm0, %v4689_v27  ;;  %v4290_v53 = vsel %vm1048_vm0, %v4186_v9, 0.0  ;;  %v6098_v44 = vld [vmem:[%s6514_s26 + $0xd0] sm:$0xff]  ;;  %v10643_v9 = vld [vmem:[#allocation73_spill] sm:$0xff] }
 0x573   : > { %4817 = vst.msk [vmem:[%s8660_s19 + $0x1c8] sm:$0xff] %vm1048_vm0, %v4721_v14  ;;  %v4045_v55 = vpop.f32.mrf.mxu3  ;;  %v4473_v27 = vmul.f32 %v4289_v54, %v4092_v61  ;;  %v10638_v14 = vld [vmem:[#allocation57_spill] sm:$0xff]  ;;  %5762 = vmatmul.msk.f32.gmra.mxu2 %vm1048_vm0, %v10641_v56  ;;  %v6099_v0 = vld [vmem:[%s6514_s26 + $0x1d0] sm:$0xff] }
 0x574   : > { %4849 = vst.msk [vmem:[%s8660_s19 + $0x2c8] sm:$0xff] %vm1048_vm0, %v4753_v8  ;;  %v4046_v28 = vadd.f32 %v9328_v24, %v4045_v55  ;;  %v10640_v8 = vld [vmem:[#allocation145_spill] sm:$0xff]  ;;  %v4293_v55 = vsel %vm1048_vm0, %v4250_v52, 0.0  ;;  %v6100_v21 = vld [vmem:[%s6514_s26 + $0x2d0] sm:$0xff] }
 0x575   : > { %v4505_v35 = vadd.f32 %v4473_v27, %v4441_v1  ;;  %v4219_v1 = vmul.f32 %v10532_v15, %v10643_v9  ;;  %v10644_v52 = vld [vmem:[#allocation10_spill] sm:$0xff] }
 0x576   : > { %v4594_v45 = vmul.f32 %v4046_v28, %v10638_v14  ;;  %v4626_v20 = vmul.f32 %v4046_v28, %v10639_v16  ;;  %v4658_v33 = vmul.f32 %v4046_v28, %v10640_v8  ;;  %v4292_v14 = vadd.f32 %v4291_v46, %v4290_v53  ;;  %v10642_v28 = vld [vmem:[#allocation179_spill] sm:$0xff]  ;;  %v4094_v27 = vpop.f32.mrf.mxu2  ;;  %v10646_v53 = vld [vmem:[#allocation186_spill] sm:$0xff] }
 0x577   : > { %v3853_v8 = vadd.f32 %v9255_v31, %v10642_v28  ;;  %4537 = vst.msk [vmem:[%s9296_s28 + $0x8] sm:$0xff] %vm1048_vm0, %v4505_v35  ;;  %v6101_v35 = vld [vmem:[%s7299_s23 + $0x10] sm:$0xff]  ;;  %v10649_v28 = vld [vmem:[#allocation149_spill] sm:$0xff] }
 0x578   : > { %v4690_v54 = vadd.f32 %v6098_v44, %v4594_v45  ;;  %v4722_v61 = vadd.f32 %v6099_v0, %v4626_v20  ;;  %v4754_v11 = vadd.f32 %v6100_v21, %v4658_v33  ;;  %v4187_v45 = vmul.f32 %v10531_v6, %v10644_v52  ;;  %v10645_v33 = vld [vmem:[#allocation140_spill] sm:$0xff] }
 0x579   : > { %v4294_v56 = vadd.f32 %v4293_v55, %v4292_v14  ;;  %v4095_v20 = vadd.f32 %v9267_v17, %v4094_v27  ;;  %v4251_v44 = vmul.f32 %v10646_v53, %v10645_v33  ;;  %v4296_v6 = vsel %vm1048_vm0, %v4219_v1, 0.0  ;;  %v10647_v14 = vld [vmem:[#allocation59_spill] sm:$0xff] }
 0x57a   : > { %4786 = vst.msk [vmem:[%s8660_s19 + $0xd0] sm:$0xff] %vm1048_vm0, %v4690_v54  ;;  %v4442_v54 = vadd.f32 %v6101_v35, %v3853_v8  ;;  %v4295_v27 = vsel %vm1048_vm0, %v4187_v45, 0.0  ;;  %v6102_v8 = vld [vmem:[%s6514_s26 + $0xd8] sm:$0xff] }
 0x57b   : > { %4818 = vst.msk [vmem:[%s8660_s19 + $0x1d0] sm:$0xff] %vm1048_vm0, %v4722_v61  ;;  %v4048_v46 = vpop.f32.mrf.mxu3  ;;  %v4474_v0 = vmul.f32 %v4294_v56, %v4095_v20  ;;  %v10648_v61 = vld [vmem:[#allocation138_spill] sm:$0xff]  ;;  %v6103_v1 = vld [vmem:[%s6514_s26 + $0x1d8] sm:$0xff]  ;;  %v4297_v35 = vadd.f32 %v4296_v6, %v4295_v27  ;;  %v10655_v27 = vld [vmem:[#allocation188_spill] sm:$0xff] }
 0x57c   : > { %4850 = vst.msk [vmem:[%s8660_s19 + $0x2d0] sm:$0xff] %vm1048_vm0, %v4754_v11  ;;  %v4049_v15 = vadd.f32 %v9328_v24, %v4048_v46  ;;  %v10650_v11 = vld [vmem:[#allocation180_spill] sm:$0xff]  ;;  %v4298_v46 = vsel %vm1048_vm0, %v4251_v44, 0.0  ;;  %v6104_v33 = vld [vmem:[%s6514_s26 + $0x2d8] sm:$0xff] }
 0x57d   : > { %v4506_v52 = vadd.f32 %v4474_v0, %v4442_v54  ;;  %5763 = vmatmul.msk.f32.gmra.mxu2 %vm1048_vm0, %v10650_v11  ;;  %v10652_v45 = vld [vmem:[#allocation75_spill] sm:$0xff]  ;;  %v10653_v44 = vld [vmem:[#allocation12_spill] sm:$0xff]  ;;  %v4299_v11 = vadd.f32 %v4298_v46, %v4297_v35  ;;  %v10656_v46 = vld [vmem:[#allocation61_spill] sm:$0xff] }
 0x57e   : > { %v4595_v55 = vmul.f32 %v4049_v15, %v10647_v14  ;;  %v4627_v21 = vmul.f32 %v4049_v15, %v10648_v61  ;;  %v4659_v9 = vmul.f32 %v4049_v15, %v10649_v28  ;;  %v10651_v15 = vld [vmem:[#allocation181_spill] sm:$0xff]  ;;  %v4220_v54 = vmul.f32 %v10538_v40, %v10652_v45  ;;  %v4097_v0 = vpop.f32.mrf.mxu2 }
 0x57f   : > { %v3856_v28 = vadd.f32 %v9255_v31, %v10651_v15  ;;  %4538 = vst.msk [vmem:[%s9296_s28 + $0x10] sm:$0xff] %vm1048_vm0, %v4506_v52  ;;  %v6105_v52 = vld [vmem:[%s7299_s23 + $0x18] sm:$0xff]  ;;  %v10658_v15 = vld [vmem:[#allocation152_spill] sm:$0xff] }
 0x580   : > { %v4691_v56 = vadd.f32 %v6102_v8, %v4595_v55  ;;  %v4723_v20 = vadd.f32 %v6103_v1, %v4627_v21  ;;  %v4755_v53 = vadd.f32 %v6104_v33, %v4659_v9  ;;  %v4188_v55 = vmul.f32 %v10537_v25, %v10653_v44  ;;  %v10654_v9 = vld [vmem:[#allocation143_spill] sm:$0xff] }
 0x581   : > { %v4098_v21 = vadd.f32 %v9267_v17, %v4097_v0  ;;  %v4252_v8 = vmul.f32 %v10655_v27, %v10654_v9  ;;  %v4301_v25 = vsel %vm1048_vm0, %v4220_v54, 0.0  ;;  %v6107_v54 = vld [vmem:[%s6514_s26 + $0x1e0] sm:$0xff] }
 0x582   : > { %4787 = vst.msk [vmem:[%s8660_s19 + $0xd8] sm:$0xff] %vm1048_vm0, %v4691_v56  ;;  %v4443_v56 = vadd.f32 %v6105_v52, %v3856_v28  ;;  %v4300_v0 = vsel %vm1048_vm0, %v4188_v55, 0.0  ;;  %v6106_v28 = vld [vmem:[%s6514_s26 + $0xe0] sm:$0xff]  ;;  %v10661_v55 = vld [vmem:[#allocation77_spill] sm:$0xff] }
 0x583   : > { %4819 = vst.msk [vmem:[%s8660_s19 + $0x1d8] sm:$0xff] %vm1048_vm0, %v4723_v20  ;;  %v4051_v6 = vpop.f32.mrf.mxu3  ;;  %v4475_v1 = vmul.f32 %v4299_v11, %v4098_v21  ;;  %v10657_v20 = vld [vmem:[#allocation141_spill] sm:$0xff]  ;;  %v6108_v9 = vld [vmem:[%s6514_s26 + $0x2e0] sm:$0xff]  ;;  %v4302_v52 = vadd.f32 %v4301_v25, %v4300_v0 }
 0x584   : > { %4851 = vst.msk [vmem:[%s8660_s19 + $0x2d8] sm:$0xff] %vm1048_vm0, %v4755_v53  ;;  %v4052_v40 = vadd.f32 %v9328_v24, %v4051_v6  ;;  %v10659_v53 = vld [vmem:[#allocation182_spill] sm:$0xff]  ;;  %v4303_v6 = vsel %vm1048_vm0, %v4252_v8, 0.0 }
 0x585   : > { %v4507_v44 = vadd.f32 %v4475_v1, %v4443_v56  ;;  %5764 = vmatmul.msk.f32.gmra.mxu2 %vm1048_vm0, %v10659_v53  ;;  %v4221_v56 = vmul.f32 %v10544_v51, %v10661_v55  ;;  %v10662_v8 = vld [vmem:[#allocation14_spill] sm:$0xff]  ;;  %v4304_v53 = vadd.f32 %v4303_v6, %v4302_v52  ;;  %v10664_v6 = vld [vmem:[#allocation63_spill] sm:$0xff] }
 0x586   : > { %v4596_v33 = vmul.f32 %v4052_v40, %v10656_v46  ;;  %v4628_v35 = vmul.f32 %v4052_v40, %v10657_v20  ;;  %v4660_v45 = vmul.f32 %v4052_v40, %v10658_v15  ;;  %v10660_v40 = vld [vmem:[#allocation183_spill] sm:$0xff]  ;;  %v4100_v1 = vpop.f32.mrf.mxu2  ;;  %v10666_v52 = vld [vmem:[#allocation154_spill] sm:$0xff] }
 0x587   : > { %v3859_v15 = vadd.f32 %v9255_v31, %v10660_v40  ;;  %4539 = vst.msk [vmem:[%s9296_s28 + $0x18] sm:$0xff] %vm1048_vm0, %v4507_v44  ;;  %v6109_v44 = vld [vmem:[%s7299_s23 + $0x20] sm:$0xff] }
 0x588   : > { %v4692_v11 = vadd.f32 %v6106_v28, %v4596_v33  ;;  %v4724_v21 = vadd.f32 %v6107_v54, %v4628_v35  ;;  %v4756_v27 = vadd.f32 %v6108_v9, %v4660_v45  ;;  %v4189_v33 = vmul.f32 %v10543_v49, %v10662_v8  ;;  %v10663_v45 = vld [vmem:[#allocation146_spill] sm:$0xff] }
 0x589   : > { %v4101_v35 = vadd.f32 %v9267_v17, %v4100_v1  ;;  %v4253_v0 = vmul.f32 %v8645_v13, %v10663_v45  ;;  %v4444_v28 = vadd.f32 %v6109_v44, %v3859_v15  ;;  %v4306_v49 = vsel %vm1048_vm0, %v4221_v56, 0.0  ;;  %v6110_v15 = vld [vmem:[%s6514_s26 + $0xe8] sm:$0xff] }
 0x58a   : > { %4788 = vst.msk [vmem:[%s8660_s19 + $0xe0] sm:$0xff] %vm1048_vm0, %v4692_v11  ;;  %v4305_v13 = vsel %vm1048_vm0, %v4189_v33, 0.0  ;;  %v6111_v56 = vld [vmem:[%s6514_s26 + $0x1e8] sm:$0xff]  ;;  %v10668_v33 = vld [vmem:[#allocation79_spill] sm:$0xff] }
 0x58b   : > { %4820 = vst.msk [vmem:[%s8660_s19 + $0x1e0] sm:$0xff] %vm1048_vm0, %v4724_v21  ;;  %v4054_v25 = vpop.f32.mrf.mxu3  ;;  %v4476_v11 = vmul.f32 %v4304_v53, %v4101_v35  ;;  %v10665_v21 = vld [vmem:[#allocation144_spill] sm:$0xff]  ;;  %v6112_v53 = vld [vmem:[%s6514_s26 + $0x2e8] sm:$0xff] }
 0x58c   : > { %4852 = vst.msk [vmem:[%s8660_s19 + $0x2e0] sm:$0xff] %vm1048_vm0, %v4756_v27  ;;  %v4055_v51 = vadd.f32 %v9328_v24, %v4054_v25  ;;  %v4308_v27 = vsel %vm1048_vm0, %v4253_v0, 0.0  ;;  %v4307_v25 = vadd.f32 %v4306_v49, %v4305_v13  ;;  %v10667_v45 = vld [vmem:[#allocation185_spill] sm:$0xff]  ;;  %v10669_v0 = vld [vmem:[#allocation16_spill] sm:$0xff] }
 0x58d   : > { %v4508_v55 = vadd.f32 %v4476_v11, %v4444_v28  ;;  %5765 = vmatmul.msk.f32.gmra.mxu2 %vm1048_vm0, %v8518_v32  ;;  %v4222_v32 = vmul.f32 %v10550_v58, %v10668_v33  ;;  %v4190_v28 = vmul.f32 %v10549_v62, %v10669_v0  ;;  %v6113_v13 = vld [vmem:[%s7299_s23 + $0x28] sm:$0xff]  ;;  %v6116_v0 = vld [vmem:[%s6514_s26 + $0x2f0] sm:$0xff] }
 0x58e   : > { %v4597_v54 = vmul.f32 %v4055_v51, %v10664_v6  ;;  %v4629_v9 = vmul.f32 %v4055_v51, %v10665_v21  ;;  %v4661_v40 = vmul.f32 %v4055_v51, %v10666_v52  ;;  %v3862_v51 = vadd.f32 %v9255_v31, %v10667_v45  ;;  %v4103_v44 = vpop.f32.mrf.mxu2 }
 0x58f   : > { %4540 = vst.msk [vmem:[%s9296_s28 + $0x20] sm:$0xff] %vm1048_vm0, %v4508_v55  ;;  %v4309_v11 = vadd.f32 %v4308_v27, %v4307_v25  ;;  %v4311_v62 = vsel %vm1048_vm0, %v4222_v32, 0.0  ;;  %v10671_v27 = vld [vmem:[#allocation65_spill] sm:$0xff]  ;;  %v6115_v32 = vld [vmem:[%s6514_s26 + $0x1f0] sm:$0xff] }
 0x590   : > { %v4693_v1 = vadd.f32 %v6110_v15, %v4597_v54  ;;  %v4725_v8 = vadd.f32 %v6111_v56, %v4629_v9  ;;  %v4757_v35 = vadd.f32 %v6112_v53, %v4661_v40  ;;  %v4104_v54 = vadd.f32 %v9267_v17, %v4103_v44  ;;  %v10670_v9 = vld [vmem:[#allocation147_spill] sm:$0xff]  ;;  %v10672_v56 = vld [vmem:[#allocation148_spill] sm:$0xff] }
 0x591   : > { %v4254_v40 = vmul.f32 %v8707_v50, %v10670_v9  ;;  %v4445_v55 = vadd.f32 %v6113_v13, %v3862_v51  ;;  %v10673_v53 = vld [vmem:[#allocation156_spill] sm:$0xff]  ;;  %v4310_v50 = vsel %vm1048_vm0, %v4190_v28, 0.0  ;;  %v6114_v51 = vld [vmem:[%s6514_s26 + $0xf0] sm:$0xff]  ;;  %v10675_v28 = vld [vmem:[#allocation81_spill] sm:$0xff] }
 0x592   : > { %4789 = vst.msk [vmem:[%s8660_s19 + $0xe8] sm:$0xff] %vm1048_vm0, %v4693_v1  ;;  %v4477_v15 = vmul.f32 %v4309_v11, %v4104_v54  ;;  %v4312_v54 = vadd.f32 %v4311_v62, %v4310_v50 }
 0x593   : > { %4821 = vst.msk [vmem:[%s8660_s19 + $0x1e8] sm:$0xff] %vm1048_vm0, %v4725_v8  ;;  %v4057_v49 = vpop.f32.mrf.mxu3 }
 0x594   : > { %4853 = vst.msk [vmem:[%s8660_s19 + $0x2e8] sm:$0xff] %vm1048_vm0, %v4757_v35  ;;  %v4058_v58 = vadd.f32 %v9328_v24, %v4057_v49  ;;  %v4509_v45 = vadd.f32 %v4477_v15, %v4445_v55  ;;  %v4313_v35 = vsel %vm1048_vm0, %v4254_v40, 0.0  ;;  %v10674_v49 = vld [vmem:[#allocation187_spill] sm:$0xff]  ;;  %v10676_v40 = vld [vmem:[#allocation18_spill] sm:$0xff] }
 0x595   : > { %5766 = vmatmul.msk.f32.gmra.mxu2 %vm1048_vm0, %v8548_v37  ;;  %v3865_v9 = vadd.f32 %v9255_v31, %v10674_v49  ;;  %v4223_v37 = vmul.f32 %v10554_v43, %v10675_v28  ;;  %v4191_v13 = vmul.f32 %v10553_v19, %v10676_v40  ;;  %v4314_v55 = vadd.f32 %v4313_v35, %v4312_v54  ;;  %v10678_v35 = vld [vmem:[#allocation67_spill] sm:$0xff] }
 0x596   : > { %v4598_v1 = vmul.f32 %v4058_v58, %v10671_v27  ;;  %v4630_v8 = vmul.f32 %v4058_v58, %v10672_v56  ;;  %v4662_v25 = vmul.f32 %v4058_v58, %v10673_v53  ;;  %4541 = vst.msk [vmem:[%s9296_s28 + $0x28] sm:$0xff] %vm1048_vm0, %v4509_v45  ;;  %v4106_v58 = vpop.f32.mrf.mxu2 }
 0x597   : > { %v4107_v15 = vadd.f32 %v9267_v17, %v4106_v58  ;;  %v4316_v19 = vsel %vm1048_vm0, %v4223_v37, 0.0  ;;  %v6120_v37 = vld [vmem:[%s6514_s26 + $0x2f8] sm:$0xff] }
 0x598   : > { %v4694_v33 = vadd.f32 %v6114_v51, %v4598_v1  ;;  %v4726_v44 = vadd.f32 %v6115_v32, %v4630_v8  ;;  %v4758_v11 = vadd.f32 %v6116_v0, %v4662_v25  ;;  %v10677_v1 = vld [vmem:[#allocation150_spill] sm:$0xff] }
 0x599   : > { %v4255_v8 = vmul.f32 %v8761_v29, %v10677_v1  ;;  %v6117_v25 = vld [vmem:[%s7299_s23 + $0x30] sm:$0xff]  ;;  %v4478_v45 = vmul.f32 %v4314_v55, %v4107_v15  ;;  %v4315_v29 = vsel %vm1048_vm0, %v4191_v13, 0.0  ;;  %v10681_v55 = vld [vmem:[#allocation189_spill] sm:$0xff] }
 0x59a   : > { %4790 = vst.msk [vmem:[%s8660_s19 + $0xf0] sm:$0xff] %vm1048_vm0, %v4694_v33  ;;  %v4446_v50 = vadd.f32 %v6117_v25, %v3865_v9  ;;  %v10679_v33 = vld [vmem:[#allocation151_spill] sm:$0xff]  ;;  %v4317_v40 = vadd.f32 %v4316_v19, %v4315_v29  ;;  %v3868_v15 = vadd.f32 %v9255_v31, %v10681_v55  ;;  %v10682_v13 = vld [vmem:[#allocation82_spill] sm:$0xff] }
 0x59b   : > { %4822 = vst.msk [vmem:[%s8660_s19 + $0x1f0] sm:$0xff] %vm1048_vm0, %v4726_v44  ;;  %v4060_v62 = vpop.f32.mrf.mxu3  ;;  %v10680_v44 = vld [vmem:[#allocation159_spill] sm:$0xff] }
 0x59c   : > { %4854 = vst.msk [vmem:[%s8660_s19 + $0x2f0] sm:$0xff] %vm1048_vm0, %v4758_v11  ;;  %v4061_v43 = vadd.f32 %v9328_v24, %v4060_v62  ;;  %v4510_v54 = vadd.f32 %v4478_v45, %v4446_v50  ;;  %v4318_v24 = vsel %vm1048_vm0, %v4255_v8, 0.0  ;;  %v6118_v11 = vld [vmem:[%s6514_s26 + $0xf8] sm:$0xff]  ;;  %v10684_v50 = vld [vmem:[#allocation153_spill] sm:$0xff] }
 0x59d   : > { %5767 = vmatmul.msk.f32.gmra.mxu2 %vm1048_vm0, %v8575_v39  ;;  %v6119_v9 = vld [vmem:[%s6514_s26 + $0x1f8] sm:$0xff]  ;;  %v4224_v39 = vmul.f32 %v10558_v34, %v10682_v13  ;;  %v4319_v1 = vadd.f32 %v4318_v24, %v4317_v40  ;;  %v4256_v45 = vmul.f32 %v8815_v18, %v10684_v50  ;;  %v10691_v50 = vld [vmem:[#allocation86_spill] sm:$0xff] }
 0x59e   : > { %v4599_v51 = vmul.f32 %v4061_v43, %v10678_v35  ;;  %v4631_v32 = vmul.f32 %v4061_v43, %v10679_v33  ;;  %v4663_v0 = vmul.f32 %v4061_v43, %v10680_v44  ;;  %4542 = vst.msk [vmem:[%s9296_s28 + $0x30] sm:$0xff] %vm1048_vm0, %v4510_v54  ;;  %v4109_v62 = vpop.f32.mrf.mxu2  ;;  %v10683_v43 = vld [vmem:[#allocation20_spill] sm:$0xff]  ;;  %v6121_v19 = vld [vmem:[%s7299_s23 + $0x38] sm:$0xff] }
 0x59f   : > { %v4110_v8 = vadd.f32 %v9267_v17, %v4109_v62  ;;  %v4192_v25 = vmul.f32 %v10557_v10, %v10683_v43  ;;  %v4323_v54 = vsel %vm1048_vm0, %v4256_v45, 0.0  ;;  %v10685_v10 = vld [vmem:[#allocation190_spill] sm:$0xff]  ;;  %v10688_v40 = vld [vmem:[#allocation155_spill] sm:$0xff]  ;;  %v4226_v45 = vmul.f32 %v10564_v2, %v10691_v50 }
 0x5a0   : > { %v4695_v49 = vadd.f32 %v6118_v11, %v4599_v51  ;;  %v4727_v28 = vadd.f32 %v6119_v9, %v4631_v32  ;;  %v4759_v58 = vadd.f32 %v6120_v37, %v4663_v0  ;;  %v4447_v51 = vadd.f32 %v6121_v19, %v3868_v15  ;;  %v10686_v11 = vld [vmem:[#allocation84_spill] sm:$0xff] }
 0x5a1   : > { %v4479_v34 = vmul.f32 %v4319_v1, %v4110_v8  ;;  %v4321_v32 = vsel %vm1048_vm0, %v4224_v39, 0.0  ;;  %v4320_v29 = vsel %vm1048_vm0, %v4192_v25, 0.0  ;;  %v3871_v24 = vadd.f32 %v9255_v31, %v10685_v10  ;;  %v6122_v15 = vld [vmem:[%s7299_s23 + $0x40] sm:$0xff]  ;;  %v10689_v8 = vld [vmem:[#allocation191_spill] sm:$0xff] }
 0x5a2   : > { %4791 = vst.msk [vmem:[%s8660_s19 + $0xf8] sm:$0xff] %vm1048_vm0, %v4695_v49  ;;  %v4322_v18 = vadd.f32 %v4321_v32, %v4320_v29  ;;  %v4225_v49 = vmul.f32 %v10561_v47, %v10686_v11  ;;  %v4257_v55 = vmul.f32 %v8865_v63, %v10688_v40  ;;  %v10690_v25 = vld [vmem:[#allocation71_spill] sm:$0xff]  ;;  %v10692_v32 = vld [vmem:[#allocation24_spill] sm:$0xff] }
 0x5a3   : > { %4823 = vst.msk [vmem:[%s8660_s19 + $0x1f8] sm:$0xff] %vm1048_vm0, %v4727_v28  ;;  %v4511_v0 = vadd.f32 %v4479_v34, %v4447_v51  ;;  %v4448_v13 = vadd.f32 %v6122_v15, %v3871_v24  ;;  %v6123_v24 = vld [vmem:[%s7299_s23 + $0x48] sm:$0xff]  ;;  %v10697_v40 = vld [vmem:[#allocation88_spill] sm:$0xff] }
 0x5a4   : > { %4855 = vst.msk [vmem:[%s8660_s19 + $0x2f8] sm:$0xff] %vm1048_vm0, %v4759_v58  ;;  %v4324_v37 = vadd.f32 %v4323_v54, %v4322_v18  ;;  %v10687_v58 = vld [vmem:[#allocation22_spill] sm:$0xff]  ;;  %v4326_v62 = vsel %vm1048_vm0, %v4225_v49, 0.0  ;;  %v4328_v43 = vsel %vm1048_vm0, %v4257_v55, 0.0  ;;  %v10694_v54 = vld [vmem:[#allocation157_spill] sm:$0xff]  ;;  %v4331_v49 = vsel %vm1048_vm0, %v4226_v45, 0.0 }
 0x5a5   : > { %5768 = vmatmul.msk.f32.gmra.mxu2 %vm1048_vm0, %v8621_v26  ;;  %4543 = vst.msk [vmem:[%s9296_s28 + $0x38] sm:$0xff] %vm1048_vm0, %v4511_v0  ;;  %v4193_v26 = vmul.f32 %v10560_v3, %v10687_v58  ;;  %v3874_v3 = vadd.f32 %v9255_v31, %v10690_v25  ;;  %v10693_v0 = vld [vmem:[#allocation25_spill] sm:$0xff]  ;;  %v4258_v10 = vmul.f32 %v8905_v41, %v10694_v54  ;;  %v6124_v25 = vld [vmem:[%s7299_s23 + $0x50] sm:$0xff] }
 0x5a6   : > { %v4112_v9 = vpop.f32.mrf.mxu2  ;;  %v4194_v29 = vmul.f32 %v10693_v0, %v10692_v32  ;;  %v10696_v58 = vld [vmem:[#allocation9_spill] sm:$0xff]  ;;  %v4227_v55 = vmul.f32 %v10567_v12, %v10697_v40  ;;  %v10703_v0 = vld [vmem:[#allocation90_spill] sm:$0xff] }
 0x5a7   : > { %v4113_v28 = vadd.f32 %v9267_v17, %v4112_v9  ;;  %v4325_v47 = vsel %vm1048_vm0, %v4193_v26, 0.0  ;;  %v4449_v18 = vadd.f32 %v6123_v24, %v3874_v3  ;;  %v3877_v26 = vadd.f32 %v9255_v31, %v10696_v58 }
 0x5a8   : > { %v4327_v63 = vadd.f32 %v4326_v62, %v4325_v47  ;;  %v4330_v2 = vsel %vm1048_vm0, %v4194_v29, 0.0  ;;  %v10698_v62 = vld [vmem:[#allocation26_spill] sm:$0xff]  ;;  %v10700_v47 = vld [vmem:[#allocation85_spill] sm:$0xff]  ;;  %v4336_v50 = vsel %vm1048_vm0, %v4227_v55, 0.0  ;;  %v4228_v29 = vmul.f32 %v10571_v42, %v10703_v0 }
 0x5a9   : > { %v4480_v39 = vmul.f32 %v4324_v37, %v4113_v28  ;;  %v10695_v28 = vld [vmem:[#allocation192_spill] sm:$0xff]  ;;  %v4333_v37 = vsel %vm1048_vm0, %v4258_v10, 0.0  ;;  %v4332_v41 = vadd.f32 %v4331_v49, %v4330_v2  ;;  %v4450_v3 = vadd.f32 %v6124_v25, %v3877_v26  ;;  %v10707_v55 = vld [vmem:[#allocation13_spill] sm:$0xff] }
 0x5aa   : > { %v4329_v34 = vadd.f32 %v4328_v43, %v4327_v63  ;;  %v10705_v49 = vld [vmem:[#allocation160_spill] sm:$0xff]  ;;  %v4341_v58 = vsel %vm1048_vm0, %v4228_v29, 0.0  ;;  %v10711_v25 = vld [vmem:[#allocation161_spill] sm:$0xff] }
 0x5ab   : > { %v4512_v1 = vadd.f32 %v4480_v39, %v4448_v13  ;;  %v4334_v39 = vadd.f32 %v4333_v37, %v4332_v41  ;;  %v10706_v41 = vld [vmem:[#allocation76_spill] sm:$0xff]  ;;  %v10714_v0 = vld [vmem:[#allocation93_spill] sm:$0xff] }
 0x5ac   : > { %v4230_v29 = vmul.f32 %v10578_v4, %v10714_v0  ;;  %v10728_v0 = vld [vmem:[#allocation105_spill] sm:$0xff] }
 0x5ad   : > { %5769 = vmatmul.msk.f32.gmra.mxu2 %vm1048_vm0, %v10689_v8  ;;  %4544 = vst.msk [vmem:[%s9296_s28 + $0x40] sm:$0xff] %vm1048_vm0, %v4512_v1  ;;  %v4195_v1 = vmul.f32 %v10566_v38, %v10698_v62  ;;  %v10699_v8 = vld [vmem:[#allocation158_spill] sm:$0xff] }
 0x5ae   : > { %v4115_v19 = vpop.f32.mrf.mxu2  ;;  %v4259_v43 = vmul.f32 %v10700_v47, %v10699_v8  ;;  %v10709_v8 = vld [vmem:[#allocation30_spill] sm:$0xff]  ;;  %v10710_v47 = vld [vmem:[#allocation31_spill] sm:$0xff] }
 0x5af   : > { %v4116_v51 = vadd.f32 %v9267_v17, %v4115_v19  ;;  %v10701_v19 = vld [vmem:[#allocation74_spill] sm:$0xff]  ;;  %v4335_v12 = vsel %vm1048_vm0, %v4195_v1, 0.0 }
 0x5b0   : > { %v4337_v32 = vadd.f32 %v4336_v50, %v4335_v12 }
 0x5b1   : > { %v4481_v11 = vmul.f32 %v4329_v34, %v4116_v51  ;;  %v4338_v51 = vsel %vm1048_vm0, %v4259_v43, 0.0  ;;  %v10702_v34 = vld [vmem:[#allocation11_spill] sm:$0xff]  ;;  %v4197_v43 = vmul.f32 %v10710_v47, %v10709_v8  ;;  %v10722_v47 = vld [vmem:[#allocation34_spill] sm:$0xff] }
 0x5b2   : > { %v3880_v38 = vadd.f32 %v9255_v31, %v10702_v34  ;;  %v4339_v24 = vadd.f32 %v4338_v51, %v4337_v32  ;;  %v10712_v51 = vld [vmem:[#allocation78_spill] sm:$0xff] }
 0x5b3   : > { %v4513_v9 = vadd.f32 %v4481_v11, %v4449_v18  ;;  %v10704_v18 = vld [vmem:[#allocation28_spill] sm:$0xff] }
 0x5b4   : > { %v4196_v11 = vmul.f32 %v10570_v48, %v10704_v18  ;;  %v3883_v48 = vadd.f32 %v9255_v31, %v10707_v55  ;;  %v10715_v18 = vld [vmem:[#allocation32_spill] sm:$0xff] }
 0x5b5   : > { %5770 = vmatmul.msk.f32.gmra.mxu2 %vm1048_vm0, %v10695_v28  ;;  %4545 = vst.msk [vmem:[%s9296_s28 + $0x48] sm:$0xff] %vm1048_vm0, %v4513_v9  ;;  %v4260_v9 = vmul.f32 %v8958_v7, %v10705_v49  ;;  %v6125_v28 = vld [vmem:[%s7299_s23 + $0x58] sm:$0xff] }
 0x5b6   : > { %v4118_v15 = vpop.f32.mrf.mxu2  ;;  %v4451_v2 = vadd.f32 %v6125_v28, %v3880_v38  ;;  %v4340_v42 = vsel %vm1048_vm0, %v4196_v11, 0.0  ;;  %v10713_v38 = vld [vmem:[#allocation15_spill] sm:$0xff]  ;;  %v10716_v11 = vld [vmem:[#allocation33_spill] sm:$0xff]  ;;  %v10718_v28 = vld [vmem:[#allocation92_spill] sm:$0xff] }
 0x5b7   : > { %v4119_v13 = vadd.f32 %v9267_v17, %v4118_v15  ;;  %v4343_v40 = vsel %vm1048_vm0, %v4260_v9, 0.0  ;;  %v4342_v7 = vadd.f32 %v4341_v58, %v4340_v42  ;;  %v10708_v15 = vld [vmem:[#allocation91_spill] sm:$0xff]  ;;  %v3886_v32 = vadd.f32 %v9255_v31, %v10713_v38  ;;  %v10717_v9 = vld [vmem:[#allocation162_spill] sm:$0xff] }
 0x5b8   : > { %v4198_v49 = vmul.f32 %v10716_v11, %v10715_v18  ;;  %v10726_v38 = vld [vmem:[#allocation19_spill] sm:$0xff]  ;;  %v10729_v18 = vld [vmem:[#allocation36_spill] sm:$0xff]  ;;  %v10730_v11 = vld [vmem:[#allocation37_spill] sm:$0xff] }
 0x5b9   : > { %v4482_v63 = vmul.f32 %v4334_v39, %v4119_v13  ;;  %v4229_v13 = vmul.f32 %v10575_v59, %v10708_v15  ;;  %v4344_v1 = vadd.f32 %v4343_v40, %v4342_v7  ;;  %v4345_v59 = vsel %vm1048_vm0, %v4197_v43, 0.0  ;;  %v10719_v40 = vld [vmem:[#allocation80_spill] sm:$0xff] }
 0x5ba   : > { %v4350_v4 = vsel %vm1048_vm0, %v4198_v49, 0.0  ;;  %v4199_v43 = vmul.f32 %v10581_v23, %v10722_v47  ;;  %v3892_v23 = vadd.f32 %v9255_v31, %v10726_v38  ;;  %v4200_v49 = vmul.f32 %v10730_v11, %v10729_v18  ;;  %v10740_v38 = vld [vmem:[#allocation111_spill] sm:$0xff]  ;;  %v10744_v18 = vld [vmem:[#allocation193_spill] sm:$0xff] }
 0x5bb   : > { %v4514_v45 = vadd.f32 %v4482_v63, %v4450_v3  ;;  %v4261_v3 = vmul.f32 %v8986_v5, %v10711_v25  ;;  %v6126_v63 = vld [vmem:[%s7299_s23 + $0x60] sm:$0xff]  ;;  %v10723_v25 = vld [vmem:[#allocation163_spill] sm:$0xff] }
 0x5bc   : > { %v4452_v50 = vadd.f32 %v6126_v63, %v3883_v48  ;;  %v10720_v48 = vld [vmem:[#allocation17_spill] sm:$0xff] }
 0x5bd   : > { %5771 = vmatmul.msk.f32.gmra.mxu2 %vm1048_vm0, %v10701_v19  ;;  %4546 = vst.msk [vmem:[%s9296_s28 + $0x50] sm:$0xff] %vm1048_vm0, %v4514_v45  ;;  %v4346_v19 = vsel %vm1048_vm0, %v4229_v13, 0.0  ;;  %v4348_v34 = vsel %vm1048_vm0, %v4261_v3, 0.0  ;;  %v3889_v7 = vadd.f32 %v9255_v31, %v10720_v48  ;;  %v10721_v13 = vld [vmem:[#allocation95_spill] sm:$0xff]  ;;  %v10724_v3 = vld [vmem:[#allocation94_spill] sm:$0xff] }
 0x5be   : > { %v4121_v54 = vpop.f32.mrf.mxu2  ;;  %v4347_v5 = vadd.f32 %v4346_v19, %v4345_v59  ;;  %v4263_v63 = vmul.f32 %v10724_v3, %v10723_v25  ;;  %v10725_v59 = vld [vmem:[#allocation83_spill] sm:$0xff]  ;;  %v10737_v25 = vld [vmem:[#allocation101_spill] sm:$0xff] }
 0x5bf   : > { %v4122_v10 = vadd.f32 %v9267_v17, %v4121_v54 }
 0x5c1   : > { %v4483_v37 = vmul.f32 %v4339_v24, %v4122_v10  ;;  %v4349_v24 = vadd.f32 %v4348_v34, %v4347_v5  ;;  %v4358_v34 = vsel %vm1048_vm0, %v4263_v63, 0.0  ;;  %v10727_v5 = vld [vmem:[#allocation97_spill] sm:$0xff]  ;;  %v6130_v63 = vld [vmem:[%s7299_s23 + $0x80] sm:$0xff] }
 0x5c3   : > { %v4515_v26 = vadd.f32 %v4483_v37, %v4451_v2  ;;  %v4262_v2 = vmul.f32 %v10718_v28, %v10717_v9  ;;  %v6127_v37 = vld [vmem:[%s7299_s23 + $0x68] sm:$0xff]  ;;  %v10731_v9 = vld [vmem:[#allocation164_spill] sm:$0xff] }
 0x5c4   : > { %v4453_v58 = vadd.f32 %v6127_v37, %v3886_v32  ;;  %v10732_v28 = vld [vmem:[#allocation96_spill] sm:$0xff]  ;;  %v6129_v37 = vld [vmem:[%s7299_s23 + $0x78] sm:$0xff] }
 0x5c5   : > { %5772 = vmatmul.msk.f32.gmra.mxu2 %vm1048_vm0, %v10706_v41  ;;  %4547 = vst.msk [vmem:[%s9296_s28 + $0x58] sm:$0xff] %vm1048_vm0, %v4515_v26  ;;  %v4351_v41 = vsel %vm1048_vm0, %v4230_v29, 0.0  ;;  %v4353_v55 = vsel %vm1048_vm0, %v4262_v2, 0.0  ;;  %v4232_v29 = vmul.f32 %v10728_v0, %v10727_v5  ;;  %v4264_v2 = vmul.f32 %v10732_v28, %v10731_v9 }
 0x5c6   : > { %v4124_v39 = vpop.f32.mrf.mxu2  ;;  %v4352_v15 = vadd.f32 %v4351_v41, %v4350_v4 }
 0x5c7   : > { %v4125_v62 = vadd.f32 %v9267_v17, %v4124_v39  ;;  %v4231_v39 = vmul.f32 %v10582_v30, %v10721_v13  ;;  %v4355_v30 = vsel %vm1048_vm0, %v4199_v43, 0.0  ;;  %v4361_v41 = vsel %vm1048_vm0, %v4232_v29, 0.0  ;;  %v10736_v43 = vld [vmem:[#allocation165_spill] sm:$0xff]  ;;  %v10741_v29 = vld [vmem:[#allocation40_spill] sm:$0xff] }
 0x5c8   : > { %v4354_v8 = vadd.f32 %v4353_v55, %v4352_v15  ;;  %v4363_v4 = vsel %vm1048_vm0, %v4264_v2, 0.0  ;;  %v10733_v55 = vld [vmem:[#allocation21_spill] sm:$0xff]  ;;  %v10734_v15 = vld [vmem:[#allocation99_spill] sm:$0xff]  ;;  %v4265_v3 = vmul.f32 %v10737_v25, %v10736_v43  ;;  %v6132_v25 = vld [vmem:[%s7299_s23 + $0x90] sm:$0xff] }
 0x5c9   : > { %v4484_v45 = vmul.f32 %v4344_v1, %v4125_v62  ;;  %v3895_v48 = vadd.f32 %v9255_v31, %v10733_v55  ;;  %v4233_v13 = vmul.f32 %v10590_v36, %v10734_v15  ;;  %v10747_v55 = vld [vmem:[#allocation114_spill] sm:$0xff] }
 0x5ca   : > { %v4368_v36 = vsel %vm1048_vm0, %v4265_v3, 0.0 }
 0x5cb   : > { %v4516_v12 = vadd.f32 %v4484_v45, %v4452_v50  ;;  %v6128_v50 = vld [vmem:[%s7299_s23 + $0x70] sm:$0xff] }
 0x5cc   : > { %v4454_v45 = vadd.f32 %v6128_v50, %v3889_v7  ;;  %v4456_v50 = vadd.f32 %v6130_v63, %v3895_v48 }
 0x5cd   : > { %5773 = vmatmul.msk.f32.gmra.mxu2 %vm1048_vm0, %v10712_v51  ;;  %4548 = vst.msk [vmem:[%s9296_s28 + $0x60] sm:$0xff] %vm1048_vm0, %v4516_v12  ;;  %v4356_v12 = vsel %vm1048_vm0, %v4231_v39, 0.0 }
 0x5ce   : > { %v4127_v54 = vpop.f32.mrf.mxu2  ;;  %v4357_v32 = vadd.f32 %v4356_v12, %v4355_v30 }
 0x5cf   : > { %v4128_v10 = vadd.f32 %v9267_v17, %v4127_v54 }
 0x5d1   : > { %v4485_v26 = vmul.f32 %v4349_v24, %v4128_v10  ;;  %v4359_v24 = vadd.f32 %v4358_v34, %v4357_v32  ;;  %v10739_v34 = vld [vmem:[#allocation100_spill] sm:$0xff] }
 0x5d3   : > { %v4517_v42 = vadd.f32 %v4485_v26, %v4453_v58  ;;  %v4455_v58 = vadd.f32 %v6129_v37, %v3892_v23  ;;  %v4234_v23 = vmul.f32 %v10740_v38, %v10739_v34 }
 0x5d5   : > { %5774 = vmatmul.msk.f32.gmra.mxu2 %vm1048_vm0, %v10719_v40  ;;  %4549 = vst.msk [vmem:[%s9296_s28 + $0x68] sm:$0xff] %vm1048_vm0, %v4517_v42  ;;  %v4360_v40 = vsel %vm1048_vm0, %v4200_v49, 0.0  ;;  %v6131_v49 = vld [vmem:[%s7299_s23 + $0x88] sm:$0xff]  ;;  %v4371_v2 = vsel %vm1048_vm0, %v4234_v23, 0.0 }
 0x5d6   : > { %v4130_v62 = vpop.f32.mrf.mxu2  ;;  %v4362_v7 = vadd.f32 %v4361_v41, %v4360_v40  ;;  %v10745_v41 = vld [vmem:[#allocation23_spill] sm:$0xff] }
 0x5d7   : > { %v4131_v1 = vadd.f32 %v9267_v17, %v4130_v62 }
 0x5d9   : > { %v4486_v19 = vmul.f32 %v4354_v8, %v4131_v1  ;;  %v4364_v1 = vadd.f32 %v4363_v4, %v4362_v7  ;;  %v10735_v8 = vld [vmem:[#allocation38_spill] sm:$0xff] }
 0x5da   : > { %v4201_v47 = vmul.f32 %v10589_v57, %v10735_v8  ;;  %v10746_v4 = vld [vmem:[#allocation102_spill] sm:$0xff]  ;;  %v10750_v8 = vld [vmem:[#allocation167_spill] sm:$0xff] }
 0x5db   : > { %v4518_v51 = vadd.f32 %v4486_v19, %v4454_v45  ;;  %v4366_v19 = vsel %vm1048_vm0, %v4233_v13, 0.0  ;;  %v4235_v48 = vmul.f32 %v10747_v55, %v10746_v4 }
 0x5dd   : > { %5775 = vmatmul.msk.f32.gmra.mxu2 %vm1048_vm0, %v10725_v59  ;;  %4550 = vst.msk [vmem:[%s9296_s28 + $0x70] sm:$0xff] %vm1048_vm0, %v4518_v51  ;;  %v4365_v51 = vsel %vm1048_vm0, %v4201_v47, 0.0  ;;  %v10738_v59 = vld [vmem:[#allocation87_spill] sm:$0xff] }
 0x5de   : > { %v4133_v54 = vpop.f32.mrf.mxu2  ;;  %v3898_v30 = vadd.f32 %v9255_v31, %v10738_v59  ;;  %v4367_v57 = vadd.f32 %v4366_v19, %v4365_v51  ;;  %v10751_v47 = vld [vmem:[#allocation107_spill] sm:$0xff]  ;;  %v10752_v51 = vld [vmem:[#allocation89_spill] sm:$0xff] }
 0x5df   : > { %v4134_v10 = vadd.f32 %v9267_v17, %v4133_v54  ;;  %v10742_v54 = vld [vmem:[#allocation41_spill] sm:$0xff]  ;;  %v4267_v43 = vmul.f32 %v10751_v47, %v10750_v8  ;;  %v6134_v47 = vld [vmem:[%s7299_s23 + $0xa0] sm:$0xff] }
 0x5e0   : > { %v4369_v0 = vadd.f32 %v4368_v36, %v4367_v57  ;;  %v4457_v9 = vadd.f32 %v6131_v49, %v3898_v30  ;;  %v3904_v36 = vadd.f32 %v9255_v31, %v10752_v51  ;;  %v10753_v30 = vld [vmem:[#allocation104_spill] sm:$0xff]  ;;  %v10754_v57 = vld [vmem:[#allocation117_spill] sm:$0xff] }
 0x5e1   : > { %v4487_v26 = vmul.f32 %v4359_v24, %v4134_v10  ;;  %v4202_v10 = vmul.f32 %v10742_v54, %v10741_v29  ;;  %v10743_v24 = vld [vmem:[#allocation166_spill] sm:$0xff]  ;;  %v4236_v34 = vmul.f32 %v10754_v57, %v10753_v30  ;;  %v10757_v54 = vld [vmem:[#allocation168_spill] sm:$0xff] }
 0x5e2   : > { %v4266_v11 = vmul.f32 %v10744_v18, %v10743_v24  ;;  %v6133_v18 = vld [vmem:[%s7299_s23 + $0x98] sm:$0xff] }
 0x5e3   : > { %v4519_v42 = vadd.f32 %v4487_v26, %v4455_v58  ;;  %v4370_v58 = vsel %vm1048_vm0, %v4202_v10, 0.0  ;;  %v10758_v10 = vld [vmem:[#allocation195_spill] sm:$0xff] }
 0x5e4   : > { %v4373_v26 = vsel %vm1048_vm0, %v4266_v11, 0.0  ;;  %v4372_v40 = vadd.f32 %v4371_v2, %v4370_v58  ;;  %v4268_v24 = vmul.f32 %v10758_v10, %v10757_v54  ;;  %v4459_v11 = vadd.f32 %v6133_v18, %v3904_v36  ;;  %v10759_v58 = vld [vmem:[#allocation27_spill] sm:$0xff]  ;;  %v10767_v36 = vld [vmem:[#allocation109_spill] sm:$0xff] }
 0x5e5   : > { %4551 = vst.msk [vmem:[%s9296_s28 + $0x78] sm:$0xff] %vm1048_vm0, %v4519_v42  ;;  %v3901_v42 = vadd.f32 %v9255_v31, %v10745_v41  ;;  %v6135_v10 = vld [vmem:[%s7299_s23 + $0xa8] sm:$0xff] }
 0x5e6   : > { %v4136_v39 = vpop.f32.mrf.mxu2  ;;  %v4374_v13 = vadd.f32 %v4373_v26, %v4372_v40  ;;  %v3907_v26 = vadd.f32 %v9255_v31, %v10759_v58  ;;  %v10761_v40 = vld [vmem:[#allocation120_spill] sm:$0xff] }
 0x5e7   : > { %v4137_v62 = vadd.f32 %v9267_v17, %v4136_v39  ;;  %v10748_v39 = vld [vmem:[#allocation42_spill] sm:$0xff]  ;;  %v4458_v3 = vadd.f32 %v6132_v25, %v3901_v42 }
 0x5e8   : > { %v10760_v42 = vld [vmem:[#allocation106_spill] sm:$0xff] }
 0x5e9   : > { %v4488_v45 = vmul.f32 %v4364_v1, %v4137_v62  ;;  %v10749_v62 = vld [vmem:[#allocation43_spill] sm:$0xff]  ;;  %v4237_v4 = vmul.f32 %v10761_v40, %v10760_v42 }
 0x5ea   : > { %v4203_v1 = vmul.f32 %v10749_v62, %v10748_v39  ;;  %v10764_v62 = vld [vmem:[#allocation169_spill] sm:$0xff] }
 0x5eb   : > { %v4520_v12 = vadd.f32 %v4488_v45, %v4456_v50  ;;  %v4376_v50 = vsel %vm1048_vm0, %v4235_v48, 0.0 }
 0x5ec   : > { %v4375_v19 = vsel %vm1048_vm0, %v4203_v1, 0.0  ;;  %v10765_v1 = vld [vmem:[#allocation197_spill] sm:$0xff] }
 0x5ed   : > { %4552 = vst.msk [vmem:[%s9296_s28 + $0x80] sm:$0xff] %vm1048_vm0, %v4520_v12  ;;  %v4378_v12 = vsel %vm1048_vm0, %v4267_v43, 0.0  ;;  %v4377_v59 = vadd.f32 %v4376_v50, %v4375_v19  ;;  %v4269_v8 = vmul.f32 %v10765_v1, %v10764_v62  ;;  %v4460_v43 = vadd.f32 %v6134_v47, %v3907_v26  ;;  %v10766_v19 = vld [vmem:[#allocation29_spill] sm:$0xff]  ;;  %v10774_v26 = vld [vmem:[#allocation110_spill] sm:$0xff] }
 0x5ee   : > { %v4139_v32 = vpop.f32.mrf.mxu2  ;;  %v6136_v1 = vld [vmem:[%s7299_s23 + $0xb0] sm:$0xff] }
 0x5ef   : > { %v4140_v5 = vadd.f32 %v9267_v17, %v4139_v32  ;;  %v4379_v32 = vadd.f32 %v4378_v12, %v4377_v59  ;;  %v3910_v12 = vadd.f32 %v9255_v31, %v10766_v19  ;;  %v10768_v59 = vld [vmem:[#allocation124_spill] sm:$0xff] }
 0x5f0   : > { %v4238_v30 = vmul.f32 %v10768_v59, %v10767_v36  ;;  %v10783_v59 = vld [vmem:[#allocation52_spill] sm:$0xff] }
 0x5f1   : > { %v4489_v28 = vmul.f32 %v4369_v0, %v4140_v5  ;;  %v10755_v5 = vld [vmem:[#allocation44_spill] sm:$0xff]  ;;  %v10756_v0 = vld [vmem:[#allocation45_spill] sm:$0xff] }
 0x5f2   : > { %v4204_v29 = vmul.f32 %v10756_v0, %v10755_v5  ;;  %v10771_v0 = vld [vmem:[#allocation170_spill] sm:$0xff] }
 0x5f3   : > { %v4521_v37 = vadd.f32 %v4489_v28, %v4457_v9  ;;  %v4381_v9 = vsel %vm1048_vm0, %v4236_v34, 0.0 }
 0x5f4   : > { %v4380_v2 = vsel %vm1048_vm0, %v4204_v29, 0.0  ;;  %v10772_v29 = vld [vmem:[#allocation200_spill] sm:$0xff] }
 0x5f5   : > { %4553 = vst.msk [vmem:[%s9296_s28 + $0x88] sm:$0xff] %vm1048_vm0, %v4521_v37  ;;  %v4383_v37 = vsel %vm1048_vm0, %v4268_v24, 0.0  ;;  %v4382_v41 = vadd.f32 %v4381_v9, %v4380_v2  ;;  %v4270_v54 = vmul.f32 %v10772_v29, %v10771_v0  ;;  %v4461_v24 = vadd.f32 %v6135_v10, %v3910_v12  ;;  %v10773_v2 = vld [vmem:[#allocation98_spill] sm:$0xff]  ;;  %v10786_v0 = vld [vmem:[#allocation139_spill] sm:$0xff] }
 0x5f6   : > { %v4142_v7 = vpop.f32.mrf.mxu2 }
 0x5f7   : > { %v4143_v15 = vadd.f32 %v9267_v17, %v4142_v7  ;;  %v4384_v7 = vadd.f32 %v4383_v37, %v4382_v41  ;;  %v3913_v37 = vadd.f32 %v9255_v31, %v10773_v2  ;;  %v10775_v41 = vld [vmem:[#allocation127_spill] sm:$0xff] }
 0x5f8   : > { %v4239_v42 = vmul.f32 %v10775_v41, %v10774_v26  ;;  %v10789_v26 = vld [vmem:[#allocation54_spill] sm:$0xff] }
 0x5f9   : > { %v4490_v63 = vmul.f32 %v4374_v13, %v4143_v15  ;;  %v10762_v15 = vld [vmem:[#allocation46_spill] sm:$0xff]  ;;  %v10763_v13 = vld [vmem:[#allocation47_spill] sm:$0xff]  ;;  %v4209_v41 = vmul.f32 %v10629_v60, %v10789_v26 }
 0x5fa   : > { %v4205_v39 = vmul.f32 %v10763_v13, %v10762_v15  ;;  %v10778_v13 = vld [vmem:[#allocation171_spill] sm:$0xff]  ;;  %v6140_v26 = vld [vmem:[%s7299_s23 + $0xd0] sm:$0xff] }
 0x5fb   : > { %v4522_v45 = vadd.f32 %v4490_v63, %v4458_v3  ;;  %v4386_v3 = vsel %vm1048_vm0, %v4237_v4, 0.0 }
 0x5fc   : > { %v4385_v50 = vsel %vm1048_vm0, %v4205_v39, 0.0  ;;  %v10779_v39 = vld [vmem:[#allocation201_spill] sm:$0xff] }
 0x5fd   : > { %4554 = vst.msk [vmem:[%s9296_s28 + $0x90] sm:$0xff] %vm1048_vm0, %v4522_v45  ;;  %v4388_v45 = vsel %vm1048_vm0, %v4269_v8, 0.0  ;;  %v4387_v51 = vadd.f32 %v4386_v3, %v4385_v50  ;;  %v4271_v62 = vmul.f32 %v10779_v39, %v10778_v13  ;;  %v4462_v8 = vadd.f32 %v6136_v1, %v3913_v37  ;;  %v10781_v50 = vld [vmem:[#allocation130_spill] sm:$0xff]  ;;  %v10788_v37 = vld [vmem:[#allocation103_spill] sm:$0xff] }
 0x5ff   : > { %v4398_v19 = vsel %vm1048_vm0, %v4271_v62, 0.0  ;;  %v4405_v62 = vsel %vm1048_vm0, %v4209_v41, 0.0 }
 0x600   : > { %v4145_v38 = vpop.f32.mrf.mxu2 }
 0x601   : > { %v4146_v23 = vadd.f32 %v9267_v17, %v4145_v38  ;;  %v4389_v38 = vadd.f32 %v4388_v45, %v4387_v51  ;;  %v10782_v51 = vld [vmem:[#allocation35_spill] sm:$0xff] }
 0x602   : > { %v3916_v36 = vadd.f32 %v9255_v31, %v10782_v51 }
 0x603   : > { %v4491_v49 = vmul.f32 %v4379_v32, %v4146_v23  ;;  %v10769_v23 = vld [vmem:[#allocation48_spill] sm:$0xff]  ;;  %v10770_v32 = vld [vmem:[#allocation49_spill] sm:$0xff] }
 0x604   : > { %v4206_v5 = vmul.f32 %v10770_v32, %v10769_v23 }
 0x605   : > { %v4523_v28 = vadd.f32 %v4491_v49, %v4459_v11  ;;  %v4391_v11 = vsel %vm1048_vm0, %v4238_v30, 0.0  ;;  %v10784_v30 = vld [vmem:[#allocation53_spill] sm:$0xff] }
 0x606   : > { %v4390_v9 = vsel %vm1048_vm0, %v4206_v5, 0.0  ;;  %v10785_v5 = vld [vmem:[#allocation108_spill] sm:$0xff] }
 0x607   : > { %4555 = vst.msk [vmem:[%s9296_s28 + $0x98] sm:$0xff] %vm1048_vm0, %v4523_v28  ;;  %v4393_v28 = vsel %vm1048_vm0, %v4270_v54, 0.0  ;;  %v4392_v58 = vadd.f32 %v4391_v11, %v4390_v9  ;;  %v4272_v29 = vmul.f32 %v10786_v0, %v10785_v5  ;;  %v6137_v54 = vld [vmem:[%s7299_s23 + $0xb8] sm:$0xff]  ;;  %v10787_v9 = vld [vmem:[#allocation116_spill] sm:$0xff]  ;;  %v10798_v0 = vld [vmem:[#allocation122_spill] sm:$0xff] }
 0x608   : > { %v4148_v55 = vpop.f32.mrf.mxu2  ;;  %v4463_v10 = vadd.f32 %v6137_v54, %v3916_v36 }
 0x609   : > { %v4149_v48 = vadd.f32 %v9267_v17, %v4148_v55  ;;  %v4394_v55 = vadd.f32 %v4393_v28, %v4392_v58  ;;  %v4241_v28 = vmul.f32 %v10630_v22, %v10787_v9  ;;  %v4403_v2 = vsel %vm1048_vm0, %v4272_v29, 0.0 }
 0x60a   : > { %v3919_v58 = vadd.f32 %v9255_v31, %v10788_v37  ;;  %v4243_v29 = vmul.f32 %v10648_v61, %v10798_v0  ;;  %v10801_v37 = vld [vmem:[#allocation118_spill] sm:$0xff] }
 0x60b   : > { %v4492_v25 = vmul.f32 %v4384_v7, %v4149_v48  ;;  %v10776_v48 = vld [vmem:[#allocation50_spill] sm:$0xff]  ;;  %v10777_v7 = vld [vmem:[#allocation51_spill] sm:$0xff] }
 0x60c   : > { %v4207_v15 = vmul.f32 %v10777_v7, %v10776_v48  ;;  %v10790_v48 = vld [vmem:[#allocation112_spill] sm:$0xff]  ;;  %v10791_v7 = vld [vmem:[#allocation142_spill] sm:$0xff] }
 0x60d   : > { %v4524_v63 = vadd.f32 %v4492_v25, %v4460_v43  ;;  %v4396_v43 = vsel %vm1048_vm0, %v4239_v42, 0.0  ;;  %v4273_v22 = vmul.f32 %v10791_v7, %v10790_v48  ;;  %v9820_v7 = vld [vmem:[%s10107_s10] ss:$0 sm:$0xff] }
 0x60e   : > { %v4395_v3 = vsel %vm1048_vm0, %v4207_v15, 0.0  ;;  %v6138_v15 = vld [vmem:[%s7299_s23 + $0xc0] sm:$0xff] }
 0x60f   : > { %4556 = vst.msk [vmem:[%s9296_s28 + $0xa0] sm:$0xff] %vm1048_vm0, %v4524_v63  ;;  %v10780_v63 = vld [vmem:[#allocation113_spill] sm:$0xff]  ;;  %v4397_v12 = vadd.f32 %v4396_v43, %v4395_v3  ;;  %v4464_v13 = vadd.f32 %v6138_v15, %v3919_v58  ;;  %v4408_v43 = vsel %vm1048_vm0, %v4273_v22, 0.0  ;;  %v10804_v22 = vld [vmem:[#allocation196_spill] sm:$0xff] }
 0x610   : > { %v4151_v57 = vpop.f32.mrf.mxu2  ;;  %v4240_v45 = vmul.f32 %v10781_v50, %v10780_v63  ;;  %v10794_v63 = vld [vmem:[#allocation56_spill] sm:$0xff]  ;;  %v10795_v50 = vld [vmem:[#allocation57_spill] sm:$0xff]  ;;  %v3928_v15 = vadd.f32 %v9820_v7, %v10804_v22 }
 0x611   : > { %v4152_v34 = vadd.f32 %v9267_v17, %v4151_v57  ;;  %v4208_v57 = vmul.f32 %v10784_v30, %v10783_v59  ;;  %v10796_v59 = vld [vmem:[#allocation115_spill] sm:$0xff]  ;;  %v10797_v30 = vld [vmem:[#allocation145_spill] sm:$0xff]  ;;  %v10817_v22 = vld [vmem:[#allocation172_spill] sm:$0xff] }
 0x612   : > { %v4401_v32 = vsel %vm1048_vm0, %v4240_v45, 0.0  ;;  %v4210_v45 = vmul.f32 %v10795_v50, %v10794_v63  ;;  %v10802_v58 = vld [vmem:[#allocation149_spill] sm:$0xff] }
 0x613   : > { %v4493_v18 = vmul.f32 %v4389_v38, %v4152_v34  ;;  %v4399_v38 = vadd.f32 %v4398_v19, %v4397_v12  ;;  %v4275_v61 = vmul.f32 %v10802_v58, %v10801_v37 }
 0x615   : > { %v4525_v49 = vadd.f32 %v4493_v18, %v4461_v24  ;;  %v4400_v18 = vsel %vm1048_vm0, %v4208_v57, 0.0  ;;  %v6139_v57 = vld [vmem:[%s7299_s23 + $0xc8] sm:$0xff]  ;;  %v4418_v48 = vsel %vm1048_vm0, %v4275_v61, 0.0 }
 0x617   : > { %4557 = vst.msk [vmem:[%s9296_s28 + $0xa8] sm:$0xff] %vm1048_vm0, %v4525_v49  ;;  %v4402_v49 = vadd.f32 %v4401_v32, %v4400_v18  ;;  %v10800_v18 = vld [vmem:[#allocation58_spill] sm:$0xff] }
 0x618   : > { %v4154_v40 = vpop.f32.mrf.mxu2 }
 0x619   : > { %v4155_v4 = vadd.f32 %v9267_v17, %v4154_v40 }
 0x61b   : > { %v4494_v47 = vmul.f32 %v4394_v55, %v4155_v4  ;;  %v4404_v4 = vadd.f32 %v4403_v2, %v4402_v49  ;;  %v4406_v55 = vsel %vm1048_vm0, %v4241_v28, 0.0  ;;  %v4416_v2 = vsel %vm1048_vm0, %v4243_v29, 0.0 }
 0x61d   : > { %v4526_v25 = vadd.f32 %v4494_v47, %v4462_v8  ;;  %v4407_v8 = vadd.f32 %v4406_v55, %v4405_v62  ;;  %v10792_v47 = vld [vmem:[#allocation119_spill] sm:$0xff] }
 0x61e   : > { %v4242_v60 = vmul.f32 %v10639_v16, %v10792_v47  ;;  %v4274_v16 = vmul.f32 %v10797_v30, %v10796_v59  ;;  %v10803_v55 = vld [vmem:[#allocation123_spill] sm:$0xff]  ;;  %v10806_v47 = vld [vmem:[#allocation121_spill] sm:$0xff]  ;;  %v10810_v59 = vld [vmem:[#allocation62_spill] sm:$0xff] }
 0x61f   : > { %4558 = vst.msk [vmem:[%s9296_s28 + $0xb0] sm:$0xff] %vm1048_vm0, %v4526_v25  ;;  %v10793_v25 = vld [vmem:[#allocation39_spill] sm:$0xff]  ;;  %v4409_v51 = vadd.f32 %v4408_v43, %v4407_v8  ;;  %v4213_v30 = vmul.f32 %v10664_v6, %v10810_v59  ;;  %v5095_v59 = vld [vmem:[%s8660_s19 + $0x8] sm:$0xff] (%p6278_p5) }
 0x620   : > { %v4157_v34 = vpop.f32.mrf.mxu2  ;;  %v3922_v3 = vadd.f32 %v9255_v31, %v10793_v25  ;;  %v4411_v36 = vsel %vm1048_vm0, %v4242_v60, 0.0  ;;  %v4413_v54 = vsel %vm1048_vm0, %v4274_v16, 0.0  ;;  %v10807_v60 = vld [vmem:[#allocation152_spill] sm:$0xff]  ;;  %v6142_v25 = vld [vmem:[%s7299_s23 + $0xd8] sm:$0xff] }
 0x621   : > { %v4158_v23 = vadd.f32 %v9267_v17, %v4157_v34  ;;  %v4276_v43 = vmul.f32 %v10807_v60, %v10806_v47  ;;  %v6146_v47 = vld [vmem:[%s7299_s23 + $0xf0] sm:$0xff] }
 0x622   : > { %v4465_v34 = vadd.f32 %v6139_v57, %v3922_v3  ;;  %v4467_v3 = vadd.f32 %v6142_v25, %v3928_v15  ;;  %v6143_v57 = vld [vmem:[%s10109_s12] ss:$0 sm:$0xff]  ;;  %v3937_v15 = vadd.f32 %v9820_v7, %v10817_v22  ;;  %v5169_v22 = vld [vmem:[%s8660_s19 + $0x130] sm:$0xff] (%p6278_p5) }
 0x623   : > { %v4495_v24 = vmul.f32 %v4399_v38, %v4158_v23  ;;  %v4410_v23 = vsel %vm1048_vm0, %v4210_v45, 0.0 }
 0x624   : > { %v4412_v5 = vadd.f32 %v4411_v36, %v4410_v23  ;;  %v10811_v23 = vld [vmem:[#allocation125_spill] sm:$0xff]  ;;  %v4470_v60 = vadd.f32 %v6146_v47, %v3937_v15  ;;  %v5171_v15 = vld [vmem:[%s8660_s19 + $0x138] sm:$0xff] (%p6278_p5)  ;;  %v5189_v47 = vld [vmem:[%s8660_s19 + $0x180] sm:$0xff] (%p6278_p5) }
 0x625   : > { %v4527_v11 = vadd.f32 %v4495_v24, %v4463_v10  ;;  %v10799_v10 = vld [vmem:[#allocation194_spill] sm:$0xff] }
 0x626   : > { %v3925_v24 = vadd.f32 %v9255_v31, %v10799_v10  ;;  %v4414_v28 = vadd.f32 %v4413_v54, %v4412_v5  ;;  %v6144_v5 = vld [vmem:[%s7299_s23 + $0xe0] sm:$0xff]  ;;  %v4425_v54 = vsel %vm1048_vm0, %v4213_v30, 0.0  ;;  %v5097_v30 = vld [vmem:[%s8660_s19 + $0x10] sm:$0xff] (%p6278_p5) }
 0x627   : > { %4559 = vst.msk [vmem:[%s9296_s28 + $0xb8] sm:$0xff] %vm1048_vm0, %v4527_v11  ;;  %v4211_v11 = vmul.f32 %v10647_v14, %v10800_v18  ;;  %v4244_v14 = vmul.f32 %v10657_v20, %v10803_v55 }
 0x628   : > { %v4160_v42 = vpop.f32.mrf.mxu2  ;;  %v4466_v41 = vadd.f32 %v6140_v26, %v3925_v24  ;;  %v10812_v24 = vld [vmem:[#allocation129_spill] sm:$0xff]  ;;  %v10815_v26 = vld [vmem:[#allocation128_spill] sm:$0xff] }
 0x629   : > { %v4161_v40 = vadd.f32 %v9267_v17, %v4160_v42  ;;  %v4415_v31 = vsel %vm1048_vm0, %v4211_v11, 0.0  ;;  %v4421_v8 = vsel %vm1048_vm0, %v4244_v14, 0.0  ;;  %v4246_v18 = vmul.f32 %v10672_v56, %v10812_v24  ;;  %v6145_v56 = vld [vmem:[%s7299_s23 + $0xe8] sm:$0xff]  ;;  %v10816_v14 = vld [vmem:[#allocation132_spill] sm:$0xff] }
 0x62a   : > { %v5125_v24 = vld [vmem:[%s8660_s19 + $0x80] sm:$0xff] (%p6278_p5) }
 0x62b   : > { %v4496_v39 = vmul.f32 %v4404_v4, %v4161_v40  ;;  %v4417_v4 = vadd.f32 %v4416_v2, %v4415_v31  ;;  %v4431_v61 = vsel %vm1048_vm0, %v4246_v18, 0.0  ;;  %v5127_v18 = vld [vmem:[%s8660_s19 + $0x88] sm:$0xff] (%p6278_p5) }
 0x62d   : > { %v4528_v1 = vadd.f32 %v4496_v39, %v4464_v13  ;;  %v10805_v13 = vld [vmem:[#allocation60_spill] sm:$0xff]  ;;  %v4419_v20 = vadd.f32 %v4418_v48, %v4417_v4  ;;  %v4247_v48 = vmul.f32 %v10679_v33, %v10816_v14  ;;  %v5163_v14 = vld [vmem:[%s8660_s19 + $0x118] sm:$0xff] (%p6278_p5) }
 0x62e   : > { %v4212_v39 = vmul.f32 %v10656_v46, %v10805_v13 }
 0x62f   : > { %4560 = vst.msk [vmem:[%s9296_s28 + $0xc0] sm:$0xff] %vm1048_vm0, %v4528_v1 }
 0x630   : > { %v4163_v19 = vpop.f32.mrf.mxu2  ;;  %v4420_v50 = vsel %vm1048_vm0, %v4212_v39, 0.0 }
 0x631   : > { %v4164_v12 = vadd.f32 %v9267_v17, %v4163_v19  ;;  %v4422_v19 = vadd.f32 %v4421_v8, %v4420_v50  ;;  %v10819_v8 = vld [vmem:[#allocation131_spill] sm:$0xff] }
 0x632   : > { %v4279_v33 = vmul.f32 %v10680_v44, %v10819_v8  ;;  %v5185_v8 = vld [vmem:[%s8660_s19 + $0x170] sm:$0xff] (%p6278_p5) }
 0x633   : > { %v4497_v38 = vmul.f32 %v4409_v51, %v4164_v12  ;;  %v10808_v12 = vld [vmem:[#allocation126_spill] sm:$0xff]  ;;  %v4423_v51 = vsel %vm1048_vm0, %v4276_v43, 0.0 }
 0x634   : > { %v4245_v46 = vmul.f32 %v10665_v21, %v10808_v12  ;;  %v4438_v50 = vsel %vm1048_vm0, %v4279_v33, 0.0  ;;  %v5187_v33 = vld [vmem:[%s8660_s19 + $0x178] sm:$0xff] (%p6278_p5) }
 0x635   : > { %v4529_v32 = vadd.f32 %v4497_v38, %v4465_v34  ;;  %v4424_v38 = vadd.f32 %v4423_v51, %v4422_v19  ;;  %v6147_v51 = vld [vmem:[%s7299_s23 + $0xf8] sm:$0xff] }
 0x636   : > { %v4426_v21 = vsel %vm1048_vm0, %v4245_v46, 0.0 }
 0x637   : > { %4561 = vst.msk [vmem:[%s9296_s28 + $0xc8] sm:$0xff] %vm1048_vm0, %v4529_v32  ;;  %v4277_v32 = vmul.f32 %v10666_v52, %v10811_v23  ;;  %v4427_v10 = vadd.f32 %v4426_v21, %v4425_v54  ;;  %v5107_v21 = vld [vmem:[%s8660_s19 + $0x38] sm:$0xff] (%p6278_p5)  ;;  %v5109_v23 = vld [vmem:[%s8660_s19 + $0x40] sm:$0xff] (%p6278_p5)  ;;  %v5119_v54 = vld [vmem:[%s8660_s19 + $0x68] sm:$0xff] (%p6278_p5) }
 0x638   : > { %v4166_v49 = vpop.f32.mrf.mxu2 }
 0x639   : > { %v4167_v9 = vadd.f32 %v9267_v17, %v4166_v49  ;;  %v4428_v11 = vsel %vm1048_vm0, %v4277_v32, 0.0  ;;  %v10813_v49 = vld [vmem:[#allocation199_spill] sm:$0xff]  ;;  %v5111_v32 = vld [vmem:[%s8660_s19 + $0x48] sm:$0xff] (%p6278_p5) }
 0x63a   : > { %v4429_v58 = vadd.f32 %v4428_v11, %v4427_v10  ;;  %v5123_v10 = vld [vmem:[%s8660_s19 + $0x78] sm:$0xff] (%p6278_p5)  ;;  %v5129_v11 = vld [vmem:[%s8660_s19 + $0x90] sm:$0xff] (%p6278_p5) }
 0x63b   : > { %v4498_v42 = vmul.f32 %v4414_v28, %v4167_v9  ;;  %v3934_v9 = vadd.f32 %v9820_v7, %v10813_v49  ;;  %v10814_v28 = vld [vmem:[#allocation64_spill] sm:$0xff]  ;;  %v5131_v49 = vld [vmem:[%s8660_s19 + $0x98] sm:$0xff] (%p6278_p5) }
 0x63c   : > { %v4214_v52 = vmul.f32 %v10671_v27, %v10814_v28  ;;  %v5135_v28 = vld [vmem:[%s8660_s19 + $0xa8] sm:$0xff] (%p6278_p5) }
 0x63d   : > { %v4530_v40 = vadd.f32 %v4498_v42, %v4466_v41  ;;  %v4278_v41 = vmul.f32 %v10673_v53, %v10815_v26  ;;  %v4469_v42 = vadd.f32 %v6145_v56, %v3934_v9  ;;  %v10818_v53 = vld [vmem:[#allocation66_spill] sm:$0xff]  ;;  %v5133_v9 = vld [vmem:[%s8660_s19 + $0xa0] sm:$0xff] (%p6278_p5)  ;;  %v5147_v26 = vld [vmem:[%s8660_s19 + $0xd8] sm:$0xff] (%p6278_p5) }
 0x63e   : > { %v4215_v13 = vmul.f32 %v10678_v35, %v10818_v53  ;;  %v10820_v35 = vld [vmem:[#allocation173_spill] sm:$0xff]  ;;  %v5173_v53 = vld [vmem:[%s8660_s19 + $0x140] sm:$0xff] (%p6278_p5) }
 0x63f   : > { %4562 = vst.msk [vmem:[%s9296_s28 + $0xd0] sm:$0xff] %vm1048_vm0, %v4530_v40  ;;  %v4430_v40 = vsel %vm1048_vm0, %v4214_v52, 0.0  ;;  %v4433_v27 = vsel %vm1048_vm0, %v4278_v41, 0.0  ;;  %v5137_v52 = vld [vmem:[%s8660_s19 + $0xb0] sm:$0xff] (%p6278_p5)  ;;  %v5149_v41 = vld [vmem:[%s8660_s19 + $0xe0] sm:$0xff] (%p6278_p5)  ;;  %v5151_v56 = vld [vmem:[%s8660_s19 + $0xe8] sm:$0xff] (%p6278_p5) }
 0x640   : > { %v4169_v62 = vpop.f32.mrf.mxu2  ;;  %v4432_v55 = vadd.f32 %v4431_v61, %v4430_v40  ;;  %v4435_v25 = vsel %vm1048_vm0, %v4215_v13, 0.0  ;;  %v5145_v61 = vld [vmem:[%s8660_s19 + $0xd0] sm:$0xff] (%p6278_p5)  ;;  %v5157_v40 = vld [vmem:[%s8660_s19 + $0x100] sm:$0xff] (%p6278_p5)  ;;  %v5175_v13 = vld [vmem:[%s8660_s19 + $0x148] sm:$0xff] (%p6278_p5) }
 0x641   : > { %v4170_v1 = vadd.f32 %v9267_v17, %v4169_v62  ;;  %v10809_v17 = vld [vmem:[#allocation198_spill] sm:$0xff] }
 0x642   : > { %v3931_v36 = vadd.f32 %v9820_v7, %v10809_v17 }
 0x643   : > { %v4499_v63 = vmul.f32 %v4419_v20, %v4170_v1  ;;  %v4434_v1 = vadd.f32 %v4433_v27, %v4432_v55  ;;  %v4436_v20 = vsel %vm1048_vm0, %v4247_v48, 0.0  ;;  %v5161_v55 = vld [vmem:[%s8660_s19 + $0x110] sm:$0xff] (%p6278_p5)  ;;  %v5165_v48 = vld [vmem:[%s8660_s19 + $0x120] sm:$0xff] (%p6278_p5)  ;;  %v5167_v27 = vld [vmem:[%s8660_s19 + $0x128] sm:$0xff] (%p6278_p5) }
 0x644   : > { %v4468_v0 = vadd.f32 %v6144_v5, %v3931_v36  ;;  %v5113_v5 = vld [vmem:[%s8660_s19 + $0x50] sm:$0xff] (%p6278_p5) }
 0x645   : > { %v4531_v45 = vadd.f32 %v4499_v63, %v4467_v3  ;;  %v4437_v63 = vadd.f32 %v4436_v20, %v4435_v25  ;;  %v5183_v20 = vld [vmem:[%s8660_s19 + $0x168] sm:$0xff] (%p6278_p5)  ;;  %v5195_v25 = vld [vmem:[%s8660_s19 + $0x198] sm:$0xff] (%p6278_p5) }
 0x647   : > { %4563 = vst.msk [vmem:[%s9296_s28 + $0xd8] sm:$0xff] %vm1048_vm0, %v4531_v45  ;;  %v3940_v45 = vadd.f32 %v9820_v7, %v10820_v35  ;;  %v4439_v46 = vadd.f32 %v4438_v50, %v4437_v63  ;;  %v5093_v7 = vld [vmem:[%s8660_s19] sm:$0xff] (%p6278_p5)  ;;  %v5199_v63 = vld [vmem:[%s8660_s19 + $0x1a8] sm:$0xff] (%p6278_p5)  ;;  %v5201_v50 = vld [vmem:[%s8660_s19 + $0x1b0] sm:$0xff] (%p6278_p5) }
 0x648   : > { %v4172_v16 = vpop.f32.mrf.mxu2  ;;  %v5203_v35 = vld [vmem:[%s8660_s19 + $0x1b8] sm:$0xff] (%p6278_p5) }
 0x649   : > { %v4173_v34 = vadd.f32 %v6143_v57, %v4172_v16  ;;  %v4471_v44 = vadd.f32 %v6147_v51, %v3940_v45  ;;  %v5099_v16 = vld [vmem:[%s8660_s19 + $0x18] sm:$0xff] (%p6278_p5)  ;;  %v5205_v45 = vld [vmem:[%s8660_s19 + $0x1c0] sm:$0xff] (%p6278_p5) }
 0x64a   : > { %v5213_v51 = vld [vmem:[%s8660_s19 + $0x1e0] sm:$0xff] (%p6278_p5) }
 0x64b   : > { %v4500_v29 = vmul.f32 %v4424_v38, %v4173_v34  ;;  %v5103_v34 = vld [vmem:[%s8660_s19 + $0x28] sm:$0xff] (%p6278_p5)  ;;  %v5105_v38 = vld [vmem:[%s8660_s19 + $0x30] sm:$0xff] (%p6278_p5) }
 0x64d   : > { %v4532_v6 = vadd.f32 %v4500_v29, %v4468_v0  ;;  %v5115_v0 = vld [vmem:[%s8660_s19 + $0x58] sm:$0xff] (%p6278_p5)  ;;  %v5117_v29 = vld [vmem:[%s8660_s19 + $0x60] sm:$0xff] (%p6278_p5) }
 0x64f   : > { %4564 = vst.msk [vmem:[%s9296_s28 + $0xe0] sm:$0xff] %vm1048_vm0, %v4532_v6  ;;  %v5121_v6 = vld [vmem:[%s8660_s19 + $0x70] sm:$0xff] (%p6278_p5) }
 0x650   : > { %v4175_v2 = vpop.f32.mrf.mxu2 }
 0x651   : > { %v4176_v37 = vadd.f32 %v6143_v57, %v4175_v2  ;;  %v5139_v2 = vld [vmem:[%s8660_s19 + $0xb8] sm:$0xff] (%p6278_p5) }
 0x653   : > { %v4501_v31 = vmul.f32 %v4429_v58, %v4176_v37  ;;  %v5141_v37 = vld [vmem:[%s8660_s19 + $0xc0] sm:$0xff] (%p6278_p5)  ;;  %v5143_v58 = vld [vmem:[%s8660_s19 + $0xc8] sm:$0xff] (%p6278_p5) }
 0x655   : > { %v4533_v4 = vadd.f32 %v4501_v31, %v4469_v42  ;;  %v5153_v42 = vld [vmem:[%s8660_s19 + $0xf0] sm:$0xff] (%p6278_p5)  ;;  %v5155_v31 = vld [vmem:[%s8660_s19 + $0xf8] sm:$0xff] (%p6278_p5) }
 0x657   : > { %4565 = vst.msk [vmem:[%s9296_s28 + $0xe8] sm:$0xff] %vm1048_vm0, %v4533_v4  ;;  %v5159_v4 = vld [vmem:[%s8660_s19 + $0x108] sm:$0xff] (%p6278_p5) }
 0x658   : > { %v4178_v39 = vpop.f32.mrf.mxu2 }
 0x659   : > { %v4179_v62 = vadd.f32 %v6143_v57, %v4178_v39  ;;  %v5177_v39 = vld [vmem:[%s8660_s19 + $0x150] sm:$0xff] (%p6278_p5) }
 0x65b   : > { %v4502_v43 = vmul.f32 %v4434_v1, %v4179_v62  ;;  %v5179_v62 = vld [vmem:[%s8660_s19 + $0x158] sm:$0xff] (%p6278_p5)  ;;  %v5181_v1 = vld [vmem:[%s8660_s19 + $0x160] sm:$0xff] (%p6278_p5) }
 0x65d   : > { %v4534_v3 = vadd.f32 %v4502_v43, %v4470_v60  ;;  %v5191_v60 = vld [vmem:[%s8660_s19 + $0x188] sm:$0xff] (%p6278_p5)  ;;  %v5193_v43 = vld [vmem:[%s8660_s19 + $0x190] sm:$0xff] (%p6278_p5) }
 0x65f   : > { %4566 = vst.msk [vmem:[%s9296_s28 + $0xf0] sm:$0xff] %vm1048_vm0, %v4534_v3  ;;  %v5197_v3 = vld [vmem:[%s8660_s19 + $0x1a0] sm:$0xff] (%p6278_p5) }
 0x660   : > { %v4181_v19 = vpop.f32.mrf.mxu2 }
 0x661   : > { %v4182_v12 = vadd.f32 %v6143_v57, %v4181_v19  ;;  %v5101_v57 = vld [vmem:[%s8660_s19 + $0x20] sm:$0xff] (%p6278_p5)  ;;  %v5207_v19 = vld [vmem:[%s8660_s19 + $0x1c8] sm:$0xff] (%p6278_p5) }
 0x663   : > { %v4503_v17 = vmul.f32 %v4439_v46, %v4182_v12  ;;  %4871 = sbr.rel (!%p6278_p5) target bundleno = 1736 (0x6c8), region = 118  ;;  %v5209_v12 = vld [vmem:[%s8660_s19 + $0x1d0] sm:$0xff] (%p6278_p5)  ;;  %v5211_v46 = vld [vmem:[%s8660_s19 + $0x1d8] sm:$0xff] (%p6278_p5) }
 0x665   : > { %v4535_v36 = vadd.f32 %v4503_v17, %v4471_v44  ;;  %v5215_v44 = vld [vmem:[%s8660_s19 + $0x1e8] sm:$0xff] (%p6278_p5)  ;;  %v5217_v17 = vld [vmem:[%s8660_s19 + $0x1f0] sm:$0xff] (%p6278_p5) }
 0x667   : > { %4567 = vst.msk [vmem:[%s9296_s28 + $0xf8] sm:$0xff] %vm1048_vm0, %v4535_v36  ;;  %s9895_s28 = scalar_lea.vmem (%p6278_p5), %s10111_s14, %s5781_s25  ;;  %v5219_v36 = vld [vmem:[%s8660_s19 + $0x1f8] sm:$0xff] (%p6278_p5) }
 0x668   : > { %5094 = vst [vmem:[%s9895_s28] sm:$0xff] %v5093_v7  ;;  %v5221_v7 = vld [vmem:[%s8660_s19 + $0x200] sm:$0xff] }
 0x669   : > { %5096 = vst [vmem:[%s9895_s28 + $0x8] sm:$0xff] %v5095_v59  ;;  %v5223_v59 = vld [vmem:[%s8660_s19 + $0x208] sm:$0xff] }
 0x66a   : > { %5098 = vst [vmem:[%s9895_s28 + $0x10] sm:$0xff] %v5097_v30  ;;  %v5225_v30 = vld [vmem:[%s8660_s19 + $0x210] sm:$0xff] }
 0x66b   : > { %5100 = vst [vmem:[%s9895_s28 + $0x18] sm:$0xff] %v5099_v16  ;;  %v5227_v16 = vld [vmem:[%s8660_s19 + $0x218] sm:$0xff] }
 0x66c   : > { %5102 = vst [vmem:[%s9895_s28 + $0x20] sm:$0xff] %v5101_v57  ;;  %v5229_v57 = vld [vmem:[%s8660_s19 + $0x220] sm:$0xff] }
 0x66d   : > { %5104 = vst [vmem:[%s9895_s28 + $0x28] sm:$0xff] %v5103_v34  ;;  %v5231_v34 = vld [vmem:[%s8660_s19 + $0x228] sm:$0xff] }
 0x66e   : > { %5106 = vst [vmem:[%s9895_s28 + $0x30] sm:$0xff] %v5105_v38  ;;  %v5233_v38 = vld [vmem:[%s8660_s19 + $0x230] sm:$0xff] }
 0x66f   : > { %5108 = vst [vmem:[%s9895_s28 + $0x38] sm:$0xff] %v5107_v21  ;;  %v5235_v21 = vld [vmem:[%s8660_s19 + $0x238] sm:$0xff] }
 0x670   : > { %5110 = vst [vmem:[%s9895_s28 + $0x40] sm:$0xff] %v5109_v23  ;;  %v5237_v23 = vld [vmem:[%s8660_s19 + $0x240] sm:$0xff] }
 0x671   : > { %5112 = vst [vmem:[%s9895_s28 + $0x48] sm:$0xff] %v5111_v32  ;;  %v5239_v32 = vld [vmem:[%s8660_s19 + $0x248] sm:$0xff] }
 0x672   : > { %5114 = vst [vmem:[%s9895_s28 + $0x50] sm:$0xff] %v5113_v5  ;;  %v5241_v5 = vld [vmem:[%s8660_s19 + $0x250] sm:$0xff] }
 0x673   : > { %5116 = vst [vmem:[%s9895_s28 + $0x58] sm:$0xff] %v5115_v0  ;;  %v5243_v0 = vld [vmem:[%s8660_s19 + $0x258] sm:$0xff] }
 0x674   : > { %5118 = vst [vmem:[%s9895_s28 + $0x60] sm:$0xff] %v5117_v29  ;;  %v5245_v29 = vld [vmem:[%s8660_s19 + $0x260] sm:$0xff] }
 0x675   : > { %5120 = vst [vmem:[%s9895_s28 + $0x68] sm:$0xff] %v5119_v54  ;;  %v5247_v54 = vld [vmem:[%s8660_s19 + $0x268] sm:$0xff] }
 0x676   : > { %5122 = vst [vmem:[%s9895_s28 + $0x70] sm:$0xff] %v5121_v6  ;;  %v5249_v6 = vld [vmem:[%s8660_s19 + $0x270] sm:$0xff] }
 0x677   : > { %5124 = vst [vmem:[%s9895_s28 + $0x78] sm:$0xff] %v5123_v10  ;;  %v5251_v10 = vld [vmem:[%s8660_s19 + $0x278] sm:$0xff] }
 0x678   : > { %5126 = vst [vmem:[%s9895_s28 + $0x80] sm:$0xff] %v5125_v24  ;;  %v5253_v24 = vld [vmem:[%s8660_s19 + $0x280] sm:$0xff] }
 0x679   : > { %5128 = vst [vmem:[%s9895_s28 + $0x88] sm:$0xff] %v5127_v18  ;;  %v5255_v18 = vld [vmem:[%s8660_s19 + $0x288] sm:$0xff] }
 0x67a   : > { %5130 = vst [vmem:[%s9895_s28 + $0x90] sm:$0xff] %v5129_v11  ;;  %v5257_v11 = vld [vmem:[%s8660_s19 + $0x290] sm:$0xff] }
 0x67b   : > { %5132 = vst [vmem:[%s9895_s28 + $0x98] sm:$0xff] %v5131_v49  ;;  %v5259_v49 = vld [vmem:[%s8660_s19 + $0x298] sm:$0xff] }
 0x67c   : > { %5134 = vst [vmem:[%s9895_s28 + $0xa0] sm:$0xff] %v5133_v9  ;;  %v5261_v9 = vld [vmem:[%s8660_s19 + $0x2a0] sm:$0xff] }
 0x67d   : > { %5136 = vst [vmem:[%s9895_s28 + $0xa8] sm:$0xff] %v5135_v28  ;;  %v5263_v28 = vld [vmem:[%s8660_s19 + $0x2a8] sm:$0xff] }
 0x67e   : > { %5138 = vst [vmem:[%s9895_s28 + $0xb0] sm:$0xff] %v5137_v52  ;;  %v5265_v52 = vld [vmem:[%s8660_s19 + $0x2b0] sm:$0xff] }
 0x67f   : > { %5140 = vst [vmem:[%s9895_s28 + $0xb8] sm:$0xff] %v5139_v2  ;;  %v5267_v2 = vld [vmem:[%s8660_s19 + $0x2b8] sm:$0xff] }
 0x680   : > { %5142 = vst [vmem:[%s9895_s28 + $0xc0] sm:$0xff] %v5141_v37  ;;  %v5269_v37 = vld [vmem:[%s8660_s19 + $0x2c0] sm:$0xff] }
 0x681   : > { %5144 = vst [vmem:[%s9895_s28 + $0xc8] sm:$0xff] %v5143_v58  ;;  %v5271_v58 = vld [vmem:[%s8660_s19 + $0x2c8] sm:$0xff] }
 0x682   : > { %5146 = vst [vmem:[%s9895_s28 + $0xd0] sm:$0xff] %v5145_v61  ;;  %v5273_v61 = vld [vmem:[%s8660_s19 + $0x2d0] sm:$0xff] }
 0x683   : > { %5148 = vst [vmem:[%s9895_s28 + $0xd8] sm:$0xff] %v5147_v26  ;;  %v5275_v26 = vld [vmem:[%s8660_s19 + $0x2d8] sm:$0xff] }
 0x684   : > { %5150 = vst [vmem:[%s9895_s28 + $0xe0] sm:$0xff] %v5149_v41  ;;  %v5277_v41 = vld [vmem:[%s8660_s19 + $0x2e0] sm:$0xff] }
 0x685   : > { %5152 = vst [vmem:[%s9895_s28 + $0xe8] sm:$0xff] %v5151_v56  ;;  %v5279_v56 = vld [vmem:[%s8660_s19 + $0x2e8] sm:$0xff] }
 0x686   : > { %5154 = vst [vmem:[%s9895_s28 + $0xf0] sm:$0xff] %v5153_v42  ;;  %v5281_v42 = vld [vmem:[%s8660_s19 + $0x2f0] sm:$0xff] }
 0x687   : > { %5156 = vst [vmem:[%s9895_s28 + $0xf8] sm:$0xff] %v5155_v31  ;;  %v5283_v31 = vld [vmem:[%s8660_s19 + $0x2f8] sm:$0xff] }
 0x688   : > { %5158 = vst [vmem:[%s9895_s28 + $0x200] sm:$0xff] %v5157_v40 }
 0x689   : > { %5160 = vst [vmem:[%s9895_s28 + $0x208] sm:$0xff] %v5159_v4 }
 0x68a   : > { %5162 = vst [vmem:[%s9895_s28 + $0x210] sm:$0xff] %v5161_v55 }
 0x68b   : > { %5164 = vst [vmem:[%s9895_s28 + $0x218] sm:$0xff] %v5163_v14 }
 0x68c   : > { %5166 = vst [vmem:[%s9895_s28 + $0x220] sm:$0xff] %v5165_v48 }
 0x68d   : > { %5168 = vst [vmem:[%s9895_s28 + $0x228] sm:$0xff] %v5167_v27 }
 0x68e   : > { %5170 = vst [vmem:[%s9895_s28 + $0x230] sm:$0xff] %v5169_v22 }
 0x68f   : > { %5172 = vst [vmem:[%s9895_s28 + $0x238] sm:$0xff] %v5171_v15 }
 0x690   : > { %5174 = vst [vmem:[%s9895_s28 + $0x240] sm:$0xff] %v5173_v53 }
 0x691   : > { %5176 = vst [vmem:[%s9895_s28 + $0x248] sm:$0xff] %v5175_v13 }
 0x692   : > { %5178 = vst [vmem:[%s9895_s28 + $0x250] sm:$0xff] %v5177_v39 }
 0x693   : > { %5180 = vst [vmem:[%s9895_s28 + $0x258] sm:$0xff] %v5179_v62 }
 0x694   : > { %5182 = vst [vmem:[%s9895_s28 + $0x260] sm:$0xff] %v5181_v1 }
 0x695   : > { %5184 = vst [vmem:[%s9895_s28 + $0x268] sm:$0xff] %v5183_v20 }
 0x696   : > { %5186 = vst [vmem:[%s9895_s28 + $0x270] sm:$0xff] %v5185_v8 }
 0x697   : > { %5188 = vst [vmem:[%s9895_s28 + $0x278] sm:$0xff] %v5187_v33 }
 0x698   : > { %5190 = vst [vmem:[%s9895_s28 + $0x280] sm:$0xff] %v5189_v47 }
 0x699   : > { %5192 = vst [vmem:[%s9895_s28 + $0x288] sm:$0xff] %v5191_v60 }
 0x69a   : > { %5194 = vst [vmem:[%s9895_s28 + $0x290] sm:$0xff] %v5193_v43 }
 0x69b   : > { %5196 = vst [vmem:[%s9895_s28 + $0x298] sm:$0xff] %v5195_v25 }
 0x69c   : > { %5198 = vst [vmem:[%s9895_s28 + $0x2a0] sm:$0xff] %v5197_v3 }
 0x69d   : > { %5200 = vst [vmem:[%s9895_s28 + $0x2a8] sm:$0xff] %v5199_v63 }
 0x69e   : > { %5202 = vst [vmem:[%s9895_s28 + $0x2b0] sm:$0xff] %v5201_v50 }
 0x69f   : > { %5204 = vst [vmem:[%s9895_s28 + $0x2b8] sm:$0xff] %v5203_v35 }
 0x6a0   : > { %5206 = vst [vmem:[%s9895_s28 + $0x2c0] sm:$0xff] %v5205_v45 }
 0x6a1   : > { %5208 = vst [vmem:[%s9895_s28 + $0x2c8] sm:$0xff] %v5207_v19 }
 0x6a2   : > { %5210 = vst [vmem:[%s9895_s28 + $0x2d0] sm:$0xff] %v5209_v12 }
 0x6a3   : > { %5212 = vst [vmem:[%s9895_s28 + $0x2d8] sm:$0xff] %v5211_v46 }
 0x6a4   : > { %5214 = vst [vmem:[%s9895_s28 + $0x2e0] sm:$0xff] %v5213_v51 }
 0x6a5   : > { %5216 = vst [vmem:[%s9895_s28 + $0x2e8] sm:$0xff] %v5215_v44 }
 0x6a6   : > { %5218 = vst [vmem:[%s9895_s28 + $0x2f0] sm:$0xff] %v5217_v17 }
 0x6a7   : > { %5220 = vst [vmem:[%s9895_s28 + $0x2f8] sm:$0xff] %v5219_v36 }
 0x6a8   : > { %5222 = vst [vmem:[%s9895_s28 + $0x400] sm:$0xff] %v5221_v7 }
 0x6a9   : > { %5224 = vst [vmem:[%s9895_s28 + $0x408] sm:$0xff] %v5223_v59 }
 0x6aa   : > { %5226 = vst [vmem:[%s9895_s28 + $0x410] sm:$0xff] %v5225_v30 }
 0x6ab   : > { %5228 = vst [vmem:[%s9895_s28 + $0x418] sm:$0xff] %v5227_v16 }
 0x6ac   : > { %5230 = vst [vmem:[%s9895_s28 + $0x420] sm:$0xff] %v5229_v57 }
 0x6ad   : > { %5232 = vst [vmem:[%s9895_s28 + $0x428] sm:$0xff] %v5231_v34 }
 0x6ae   : > { %5234 = vst [vmem:[%s9895_s28 + $0x430] sm:$0xff] %v5233_v38 }
 0x6af   : > { %5236 = vst [vmem:[%s9895_s28 + $0x438] sm:$0xff] %v5235_v21 }
 0x6b0   : > { %5238 = vst [vmem:[%s9895_s28 + $0x440] sm:$0xff] %v5237_v23 }
 0x6b1   : > { %5240 = vst [vmem:[%s9895_s28 + $0x448] sm:$0xff] %v5239_v32 }
 0x6b2   : > { %5242 = vst [vmem:[%s9895_s28 + $0x450] sm:$0xff] %v5241_v5 }
 0x6b3   : > { %5244 = vst [vmem:[%s9895_s28 + $0x458] sm:$0xff] %v5243_v0 }
 0x6b4   : > { %5246 = vst [vmem:[%s9895_s28 + $0x460] sm:$0xff] %v5245_v29 }
 0x6b5   : > { %5248 = vst [vmem:[%s9895_s28 + $0x468] sm:$0xff] %v5247_v54 }
 0x6b6   : > { %5250 = vst [vmem:[%s9895_s28 + $0x470] sm:$0xff] %v5249_v6 }
 0x6b7   : > { %5252 = vst [vmem:[%s9895_s28 + $0x478] sm:$0xff] %v5251_v10 }
 0x6b8   : > { %5254 = vst [vmem:[%s9895_s28 + $0x480] sm:$0xff] %v5253_v24 }
 0x6b9   : > { %5256 = vst [vmem:[%s9895_s28 + $0x488] sm:$0xff] %v5255_v18 }
 0x6ba   : > { %5258 = vst [vmem:[%s9895_s28 + $0x490] sm:$0xff] %v5257_v11 }
 0x6bb   : > { %5260 = vst [vmem:[%s9895_s28 + $0x498] sm:$0xff] %v5259_v49 }
 0x6bc   : > { %5262 = vst [vmem:[%s9895_s28 + $0x4a0] sm:$0xff] %v5261_v9 }
 0x6bd   : > { %5264 = vst [vmem:[%s9895_s28 + $0x4a8] sm:$0xff] %v5263_v28 }
 0x6be   : > { %5266 = vst [vmem:[%s9895_s28 + $0x4b0] sm:$0xff] %v5265_v52 }
 0x6bf   : > { %5268 = vst [vmem:[%s9895_s28 + $0x4b8] sm:$0xff] %v5267_v2 }
 0x6c0   : > { %5270 = vst [vmem:[%s9895_s28 + $0x4c0] sm:$0xff] %v5269_v37 }
 0x6c1   : > { %5272 = vst [vmem:[%s9895_s28 + $0x4c8] sm:$0xff] %v5271_v58 }
 0x6c2   : > { %5274 = vst [vmem:[%s9895_s28 + $0x4d0] sm:$0xff] %v5273_v61 }
 0x6c3   : > { %5276 = vst [vmem:[%s9895_s28 + $0x4d8] sm:$0xff] %v5275_v26 }
 0x6c4   : > { %5278 = vst [vmem:[%s9895_s28 + $0x4e0] sm:$0xff] %v5277_v41 }
 0x6c5   : > { %5280 = vst [vmem:[%s9895_s28 + $0x4e8] sm:$0xff] %v5279_v56 }
 0x6c6   : > { %5282 = vst [vmem:[%s9895_s28 + $0x4f0] sm:$0xff] %v5281_v42 }
 0x6c7   : > { %5284 = vst [vmem:[%s9895_s28 + $0x4f8] sm:$0xff] %v5283_v31 }
 0x6c8 PF: > { %p22_p11 = scmp.ge.s32.totalorder %s6266_s17, 4   ;;  %s10821_s29 = smov %s6166_s30 }
 0x6c9   : > { %s10822_s30 = smov %s6276_s20  ;;  %s10823_s15 = smov %s6266_s17 }
 0x6ca   :  { %24 = sbr.rel (!%p22_p11) target bundleno = 2 (0x2), region = 198 }

</bundles_post_ra>
